<compile_context>
chip_gen: v7x
topology: tpu7x:2x2x1
jax: 0.10.0
libtpu: 0.0.40
codegen_flags: <defaults>
</compile_context>

<pallas_src>
import functools
import math

import numpy as np
import jax
import jax.numpy as jnp
from jax.experimental import pallas as pl
from jax.experimental.pallas import tpu as pltpu

d_model = 512
num_heads = 8
d_k = d_model // num_heads
# Weight column/row slabs must be >=128 lanes wide -> 2 heads (2*64) per step.
HEADS_PER_STEP = max(1, 128 // d_k)
assert num_heads % HEADS_PER_STEP == 0


# ----------------------------- Pallas kernel ------------------------------

def _fused_mha_kernel(q_ref, k_ref, wq_ref, wk_ref, wo_ref,
                      bq_ref, bk_ref, bo_ref, o_ref, *, batch, seq, dk):
    """One grid step = one head pair (one 128-wide weight slab).

    q_ref, k_ref : (B*S, D)   activations; constant block index -> DMA'd once
    wq_ref/wk_ref: (D, 2*dk)  column slab of pre-transposed weight (scale in Wq)
    wo_ref       : (2*dk, D)  row slab of pre-transposed output weight
    bq_ref/bk_ref: (1, 2*dk)
    bo_ref       : (1, D)
    o_ref        : (B*S, D)   f32, VMEM-resident across the grid; accumulator
    """
    step = pl.program_id(0)
    hi = jax.lax.Precision.HIGHEST

    @pl.when(step == 0)
    def _():
        # Seed the resident output accumulator with the output-projection bias.
        o_ref[...] = jnp.broadcast_to(bo_ref[...], o_ref.shape)

    # Head-pair projections: (B*S, 2*dk). 1/sqrt(d_k) pre-folded into Wq/bq.
    qp = jnp.dot(q_ref[...], wq_ref[...], precision=hi,
                 preferred_element_type=jnp.float32) + bq_ref[...]
    kp = jnp.dot(k_ref[...], wk_ref[...], precision=hi,
                 preferred_element_type=jnp.float32) + bk_ref[...]
    # Reference bug: V = split_heads(W_k(K)) -> kp doubles as V below
    # (no third projection matmul, W_v / the V input are dead).

    heads_here = qp.shape[-1] // dk
    for hl in range(heads_here):
        lo = hl * dk
        wo_slab = wo_ref[lo:lo + dk, :]                          # (dk, D)
        for b in range(batch):
            r0 = b * seq
            q_hb = qp[r0:r0 + seq, lo:lo + dk]                   # (S, dk)
            k_hb = kp[r0:r0 + seq, lo:lo + dk]                   # (S, dk); also V
            # scores = q_hb @ k_hb.T (contract both dim-1, no transpose)
            s = jax.lax.dot_general(
                q_hb, k_hb, dimension_numbers=(((1,), (1,)), ((), ())),
                precision=hi, preferred_element_type=jnp.float32)  # (S, S)
            m = jnp.max(s, axis=-1, keepdims=True)
            p = jnp.exp(s - m)
            denom = jnp.sum(p, axis=-1, keepdims=True)
            # EUP reciprocal + one Newton step: frees the VALU divide while
            # keeping f32 accuracy vs the HIGHEST-precision reference.
            inv = pl.reciprocal(denom, approx=True)
            inv = inv * (2.0 - denom * inv)
            out_hb = jnp.dot(p * inv, k_hb, precision=hi,
                             preferred_element_type=jnp.float32)   # (S, dk)
            # Output projection folded into the head loop: accumulate the
            # partial Wo contraction directly into the resident output block.
            o_ref[r0:r0 + seq, :] += jnp.dot(
                out_hb, wo_slab, precision=hi,
                preferred_element_type=jnp.float32)


def fused_multihead_attention(kparams, Q, K, V=None, mask=None):
    """Q, K: (B, S, d_model) f32 -> (B, S, d_model) f32."""
    # TODO(synk): the reference forward() never uses the V input (it reuses
    # W_k(K)) and its mask branch would crash; with mask=None no masking is
    # applied, which is what we implement.
    del V, mask
    B, S, D = Q.shape
    M = B * S
    slab = HEADS_PER_STEP * d_k                                   # 128 lanes
    steps = num_heads // HEADS_PER_STEP                           # 4

    Qf = Q.reshape(M, D)
    Kf = K.reshape(M, D)

    kern = functools.partial(_fused_mha_kernel, batch=B, seq=S, dk=d_k)
    act_spec = pl.BlockSpec((M, D), lambda h: (0, 0))             # loaded once
    out = pl.pallas_call(
        kern,
        out_shape=jax.ShapeDtypeStruct((M, D), jnp.float32),
        grid=(steps,),
        in_specs=[
            act_spec,                                             # Q (B*S, D)
            act_spec,                                             # K (B*S, D)
            pl.BlockSpec((D, slab), lambda h: (0, h)),            # Wq_t col slab
            pl.BlockSpec((D, slab), lambda h: (0, h)),            # Wk_t col slab
            pl.BlockSpec((slab, D), lambda h: (h, 0)),            # Wo_t row slab
            pl.BlockSpec((1, slab), lambda h: (0, h)),            # b_q slab
            pl.BlockSpec((1, slab), lambda h: (0, h)),            # b_k slab
            pl.BlockSpec((1, D), lambda h: (0, 0)),               # b_o
        ],
        out_specs=pl.BlockSpec((M, D), lambda h: (0, 0)),         # accumulator
        compiler_params=pltpu.CompilerParams(
            # Output block index is constant across the (only) grid axis ->
            # it is a reduction/accumulation axis: must be "arbitrary".
            dimension_semantics=("arbitrary",),
            vmem_limit_bytes=32 * 1024 * 1024),                   # ~2 MB used
    )(Qf, Kf,
      kparams["Wq_t"], kparams["Wk_t"], kparams["Wo_t"],
      kparams["b_q"], kparams["b_k"], kparams["b_o"])
    return out.reshape(B, S, D)


# ------------------------------ Module glue -------------------------------

def init_params(key):
    """Parameters in PyTorch nn.Linear layout: W (out_features, in_features)."""
    def init_linear(k, in_f, out_f):
        kw, kb = jax.random.split(k)
        bound = 1.0 / math.sqrt(in_f)
        w = jax.random.uniform(kw, (out_f, in_f), jnp.float32, -bound, bound)
        b = jax.random.uniform(kb, (out_f,), jnp.float32, -bound, bound)
        return w, b

    kq, kk, kv, ko = jax.random.split(key, 4)
    p = {}
    p["W_q"], p["b_q"] = init_linear(kq, d_model, d_model)
    p["W_k"], p["b_k"] = init_linear(kk, d_model, d_model)
    p["W_v"], p["b_v"] = init_linear(kv, d_model, d_model)  # dead (reference bug)
    p["W_o"], p["b_o"] = init_linear(ko, d_model, d_model)
    return p


def prepare_kernel_params(params):
    """One-time repack: transpose weights to (in, out), biases to (1, D), and
    fold 1/sqrt(d_k) (= 0.125, exact in binary fp) into Wq / b_q."""
    scale = jnp.float32(1.0 / math.sqrt(d_k))
    return {
        "Wq_t": jnp.asarray(params["W_q"].T) * scale,
        "Wk_t": jnp.asarray(params["W_k"].T),
        "Wo_t": jnp.asarray(params["W_o"].T),
        "b_q": params["b_q"].reshape(1, -1) * scale,
        "b_k": params["b_k"].reshape(1, -1),
        "b_o": params["b_o"].reshape(1, -1),
    }


# ------------------------------ Reference ---------------------------------

def reference_mha(params, Q, K):
    hi = jax.lax.Precision.HIGHEST

    def lin(x, w, b):
        return jnp.einsum("bsd,nd->bsn", x, w, precision=hi) + b

    B, S, D = Q.shape
    H, dk = num_heads, D // num_heads
    qp = lin(Q, params["W_q"], params["b_q"])
    kp = lin(K, params["W_k"], params["b_k"])
    vp = kp  # reference bug: V = W_k(K)

    def split(x):
        return x.reshape(B, S, H, dk).transpose(0, 2, 1, 3)

    q, k, v = split(qp), split(kp), split(vp)
    scores = jnp.einsum("bhqd,bhkd->bhqk", q, k, precision=hi) / math.sqrt(dk)
    probs = jax.nn.softmax(scores, axis=-1)
    out = jnp.einsum("bhqk,bhkd->bhqd", probs, v, precision=hi)
    out = out.transpose(0, 2, 1, 3).reshape(B, S, D)
    return lin(out, params["W_o"], params["b_o"])


# --------------------------------- Main ------------------------------------

if __name__ == "__main__":
    key = jax.random.PRNGKey(0)
    kp, kq, kk, kv = jax.random.split(key, 4)

    batch, seq = 2, 16
    params = init_params(kp)
    kparams = prepare_kernel_params(params)
    Q = jax.random.normal(kq, (batch, seq, d_model), jnp.float32)
    K = jax.random.normal(kk, (batch, seq, d_model), jnp.float32)
    V = jax.random.normal(kv, (batch, seq, d_model), jnp.float32)

    out = jax.block_until_ready(
        fused_multihead_attention(kparams, Q, K, V, mask=None))
    ref = jax.block_until_ready(reference_mha(params, Q, K))

    assert out.shape == (batch, seq, d_model)
    max_err = float(np.max(np.abs(np.asarray(out) - np.asarray(ref))))
    assert np.allclose(np.asarray(out), np.asarray(ref), rtol=2e-3, atol=2e-3), (
        "mismatch vs reference: max abs err = %g" % max_err)

    print("KERNEL_OK")
</pallas_src>

<mosaic_0001>
module attributes {stable_mosaic.version = 11 : i64} {
  func.func @_fused_mha_kernel(%arg0: i32, %arg1: memref<32x512xf32, #tpu.memory_space<vmem>>, %arg2: memref<32x512xf32, #tpu.memory_space<vmem>>, %arg3: memref<512x128xf32, #tpu.memory_space<vmem>>, %arg4: memref<512x128xf32, #tpu.memory_space<vmem>>, %arg5: memref<128x512xf32, #tpu.memory_space<vmem>>, %arg6: memref<1x128xf32, #tpu.memory_space<vmem>>, %arg7: memref<1x128xf32, #tpu.memory_space<vmem>>, %arg8: memref<1x512xf32, #tpu.memory_space<vmem>>, %arg9: memref<32x512xf32, #tpu.memory_space<vmem>>) attributes {dimension_semantics = [#tpu.dimension_semantics<arbitrary>], iteration_bounds = array<i64: 4>, scalar_prefetch = 0 : i64, scratch_operands = 0 : i64, tpu.core_type = #tpu.core_type<tc>, window_params = [{pipeline_mode = #tpu.pipeline_mode<synchronous>, transform_indices = @transform_0, window_bounds = array<i64: 32, 512>}, {pipeline_mode = #tpu.pipeline_mode<synchronous>, transform_indices = @transform_1, window_bounds = array<i64: 32, 512>}, {transform_indices = @transform_2, window_bounds = array<i64: 512, 128>}, {transform_indices = @transform_3, window_bounds = array<i64: 512, 128>}, {transform_indices = @transform_4, window_bounds = array<i64: 128, 512>}, {transform_indices = @transform_5, window_bounds = array<i64: 1, 128>}, {transform_indices = @transform_6, window_bounds = array<i64: 1, 128>}, {pipeline_mode = #tpu.pipeline_mode<synchronous>, transform_indices = @transform_7, window_bounds = array<i64: 1, 512>}, {pipeline_mode = #tpu.pipeline_mode<synchronous>, transform_indices = @transform_8, window_bounds = array<i64: 32, 512>}]} {
    %c0_i32 = arith.constant 0 : i32
    %0 = arith.cmpi eq, %arg0, %c0_i32 : i32
    %1 = arith.extui %0 : i1 to i32
    %c0_i32_0 = arith.constant 0 : i32
    %2 = arith.cmpi ne, %1, %c0_i32_0 : i32
    scf.if %2 {
      %c0_55 = arith.constant 0 : index
      %c0_56 = arith.constant 0 : index
      %105 = vector.load %arg8[%c0_55, %c0_56] : memref<1x512xf32, #tpu.memory_space<vmem>>, vector<1x512xf32>
      %106 = vector.shape_cast %105 : vector<1x512xf32> to vector<1x512xf32>
      %107 = vector.broadcast %106 : vector<1x512xf32> to vector<32x512xf32>
      %c0_57 = arith.constant 0 : index
      %c0_58 = arith.constant 0 : index
      %108 = vector.load %arg9[%c0_57, %c0_58] : memref<32x512xf32, #tpu.memory_space<vmem>>, vector<32x512xf32>
      tpu.vector_store %arg9[%c0_57, %c0_58], %107 {strides = array<i32>} : memref<32x512xf32, #tpu.memory_space<vmem>>, vector<32x512xf32>,
    } else {
    }
    %c0 = arith.constant 0 : index
    %c0_1 = arith.constant 0 : index
    %3 = vector.load %arg1[%c0, %c0_1] : memref<32x512xf32, #tpu.memory_space<vmem>>, vector<32x512xf32>
    %c0_2 = arith.constant 0 : index
    %c0_3 = arith.constant 0 : index
    %4 = vector.load %arg3[%c0_2, %c0_3] : memref<512x128xf32, #tpu.memory_space<vmem>>, vector<512x128xf32>
    %cst = arith.constant dense<0.000000e+00> : vector<32x128xf32>
    %5 = tpu.matmul %3, %4, %cst {dimension_numbers = #tpu.dot_dimension_numbers<[1], [0], [0], [1], [0, 0, 1, 1], [], []>, precision = #tpu.contract_precision<fp32>} : vector<32x512xf32>, vector<512x128xf32>, vector<32x128xf32> -> vector<32x128xf32>
    %c0_4 = arith.constant 0 : index
    %c0_5 = arith.constant 0 : index
    %6 = vector.load %arg6[%c0_4, %c0_5] : memref<1x128xf32, #tpu.memory_space<vmem>>, vector<1x128xf32>
    %7 = vector.broadcast %6 : vector<1x128xf32> to vector<32x128xf32>
    %8 = arith.addf %5, %7 : vector<32x128xf32>
    %c0_6 = arith.constant 0 : index
    %c0_7 = arith.constant 0 : index
    %9 = vector.load %arg2[%c0_6, %c0_7] : memref<32x512xf32, #tpu.memory_space<vmem>>, vector<32x512xf32>
    %c0_8 = arith.constant 0 : index
    %c0_9 = arith.constant 0 : index
    %10 = vector.load %arg4[%c0_8, %c0_9] : memref<512x128xf32, #tpu.memory_space<vmem>>, vector<512x128xf32>
    %cst_10 = arith.constant dense<0.000000e+00> : vector<32x128xf32>
    %11 = tpu.matmul %9, %10, %cst_10 {dimension_numbers = #tpu.dot_dimension_numbers<[1], [0], [0], [1], [0, 0, 1, 1], [], []>, precision = #tpu.contract_precision<fp32>} : vector<32x512xf32>, vector<512x128xf32>, vector<32x128xf32> -> vector<32x128xf32>
    %c0_11 = arith.constant 0 : index
    %c0_12 = arith.constant 0 : index
    %12 = vector.load %arg7[%c0_11, %c0_12] : memref<1x128xf32, #tpu.memory_space<vmem>>, vector<1x128xf32>
    %13 = vector.broadcast %12 : vector<1x128xf32> to vector<32x128xf32>
    %14 = arith.addf %11, %13 : vector<32x128xf32>
    %c0_13 = arith.constant 0 : index
    %c0_14 = arith.constant 0 : index
    %15 = vector.load %arg5[%c0_13, %c0_14] : memref<128x512xf32, #tpu.memory_space<vmem>>, vector<64x512xf32>
    %16 = vector.extract_strided_slice %8 {offsets = [0, 0], sizes = [16, 64], strides = [1, 1]} : vector<32x128xf32> to vector<16x64xf32>
    %17 = vector.extract_strided_slice %14 {offsets = [0, 0], sizes = [16, 64], strides = [1, 1]} : vector<32x128xf32> to vector<16x64xf32>
    %cst_15 = arith.constant dense<0.000000e+00> : vector<16x16xf32>
    %18 = tpu.matmul %16, %17, %cst_15 {dimension_numbers = #tpu.dot_dimension_numbers<[1], [1], [0], [0], [0, 0, 1, 0], [], []>, precision = #tpu.contract_precision<fp32>} : vector<16x64xf32>, vector<16x64xf32>, vector<16x16xf32> -> vector<16x16xf32>
    %cst_16 = arith.constant dense<0xFF800000> : vector<16xf32>
    %19 = vector.multi_reduction <maximumf>, %18, %cst_16 [1] : vector<16x16xf32> to vector<16xf32>
    %20 = vector.shape_cast %19 : vector<16xf32> to vector<16x1xf32>
    %21 = vector.broadcast %20 : vector<16x1xf32> to vector<16x16xf32>
    %22 = arith.subf %18, %21 : vector<16x16xf32>
    %23 = math.exp %22 : vector<16x16xf32>
    %cst_17 = arith.constant dense<0.000000e+00> : vector<16xf32>
    %24 = vector.multi_reduction <add>, %23, %cst_17 [1] : vector<16x16xf32> to vector<16xf32>
    %25 = vector.shape_cast %24 : vector<16xf32> to vector<16x1xf32>
    %26 = tpu.reciprocal %25 {approx = true} : vector<16x1xf32> -> vector<16x1xf32>
    %27 = arith.mulf %25, %26 : vector<16x1xf32>
    %cst_18 = arith.constant 2.000000e+00 : f32
    %28 = vector.broadcast %cst_18 : f32 to vector<16x1xf32>
    %29 = arith.subf %28, %27 : vector<16x1xf32>
    %30 = arith.mulf %26, %29 : vector<16x1xf32>
    %31 = vector.broadcast %30 : vector<16x1xf32> to vector<16x16xf32>
    %32 = arith.mulf %23, %31 : vector<16x16xf32>
    %cst_19 = arith.constant dense<0.000000e+00> : vector<16x64xf32>
    %33 = tpu.matmul %32, %17, %cst_19 {dimension_numbers = #tpu.dot_dimension_numbers<[1], [0], [0], [1], [0, 0, 1, 1], [], []>, precision = #tpu.contract_precision<fp32>} : vector<16x16xf32>, vector<16x64xf32>, vector<16x64xf32> -> vector<16x64xf32>
    %c0_20 = arith.constant 0 : index
    %c0_21 = arith.constant 0 : index
    %34 = vector.load %arg9[%c0_20, %c0_21] : memref<32x512xf32, #tpu.memory_space<vmem>>, vector<16x512xf32>
    %cst_22 = arith.constant dense<0.000000e+00> : vector<16x512xf32>
    %35 = tpu.matmul %33, %15, %cst_22 {dimension_numbers = #tpu.dot_dimension_numbers<[1], [0], [0], [1], [0, 0, 1, 1], [], []>, precision = #tpu.contract_precision<fp32>} : vector<16x64xf32>, vector<64x512xf32>, vector<16x512xf32> -> vector<16x512xf32>
    %36 = arith.addf %34, %35 : vector<16x512xf32>
    %c0_23 = arith.constant 0 : index
    %c0_24 = arith.constant 0 : index
    %37 = vector.load %arg9[%c0_23, %c0_24] : memref<32x512xf32, #tpu.memory_space<vmem>>, vector<16x512xf32>
    tpu.vector_store %arg9[%c0_23, %c0_24], %36 {strides = array<i32>} : memref<32x512xf32, #tpu.memory_space<vmem>>, vector<16x512xf32>,
    %38 = vector.extract_strided_slice %8 {offsets = [16, 0], sizes = [16, 64], strides = [1, 1]} : vector<32x128xf32> to vector<16x64xf32>
    %39 = vector.extract_strided_slice %14 {offsets = [16, 0], sizes = [16, 64], strides = [1, 1]} : vector<32x128xf32> to vector<16x64xf32>
    %cst_25 = arith.constant dense<0.000000e+00> : vector<16x16xf32>
    %40 = tpu.matmul %38, %39, %cst_25 {dimension_numbers = #tpu.dot_dimension_numbers<[1], [1], [0], [0], [0, 0, 1, 0], [], []>, precision = #tpu.contract_precision<fp32>} : vector<16x64xf32>, vector<16x64xf32>, vector<16x16xf32> -> vector<16x16xf32>
    %cst_26 = arith.constant dense<0xFF800000> : vector<16xf32>
    %41 = vector.multi_reduction <maximumf>, %40, %cst_26 [1] : vector<16x16xf32> to vector<16xf32>
    %42 = vector.shape_cast %41 : vector<16xf32> to vector<16x1xf32>
    %43 = vector.broadcast %42 : vector<16x1xf32> to vector<16x16xf32>
    %44 = arith.subf %40, %43 : vector<16x16xf32>
    %45 = math.exp %44 : vector<16x16xf32>
    %cst_27 = arith.constant dense<0.000000e+00> : vector<16xf32>
    %46 = vector.multi_reduction <add>, %45, %cst_27 [1] : vector<16x16xf32> to vector<16xf32>
    %47 = vector.shape_cast %46 : vector<16xf32> to vector<16x1xf32>
    %48 = tpu.reciprocal %47 {approx = true} : vector<16x1xf32> -> vector<16x1xf32>
    %49 = arith.mulf %47, %48 : vector<16x1xf32>
    %cst_28 = arith.constant 2.000000e+00 : f32
    %50 = vector.broadcast %cst_28 : f32 to vector<16x1xf32>
    %51 = arith.subf %50, %49 : vector<16x1xf32>
    %52 = arith.mulf %48, %51 : vector<16x1xf32>
    %53 = vector.broadcast %52 : vector<16x1xf32> to vector<16x16xf32>
    %54 = arith.mulf %45, %53 : vector<16x16xf32>
    %cst_29 = arith.constant dense<0.000000e+00> : vector<16x64xf32>
    %55 = tpu.matmul %54, %39, %cst_29 {dimension_numbers = #tpu.dot_dimension_numbers<[1], [0], [0], [1], [0, 0, 1, 1], [], []>, precision = #tpu.contract_precision<fp32>} : vector<16x16xf32>, vector<16x64xf32>, vector<16x64xf32> -> vector<16x64xf32>
    %c16 = arith.constant 16 : index
    %c0_30 = arith.constant 0 : index
    %56 = vector.load %arg9[%c16, %c0_30] : memref<32x512xf32, #tpu.memory_space<vmem>>, vector<16x512xf32>
    %cst_31 = arith.constant dense<0.000000e+00> : vector<16x512xf32>
    %57 = tpu.matmul %55, %15, %cst_31 {dimension_numbers = #tpu.dot_dimension_numbers<[1], [0], [0], [1], [0, 0, 1, 1], [], []>, precision = #tpu.contract_precision<fp32>} : vector<16x64xf32>, vector<64x512xf32>, vector<16x512xf32> -> vector<16x512xf32>
    %58 = arith.addf %56, %57 : vector<16x512xf32>
    %c16_32 = arith.constant 16 : index
    %c0_33 = arith.constant 0 : index
    %59 = vector.load %arg9[%c16_32, %c0_33] : memref<32x512xf32, #tpu.memory_space<vmem>>, vector<16x512xf32>
    tpu.vector_store %arg9[%c16_32, %c0_33], %58 {strides = array<i32>} : memref<32x512xf32, #tpu.memory_space<vmem>>, vector<16x512xf32>,
    %c64 = arith.constant 64 : index
    %c0_34 = arith.constant 0 : index
    %60 = vector.load %arg5[%c64, %c0_34] : memref<128x512xf32, #tpu.memory_space<vmem>>, vector<64x512xf32>
    %61 = vector.extract_strided_slice %8 {offsets = [0, 64], sizes = [16, 64], strides = [1, 1]} : vector<32x128xf32> to vector<16x64xf32>
    %62 = vector.extract_strided_slice %14 {offsets = [0, 64], sizes = [16, 64], strides = [1, 1]} : vector<32x128xf32> to vector<16x64xf32>
    %cst_35 = arith.constant dense<0.000000e+00> : vector<16x16xf32>
    %63 = tpu.matmul %61, %62, %cst_35 {dimension_numbers = #tpu.dot_dimension_numbers<[1], [1], [0], [0], [0, 0, 1, 0], [], []>, precision = #tpu.contract_precision<fp32>} : vector<16x64xf32>, vector<16x64xf32>, vector<16x16xf32> -> vector<16x16xf32>
    %cst_36 = arith.constant dense<0xFF800000> : vector<16xf32>
    %64 = vector.multi_reduction <maximumf>, %63, %cst_36 [1] : vector<16x16xf32> to vector<16xf32>
    %65 = vector.shape_cast %64 : vector<16xf32> to vector<16x1xf32>
    %66 = vector.broadcast %65 : vector<16x1xf32> to vector<16x16xf32>
    %67 = arith.subf %63, %66 : vector<16x16xf32>
    %68 = math.exp %67 : vector<16x16xf32>
    %cst_37 = arith.constant dense<0.000000e+00> : vector<16xf32>
    %69 = vector.multi_reduction <add>, %68, %cst_37 [1] : vector<16x16xf32> to vector<16xf32>
    %70 = vector.shape_cast %69 : vector<16xf32> to vector<16x1xf32>
    %71 = tpu.reciprocal %70 {approx = true} : vector<16x1xf32> -> vector<16x1xf32>
    %72 = arith.mulf %70, %71 : vector<16x1xf32>
    %cst_38 = arith.constant 2.000000e+00 : f32
    %73 = vector.broadcast %cst_38 : f32 to vector<16x1xf32>
    %74 = arith.subf %73, %72 : vector<16x1xf32>
    %75 = arith.mulf %71, %74 : vector<16x1xf32>
    %76 = vector.broadcast %75 : vector<16x1xf32> to vector<16x16xf32>
    %77 = arith.mulf %68, %76 : vector<16x16xf32>
    %cst_39 = arith.constant dense<0.000000e+00> : vector<16x64xf32>
    %78 = tpu.matmul %77, %62, %cst_39 {dimension_numbers = #tpu.dot_dimension_numbers<[1], [0], [0], [1], [0, 0, 1, 1], [], []>, precision = #tpu.contract_precision<fp32>} : vector<16x16xf32>, vector<16x64xf32>, vector<16x64xf32> -> vector<16x64xf32>
    %c0_40 = arith.constant 0 : index
    %c0_41 = arith.constant 0 : index
    %79 = vector.load %arg9[%c0_40, %c0_41] : memref<32x512xf32, #tpu.memory_space<vmem>>, vector<16x512xf32>
    %cst_42 = arith.constant dense<0.000000e+00> : vector<16x512xf32>
    %80 = tpu.matmul %78, %60, %cst_42 {dimension_numbers = #tpu.dot_dimension_numbers<[1], [0], [0], [1], [0, 0, 1, 1], [], []>, precision = #tpu.contract_precision<fp32>} : vector<16x64xf32>, vector<64x512xf32>, vector<16x512xf32> -> vector<16x512xf32>
    %81 = arith.addf %79, %80 : vector<16x512xf32>
    %c0_43 = arith.constant 0 : index
    %c0_44 = arith.constant 0 : index
    %82 = vector.load %arg9[%c0_43, %c0_44] : memref<32x512xf32, #tpu.memory_space<vmem>>, vector<16x512xf32>
    tpu.vector_store %arg9[%c0_43, %c0_44], %81 {strides = array<i32>} : memref<32x512xf32, #tpu.memory_space<vmem>>, vector<16x512xf32>,
    %83 = vector.extract_strided_slice %8 {offsets = [16, 64], sizes = [16, 64], strides = [1, 1]} : vector<32x128xf32> to vector<16x64xf32>
    %84 = vector.extract_strided_slice %14 {offsets = [16, 64], sizes = [16, 64], strides = [1, 1]} : vector<32x128xf32> to vector<16x64xf32>
    %cst_45 = arith.constant dense<0.000000e+00> : vector<16x16xf32>
    %85 = tpu.matmul %83, %84, %cst_45 {dimension_numbers = #tpu.dot_dimension_numbers<[1], [1], [0], [0], [0, 0, 1, 0], [], []>, precision = #tpu.contract_precision<fp32>} : vector<16x64xf32>, vector<16x64xf32>, vector<16x16xf32> -> vector<16x16xf32>
    %cst_46 = arith.constant dense<0xFF800000> : vector<16xf32>
    %86 = vector.multi_reduction <maximumf>, %85, %cst_46 [1] : vector<16x16xf32> to vector<16xf32>
    %87 = vector.shape_cast %86 : vector<16xf32> to vector<16x1xf32>
    %88 = vector.broadcast %87 : vector<16x1xf32> to vector<16x16xf32>
    %89 = arith.subf %85, %88 : vector<16x16xf32>
    %90 = math.exp %89 : vector<16x16xf32>
    %cst_47 = arith.constant dense<0.000000e+00> : vector<16xf32>
    %91 = vector.multi_reduction <add>, %90, %cst_47 [1] : vector<16x16xf32> to vector<16xf32>
    %92 = vector.shape_cast %91 : vector<16xf32> to vector<16x1xf32>
    %93 = tpu.reciprocal %92 {approx = true} : vector<16x1xf32> -> vector<16x1xf32>
    %94 = arith.mulf %92, %93 : vector<16x1xf32>
    %cst_48 = arith.constant 2.000000e+00 : f32
    %95 = vector.broadcast %cst_48 : f32 to vector<16x1xf32>
    %96 = arith.subf %95, %94 : vector<16x1xf32>
    %97 = arith.mulf %93, %96 : vector<16x1xf32>
    %98 = vector.broadcast %97 : vector<16x1xf32> to vector<16x16xf32>
    %99 = arith.mulf %90, %98 : vector<16x16xf32>
    %cst_49 = arith.constant dense<0.000000e+00> : vector<16x64xf32>
    %100 = tpu.matmul %99, %84, %cst_49 {dimension_numbers = #tpu.dot_dimension_numbers<[1], [0], [0], [1], [0, 0, 1, 1], [], []>, precision = #tpu.contract_precision<fp32>} : vector<16x16xf32>, vector<16x64xf32>, vector<16x64xf32> -> vector<16x64xf32>
    %c16_50 = arith.constant 16 : index
    %c0_51 = arith.constant 0 : index
    %101 = vector.load %arg9[%c16_50, %c0_51] : memref<32x512xf32, #tpu.memory_space<vmem>>, vector<16x512xf32>
    %cst_52 = arith.constant dense<0.000000e+00> : vector<16x512xf32>
    %102 = tpu.matmul %100, %60, %cst_52 {dimension_numbers = #tpu.dot_dimension_numbers<[1], [0], [0], [1], [0, 0, 1, 1], [], []>, precision = #tpu.contract_precision<fp32>} : vector<16x64xf32>, vector<64x512xf32>, vector<16x512xf32> -> vector<16x512xf32>
    %103 = arith.addf %101, %102 : vector<16x512xf32>
    %c16_53 = arith.constant 16 : index
    %c0_54 = arith.constant 0 : index
    %104 = vector.load %arg9[%c16_53, %c0_54] : memref<32x512xf32, #tpu.memory_space<vmem>>, vector<16x512xf32>
    tpu.vector_store %arg9[%c16_53, %c0_54], %103 {strides = array<i32>} : memref<32x512xf32, #tpu.memory_space<vmem>>, vector<16x512xf32>,
    return
  }
  func.func @transform_0(%arg0: i32) -> (i32, i32) {
    %c0_i32 = arith.constant 0 : i32
    %c0_i32_0 = arith.constant 0 : i32
    %c0_i32_1 = arith.constant 0 : i32
    return %c0_i32, %c0_i32_0 : i32, i32
  }
  func.func @transform_1(%arg0: i32) -> (i32, i32) {
    %c0_i32 = arith.constant 0 : i32
    %c0_i32_0 = arith.constant 0 : i32
    %c0_i32_1 = arith.constant 0 : i32
    return %c0_i32, %c0_i32_0 : i32, i32
  }
  func.func @transform_2(%arg0: i32) -> (i32, i32) {
    %c0_i32 = arith.constant 0 : i32
    %c0_i32_0 = arith.constant 0 : i32
    return %c0_i32, %arg0 : i32, i32
  }
  func.func @transform_3(%arg0: i32) -> (i32, i32) {
    %c0_i32 = arith.constant 0 : i32
    %c0_i32_0 = arith.constant 0 : i32
    return %c0_i32, %arg0 : i32, i32
  }
  func.func @transform_4(%arg0: i32) -> (i32, i32) {
    %c0_i32 = arith.constant 0 : i32
    %c0_i32_0 = arith.constant 0 : i32
    return %arg0, %c0_i32 : i32, i32
  }
  func.func @transform_5(%arg0: i32) -> (i32, i32) {
    %c0_i32 = arith.constant 0 : i32
    %c0_i32_0 = arith.constant 0 : i32
    return %c0_i32, %arg0 : i32, i32
  }
  func.func @transform_6(%arg0: i32) -> (i32, i32) {
    %c0_i32 = arith.constant 0 : i32
    %c0_i32_0 = arith.constant 0 : i32
    return %c0_i32, %arg0 : i32, i32
  }
  func.func @transform_7(%arg0: i32) -> (i32, i32) {
    %c0_i32 = arith.constant 0 : i32
    %c0_i32_0 = arith.constant 0 : i32
    %c0_i32_1 = arith.constant 0 : i32
    return %c0_i32, %c0_i32_0 : i32, i32
  }
  func.func @transform_8(%arg0: i32) -> (i32, i32) {
    %c0_i32 = arith.constant 0 : i32
    %c0_i32_0 = arith.constant 0 : i32
    %c0_i32_1 = arith.constant 0 : i32
    return %c0_i32, %c0_i32_0 : i32, i32
  }
}

</mosaic_0001>

<bundles_post_ra>
// kernel: tpu_custom_call.1
= control target key start
LH: loop header
LB: loop body
LE: loop exit
PB: predicated region body
PF: predicated region fallthrough
CT: control target
= control target key end

     0   :  { %s23787_s0 = inlined_call_operand.hbm [shape: f32[32,512], index: 0, kind: input, shape index: {}]   ;;  %s23788_s1 = inlined_call_operand.hbm [shape: f32[32,512], index: 1, kind: input, shape index: {}]   ;;  %s23789_s2 = inlined_call_operand.hbm [shape: f32[512,512], index: 2, kind: input, shape index: {}]   ;;  %s23790_s3 = inlined_call_operand.hbm [shape: f32[512,512], index: 3, kind: input, shape index: {}]   ;;  %s23791_s4 = inlined_call_operand.hbm [shape: f32[512,512], index: 4, kind: input, shape index: {}]   ;;  %s23792_s5 = inlined_call_operand.vmem [shape: f32[1,512], index: 5, kind: input, shape index: {}]   ;;  %s23793_s6 = inlined_call_operand.vmem [shape: f32[1,512], index: 6, kind: input, shape index: {}]   ;;  %s23794_s7 = inlined_call_operand.vmem [shape: f32[1,512], index: 7, kind: input, shape index: {}]   ;;  %s23795_s8 = inlined_call_operand.hbm [shape: f32[32,512], index: 8, kind: output, shape index: {}]  }
   0x1   :  { %24394 = sst [smem:[#allocation73_spill]] %s23787_s0 }
   0x2   :  { %24395 = sst [smem:[#allocation74_spill]] %s23789_s2 }
   0x3   :  { %13 = vsyncpa [#allocation3], 0 }
   0x4   :  { %14 = vsyncpa [#allocation6], 0 }
   0x5   :  { %15 = vsyncpa [#allocation4], 0  ;;  %s18919_s27 = smov 0   ;;  %s18921_s28 = smov 0  }
   0x6   :  { %s18923_s29 = smov 0   ;;  %s18925_s30 = smov 0  }
   0x7 LB: > { %24396 = sst [smem:[#allocation15_spill]] %s18854_s29  ;;  %s18938_s9 = sadd.s32 4294967295, %s18858_s30   ;;  %s18858_s30 = sphi %s18925_s30, %s25257_s30   ;;  %s18854_s29 = sphi %s18923_s29, %s25259_s29   ;;  %s18850_s28 = sphi %s18921_s28, %s25261_s28   ;;  %s18846_s27 = sphi %s18919_s27, %s25260_s27  }
   0x8   : > { %s18941_s10 = sadd.s32 1, %s18858_s30   ;;  %s70_s12 = sadd.s32 1, %s18854_s29 }
   0x9   : > { %24397 = sst [smem:[#allocation16_spill]] %s18941_s10  ;;  %s67_s11 = ssub.s32 %s18858_s30, %s18941_s10 }
   0xa   : > { %p68_p0 = scmp.eq.s32.totalorder %s67_s11, 0  ;;  %p77_p1 = scmp.ne.s32.totalorder %s18854_s29, %s18850_s28 }
   0xb   : > { %p78_p2 = scmp.eq.s32.totalorder %s18858_s30, 0  ;;  %p83_p3 = scmp.ne.s32.totalorder %s18850_s28, %s18846_s27 }
   0xc   : > { %s18951_s13 = scalar_select %p68_p0, %s18854_s29, %s70_s12  }
   0xd   : > { %p18953_p4 = por %p78_p2, %p77_p1  ;;  %p23796_p5 = scmp.eq.s32.totalorder %s18938_s9, 0 }
   0xe   : > { %24398 = sst [smem:[#allocation17_spill]] %s18951_s13  ;;  %p14880_p6 = scmp.ge.s32.totalorder %s18858_s30, 1 }
   0xf   : > { %p240_p7 = scmp.lt.s32.totalorder %s18858_s30, 5  ;;  %p18962_p8 = por %p23796_p5, %p83_p3 }
  0x10   : > { %s18860_s17 = smov [#allocation2]   ;;  %p18560_p13 = scmp.lt.s32.totalorder %s18858_s30, 4 }
  0x11   : > { %s24400_s15 = scalar_select %p18962_p8, 1, 0 }
  0x12   : > { %p18967_p10 = pnand %p14880_p6, %p240_p7  ;;  %s252_s18 = sshll.u32 %s18860_s17, 4  ;;  %s253_s18 = int_to_ptr.vmem [resolvable:$true] %s252_s18 }
  0x13   : > { %s282_s20 = sand.u32 1, %s18858_s30   ;;  %s284_s21 = sand.u32 1, %s18854_s29  }
  0x14   : > { %s24401_s16 = scalar_select %p18967_p10, 1, 0 }
  0x15   : > { %p18541_p11 = pneg %p18967_p10  ;;  %p18984_p0 = pnand %p18560_p13, %p18953_p4 }
  0x16   : > { %s24404_s0 = sld [smem:[#allocation73_spill]] }
  0x17   : > { %p18975_p12 = pnand %p18541_p11, %p23796_p5 }
  0x18   : > { %s24403_s22 = scalar_select %p18984_p0, 1, 0 }
  0x19   : > { %s24402_s19 = scalar_select %p18975_p12, 1, 0 }
  0x1a   : > { %p23803_p2 = pneg %p18975_p12 }
  0x1c   : > { %s18640_s25 = scalar_lea.hbm %s24404_s0, 2048 }
  0x1d   : > { %p18641_p1 = scmp.ne.s32.totalorder %s24404_s0, %s18640_s25  ;;  %p18647_p4 = scmp.lt.u32.totalorder %s18640_s25, %s24404_s0 }
  0x1f   : > { %p18643_p3 = pnand %p23803_p2, %p18641_p1 }
  0x21   : > { %p18644_p6 = pneg %p18643_p3 }
  0x23   : > { %p18649_p7 = pnand %p18647_p4, %p18644_p6 }
  0x25   : > { %18652 = shalt.err (!%p18649_p7)
}
  0x26   : > { %s18653_s14 = scalar_lea.vmem %s253_s18, 2048  ;;  %p18661_p5 = scmp.lt.s32.totalorder %s253_s18, %s253_s18 }
  0x27   : > { %p18654_p11 = scmp.ne.s32.totalorder %s253_s18, %s18653_s14  ;;  %p18662_p8 = scmp.lt.s32.totalorder %s18653_s14, %s18653_s14 }
  0x29   : > { %p18656_p13 = pnand %p18654_p11, %p23803_p2  ;;  %p18663_p10 = por %p18662_p8, %p18661_p5 }
  0x2b   : > { %p18657_p9 = pneg %p18656_p13 }
  0x2d   : > { %p18664_p0 = pnand %p18663_p10, %p18657_p9 }
  0x2f   : > { %18667 = shalt.err (!%p18664_p0)
}
  0x30   : > { %s18861_s17 = smov 512   ;;  %s23801_s23 = smov 32  }
  0x31   : > { %18544 = dma.hbm_to_vmem [thread:$0]  (!%p18975_p12), %s24404_s0, 2048, %s253_s18, [#allocation3], %s18861_s17, %s18861_s17, %s23801_s23  }
  0x32   : > { %s19013_s26 = sshll.u32 %s284_s21, 9  ;;  %s14885_s27 = sshll.u32 %s18858_s30, 7 }
  0x33   : > { %s24405_s2 = sld [smem:[#allocation74_spill]]  ;;  %s286_s13 = scalar_lea.vmem [#allocation7], %s19013_s26 }
  0x34   : > { %s292_s29 = sshll.u32 %s286_s13, 4  ;;  %s19026_s24 = scalar_lea.sflag [#allocation3], %s282_s20  ;;  %s19024_s29 = int_to_ptr.vmem [resolvable:$true] %s292_s29 }
  0x35   : > { %p24406_p8 = scmp.ne.s32.totalorder %s24403_s22, 0 }
  0x37   : > { %p19032_p9 = pneg %p24406_p8 }
  0x39   : > { %s19021_s14 = scalar_lea.hbm %s24405_s2, %s14885_s27  ;;  %s18673_s12 = scalar_lea.hbm %s24405_s2, 32768 }
  0x3a   : > { %s18668_s18 = scalar_lea.hbm %s19021_s14, 8192  ;;  %p18674_p1 = scmp.lt.u32.totalorder %s19021_s14, %s24405_s2 }
  0x3b   : > { %p18669_p5 = scmp.ne.s32.totalorder %s19021_s14, %s18668_s18  ;;  %p18675_p3 = scmp.lt.u32.totalorder %s18673_s12, %s18668_s18 }
  0x3c   : > { %s24407_s21 = scalar_select %p19032_p9, 1, 0 }
  0x3d   : > { %p18671_p10 = pnand %p19032_p9, %p18669_p5  ;;  %p18676_p6 = por %p18675_p3, %p18674_p1 }
  0x3e   : > { %p18677_p4 = scmp.lt.u32.totalorder %s18668_s18, %s19021_s14 }
  0x3f   : > { %p18672_p0 = pneg %p18671_p10 }
  0x40   : > { %p18678_p7 = por %p18677_p4, %p18676_p6 }
  0x42   : > { %p18679_p11 = pnand %p18678_p7, %p18672_p0 }
  0x44   : > { %18682 = shalt.err (!%p18679_p11)
}
  0x45   : > { %s18683_s20 = scalar_lea.vmem %s19024_s29, 8192  ;;  %s18863_s25 = smov [#allocation7]  }
  0x46   : > { %p18684_p13 = scmp.ne.s32.totalorder %s19024_s29, %s18683_s20  ;;  %s18688_s11 = sshll.u32 %s18863_s25, 4  ;;  %s18689_s11 = int_to_ptr.vmem [resolvable:$false] %s18688_s11 }
  0x47   : > { %s18690_s23 = scalar_lea.vmem %s18689_s11, 16384  ;;  %p18691_p2 = scmp.lt.s32.totalorder %s19024_s29, %s18689_s11 }
  0x48   : > { %p18686_p5 = pnand %p18684_p13, %p19032_p9  ;;  %p18692_p12 = scmp.lt.s32.totalorder %s18690_s23, %s18683_s20 }
  0x4a   : > { %p18687_p10 = pneg %p18686_p5  ;;  %p18693_p1 = por %p18692_p12, %p18691_p2 }
  0x4c   : > { %p18694_p3 = pnand %p18693_p1, %p18687_p10 }
  0x4e   : > { %18697 = shalt.err (!%p18694_p3)
}
  0x4f   : > { %s18864_s18 = smov 128   ;;  %s18865_s12 = smov 8  }
  0x50   : > { %18551 = dma.hbm_to_vmem [thread:$0]  (!%p24406_p8), %s19021_s14, 8192, %s19024_s29, %s19026_s24, %s18861_s17, %s18864_s18, %s18865_s12  }
  0x51   : > { %s19064_s25 = scalar_lea.hbm %s23790_s3, %s14885_s27  ;;  %s306_s11 = scalar_lea.vmem [#allocation8], %s19013_s26 }
  0x52   : > { %s312_s23 = sshll.u32 %s306_s11, 4  ;;  %s18866_s0 = smov [#allocation5]   ;;  %s19067_s23 = int_to_ptr.vmem [resolvable:$true] %s312_s23 }
  0x53   : > { %s19069_s2 = sshll.u32 %s18866_s0, 4  ;;  %s18698_s10 = scalar_lea.hbm %s19064_s25, 8192  ;;  %s266_s2 = int_to_ptr.vmem [resolvable:$true] %s19069_s2 }
  0x54   : > { %p18699_p12 = scmp.ne.s32.totalorder %s19064_s25, %s18698_s10  ;;  %s18703_s27 = scalar_lea.hbm %s23790_s3, 32768 }
  0x55   : > { %p18704_p6 = scmp.lt.u32.totalorder %s19064_s25, %s23790_s3  ;;  %p18705_p4 = scmp.lt.u32.totalorder %s18703_s27, %s18698_s10 }
  0x56   : > { %p18701_p2 = pnand %p18699_p12, %p19032_p9  ;;  %p18707_p11 = scmp.lt.u32.totalorder %s18698_s10, %s19064_s25 }
  0x57   : > { %p18706_p7 = por %p18705_p4, %p18704_p6 }
  0x58   : > { %p18702_p0 = pneg %p18701_p2 }
  0x59   : > { %p18708_p13 = por %p18707_p11, %p18706_p7 }
  0x5b   : > { %p18709_p5 = pnand %p18708_p13, %p18702_p0 }
  0x5d   : > { %18712 = shalt.err (!%p18709_p5)
}
  0x5e   : > { %s18713_s0 = scalar_lea.vmem %s19067_s23, 8192  ;;  %s18867_s11 = smov [#allocation8]  }
  0x5f   : > { %p18714_p10 = scmp.ne.s32.totalorder %s19067_s23, %s18713_s0  ;;  %s18718_s29 = sshll.u32 %s18867_s11, 4  ;;  %s18719_s29 = int_to_ptr.vmem [resolvable:$false] %s18718_s29 }
  0x60   : > { %s18720_s14 = scalar_lea.vmem %s18719_s29, 16384  ;;  %p18721_p12 = scmp.lt.s32.totalorder %s19067_s23, %s18719_s29 }
  0x61   : > { %p18716_p1 = pnand %p18714_p10, %p19032_p9  ;;  %p18722_p2 = scmp.lt.s32.totalorder %s18720_s14, %s18713_s0 }
  0x63   : > { %p18717_p3 = pneg %p18716_p1  ;;  %p18723_p6 = por %p18722_p2, %p18721_p12 }
  0x65   : > { %p18724_p4 = pnand %p18723_p6, %p18717_p3 }
  0x67   : > { %18727 = shalt.err (!%p18724_p4)
}
  0x68   : > { %18554 = dma.hbm_to_vmem [thread:$0]  (!%p24406_p8), %s19064_s25, 8192, %s19067_s23, %s19026_s24, %s18861_s17, %s18864_s18, %s18865_s12  }
  0x69   : > { %s18728_s13 = scalar_lea.hbm %s23788_s1, 2048  ;;  %p24408_p7 = scmp.ne.s32.totalorder %s24402_s19, 0 }
  0x6a   : > { %p18729_p0 = scmp.ne.s32.totalorder %s23788_s1, %s18728_s13  ;;  %p18735_p10 = scmp.lt.u32.totalorder %s18728_s13, %s23788_s1 }
  0x6b   : > { %p24409_p11 = pneg %p24408_p7 }
  0x6d   : > { %p18731_p13 = pnand %p18729_p0, %p24409_p11 }
  0x6f   : > { %p18732_p5 = pneg %p18731_p13 }
  0x71   : > { %p18737_p1 = pnand %p18735_p10, %p18732_p5 }
  0x73   : > { %18740 = shalt.err (!%p18737_p1)
}
  0x74   : > { %s18741_s18 = scalar_lea.vmem %s266_s2, 2048  ;;  %p24410_p12 = pmov %p24409_p11 }
  0x75   : > { %p18742_p3 = scmp.ne.s32.totalorder %s266_s2, %s18741_s18  ;;  %p18749_p4 = scmp.lt.s32.totalorder %s266_s2, %s266_s2 }
  0x76   : > { %p18750_p8 = scmp.lt.s32.totalorder %s18741_s18, %s18741_s18 }
  0x77   : > { %p18744_p2 = pnand %p18742_p3, %p24410_p12 }
  0x78   : > { %p18751_p9 = por %p18750_p8, %p18749_p4 }
  0x79   : > { %p18745_p6 = pneg %p18744_p2 }
  0x7b   : > { %p18752_p0 = pnand %p18751_p9, %p18745_p6 }
  0x7d   : > { %18755 = shalt.err (!%p18752_p0)
}
  0x7e   : > { %s24411_s12 = smov 32   ;;  %s14906_s14 = sshll.u32 %s18858_s30, 13 }
  0x7f   : > { %18547 = dma.hbm_to_vmem [thread:$0]  (!%p24408_p7), %s23788_s1, 2048, %s266_s2, [#allocation6], %s18861_s17, %s18861_s17, %s24411_s12  }
  0x80   : > { %s326_s10 = scalar_lea.vmem [#allocation9], %s19013_s26  ;;  %s19125_s0 = scalar_lea.hbm %s23791_s4, %s14906_s14 }
  0x81   : > { %s334_s27 = sshll.u32 %s326_s10, 4  ;;  %s18756_s19 = scalar_lea.hbm %s19125_s0, 8192  ;;  %s19127_s27 = int_to_ptr.vmem [resolvable:$true] %s334_s27 }
  0x82   : > { %p18757_p8 = scmp.ne.s32.totalorder %s19125_s0, %s18756_s19  ;;  %p24412_p9 = scmp.ne.s32.totalorder %s24407_s21, 0 }
  0x83   : > { %s18761_s26 = scalar_lea.hbm %s23791_s4, 32768  ;;  %p18762_p7 = scmp.lt.u32.totalorder %s19125_s0, %s23791_s4 }
  0x84   : > { %p18759_p11 = pnand %p18757_p8, %p24412_p9  ;;  %p18763_p5 = scmp.lt.u32.totalorder %s18761_s26, %s18756_s19 }
  0x85   : > { %p18765_p1 = scmp.lt.u32.totalorder %s18756_s19, %s19125_s0 }
  0x86   : > { %p18760_p13 = pneg %p18759_p11  ;;  %p18764_p10 = por %p18763_p5, %p18762_p7 }
  0x88   : > { %p18766_p3 = por %p18765_p1, %p18764_p10 }
  0x8a   : > { %p18767_p12 = pnand %p18766_p3, %p18760_p13 }
  0x8c   : > { %18770 = shalt.err (!%p18767_p12)
}
  0x8d   : > { %s18771_s18 = scalar_lea.vmem %s19127_s27, 8192  ;;  %s18868_s25 = smov [#allocation9]  }
  0x8e   : > { %p18772_p2 = scmp.ne.s32.totalorder %s19127_s27, %s18771_s18  ;;  %s18776_s23 = sshll.u32 %s18868_s25, 4  ;;  %s18777_s23 = int_to_ptr.vmem [resolvable:$false] %s18776_s23 }
  0x8f   : > { %s18778_s14 = scalar_lea.vmem %s18777_s23, 16384  ;;  %p18779_p0 = scmp.lt.s32.totalorder %s19127_s27, %s18777_s23 }
  0x90   : > { %p18774_p6 = pnand %p18772_p2, %p24412_p9  ;;  %p18780_p8 = scmp.lt.s32.totalorder %s18778_s14, %s18771_s18 }
  0x92   : > { %p18775_p4 = pneg %p18774_p6  ;;  %p18781_p11 = por %p18780_p8, %p18779_p0 }
  0x94   : > { %p18782_p7 = pnand %p18781_p11, %p18775_p4 }
  0x96   : > { %18785 = shalt.err (!%p18782_p7)
}
  0x97   : > { %p24413_p13 = scmp.ne.s32.totalorder %s24403_s22, 0  ;;  %p24414_p9 = scmp.ne.s32.totalorder %s24401_s16, 0 }
  0x99   : > { %18557 = dma.hbm_to_vmem [thread:$0]  (!%p24413_p13), %s19125_s0, 8192, %s19127_s27, %s19026_s24, %s18861_s17, %s18861_s17, %s24411_s12  }
  0x9a   : > { %358 = sbr.rel (%p24414_p9) target bundleno = 4842 (0x12ea), region = 52 }
  0xa1   : > { %p24415_p5 = scmp.eq.s32.totalorder %s18938_s9, 0 }
  0xa3   : > { %18829 = dma.done.wait (%p24415_p5), [#allocation3], 2048   ;;  %p24416_p10 = pmov %p24415_p5 }
  0xa4   : > { %p24417_p1 = pmov %p24415_p5 }
  0xa5   : > { %18831 = vsyncadd (%p24416_p10), [#allocation3], 4294965248 }
  0xa6   : > { %18833 = dma.done.wait (%p24417_p1), [#allocation6], 2048   ;;  %p24418_p3 = pmov %p24417_p1 }
  0xa7   : > { %s368_s22 = sand.u32 1, %s18938_s9   ;;  %s370_s17 = sand.u32 1, %s18850_s28  }
  0xa8   : > { %18835 = vsyncadd (%p24418_p3), [#allocation6], 4294965248  ;;  %s14895_s24 = sshll.u32 %s370_s17, 9  ;;  %s369_s16 = scalar_lea.sflag [#allocation3], %s368_s22 }
  0xa9   : > { %s19166_s21 = scalar_lea.vmem [#allocation7], %s14895_s24  ;;  %p24419_p12 = scmp.ne.s32.totalorder %s24400_s15, 0 }
  0xab   : > { %18837 = dma.done.wait (%p24419_p12), %s369_s16, 24576  }
  0xac   : > { %18839 = vsyncadd (%p24419_p12), %s369_s16, 4294942720  ;;  %p435_p2 = scmp.lt.s32.totalorder %s18938_s9, 3  ;;  %s19184_s2 = scalar_lea.vmem [#allocation8], %s14895_s24 }
  0xad   : > { %s19186_s30 = scalar_lea.vmem [#allocation9], %s14895_s24  ;;  %p24420_p6 = scmp.ne.s32.totalorder %s18938_s9, 0 }
  0xae   : > { %s19174_s12 = scalar_select %p435_p2, %s18938_s9, 3 }
  0xaf   : > { %444 = sbr.rel (%p24420_p6) target bundleno = 191 (0xbf), region = 76  ;;  %v447_v0 = vlaneseq (!%p24420_p6)  ;;  %v445_v2 = vld [vmem:[%s23794_s7] sm:$0xf] (!%p24420_p6) }
  0xb0   : > { %s437_s13 = scalar_lea.vmem %s23792_s5, %s19174_s12  ;;  %s440_s19 = scalar_lea.vmem %s23793_s6, %s19174_s12 }
  0xb1   : > { %v448_v1 = vshrl.u32 (!%p24420_p6), %v447_v0, 7 }
  0xb3   : > { %v449_v3 = vsub.s32 (!%p24420_p6), 0, %v448_v1  ;;  %v453_v4 = vsub.s32 (!%p24420_p6), 1, %v448_v1  ;;  %v457_v5 = vsub.s32 (!%p24420_p6), 2, %v448_v1  ;;  %v461_v6 = vsub.s32 (!%p24420_p6), 3, %v448_v1 }
  0xb5   : > { %v450_v7 = vrot.slane (!%p24420_p6), %v445_v2, %v449_v3  ;;  %v454_v8 = vrot.slane (!%p24420_p6), %v445_v2, %v453_v4  ;;  %v458_v9 = vrot.slane (!%p24420_p6), %v445_v2, %v457_v5  ;;  %v462_v10 = vrot.slane (!%p24420_p6), %v445_v2, %v461_v6 }
  0xb7   : > { %467 = vst [vmem:[#allocation10] sm:$0xff] %v450_v7  ;;  %471 = vst [vmem:[#allocation10 + $0x20] sm:$0xff] %v450_v7 }
  0xb8   : > { %475 = vst [vmem:[#allocation10 + $0x40] sm:$0xff] %v450_v7  ;;  %479 = vst [vmem:[#allocation10 + $0x60] sm:$0xff] %v450_v7 }
  0xb9   : > { %468 = vst [vmem:[#allocation10 + $0x8] sm:$0xff] %v454_v8  ;;  %472 = vst [vmem:[#allocation10 + $0x28] sm:$0xff] %v454_v8 }
  0xba   : > { %476 = vst [vmem:[#allocation10 + $0x48] sm:$0xff] %v454_v8  ;;  %480 = vst [vmem:[#allocation10 + $0x68] sm:$0xff] %v454_v8 }
  0xbb   : > { %469 = vst [vmem:[#allocation10 + $0x10] sm:$0xff] %v458_v9  ;;  %473 = vst [vmem:[#allocation10 + $0x30] sm:$0xff] %v458_v9 }
  0xbc   : > { %477 = vst [vmem:[#allocation10 + $0x50] sm:$0xff] %v458_v9  ;;  %481 = vst [vmem:[#allocation10 + $0x70] sm:$0xff] %v458_v9 }
  0xbd   : > { %470 = vst [vmem:[#allocation10 + $0x18] sm:$0xff] %v462_v10  ;;  %474 = vst [vmem:[#allocation10 + $0x38] sm:$0xff] %v462_v10 }
  0xbe   : > { %478 = vst [vmem:[#allocation10 + $0x58] sm:$0xff] %v462_v10  ;;  %482 = vst [vmem:[#allocation10 + $0x78] sm:$0xff] %v462_v10 }
  0xbf PF: > { %v515_v11 = vld [vmem:[%s19166_s21 + $0x80] sm:$0xff]  ;;  %v516_v12 = vld [vmem:[%s19166_s21 + $0x88] sm:$0xff]  ;;  %v517_v18 = vld [vmem:[%s19166_s21 + $0x90] sm:$0xff]  ;;  %vm4809_vm0 = vcmask 523264   ;;  %vm5324_vm1 = vcmask 130048   ;;  %s18870_s23 = smov 64  }
  0xc0   : > { %v499_v13 = vld [vmem:[%s19166_s21] sm:$0xff]  ;;  %v619_v14 = vand.u32 4294901760, %v515_v11  ;;  %v622_v15 = vand.u32 4294901760, %v516_v12  ;;  %v500_v16 = vld [vmem:[%s19166_s21 + $0x8] sm:$0xff]  ;;  %v518_v19 = vld [vmem:[%s19166_s21 + $0x98] sm:$0xff]  ;;  %v625_v21 = vand.u32 4294901760, %v517_v18 }
  0xc1   : > { %v571_v17 = vand.u32 4294901760, %v499_v13  ;;  %v574_v20 = vand.u32 4294901760, %v500_v16  ;;  %v628_v22 = vand.u32 4294901760, %v518_v19  ;;  %v501_v23 = vld [vmem:[%s19166_s21 + $0x10] sm:$0xff]  ;;  %v502_v24 = vld [vmem:[%s19166_s21 + $0x18] sm:$0xff]  ;;  %v519_v29 = vld [vmem:[%s19166_s21 + $0xa0] sm:$0xff] }
  0xc2   : > { %v19201_v25 = vpack.c.bf16 %v622_v15, %v619_v14  ;;  %v577_v27 = vand.u32 4294901760, %v501_v23  ;;  %v580_v28 = vand.u32 4294901760, %v502_v24  ;;  %v520_v30 = vld [vmem:[%s19166_s21 + $0xa8] sm:$0xff]  ;;  %v503_v34 = vld [vmem:[%s19166_s21 + $0x20] sm:$0xff]  ;;  %v19216_v36 = vsub.f32 %v517_v18, %v625_v21  ;;  %v521_v48 = vld [vmem:[%s19166_s21 + $0xb0] sm:$0xff]  ;;  %s18871_s14 = smov [#allocation10]  }
  0xc3   : > { %v19203_v26 = vsub.f32 %v499_v13, %v571_v17  ;;  %v19207_v31 = vpack.c.bf16 %v574_v20, %v571_v17  ;;  %v19209_v32 = vsub.f32 %v500_v16, %v574_v20  ;;  %v19211_v33 = vpack.c.bf16 %v628_v22, %v625_v21  ;;  %v504_v35 = vld [vmem:[%s19166_s21 + $0x28] sm:$0xff]  ;;  %v522_v53 = vld [vmem:[%s19166_s21 + $0xb8] sm:$0xff]  ;;  %v505_v2 = vld [vmem:[%s19166_s21 + $0x30] sm:$0xff]  ;;  %s14749_s22 = sshll.u32 %s18871_s14, 4  ;;  %p18563_p4 = scmp.eq.s32.totalorder %s18938_s9, 3  ;;  %s14750_s22 = int_to_ptr.vmem [resolvable:$true] %s14749_s22 }
  0xc4   : > { %24421 = vst [vmem:[#allocation18_spill] sm:$0xff] %v19201_v25  ;;  %16492 = vmatprep.subr.bf16.mxu0 %v19201_v25  ;;  %v19218_v37 = vsub.f32 %v518_v19, %v628_v22  ;;  %v19220_v38 = vpack.c.bf16 %v580_v28, %v577_v27  ;;  %v19222_v39 = vsub.f32 %v501_v23, %v577_v27  ;;  %v631_v40 = vand.u32 4294901760, %v519_v29  ;;  %v506_v3 = vld [vmem:[%s19166_s21 + $0x38] sm:$0xff]  ;;  %v523_v16 = vld [vmem:[%s19166_s21 + $0xc0] sm:$0xff]  ;;  %v524_v17 = vld [vmem:[%s19166_s21 + $0xc8] sm:$0xff]  ;;  %s18786_s17 = scalar_lea.vmem %s14750_s22, 2048  ;;  %p18793_p7 = scmp.lt.s32.totalorder %s14750_s22, %s14750_s22 }
  0xc5   : > { %16494 = vmatpush3.bf16.msra.mxu0 %v19207_v31  ;;  %v634_v41 = vand.u32 4294901760, %v520_v30  ;;  %v19225_v42 = vsub.f32 %v515_v11, %v619_v14  ;;  %v19227_v43 = vsub.f32 %v516_v12, %v622_v15  ;;  %v583_v44 = vand.u32 4294901760, %v503_v34  ;;  %v507_v22 = vld [vmem:[%s19166_s21 + $0x40] sm:$0xff]  ;;  %p18787_p0 = scmp.ne.s32.totalorder %s14750_s22, %s18786_s17  ;;  %p18794_p13 = scmp.lt.s32.totalorder %s18786_s17, %s18786_s17 }
  0xc6   : > { %16496 = vmatprep.subr.bf16.mxu0 %v19211_v33  ;;  %v586_v45 = vand.u32 4294901760, %v504_v35  ;;  %v23826_v46 = vand.u32 4294901760, %v19203_v26  ;;  %v23825_v47 = vand.u32 4294901760, %v19209_v32  ;;  %v19233_v49 = vsub.f32 %v502_v24, %v580_v28 }
  0xc7   : > { %v19235_v50 = vpack.c.bf16 %v634_v41, %v631_v40  ;;  %v19237_v51 = vsub.f32 %v519_v29, %v631_v40  ;;  %v23830_v52 = vand.u32 4294901760, %v19225_v42  ;;  %v19241_v54 = vsub.f32 %v520_v30, %v634_v41  ;;  %v508_v40 = vld [vmem:[%s19166_s21 + $0x48] sm:$0xff]  ;;  %p18788_p8 = pnand %p18787_p0, %p18563_p4  ;;  %p18795_p9 = por %p18794_p13, %p18793_p7 }
  0xc8   : > { %v23828_v55 = vand.u32 4294901760, %v19227_v43  ;;  %v19244_v56 = vpack.c.bf16 %v586_v45, %v583_v44  ;;  %v19246_v57 = vsub.f32 %v503_v34, %v583_v44  ;;  %v731_v59 = vsub.f32 %v19203_v26, %v23826_v46 }
  0xc9   : > { %16498 = vmatpush3.bf16.msra.mxu0 %v19220_v38  ;;  %v843_v58 = vsub.f32 %v19225_v42, %v23830_v52  ;;  %v738_v60 = vsub.f32 %v19209_v32, %v23825_v47  ;;  %v637_v61 = vand.u32 4294901760, %v521_v48  ;;  %v640_v63 = vand.u32 4294901760, %v522_v53  ;;  %v484_v52 = vld [vmem:[#allocation2 + $0x8] sm:$0xff]  ;;  %p18789_p11 = pneg %p18788_p8 }
  0xca   : > { %16500 = vmatprep.subr.bf16.mxu0 %v19235_v50  ;;  %v850_v62 = vsub.f32 %v19227_v43, %v23828_v55  ;;  %v23823_v0 = vand.u32 4294901760, %v19216_v36  ;;  %v23822_v1 = vand.u32 4294901760, %v19218_v37  ;;  %v19266_v5 = vsub.f32 %v504_v35, %v586_v45 }
  0xcb   : > { %v844_v4 = vand.u32 4294901760, %v843_v58  ;;  %v732_v6 = vand.u32 4294901760, %v731_v59  ;;  %v739_v7 = vand.u32 4294901760, %v738_v60  ;;  %v19268_v9 = vpack.c.bf16 %v640_v63, %v637_v61  ;;  %p18796_p5 = pnand %p18795_p9, %p18789_p11 }
  0xcc   : > { %v851_v8 = vand.u32 4294901760, %v850_v62  ;;  %v19270_v10 = vsub.f32 %v521_v48, %v637_v61  ;;  %v857_v11 = vsub.f32 %v19216_v36, %v23823_v0  ;;  %v864_v13 = vsub.f32 %v19218_v37, %v23822_v1 }
  0xcd   : > { %16502 = vmatpush3.bf16.msra.mxu0 %v19244_v56  ;;  %v16525_v12 = vpack.c.bf16 %v739_v7, %v732_v6  ;;  %v589_v14 = vand.u32 4294901760, %v505_v2  ;;  %v592_v15 = vand.u32 4294901760, %v506_v3  ;;  %v23820_v20 = vand.u32 4294901760, %v19222_v39 }
  0xce   : > { %v16523_v18 = vpack.c.bf16 %v851_v8, %v844_v4  ;;  %16504 = vmatprep.subr.bf16.mxu0 %v19268_v9  ;;  %v858_v19 = vand.u32 4294901760, %v857_v11  ;;  %v23819_v21 = vand.u32 4294901760, %v19233_v49  ;;  %v19285_v23 = vsub.f32 %v522_v53, %v640_v63  ;;  %v525_v4 = vld [vmem:[%s19166_s21 + $0xd0] sm:$0xff] }
  0xcf   : > { %v865_v24 = vand.u32 4294901760, %v864_v13  ;;  %v19287_v27 = vpack.c.bf16 %v592_v15, %v589_v14  ;;  %v19289_v28 = vsub.f32 %v505_v2, %v589_v14  ;;  %v745_v29 = vsub.f32 %v19222_v39, %v23820_v20  ;;  %v529_v20 = vld [vmem:[%s19166_s21 + $0xf0] sm:$0xff] }
  0xd0   : > { %16524 = vmatprep.subr.bf16.mxu1 %v16523_v18  ;;  %v752_v30 = vsub.f32 %v19233_v49, %v23819_v21  ;;  %v643_v34 = vand.u32 4294901760, %v523_v16  ;;  %v646_v35 = vand.u32 4294901760, %v524_v17  ;;  %v23817_v44 = vand.u32 4294901760, %v19237_v51 }
  0xd1   : > { %16526 = vmatpush3.bf16.msra.mxu1 %v16525_v12  ;;  %v16527_v41 = vpack.c.bf16 %v865_v24, %v858_v19  ;;  %16506 = vmatpush3.bf16.msra.mxu0 %v19287_v27  ;;  %v23816_v45 = vand.u32 4294901760, %v19241_v54  ;;  %v595_v48 = vand.u32 4294901760, %v507_v22  ;;  %v19301_v53 = vsub.f32 %v506_v3, %v592_v15  ;;  %v526_v3 = vld [vmem:[%s19166_s21 + $0xd8] sm:$0xff]  ;;  %v509_v12 = vld [vmem:[%s19166_s21 + $0x50] sm:$0xff] }
  0xd2   : > { %v746_v58 = vand.u32 4294901760, %v745_v29  ;;  %v753_v59 = vand.u32 4294901760, %v752_v30  ;;  %v19303_v60 = vpack.c.bf16 %v646_v35, %v643_v34  ;;  %v19305_v61 = vsub.f32 %v523_v16, %v643_v34  ;;  %v510_v29 = vld [vmem:[%s19166_s21 + $0x58] sm:$0xff] }
  0xd3   : > { %16528 = vmatprep.subr.bf16.mxu1 %v16527_v41  ;;  %v871_v62 = vsub.f32 %v19237_v51, %v23817_v44  ;;  %v878_v63 = vsub.f32 %v19241_v54, %v23816_v45  ;;  %v598_v2 = vand.u32 4294901760, %v508_v40  ;;  %v19316_v7 = vsub.f32 %v524_v17, %v646_v35 }
  0xd4   : > { %24422 = vst [vmem:[#allocation19_spill] sm:$0xff] %v19303_v60  ;;  %v16529_v6 = vpack.c.bf16 %v753_v59, %v746_v58  ;;  %16508 = vmatprep.subr.bf16.mxu0 %v19303_v60  ;;  %v23813_v8 = vand.u32 4294901760, %v19246_v57  ;;  %v23812_v11 = vand.u32 4294901760, %v19266_v5  ;;  %v19323_v16 = vsub.f32 %v507_v22, %v595_v48 }
  0xd5   : > { %v872_v13 = vand.u32 4294901760, %v871_v62  ;;  %v879_v14 = vand.u32 4294901760, %v878_v63  ;;  %v19321_v15 = vpack.c.bf16 %v598_v2, %v595_v48  ;;  %v649_v19 = vand.u32 4294901760, %v525_v4 }
  0xd6   : > { %16530 = vmatpush3.bf16.msra.mxu1 %v16529_v6  ;;  %v759_v18 = vsub.f32 %v19246_v57, %v23813_v8  ;;  %v766_v17 = vsub.f32 %v19266_v5, %v23812_v11  ;;  %v652_v24 = vand.u32 4294901760, %v526_v3  ;;  %v23811_v22 = vand.u32 4294901760, %v19270_v10 }
  0xd7   : > { %24423 = vst [vmem:[#allocation20_spill] sm:$0xff] %v19321_v15  ;;  %v16531_v30 = vpack.c.bf16 %v879_v14, %v872_v13  ;;  %16510 = vmatpush3.bf16.msra.mxu0 %v19321_v15  ;;  %v23814_v34 = vand.u32 4294901760, %v19285_v23  ;;  %v601_v35 = vand.u32 4294901760, %v509_v12  ;;  %v19335_v41 = vsub.f32 %v508_v40, %v598_v2  ;;  %v527_v14 = vld [vmem:[%s19166_s21 + $0xe0] sm:$0xff]  ;;  %v528_v40 = vld [vmem:[%s19166_s21 + $0xe8] sm:$0xff] }
  0xd8   : > { %v760_v48 = vand.u32 4294901760, %v759_v18  ;;  %v767_v58 = vand.u32 4294901760, %v766_v17  ;;  %v19337_v59 = vpack.c.bf16 %v652_v24, %v649_v19  ;;  %v19339_v62 = vsub.f32 %v525_v4, %v649_v19  ;;  %v511_v19 = vld [vmem:[%s19166_s21 + $0x60] sm:$0xff] }
  0xd9   : > { %16532 = vmatprep.subr.bf16.mxu1 %v16531_v30  ;;  %v885_v63 = vsub.f32 %v19270_v10, %v23811_v22  ;;  %v892_v6 = vsub.f32 %v19285_v23, %v23814_v34  ;;  %v604_v13 = vand.u32 4294901760, %v510_v29  ;;  %v19350_v18 = vsub.f32 %v526_v3, %v652_v24  ;;  %v512_v34 = vld [vmem:[%s19166_s21 + $0x68] sm:$0xff] }
  0xda   : > { %24424 = vst [vmem:[#allocation21_spill] sm:$0xff] %v19337_v59  ;;  %v16533_v2 = vpack.c.bf16 %v767_v58, %v760_v48  ;;  %16512 = vmatprep.subr.bf16.mxu0 %v19337_v59  ;;  %v23815_v4 = vand.u32 4294901760, %v19289_v28  ;;  %v23818_v17 = vand.u32 4294901760, %v19301_v53  ;;  %v19357_v8 = vsub.f32 %v509_v12, %v601_v35 }
  0xdb   : > { %v886_v30 = vand.u32 4294901760, %v885_v63  ;;  %v893_v22 = vand.u32 4294901760, %v892_v6  ;;  %v19355_v11 = vpack.c.bf16 %v604_v13, %v601_v35  ;;  %v655_v24 = vand.u32 4294901760, %v527_v14 }
  0xdc   : > { %16534 = vmatpush3.bf16.msra.mxu1 %v16533_v2  ;;  %v773_v48 = vsub.f32 %v19289_v28, %v23815_v4  ;;  %v780_v3 = vsub.f32 %v19301_v53, %v23818_v17  ;;  %v658_v58 = vand.u32 4294901760, %v528_v40  ;;  %v23821_v12 = vand.u32 4294901760, %v19305_v61 }
  0xdd   : > { %24425 = vst [vmem:[#allocation22_spill] sm:$0xff] %v19355_v11  ;;  %v16535_v63 = vpack.c.bf16 %v893_v22, %v886_v30  ;;  %16514 = vmatpush3.bf16.msra.mxu0 %v19355_v11  ;;  %v23824_v35 = vand.u32 4294901760, %v19316_v7  ;;  %v607_v6 = vand.u32 4294901760, %v511_v19  ;;  %v19369_v2 = vsub.f32 %v510_v29, %v604_v13  ;;  %v530_v29 = vld [vmem:[%s19166_s21 + $0xf8] sm:$0xff]  ;;  %v488_v11 = vld [vmem:[#allocation2 + $0x28] sm:$0xff] }
  0xde   : > { %v774_v4 = vand.u32 4294901760, %v773_v48  ;;  %v781_v45 = vand.u32 4294901760, %v780_v3  ;;  %v19371_v44 = vpack.c.bf16 %v658_v58, %v655_v24  ;;  %v19373_v17 = vsub.f32 %v527_v14, %v655_v24  ;;  %v513_v24 = vld [vmem:[%s19166_s21 + $0x70] sm:$0xff] }
  0xdf   : > { %16536 = vmatprep.subr.bf16.mxu1 %v16535_v63  ;;  %v899_v22 = vsub.f32 %v19305_v61, %v23821_v12  ;;  %v906_v30 = vsub.f32 %v19316_v7, %v23824_v35  ;;  %v610_v21 = vand.u32 4294901760, %v512_v34  ;;  %v19384_v48 = vsub.f32 %v528_v40, %v658_v58  ;;  %v514_v35 = vld [vmem:[%s19166_s21 + $0x78] sm:$0xff] }
  0xe0   : > { %24426 = vst [vmem:[#allocation23_spill] sm:$0xff] %v19371_v44  ;;  %v16537_v13 = vpack.c.bf16 %v781_v45, %v774_v4  ;;  %16516 = vmatprep.subr.bf16.mxu0 %v19371_v44  ;;  %v23827_v14 = vand.u32 4294901760, %v19323_v16  ;;  %v23829_v3 = vand.u32 4294901760, %v19335_v41  ;;  %v19391_v0 = vsub.f32 %v511_v19, %v607_v6 }
  0xe1   : > { %v900_v63 = vand.u32 4294901760, %v899_v22  ;;  %v907_v12 = vand.u32 4294901760, %v906_v30  ;;  %v19389_v1 = vpack.c.bf16 %v610_v21, %v607_v6  ;;  %v661_v4 = vand.u32 4294901760, %v529_v20 }
  0xe2   : > { %16538 = vmatpush3.bf16.msra.mxu1 %v16537_v13  ;;  %v787_v45 = vsub.f32 %v19323_v16, %v23827_v14  ;;  %v794_v40 = vsub.f32 %v19335_v41, %v23829_v3  ;;  %v664_v58 = vand.u32 4294901760, %v530_v29  ;;  %v23833_v22 = vand.u32 4294901760, %v19339_v62 }
  0xe3   : > { %24427 = vst [vmem:[#allocation24_spill] sm:$0xff] %v19389_v1  ;;  %v16539_v47 = vpack.c.bf16 %v907_v12, %v900_v63  ;;  %16518 = vmatpush3.bf16.msra.mxu0 %v19389_v1  ;;  %v23834_v19 = vand.u32 4294901760, %v19350_v18  ;;  %v613_v6 = vand.u32 4294901760, %v513_v24  ;;  %v19403_v30 = vsub.f32 %v512_v34, %v610_v21 }
  0xe4   : > { %v788_v13 = vand.u32 4294901760, %v787_v45  ;;  %v795_v46 = vand.u32 4294901760, %v794_v40  ;;  %v19405_v14 = vpack.c.bf16 %v664_v58, %v661_v4  ;;  %v19407_v55 = vsub.f32 %v529_v20, %v661_v4  ;;  %v483_v20 = vld [vmem:[#allocation2] sm:$0xff] }
  0xe5   : > { %16540 = vmatprep.subr.bf16.mxu1 %v16539_v47  ;;  %v913_v12 = vsub.f32 %v19339_v62, %v23833_v22  ;;  %v920_v63 = vsub.f32 %v19350_v18, %v23834_v19  ;;  %v616_v3 = vand.u32 4294901760, %v514_v35  ;;  %v19416_v21 = vsub.f32 %v530_v29, %v664_v58 }
  0xe6   : > { %24428 = vst [vmem:[#allocation25_spill] sm:$0xff] %v19405_v14  ;;  %v16541_v1 = vpack.c.bf16 %v795_v46, %v788_v13  ;;  %16520 = vmatprep.subr.bf16.mxu0 %v19405_v14  ;;  %v23835_v34 = vand.u32 4294901760, %v19357_v8  ;;  %v23836_v47 = vand.u32 4294901760, %v19369_v2  ;;  %v19422_v22 = vsub.f32 %v513_v24, %v613_v6 }
  0xe7   : > { %24429 = vst [vmem:[#allocation26_spill] sm:$0xff] %v19416_v21  ;;  %v914_v45 = vand.u32 4294901760, %v913_v12  ;;  %v921_v40 = vand.u32 4294901760, %v920_v63  ;;  %v19420_v4 = vpack.c.bf16 %v616_v3, %v613_v6  ;;  %v19430_v58 = vand.u32 4294901760, %v484_v52 }
  0xe8   : > { %24431 = vst [vmem:[#allocation28_spill] sm:$0xff] %v19422_v22  ;;  %16542 = vmatpush3.bf16.msra.mxu1 %v16541_v1  ;;  %v801_v46 = vsub.f32 %v19357_v8, %v23835_v34  ;;  %v808_v29 = vsub.f32 %v19369_v2, %v23836_v47  ;;  %v23839_v13 = vand.u32 4294901760, %v19373_v17  ;;  %v23845_v12 = vand.u32 4294901760, %v19384_v48 }
  0xe9   : > { %24430 = vst [vmem:[#allocation27_spill] sm:$0xff] %v19420_v4  ;;  %24432 = vst [vmem:[#allocation29_spill] sm:$0xff] %v19430_v58  ;;  %v16543_v19 = vpack.c.bf16 %v921_v40, %v914_v45  ;;  %16522 = vmatpush3.bf16.msra.mxu0 %v19420_v4  ;;  %v16555_v1 = vpack.c.bf16 %v19227_v43, %v19225_v42  ;;  %v19437_v24 = vand.u32 4294901760, %v483_v20  ;;  %952 = vmatprep.mubr.f32.mxu1 %v19430_v58 }
  0xea   : > { %v802_v6 = vand.u32 4294901760, %v801_v46  ;;  %v809_v63 = vand.u32 4294901760, %v808_v29  ;;  %v19440_v34 = vsub.f32 %v484_v52, %v19430_v58  ;;  %v927_v47 = vsub.f32 %v19373_v17, %v23839_v13 }
  0xeb   : > { %24433 = vst [vmem:[#allocation30_spill] sm:$0xff] %v19437_v24  ;;  %16544 = vmatprep.subr.bf16.mxu1 %v16543_v19  ;;  %v934_v45 = vsub.f32 %v19384_v48, %v23845_v12  ;;  %16556 = vmatprep.subr.bf16.mxu0 %v16555_v1  ;;  %v19450_v40 = vsub.f32 %v483_v20, %v19437_v24  ;;  %v23844_v46 = vand.u32 4294901760, %v19391_v0  ;;  %v23846_v52 = vand.u32 4294901760, %v19403_v30 }
  0xec   : > { %v19454_v29 = vsub.f32 %v514_v35, %v616_v3  ;;  %v16545_v4 = vpack.c.bf16 %v809_v63, %v802_v6  ;;  %v23847_v13 = vand.u32 4294901760, %v19440_v34  ;;  %v928_v14 = vand.u32 4294901760, %v927_v47 }
  0xed   : > { %24434 = vst [vmem:[#allocation31_spill] sm:$0xff] %v19450_v40  ;;  %v935_v58 = vand.u32 4294901760, %v934_v45  ;;  %v23852_v19 = vand.u32 4294901760, %v19450_v40  ;;  %v815_v1 = vsub.f32 %v19391_v0, %v23844_v46  ;;  %v822_v20 = vsub.f32 %v19403_v30, %v23846_v52 }
  0xee   : > { %24435 = vst [vmem:[#allocation32_spill] sm:$0xff] %v19454_v29  ;;  %16546 = vmatpush3.bf16.msra.mxu1 %v16545_v4  ;;  %v669_v35 = vsub.f32 %v19440_v34, %v23847_v13  ;;  %v16557_v3 = vpack.c.bf16 %v19209_v32, %v19203_v26  ;;  %v23853_v47 = vand.u32 4294901760, %v19407_v55  ;;  %v23856_v6 = vand.u32 4294901760, %v19416_v21 }
  0xef   : > { %v16547_v63 = vpack.c.bf16 %v935_v58, %v928_v14  ;;  %v675_v45 = vsub.f32 %v19450_v40, %v23852_v19  ;;  %v816_v46 = vand.u32 4294901760, %v815_v1  ;;  %v823_v12 = vand.u32 4294901760, %v822_v20  ;;  %v487_v40 = vld [vmem:[#allocation2 + $0x20] sm:$0xff] }
  0xf0   : > { %v670_v52 = vand.u32 4294901760, %v669_v35  ;;  %v941_v4 = vsub.f32 %v19407_v55, %v23853_v47  ;;  %v948_v13 = vsub.f32 %v19416_v21, %v23856_v6  ;;  %v23857_v44 = vand.u32 4294901760, %v19422_v22 }
  0xf1   : > { %16548 = vmatprep.subr.bf16.mxu1 %v16547_v63  ;;  %v676_v14 = vand.u32 4294901760, %v675_v45  ;;  %v16549_v58 = vpack.c.bf16 %v823_v12, %v816_v46  ;;  %v16559_v19 = vpack.c.bf16 %v19218_v37, %v19216_v36  ;;  %v23858_v1 = vand.u32 4294901760, %v19454_v29  ;;  %v492_v46 = vld [vmem:[#allocation2 + $0x48] sm:$0xff]  ;;  %v491_v45 = vld [vmem:[#allocation2 + $0x40] sm:$0xff] }
  0xf2   : > { %671 = vmatprep.mubr.f32.mxu0 %v670_v52  ;;  %v942_v20 = vand.u32 4294901760, %v941_v4  ;;  %v949_v35 = vand.u32 4294901760, %v948_v13  ;;  %v829_v47 = vsub.f32 %v19422_v22, %v23857_v44  ;;  %v19490_v12 = vand.u32 4294901760, %v488_v11 }
  0xf3   : > { %677 = vmatmul.mubr.f32.vlgmr.msra.gmra.mrb[0].mxu0 %v676_v14  ;;  %16550 = vmatpush3.bf16.msra.mxu1 %v16549_v58  ;;  %v836_v63 = vsub.f32 %v19454_v29, %v23858_v1  ;;  %v16561_v13 = vpack.c.bf16 %v19233_v49, %v19222_v39  ;;  %v16563_v14 = vpack.c.bf16 %v19241_v54, %v19237_v51  ;;  %v19499_v44 = vand.u32 4294901760, %v487_v40  ;;  %v496_v1 = vld [vmem:[#allocation2 + $0x68] sm:$0xff] }
  0xf4   : > { %16558 = vmatpush3.bf16.msra.mxu0 %v16557_v3  ;;  %v16551_v6 = vpack.c.bf16 %v949_v35, %v942_v20  ;;  %v830_v52 = vand.u32 4294901760, %v829_v47  ;;  %v19497_v58 = vsub.f32 %v488_v11, %v19490_v12  ;;  %v19501_v59 = vand.u32 4294901760, %v492_v46  ;;  %v495_v47 = vld [vmem:[#allocation2 + $0x60] sm:$0xff] }
  0xf5   : > { %16560 = vmatprep.subr.bf16.mxu0 %v16559_v19  ;;  %v837_v4 = vand.u32 4294901760, %v836_v63  ;;  %v19503_v3 = vand.u32 4294901760, %v491_v45  ;;  %v16565_v19 = vpack.c.bf16 %v19266_v5, %v19246_v57  ;;  %v19509_v63 = vsub.f32 %v487_v40, %v19499_v44 }
  0xf6   : > { %24436 = vst [vmem:[#allocation33_spill] sm:$0xff] %v19497_v58  ;;  %16552 = vmatprep.subr.bf16.mxu1 %v16551_v6  ;;  %v23867_v35 = vand.u32 4294901760, %v19497_v58  ;;  %v16567_v11 = vpack.c.bf16 %v19285_v23, %v19270_v10  ;;  %v19514_v6 = vsub.f32 %v492_v46, %v19501_v59  ;;  %v19519_v29 = vand.u32 4294901760, %v496_v1 }
  0xf7   : > { %24437 = vst [vmem:[#allocation34_spill] sm:$0xff] %v19503_v3  ;;  %v16553_v20 = vpack.c.bf16 %v837_v4, %v830_v52  ;;  %v19517_v15 = vsub.f32 %v491_v45, %v19503_v3  ;;  %v16569_v52 = vpack.c.bf16 %v19301_v53, %v19289_v28  ;;  %v19527_v4 = vand.u32 4294901760, %v495_v47 }
  0xf8   : > { %16562 = vmatpush3.bf16.msra.mxu0 %v16561_v13  ;;  %24438 = vst [vmem:[#allocation35_spill] sm:$0xff] %v19519_v29  ;;  %v684_v40 = vsub.f32 %v19497_v58, %v23867_v35  ;;  %v23875_v13 = vand.u32 4294901760, %v19509_v63  ;;  %v16571_v46 = vpack.c.bf16 %v19316_v7, %v19305_v61  ;;  %v23876_v45 = vand.u32 4294901760, %v19514_v6 }
  0xf9   : > { %16554 = vmatpush3.bf16.msra.mxu1 %v16553_v20  ;;  %16564 = vmatprep.subr.bf16.mxu0 %v16563_v14  ;;  %24439 = vst [vmem:[#allocation36_spill] sm:$0xff] %v19527_v4  ;;  %v23879_v14 = vand.u32 4294901760, %v19517_v15  ;;  %v19535_v20 = vsub.f32 %v496_v1, %v19519_v29  ;;  %v19541_v58 = vsub.f32 %v495_v47, %v19527_v4  ;;  %v24441_v60 = vand.u32 4294901760, %v19227_v43 }
  0xfa   : > { %16588 = vmatprep.subr.bf16.mxu1 %v19201_v25  ;;  %v685_v22 = vand.u32 4294901760, %v684_v40  ;;  %v690_v35 = vsub.f32 %v19509_v63, %v23875_v13  ;;  %v24440_v25 = vand.u32 4294901760, %v19225_v42  ;;  %v699_v1 = vsub.f32 %v19514_v6, %v23876_v45 }
  0xfb   : > { %v705_v40 = vsub.f32 %v19517_v15, %v23879_v14  ;;  %v24442_v13 = vand.u32 4294901760, %v19203_v26  ;;  %v24443_v42 = vand.u32 4294901760, %v19209_v32  ;;  %v24445_v45 = vand.u32 4294901760, %v19218_v37 }
  0xfc   : > { %v19547_v21 = vpack.c.bf16 %v24441_v60, %v24440_v25  ;;  %954 = vmatmul.mubr.f32.vlgmr.msra.gmra.mrb[0].mxu1 %v19437_v24  ;;  %16566 = vmatpush3.bf16.msra.mxu0 %v16565_v19  ;;  %v691_v25 = vand.u32 4294901760, %v690_v35  ;;  %v23880_v60 = vand.u32 4294901760, %v19541_v58  ;;  %v24444_v19 = vand.u32 4294901760, %v19216_v36 }
  0xfd   : > { %v19561_v43 = vpack.c.bf16 %v24443_v42, %v24442_v13  ;;  %16590 = vmatpush3.bf16.msra.mxu1 %v19207_v31  ;;  %16568 = vmatprep.subr.bf16.mxu0 %v16567_v11  ;;  %v24446_v14 = vand.u32 4294901760, %v19222_v39  ;;  %v24447_v26 = vand.u32 4294901760, %v19233_v49  ;;  %v16573_v32 = vpack.c.bf16 %v19335_v41, %v19323_v16 }
  0xfe   : > { %v19569_v24 = vpack.c.bf16 %v24445_v45, %v24444_v19  ;;  %16592 = vmatprep.subr.bf16.mxu1 %v19211_v33  ;;  %686 = vmatprep.mubr.f32.mxu0 %v685_v22  ;;  %v700_v35 = vand.u32 4294901760, %v699_v1  ;;  %v24448_v11 = vand.u32 4294901760, %v19535_v20  ;;  %v24449_v37 = vand.u32 4294901760, %v19237_v51 }
  0xff   : > { %v19575_v47 = vpack.c.bf16 %v24447_v26, %v24446_v14  ;;  %v24450_v13 = vand.u32 4294901760, %v19241_v54  ;;  %692 = vmatmul.mubr.f32.gmra.mrb[2].mxu0 %v691_v25  ;;  %v706_v49 = vand.u32 4294901760, %v705_v40  ;;  %959 = vmatprep.mubr.f32.mxu1 %v19490_v12  ;;  %v720_v45 = vsub.f32 %v19541_v58, %v23880_v60  ;;  %v24477_v60 = vld [vmem:[#allocation18_spill] sm:$0xff] }
 0x100   : > { %v714_v36 = vsub.f32 %v19535_v20, %v24448_v11  ;;  %v24451_v22 = vand.u32 4294901760, %v19246_v57  ;;  %v24452_v14 = vand.u32 4294901760, %v19266_v5  ;;  %v24453_v51 = vand.u32 4294901760, %v19270_v10  ;;  %16570 = vmatpush3.bf16.msra.mxu0 %v16569_v52  ;;  %701 = vmatprep.mubr.f32.mxu0 %v700_v35 }
 0x101   : > { %v19587_v39 = vpack.c.bf16 %v24450_v13, %v24449_v37  ;;  %v24454_v54 = vand.u32 4294901760, %v19285_v23  ;;  %v24455_v25 = vand.u32 4294901760, %v19289_v28  ;;  %v24456_v19 = vand.u32 4294901760, %v19301_v53  ;;  %16594 = vmatpush3.bf16.msra.mxu1 %v19220_v38  ;;  %16572 = vmatprep.subr.bf16.mxu0 %v16571_v46  ;;  %v24467_v13 = vld [vmem:[#allocation32_spill] sm:$0xff] }
 0x102   : > { %v19597_v1 = vpack.c.bf16 %v24452_v14, %v24451_v22  ;;  %v715_v40 = vand.u32 4294901760, %v714_v36  ;;  %v24457_v57 = vand.u32 4294901760, %v19305_v61  ;;  %v24458_v5 = vand.u32 4294901760, %v19316_v7  ;;  %16596 = vmatprep.subr.bf16.mxu1 %v19235_v50  ;;  %961 = vmatmul.mubr.f32.gmra.mrb[2].mxu1 %v19499_v44  ;;  %v24466_v36 = vld [vmem:[#allocation28_spill] sm:$0xff]  ;;  %v24469_v22 = vld [vmem:[#allocation21_spill] sm:$0xff]  ;;  %v547_v14 = vld [vmem:[%s19166_s21 + $0x180] sm:$0xff] }
 0x103   : > { %v19603_v42 = vpack.c.bf16 %v24454_v54, %v24453_v51  ;;  %v19609_v26 = vpack.c.bf16 %v24456_v19, %v24455_v25  ;;  %v24459_v10 = vand.u32 4294901760, %v19323_v16  ;;  %v24460_v23 = vand.u32 4294901760, %v19335_v41  ;;  %707 = vmatmul.mubr.f32.gmra.mrb[4].mxu0 %v706_v49  ;;  %966 = vmatprep.mubr.f32.mxu1 %v19501_v59  ;;  %v548_v51 = vld [vmem:[%s19166_s21 + $0x188] sm:$0xff]  ;;  %v24470_v54 = vld [vmem:[#allocation22_spill] sm:$0xff] }
 0x104   : > { %v19615_v11 = vpack.c.bf16 %v24458_v5, %v24457_v57  ;;  %v16575_v28 = vpack.c.bf16 %v19350_v18, %v19339_v62  ;;  %v24461_v53 = vand.u32 4294901760, %v19339_v62  ;;  %v24462_v61 = vand.u32 4294901760, %v19350_v18  ;;  %16574 = vmatpush3.bf16.msra.mxu0 %v16573_v32  ;;  %716 = vmatprep.mubr.f32.mxu0 %v715_v40  ;;  %v24463_v18 = vld [vmem:[#allocation26_spill] sm:$0xff]  ;;  %v24464_v32 = vld [vmem:[#allocation19_spill] sm:$0xff] }
 0x105   : > { %v19621_v37 = vpack.c.bf16 %v24460_v23, %v24459_v10  ;;  %v721_v7 = vand.u32 4294901760, %v720_v45  ;;  %v16577_v16 = vpack.c.bf16 %v19369_v2, %v19357_v8  ;;  %16598 = vmatpush3.bf16.msra.mxu1 %v19244_v56  ;;  %v16579_v41 = vpack.c.bf16 %v19384_v48, %v19373_v17  ;;  %v24468_v45 = vld [vmem:[#allocation20_spill] sm:$0xff]  ;;  %v531_v40 = vld [vmem:[%s19166_s21 + $0x100] sm:$0xff]  ;;  %v24472_v25 = vld [vmem:[#allocation31_spill] sm:$0xff] }
 0x106   : > { %v19630_v52 = vpack.c.bf16 %v24462_v61, %v24461_v53  ;;  %16576 = vmatprep.subr.bf16.mxu0 %v16575_v28  ;;  %16600 = vmatprep.subr.bf16.mxu1 %v19268_v9  ;;  %v16581_v62 = vpack.c.bf16 %v19403_v30, %v19391_v0  ;;  %v16583_v46 = vpack.c.bf16 %v24463_v18, %v19407_v55  ;;  %v24465_v35 = vand.u32 4294901760, %v19440_v34  ;;  %v532_v5 = vld [vmem:[%s19166_s21 + $0x108] sm:$0xff]  ;;  %v24473_v10 = vld [vmem:[#allocation33_spill] sm:$0xff]  ;;  %v549_v23 = vld [vmem:[%s19166_s21 + $0x190] sm:$0xff] }
 0x107   : > { %968 = vmatmul.mubr.f32.gmra.mrb[4].mxu1 %v19503_v3  ;;  %722 = vmatmul.mubr.f32.gmra.mrb[6].mxu0 %v721_v7  ;;  %v16585_v49 = vpack.c.bf16 %v24467_v13, %v24466_v36  ;;  %v1649_v19 = vand.u32 4294901760, %v547_v14  ;;  %v1652_v57 = vand.u32 4294901760, %v548_v51  ;;  %v550_v28 = vld [vmem:[%s19166_s21 + $0x198] sm:$0xff]  ;;  %v24474_v53 = vld [vmem:[#allocation24_spill] sm:$0xff]  ;;  %v1604_v7 = vand.u32 4294901760, %v532_v5 }
 0x108   : > { %973 = vmatprep.mubr.f32.mxu1 %v19519_v29  ;;  %16578 = vmatpush3.bf16.msra.mxu0 %v16577_v16  ;;  %v24475_v61 = vld [vmem:[#allocation25_spill] sm:$0xff]  ;;  %v24481_v29 = vand.u32 4294901760, %v19384_v48  ;;  %v24483_v48 = vand.u32 4294901760, %v19391_v0  ;;  %v24487_v0 = vand.u32 4294901760, %v24466_v36 }
 0x109   : > { %1110 = vmatprep.mubr.f32.mxu0 %v19440_v34  ;;  %16602 = vmatpush3.bf16.msra.mxu1 %v19287_v27  ;;  %v24471_v34 = vld [vmem:[#allocation23_spill] sm:$0xff]  ;;  %v19673_v16 = vsub.f32 %v547_v14, %v1649_v19  ;;  %v24478_v14 = vand.u32 4294901760, %v19357_v8 }
 0x10a   : > { %16580 = vmatprep.subr.bf16.mxu0 %v16579_v41  ;;  %16604 = vmatprep.subr.bf16.mxu1 %v24464_v32  ;;  %v1655_v41 = vand.u32 4294901760, %v549_v23  ;;  %v552_v8 = vld [vmem:[%s19166_s21 + $0x1a8] sm:$0xff] }
 0x10b   : > { %975 = vmatmul.mubr.f32.gmra.mrb[6].mxu1 %v19527_v4  ;;  %v1664_v36 = vand.u32 4294901760, %v552_v8 }
 0x10c   : > { %1244 = vmatprep.mubr.f32.mxu1 %v24465_v35  ;;  %16582 = vmatpush3.bf16.msra.mxu0 %v16581_v62  ;;  %v1658_v62 = vand.u32 4294901760, %v550_v28  ;;  %v533_v35 = vld [vmem:[%s19166_s21 + $0x110] sm:$0xff] }
 0x10d   : > { %16606 = vmatpush3.bf16.msra.mxu1 %v24468_v45  ;;  %16584 = vmatprep.subr.bf16.mxu0 %v16583_v46  ;;  %v24476_v46 = vld [vmem:[#allocation27_spill] sm:$0xff] }
 0x10e   : > { %16608 = vmatprep.subr.bf16.mxu1 %v24469_v22 }
 0x110   : > { %16586 = vmatpush3.bf16.msra.mxu0 %v16585_v49  ;;  %v534_v49 = vld [vmem:[%s19166_s21 + $0x118] sm:$0xff] }
 0x111   : > { %16610 = vmatpush3.bf16.msra.mxu1 %v24470_v54  ;;  %16620 = vmatprep.subr.bf16.mxu0 %v19547_v21  ;;  %v1601_v21 = vand.u32 4294901760, %v531_v40 }
 0x112   : > { %16612 = vmatprep.subr.bf16.mxu1 %v24471_v34 }
 0x113   : > { %1113 = vmatmul.mubr.f32.vlgmr.msra.gmra.mrb[8].mxu0 %v24472_v25 }
 0x114   : > { %16622 = vmatpush3.bf16.msra.mxu0 %v19561_v43  ;;  %1119 = vmatprep.mubr.f32.mxu0 %v24473_v10  ;;  %v19675_v43 = vsub.f32 %v548_v51, %v1652_v57  ;;  %v24479_v51 = vand.u32 4294901760, %v19369_v2  ;;  %v23891_v2 = vand.u32 4294901760, %v19673_v16 }
 0x115   : > { %16614 = vmatpush3.bf16.msra.mxu1 %v24474_v53  ;;  %16624 = vmatprep.subr.bf16.mxu0 %v19569_v24  ;;  %v19681_v24 = vsub.f32 %v531_v40, %v1601_v21  ;;  %v19702_v40 = vsub.f32 %v549_v23, %v1655_v41  ;;  %v24485_v23 = vand.u32 4294901760, %v19407_v55 }
 0x116   : > { %16616 = vmatprep.subr.bf16.mxu1 %v24475_v61  ;;  %v19690_v4 = vpack.c.bf16 %v24479_v51, %v24478_v14  ;;  %v1610_v14 = vand.u32 4294901760, %v534_v49 }
 0x117   : > { %1122 = vmatmul.mubr.f32.gmra.mrb[10].mxu0 %v19509_v63 }
 0x118   : > { %16626 = vmatpush3.bf16.msra.mxu0 %v19575_v47  ;;  %1128 = vmatprep.mubr.f32.mxu0 %v19514_v6  ;;  %v24480_v47 = vand.u32 4294901760, %v19373_v17  ;;  %v24482_v17 = vand.u32 4294901760, %v24472_v25  ;;  %v19732_v25 = vpack.c.bf16 %v1652_v57, %v1649_v19  ;;  %v1873_v19 = vsub.f32 %v19673_v16, %v23891_v2  ;;  %v555_v2 = vld [vmem:[%s19166_s21 + $0x1c0] sm:$0xff] }
 0x119   : > { %16618 = vmatpush3.bf16.msra.mxu1 %v24476_v46  ;;  %16628 = vmatprep.subr.bf16.mxu0 %v19587_v39  ;;  %v19698_v46 = vsub.f32 %v532_v5, %v1604_v7  ;;  %v551_v39 = vld [vmem:[%s19166_s21 + $0x1a0] sm:$0xff] }
 0x11a   : > { %16652 = vmatprep.subr.bf16.mxu1 %v24477_v60  ;;  %v19696_v3 = vpack.c.bf16 %v24481_v29, %v24480_v47  ;;  %v19704_v60 = vsub.f32 %v550_v28, %v1658_v62  ;;  %v24484_v29 = vand.u32 4294901760, %v19403_v30  ;;  %v24486_v28 = vand.u32 4294901760, %v24463_v18  ;;  %24489 = vst [vmem:[#allocation26_spill] sm:$0xff] %v19732_v25  ;;  %v535_v18 = vld [vmem:[%s19166_s21 + $0x120] sm:$0xff] }
 0x11b   : > { %1131 = vmatmul.mubr.f32.gmra.mrb[12].mxu0 %v19517_v15  ;;  %v1607_v47 = vand.u32 4294901760, %v533_v35  ;;  %v24488_v30 = vand.u32 4294901760, %v24467_v13  ;;  %v1661_v55 = vand.u32 4294901760, %v551_v39  ;;  %v23889_v13 = vand.u32 4294901760, %v19698_v46 }
 0x11c   : > { %1248 = vmatmul.mubr.f32.vlgmr.msra.gmra.mrb[8].mxu1 %v24482_v17  ;;  %16630 = vmatpush3.bf16.msra.mxu0 %v19597_v1  ;;  %v19716_v5 = vpack.c.bf16 %v24484_v29, %v24483_v48  ;;  %v19722_v51 = vpack.c.bf16 %v24486_v28, %v24485_v23  ;;  %v23890_v17 = vand.u32 4294901760, %v19681_v24  ;;  %v24490_v48 = vand.u32 4294901760, %v24473_v10  ;;  %v536_v23 = vld [vmem:[%s19166_s21 + $0x128] sm:$0xff]  ;;  %v553_v28 = vld [vmem:[%s19166_s21 + $0x1b0] sm:$0xff] }
 0x11d   : > { %16654 = vmatpush3.bf16.msra.mxu1 %v19207_v31  ;;  %1137 = vmatprep.mubr.f32.mxu0 %v19535_v20  ;;  %v19730_v1 = vpack.c.bf16 %v24488_v30, %v24487_v0  ;;  %v19739_v31 = vpack.c.bf16 %v1604_v7, %v1601_v21  ;;  %v19741_v29 = vpack.c.bf16 %v1658_v62, %v1655_v41  ;;  %v23887_v10 = vand.u32 4294901760, %v19702_v40 }
 0x11e   : > { %1255 = vmatprep.mubr.f32.mxu1 %v24490_v48  ;;  %16632 = vmatprep.subr.bf16.mxu0 %v19603_v42  ;;  %v24493_v42 = vand.u32 4294901760, %v19675_v43  ;;  %v23888_v21 = vand.u32 4294901760, %v19704_v60  ;;  %v24494_v7 = vand.u32 4294901760, %v19509_v63  ;;  %v19759_v41 = vpack.c.bf16 %v1610_v14, %v1607_v47 }
 0x11f   : > { %24491 = vst [vmem:[#allocation19_spill] sm:$0xff] %v19739_v31  ;;  %24492 = vst [vmem:[#allocation28_spill] sm:$0xff] %v19741_v29  ;;  %1140 = vmatmul.mubr.f32.gmra.mrb[14].mxu0 %v19541_v58  ;;  %16656 = vmatprep.subr.bf16.mxu1 %v19211_v33  ;;  %v19761_v33 = vsub.f32 %v533_v35, %v1607_v47  ;;  %v19763_v62 = vsub.f32 %v534_v49, %v1610_v14  ;;  %v1613_v0 = vand.u32 4294901760, %v535_v18 }
 0x120   : > { %v1880_v57 = vsub.f32 %v19675_v43, %v24493_v42  ;;  %1259 = vmatmul.mubr.f32.gmra.mrb[10].mxu1 %v24494_v7  ;;  %16634 = vmatpush3.bf16.msra.mxu0 %v19609_v26  ;;  %24495 = vst [vmem:[#allocation32_spill] sm:$0xff] %v19759_v41  ;;  %v24496_v30 = vand.u32 4294901760, %v19514_v6  ;;  %v19768_v48 = vsub.f32 %v551_v39, %v1661_v55  ;;  %v1616_v63 = vand.u32 4294901760, %v536_v23  ;;  %v554_v42 = vld [vmem:[%s19166_s21 + $0x1b8] sm:$0xff] }
 0x121   : > { %16658 = vmatpush3.bf16.msra.mxu1 %v19220_v38  ;;  %v1761_v26 = vsub.f32 %v19681_v24, %v23890_v17  ;;  %v1667_v35 = vand.u32 4294901760, %v553_v28  ;;  %16636 = vmatprep.subr.bf16.mxu0 %v19615_v11  ;;  %v19776_v49 = vpack.c.bf16 %v1664_v36, %v1661_v55  ;;  %v19778_v38 = vsub.f32 %v552_v8, %v1664_v36  ;;  %v24498_v39 = vld [vmem:[#allocation29_spill] sm:$0xff]  ;;  %v537_v11 = vld [vmem:[%s19166_s21 + $0x130] sm:$0xff] }
 0x122   : > { %1266 = vmatprep.mubr.f32.mxu1 %v24496_v30  ;;  %16660 = vmatprep.subr.bf16.mxu1 %v19235_v50  ;;  %v1768_v6 = vsub.f32 %v19698_v46, %v23889_v13  ;;  %v1874_v14 = vand.u32 4294901760, %v1873_v19  ;;  %v1881_v47 = vand.u32 4294901760, %v1880_v57  ;;  %v1887_v7 = vsub.f32 %v19702_v40, %v23887_v10  ;;  %v538_v55 = vld [vmem:[%s19166_s21 + $0x138] sm:$0xff] }
 0x123   : > { %24497 = vst [vmem:[#allocation20_spill] sm:$0xff] %v19776_v49  ;;  %1447 = vmatprep.mubr.f32.mxu0 %v24498_v39  ;;  %v1894_v50 = vsub.f32 %v19704_v60, %v23888_v21  ;;  %v24499_v8 = vand.u32 4294901760, %v19517_v15  ;;  %v19795_v36 = vsub.f32 %v535_v18, %v1613_v0  ;;  %v1670_v19 = vand.u32 4294901760, %v554_v42 }
 0x124   : > { %16638 = vmatpush3.bf16.msra.mxu0 %v19621_v37  ;;  %v23897_v57 = vand.u32 4294901760, %v19761_v33  ;;  %v23892_v30 = vand.u32 4294901760, %v19763_v62  ;;  %v24500_v10 = vand.u32 4294901760, %v19535_v20  ;;  %v19802_v21 = vpack.c.bf16 %v1616_v63, %v1613_v0  ;;  %v556_v0 = vld [vmem:[%s19166_s21 + $0x1c8] sm:$0xff] }
 0x125   : > { %1270 = vmatmul.mubr.f32.gmra.mrb[12].mxu1 %v24499_v8  ;;  %v19804_v15 = vsub.f32 %v536_v23, %v1616_v63  ;;  %v1762_v8 = vand.u32 4294901760, %v1761_v26  ;;  %v19806_v37 = vsub.f32 %v553_v28, %v1667_v35  ;;  %16640 = vmatprep.subr.bf16.mxu0 %v19630_v52  ;;  %v1769_v18 = vand.u32 4294901760, %v1768_v6 }
 0x126   : > { %16662 = vmatpush3.bf16.msra.mxu1 %v19244_v56  ;;  %1277 = vmatprep.mubr.f32.mxu1 %v24500_v10  ;;  %24501 = vst [vmem:[#allocation21_spill] sm:$0xff] %v19802_v21  ;;  %v1619_v13 = vand.u32 4294901760, %v537_v11  ;;  %v1622_v17 = vand.u32 4294901760, %v538_v55  ;;  %v23893_v56 = vand.u32 4294901760, %v19768_v48  ;;  %v19812_v20 = vpack.c.bf16 %v1881_v47, %v1874_v14  ;;  %v539_v14 = vld [vmem:[%s19166_s21 + $0x140] sm:$0xff]  ;;  %v540_v47 = vld [vmem:[%s19166_s21 + $0x148] sm:$0xff] }
 0x127   : > { %24502 = vst [vmem:[#allocation22_spill] sm:$0xff] %v19804_v15  ;;  %24503 = vst [vmem:[#allocation23_spill] sm:$0xff] %v19806_v37  ;;  %16664 = vmatprep.subr.bf16.mxu1 %v19268_v9  ;;  %v1888_v10 = vand.u32 4294901760, %v1887_v7  ;;  %v1895_v23 = vand.u32 4294901760, %v1894_v50  ;;  %v23895_v28 = vand.u32 4294901760, %v19778_v38  ;;  %v24504_v63 = vand.u32 4294901760, %v19541_v58 }
 0x128   : > { %16642 = vmatpush3.bf16.msra.mxu0 %v19690_v4  ;;  %v19819_v9 = vpack.c.bf16 %v1670_v19, %v1667_v35  ;;  %v1775_v52 = vsub.f32 %v19761_v33, %v23897_v57  ;;  %v1782_v26 = vsub.f32 %v19763_v62, %v23892_v30  ;;  %v19829_v6 = vsub.f32 %v554_v42, %v1670_v19 }
 0x129   : > { %1281 = vmatmul.mubr.f32.gmra.mrb[14].mxu1 %v24504_v63  ;;  %16644 = vmatprep.subr.bf16.mxu0 %v19696_v3  ;;  %v1673_v58 = vand.u32 4294901760, %v555_v2  ;;  %v23894_v4 = vand.u32 4294901760, %v19795_v36  ;;  %v23896_v35 = vand.u32 4294901760, %v19804_v15  ;;  %v19837_v7 = vpack.c.bf16 %v1769_v18, %v1762_v8 }
 0x12a   : > { %16666 = vmatpush3.bf16.msra.mxu1 %v19287_v27  ;;  %24505 = vst [vmem:[#allocation31_spill] sm:$0xff] %v19829_v6  ;;  %1572 = vmatprep.mubr.f32.mxu1 %v24498_v39  ;;  %v19839_v50 = vpack.c.bf16 %v1622_v17, %v1619_v13  ;;  %v1676_v27 = vand.u32 4294901760, %v556_v0  ;;  %v1901_v3 = vsub.f32 %v19768_v48, %v23893_v56  ;;  %v1776_v39 = vand.u32 4294901760, %v1775_v52  ;;  %v486_v56 = vld [vmem:[#allocation2 + $0x18] sm:$0xff] }
 0x12b   : > { %16668 = vmatprep.subr.bf16.mxu1 %v24464_v32  ;;  %v19844_v42 = vpack.c.bf16 %v1895_v23, %v1888_v10  ;;  %v19846_v19 = vsub.f32 %v537_v11, %v1619_v13  ;;  %v19848_v63 = vsub.f32 %v538_v55, %v1622_v17  ;;  %v1908_v32 = vsub.f32 %v19778_v38, %v23895_v28  ;;  %v557_v11 = vld [vmem:[%s19166_s21 + $0x1d0] sm:$0xff]  ;;  %v558_v55 = vld [vmem:[%s19166_s21 + $0x1d8] sm:$0xff] }
 0x12c   : > { %16646 = vmatpush3.bf16.msra.mxu0 %v19716_v5  ;;  %v1783_v8 = vand.u32 4294901760, %v1782_v26  ;;  %v1625_v18 = vand.u32 4294901760, %v539_v14  ;;  %v1628_v30 = vand.u32 4294901760, %v540_v47  ;;  %v19856_v13 = vsub.f32 %v555_v2, %v1673_v58  ;;  %v541_v26 = vld [vmem:[%s19166_s21 + $0x150] sm:$0xff] }
 0x12d   : > { %24506 = vst [vmem:[#allocation33_spill] sm:$0xff] %v19846_v19  ;;  %24507 = vst [vmem:[#allocation24_spill] sm:$0xff] %v19848_v63  ;;  %16648 = vmatprep.subr.bf16.mxu0 %v19722_v51  ;;  %v1789_v17 = vsub.f32 %v19795_v36, %v23894_v4  ;;  %v1796_v5 = vsub.f32 %v19804_v15, %v23896_v35  ;;  %v23900_v10 = vand.u32 4294901760, %v19806_v37  ;;  %v1902_v2 = vand.u32 4294901760, %v1901_v3  ;;  %v542_v4 = vld [vmem:[%s19166_s21 + $0x158] sm:$0xff]  ;;  %v24530_v15 = vld [vmem:[#allocation36_spill] sm:$0xff] }
 0x12e   : > { %16670 = vmatpush3.bf16.msra.mxu1 %v24468_v45  ;;  %24508 = vst [vmem:[#allocation25_spill] sm:$0xff] %v19856_v13  ;;  %v19868_v23 = vpack.c.bf16 %v1676_v27, %v1673_v58  ;;  %v19870_v45 = vsub.f32 %v556_v0, %v1676_v27  ;;  %v23901_v51 = vand.u32 4294901760, %v19829_v6  ;;  %v1909_v52 = vand.u32 4294901760, %v1908_v32 }
 0x12f   : > { %16672 = vmatprep.subr.bf16.mxu1 %v24469_v22  ;;  %v19877_v57 = vand.u32 4294901760, %v486_v56  ;;  %v19880_v22 = vpack.c.bf16 %v1783_v8, %v1776_v39  ;;  %v19882_v58 = vpack.c.bf16 %v1628_v30, %v1625_v18  ;;  %v1679_v0 = vand.u32 4294901760, %v557_v11 }
 0x130   : > { %24509 = vst [vmem:[#allocation18_spill] sm:$0xff] %v19870_v45  ;;  %16650 = vmatpush3.bf16.msra.mxu0 %v19730_v1  ;;  %v1682_v27 = vand.u32 4294901760, %v558_v55  ;;  %v19886_v3 = vsub.f32 %v539_v14, %v1625_v18  ;;  %v1790_v32 = vand.u32 4294901760, %v1789_v17  ;;  %v1797_v28 = vand.u32 4294901760, %v1796_v5  ;;  %v24513_v14 = vld [vmem:[#allocation30_spill] sm:$0xff] }
 0x131   : > { %24510 = vst [vmem:[#allocation29_spill] sm:$0xff] %v19877_v57  ;;  %16684 = vmatprep.subr.bf16.mxu0 %v19732_v25  ;;  %v1915_v35 = vsub.f32 %v19806_v37, %v23900_v10  ;;  %v19892_v1 = vsub.f32 %v540_v47, %v1628_v30  ;;  %v1922_v39 = vsub.f32 %v19829_v6, %v23901_v51  ;;  %v1634_v8 = vand.u32 4294901760, %v542_v4  ;;  %v559_v25 = vld [vmem:[%s19166_s21 + $0x1e0] sm:$0xff]  ;;  %v19927_v6 = vld [vmem:[%s19166_s21 + $0x168] sm:$0xff] }
 0x132   : > { %16674 = vmatpush3.bf16.msra.mxu1 %v24470_v54  ;;  %24511 = vst [vmem:[#allocation37_spill] sm:$0xff] %v19886_v3  ;;  %v1631_v54 = vand.u32 4294901760, %v541_v26  ;;  %v19899_v18 = vpack.c.bf16 %v1909_v52, %v1902_v2  ;;  %v24514_v17 = vand.u32 4294901760, %v19846_v19  ;;  %v24515_v10 = vand.u32 4294901760, %v19848_v63  ;;  %v560_v52 = vld [vmem:[%s19166_s21 + $0x1e8] sm:$0xff] }
 0x133   : > { %16676 = vmatprep.subr.bf16.mxu1 %v24471_v34  ;;  %24512 = vst [vmem:[#allocation38_spill] sm:$0xff] %v19892_v1  ;;  %1449 = vmatmul.mubr.f32.vlgmr.msra.gmra.mrb[16].mxu0 %v24513_v14  ;;  %v19908_v30 = vsub.f32 %v486_v56, %v19877_v57  ;;  %v19912_v47 = vpack.c.bf16 %v1682_v27, %v1679_v0 }
 0x134   : > { %v1803_v5 = vsub.f32 %v19846_v19, %v24514_v17  ;;  %v1810_v34 = vsub.f32 %v19848_v63, %v24515_v10  ;;  %16686 = vmatpush3.bf16.msra.mxu0 %v19739_v31  ;;  %1454 = vmatprep.mubr.f32.mxu0 %v19490_v12  ;;  %v19914_v2 = vsub.f32 %v557_v11, %v1679_v0  ;;  %v23912_v17 = vand.u32 4294901760, %v19856_v13  ;;  %v543_v19 = vld [vmem:[%s19166_s21 + $0x160] sm:$0xff] }
 0x135   : > { %24516 = vst [vmem:[#allocation30_spill] sm:$0xff] %v19908_v30  ;;  %16688 = vmatprep.subr.bf16.mxu0 %v19741_v29  ;;  %v19921_v10 = vpack.c.bf16 %v1797_v28, %v1790_v32  ;;  %v19923_v56 = vsub.f32 %v558_v55, %v1682_v27  ;;  %v1916_v31 = vand.u32 4294901760, %v1915_v35  ;;  %v1685_v63 = vand.u32 4294901760, %v559_v25 }
 0x136   : > { %24517 = vst [vmem:[#allocation39_spill] sm:$0xff] %v19914_v2  ;;  %16678 = vmatpush3.bf16.msra.mxu1 %v24474_v53  ;;  %v1923_v11 = vand.u32 4294901760, %v1922_v39  ;;  %v19930_v0 = vpack.c.bf16 %v1634_v8, %v1631_v54  ;;  %v1804_v28 = vand.u32 4294901760, %v1803_v5  ;;  %v1811_v55 = vand.u32 4294901760, %v1810_v34  ;;  %v24520_v34 = vld [vmem:[#allocation27_spill] sm:$0xff] }
 0x137   : > { %24518 = vst [vmem:[#allocation40_spill] sm:$0xff] %v19923_v56  ;;  %16680 = vmatprep.subr.bf16.mxu1 %v24475_v61  ;;  %1456 = vmatmul.mubr.f32.gmra.mrb[18].mxu0 %v19499_v44  ;;  %v1688_v27 = vand.u32 4294901760, %v560_v52  ;;  %v1929_v61 = vsub.f32 %v19856_v13, %v23912_v17  ;;  %v24519_v32 = vand.u32 4294901760, %v19870_v45  ;;  %v1637_v53 = vand.u32 4294901760, %v543_v19 }
 0x138   : > { %16690 = vmatpush3.bf16.msra.mxu0 %v19759_v41  ;;  %1461 = vmatprep.mubr.f32.mxu0 %v19501_v59  ;;  %v1640_v5 = vand.u32 4294901760, %v19927_v6  ;;  %v19947_v35 = vsub.f32 %v541_v26, %v1631_v54  ;;  %v19949_v51 = vsub.f32 %v542_v4, %v1634_v8  ;;  %v561_v41 = vld [vmem:[%s19166_s21 + $0x1f0] sm:$0xff]  ;;  %v24522_v26 = vand.u32 4294901760, %v19892_v1  ;;  %v562_v54 = vld [vmem:[%s19166_s21 + $0x1f8] sm:$0xff]  ;;  %v24523_v8 = vld [vmem:[#allocation34_spill] sm:$0xff] }
 0x139   : > { %v1936_v39 = vsub.f32 %v19870_v45, %v24519_v32  ;;  %16692 = vmatprep.subr.bf16.mxu0 %v19776_v49  ;;  %v19955_v32 = vpack.c.bf16 %v1923_v11, %v1916_v31  ;;  %v19957_v45 = vsub.f32 %v559_v25, %v1685_v63  ;;  %v19967_v17 = vpack.c.bf16 %v1811_v55, %v1804_v28  ;;  %v545_v25 = vld [vmem:[%s19166_s21 + $0x170] sm:$0xff]  ;;  %v546_v28 = vld [vmem:[%s19166_s21 + $0x178] sm:$0xff] }
 0x13a   : > { %16682 = vmatpush3.bf16.msra.mxu1 %v24520_v34  ;;  %v24521_v34 = vand.u32 4294901760, %v19886_v3  ;;  %v1824_v4 = vsub.f32 %v19892_v1, %v24522_v26  ;;  %v19969_v29 = vpack.c.bf16 %v1688_v27, %v1685_v63  ;;  %v19971_v31 = vsub.f32 %v560_v52, %v1688_v27  ;;  %v485_v55 = vld [vmem:[#allocation2 + $0x10] sm:$0xff]  ;;  %v24527_v63 = vld [vmem:[#allocation35_spill] sm:$0xff] }
 0x13b   : > { %16716 = vmatprep.subr.bf16.mxu1 %v19812_v20  ;;  %1463 = vmatmul.mubr.f32.gmra.mrb[20].mxu0 %v24523_v8  ;;  %v24525_v20 = vand.u32 4294901760, %v19908_v30  ;;  %v1937_v26 = vand.u32 4294901760, %v1936_v39  ;;  %v19979_v1 = vpack.c.bf16 %v1640_v5, %v1637_v53  ;;  %v1694_v52 = vand.u32 4294901760, %v562_v54  ;;  %v490_v39 = vld [vmem:[#allocation2 + $0x38] sm:$0xff] }
 0x13c   : > { %v1817_v49 = vsub.f32 %v19886_v3, %v24521_v34  ;;  %24524 = vst [vmem:[#allocation27_spill] sm:$0xff] %v19969_v29  ;;  %16694 = vmatpush3.bf16.msra.mxu0 %v19802_v21  ;;  %v1930_v34 = vand.u32 4294901760, %v1929_v61  ;;  %v1691_v3 = vand.u32 4294901760, %v561_v41  ;;  %1468 = vmatprep.mubr.f32.mxu0 %v24527_v63  ;;  %v24528_v27 = vand.u32 4294901760, %v19914_v2 }
 0x13d   : > { %v1699_v11 = vsub.f32 %v19908_v30, %v24525_v20  ;;  %1574 = vmatmul.mubr.f32.vlgmr.msra.gmra.mrb[16].mxu1 %v24513_v14  ;;  %24526 = vst [vmem:[#allocation34_spill] sm:$0xff] %v19979_v1  ;;  %v24529_v14 = vand.u32 4294901760, %v19923_v56  ;;  %v23939_v61 = vand.u32 4294901760, %v19947_v35  ;;  %16696 = vmatprep.subr.bf16.mxu0 %v19819_v9  ;;  %v19993_v30 = vsub.f32 %v543_v19, %v1637_v53 }
 0x13e   : > { %16718 = vmatpush3.bf16.msra.mxu1 %v19837_v7  ;;  %v1943_v20 = vsub.f32 %v19914_v2, %v24528_v27  ;;  %1579 = vmatprep.mubr.f32.mxu1 %v19490_v12  ;;  %v1818_v7 = vand.u32 4294901760, %v1817_v49  ;;  %v1825_v13 = vand.u32 4294901760, %v1824_v4  ;;  %v1643_v37 = vand.u32 4294901760, %v545_v25  ;;  %v489_v4 = vld [vmem:[#allocation2 + $0x30] sm:$0xff] }
 0x13f   : > { %v1950_v21 = vsub.f32 %v19923_v56, %v24529_v14  ;;  %1470 = vmatmul.mubr.f32.gmra.mrb[22].mxu0 %v24530_v15  ;;  %16720 = vmatprep.subr.bf16.mxu1 %v19844_v42  ;;  %v1646_v27 = vand.u32 4294901760, %v546_v28  ;;  %v1700_v14 = vand.u32 4294901760, %v1699_v11  ;;  %v19998_v56 = vand.u32 4294901760, %v485_v55 }
 0x140   : > { %16698 = vmatpush3.bf16.msra.mxu0 %v19839_v50  ;;  %v16731_v12 = vpack.c.bf16 %v1937_v26, %v1930_v34  ;;  %v20003_v19 = vsub.f32 %v19927_v6, %v1640_v5  ;;  %v20005_v49 = vsub.f32 %v561_v41, %v1691_v3  ;;  %v20007_v53 = vand.u32 4294901760, %v490_v39  ;;  %v494_v34 = vld [vmem:[#allocation2 + $0x58] sm:$0xff] }
 0x141   : > { %24531 = vst [vmem:[#allocation35_spill] sm:$0xff] %v19998_v56  ;;  %1581 = vmatmul.mubr.f32.gmra.mrb[18].mxu1 %v19499_v44  ;;  %v20011_v42 = vpack.c.bf16 %v1694_v52, %v1691_v3  ;;  %v1944_v11 = vand.u32 4294901760, %v1943_v20  ;;  %v1951_v2 = vand.u32 4294901760, %v1950_v21  ;;  %v1831_v44 = vsub.f32 %v19947_v35, %v23939_v61  ;;  %16700 = vmatprep.subr.bf16.mxu0 %v19868_v23 }
 0x142   : > { %24532 = vst [vmem:[#allocation36_spill] sm:$0xff] %v20007_v53  ;;  %16722 = vmatpush3.bf16.msra.mxu1 %v19880_v22  ;;  %1586 = vmatprep.mubr.f32.mxu1 %v19501_v59  ;;  %v16733_v41 = vpack.c.bf16 %v1825_v13, %v1818_v7  ;;  %v20018_v6 = vsub.f32 %v562_v54, %v1694_v52  ;;  %v23938_v22 = vand.u32 4294901760, %v19957_v45  ;;  %v23937_v59 = vand.u32 4294901760, %v19971_v31  ;;  %v493_v7 = vld [vmem:[#allocation2 + $0x50] sm:$0xff] }
 0x143   : > { %24533 = vst [vmem:[#allocation41_spill] sm:$0xff] %v20011_v42  ;;  %16724 = vmatprep.subr.bf16.mxu1 %v19899_v18  ;;  %v20022_v3 = vpack.c.bf16 %v1646_v27, %v1643_v37  ;;  %v24535_v21 = vand.u32 4294901760, %v19949_v51  ;;  %1701 = vmatprep.mubr.f32.mxu0 %v1700_v14  ;;  %v20028_v26 = vsub.f32 %v485_v55, %v19998_v56  ;;  %v20030_v20 = vand.u32 4294901760, %v489_v4 }
 0x144   : > { %16702 = vmatpush3.bf16.msra.mxu0 %v19882_v58  ;;  %v20034_v13 = vsub.f32 %v545_v25, %v1643_v37  ;;  %v23940_v18 = vand.u32 4294901760, %v19993_v30  ;;  %v20038_v54 = vsub.f32 %v490_v39, %v20007_v53  ;;  %v20040_v52 = vand.u32 4294901760, %v494_v34 }
 0x145   : > { %24534 = vst [vmem:[#allocation42_spill] sm:$0xff] %v20022_v3  ;;  %v1838_v5 = vsub.f32 %v19949_v51, %v24535_v21  ;;  %24536 = vst [vmem:[#allocation43_spill] sm:$0xff] %v20028_v26  ;;  %1588 = vmatmul.mubr.f32.gmra.mrb[20].mxu1 %v24523_v8  ;;  %v16735_v55 = vpack.c.bf16 %v1951_v2, %v1944_v11  ;;  %v20044_v14 = vsub.f32 %v546_v28, %v1646_v27  ;;  %v498_v28 = vld [vmem:[#allocation2 + $0x78] sm:$0xff] }
 0x146   : > { %24537 = vst [vmem:[#allocation44_spill] sm:$0xff] %v20030_v20  ;;  %24538 = vst [vmem:[#allocation45_spill] sm:$0xff] %v20040_v52  ;;  %16726 = vmatpush3.bf16.msra.mxu1 %v19921_v10  ;;  %1593 = vmatprep.mubr.f32.mxu1 %v24527_v63  ;;  %v1832_v8 = vand.u32 4294901760, %v1831_v44  ;;  %v23941_v21 = vand.u32 4294901760, %v20003_v19  ;;  %v1957_v37 = vsub.f32 %v19957_v45, %v23938_v22  ;;  %v23942_v25 = vand.u32 4294901760, %v20005_v49 }
 0x147   : > { %16704 = vmatprep.subr.bf16.mxu0 %v19912_v47  ;;  %16728 = vmatprep.subr.bf16.mxu1 %v19955_v32  ;;  %v1964_v10 = vsub.f32 %v19971_v31, %v23937_v59  ;;  %v23945_v2 = vand.u32 4294901760, %v20018_v6  ;;  %v1839_v63 = vand.u32 4294901760, %v1838_v5  ;;  %v20059_v27 = vsub.f32 %v489_v4, %v20030_v20  ;;  %v497_v4 = vld [vmem:[#allocation2 + $0x70] sm:$0xff] }
 0x148   : > { %v20061_v32 = vand.u32 4294901760, %v493_v7  ;;  %16706 = vmatpush3.bf16.msra.mxu0 %v19930_v0  ;;  %v16747_v11 = vpack.c.bf16 %v19675_v43, %v19673_v16  ;;  %v1845_v44 = vsub.f32 %v19993_v30, %v23940_v18  ;;  %v20072_v59 = vsub.f32 %v494_v34, %v20040_v52 }
 0x149   : > { %24539 = vst [vmem:[#allocation46_spill] sm:$0xff] %v20059_v27  ;;  %1595 = vmatmul.mubr.f32.gmra.mrb[22].mxu1 %v24530_v15  ;;  %16708 = vmatprep.subr.bf16.mxu0 %v19969_v29  ;;  %v1852_v15 = vsub.f32 %v20003_v19, %v23941_v21  ;;  %v20081_v39 = vand.u32 4294901760, %v498_v28  ;;  %v1958_v18 = vand.u32 4294901760, %v1957_v37  ;;  %v1965_v5 = vand.u32 4294901760, %v1964_v10 }
 0x14a   : > { %24540 = vst [vmem:[#allocation47_spill] sm:$0xff] %v20061_v32  ;;  %16730 = vmatpush3.bf16.msra.mxu1 %v19967_v17  ;;  %v1971_v34 = vsub.f32 %v20005_v49, %v23942_v25  ;;  %v1978_v17 = vsub.f32 %v20018_v6, %v23945_v2  ;;  %1982 = vmatprep.mubr.f32.mxu1 %v19877_v57  ;;  %v24542_v21 = vand.u32 4294901760, %v20028_v26  ;;  %v20097_v37 = vand.u32 4294901760, %v497_v4 }
 0x14b   : > { %24541 = vst [vmem:[#allocation48_spill] sm:$0xff] %v20081_v39  ;;  %16732 = vmatprep.subr.bf16.mxu1 %v16731_v12  ;;  %v20095_v12 = vsub.f32 %v493_v7, %v20061_v32  ;;  %v16737_v10 = vpack.c.bf16 %v1839_v63, %v1832_v8  ;;  %v1846_v25 = vand.u32 4294901760, %v1845_v44  ;;  %v24544_v29 = vand.u32 4294901760, %v20038_v54 }
 0x14c   : > { %v1705_v22 = vsub.f32 %v20028_v26, %v24542_v21  ;;  %24543 = vst [vmem:[#allocation49_spill] sm:$0xff] %v20097_v37  ;;  %16710 = vmatpush3.bf16.msra.mxu0 %v19979_v1  ;;  %v1853_v21 = vand.u32 4294901760, %v1852_v15  ;;  %v24545_v61 = vand.u32 4294901760, %v20034_v13  ;;  %v24546_v26 = vand.u32 4294901760, %v20044_v14 }
 0x14d   : > { %v1714_v2 = vsub.f32 %v20038_v54, %v24544_v29  ;;  %16712 = vmatprep.subr.bf16.mxu0 %v20011_v42  ;;  %v20112_v8 = vsub.f32 %v498_v28, %v20081_v39  ;;  %v16739_v63 = vpack.c.bf16 %v1965_v5, %v1958_v18  ;;  %v1972_v29 = vand.u32 4294901760, %v1971_v34 }
 0x14e   : > { %16734 = vmatpush3.bf16.msra.mxu1 %v16733_v41  ;;  %v1859_v7 = vsub.f32 %v20034_v13, %v24545_v61  ;;  %v1866_v1 = vsub.f32 %v20044_v14, %v24546_v26  ;;  %v1979_v44 = vand.u32 4294901760, %v1978_v17  ;;  %v1706_v57 = vand.u32 4294901760, %v1705_v22 }
 0x14f   : > { %16736 = vmatprep.subr.bf16.mxu1 %v16735_v55  ;;  %v24547_v41 = vand.u32 4294901760, %v20059_v27  ;;  %v20119_v61 = vsub.f32 %v497_v4, %v20097_v37  ;;  %v16749_v26 = vpack.c.bf16 %v19698_v46, %v19681_v24  ;;  %v1715_v28 = vand.u32 4294901760, %v1714_v2 }
 0x150   : > { %16714 = vmatpush3.bf16.msra.mxu0 %v20022_v3  ;;  %v16751_v18 = vpack.c.bf16 %v19704_v60, %v19702_v40  ;;  %v24548_v22 = vand.u32 4294901760, %v20072_v59  ;;  %v16741_v5 = vpack.c.bf16 %v1853_v21, %v1846_v25  ;;  %v1860_v34 = vand.u32 4294901760, %v1859_v7 }
 0x151   : > { %v1720_v15 = vsub.f32 %v20059_v27, %v24547_v41  ;;  %16748 = vmatprep.subr.bf16.mxu0 %v16747_v11  ;;  %v1867_v17 = vand.u32 4294901760, %v1866_v1  ;;  %v23959_v4 = vand.u32 4294901760, %v20112_v8  ;;  %v16743_v41 = vpack.c.bf16 %v1979_v44, %v1972_v29 }
 0x152   : > { %v1729_v55 = vsub.f32 %v20072_v59, %v24548_v22  ;;  %16738 = vmatpush3.bf16.msra.mxu1 %v16737_v10  ;;  %v24549_v2 = vand.u32 4294901760, %v20095_v12  ;;  %v23958_v27 = vand.u32 4294901760, %v20119_v61  ;;  %v16753_v11 = vpack.c.bf16 %v19763_v62, %v19761_v33  ;;  %v24555_v22 = vld [vmem:[#allocation24_spill] sm:$0xff] }
 0x153   : > { %16740 = vmatprep.subr.bf16.mxu1 %v16739_v63  ;;  %1707 = vmatmul.mubr.f32.vlgmr.msra.gmra.mrb[24].mxu0 %v1706_v57  ;;  %v1721_v42 = vand.u32 4294901760, %v1720_v15  ;;  %v16745_v1 = vpack.c.bf16 %v1867_v17, %v1860_v34  ;;  %v16755_v10 = vpack.c.bf16 %v19778_v38, %v19768_v48  ;;  %v1744_v57 = vsub.f32 %v20112_v8, %v23959_v4  ;;  %v24550_v63 = vld [vmem:[#allocation22_spill] sm:$0xff]  ;;  %v24557_v34 = vld [vmem:[#allocation25_spill] sm:$0xff] }
 0x154   : > { %v1735_v3 = vsub.f32 %v20095_v12, %v24549_v2  ;;  %16750 = vmatpush3.bf16.msra.mxu0 %v16749_v26  ;;  %1716 = vmatprep.mubr.f32.mxu0 %v1715_v28  ;;  %v1730_v25 = vand.u32 4294901760, %v1729_v55  ;;  %v1750_v7 = vsub.f32 %v20119_v61, %v23958_v27  ;;  %v16757_v29 = vpack.c.bf16 %v24550_v63, %v19795_v36  ;;  %v24551_v15 = vld [vmem:[#allocation26_spill] sm:$0xff]  ;;  %v24552_v26 = vld [vmem:[#allocation23_spill] sm:$0xff]  ;;  %v24559_v2 = vld [vmem:[#allocation28_spill] sm:$0xff] }
 0x155   : > { %16752 = vmatprep.subr.bf16.mxu0 %v16751_v18  ;;  %v1745_v44 = vand.u32 4294901760, %v1744_v57  ;;  %v24553_v28 = vld [vmem:[#allocation31_spill] sm:$0xff]  ;;  %v24558_v17 = vld [vmem:[#allocation18_spill] sm:$0xff]  ;;  %v24563_v57 = vld [vmem:[#allocation20_spill] sm:$0xff]  ;;  %v24569_v27 = vand.u32 4294901760, %v19673_v16  ;;  %v24573_v16 = vand.u32 4294901760, %v19702_v40 }
 0x156   : > { %16742 = vmatpush3.bf16.msra.mxu1 %v16741_v5  ;;  %v1736_v21 = vand.u32 4294901760, %v1735_v3  ;;  %v16759_v18 = vpack.c.bf16 %v24553_v28, %v24552_v26  ;;  %v24554_v3 = vld [vmem:[#allocation33_spill] sm:$0xff]  ;;  %v24556_v5 = vld [vmem:[#allocation19_spill] sm:$0xff] }
 0x157   : > { %16744 = vmatprep.subr.bf16.mxu1 %v16743_v41  ;;  %1722 = vmatmul.mubr.f32.gmra.mrb[26].mxu0 %v1721_v42  ;;  %v1751_v42 = vand.u32 4294901760, %v1750_v7  ;;  %v16761_v55 = vpack.c.bf16 %v24555_v22, %v24554_v3  ;;  %v16763_v41 = vpack.c.bf16 %v24558_v17, %v24557_v34  ;;  %v24565_v7 = vld [vmem:[#allocation40_spill] sm:$0xff] }
 0x158   : > { %16754 = vmatpush3.bf16.msra.mxu0 %v16753_v11  ;;  %1731 = vmatprep.mubr.f32.mxu0 %v1730_v25  ;;  %v24560_v11 = vld [vmem:[#allocation37_spill] sm:$0xff]  ;;  %v24561_v25 = vld [vmem:[#allocation38_spill] sm:$0xff] }
 0x159   : > { %16756 = vmatprep.subr.bf16.mxu0 %v16755_v10  ;;  %v24562_v10 = vld [vmem:[#allocation32_spill] sm:$0xff] }
 0x15a   : > { %16746 = vmatpush3.bf16.msra.mxu1 %v16745_v1  ;;  %v16765_v1 = vpack.c.bf16 %v24561_v25, %v24560_v11 }
 0x15b   : > { %16780 = vmatprep.subr.bf16.mxu1 %v24551_v15  ;;  %1737 = vmatmul.mubr.f32.gmra.mrb[28].mxu0 %v1736_v21  ;;  %v24564_v21 = vld [vmem:[#allocation39_spill] sm:$0xff] }
 0x15c   : > { %16758 = vmatpush3.bf16.msra.mxu0 %v16757_v29  ;;  %1746 = vmatprep.mubr.f32.mxu0 %v1745_v44  ;;  %v16767_v29 = vpack.c.bf16 %v24565_v7, %v24564_v21  ;;  %v24566_v44 = vld [vmem:[#allocation30_spill] sm:$0xff] }
 0x15d   : > { %1984 = vmatmul.mubr.f32.vlgmr.msra.gmra.mrb[24].mxu1 %v19998_v56  ;;  %16760 = vmatprep.subr.bf16.mxu0 %v16759_v18  ;;  %v16769_v18 = vpack.c.bf16 %v19949_v51, %v19947_v35  ;;  %v24582_v56 = vld [vmem:[#allocation41_spill] sm:$0xff] }
 0x15e   : > { %16782 = vmatpush3.bf16.msra.mxu1 %v24556_v5  ;;  %1989 = vmatprep.mubr.f32.mxu1 %v20007_v53 }
 0x15f   : > { %1752 = vmatmul.mubr.f32.gmra.mrb[30].mxu0 %v1751_v42  ;;  %16784 = vmatprep.subr.bf16.mxu1 %v24559_v2  ;;  %v24567_v42 = vld [vmem:[#allocation21_spill] sm:$0xff] }
 0x160   : > { %16762 = vmatpush3.bf16.msra.mxu0 %v16761_v55  ;;  %2140 = vmatprep.mubr.f32.mxu0 %v24566_v44  ;;  %v16771_v55 = vpack.c.bf16 %v19971_v31, %v19957_v45 }
 0x161   : > { %1991 = vmatmul.mubr.f32.gmra.mrb[26].mxu1 %v20030_v20  ;;  %16764 = vmatprep.subr.bf16.mxu0 %v16763_v41  ;;  %v16773_v41 = vpack.c.bf16 %v20003_v19, %v19993_v30 }
 0x162   : > { %16786 = vmatpush3.bf16.msra.mxu1 %v24562_v10  ;;  %1996 = vmatprep.mubr.f32.mxu1 %v20040_v52  ;;  %v24581_v52 = vand.u32 4294901760, %v19778_v38 }
 0x163   : > { %16788 = vmatprep.subr.bf16.mxu1 %v24563_v57 }
 0x164   : > { %16766 = vmatpush3.bf16.msra.mxu0 %v16765_v1  ;;  %v16775_v1 = vpack.c.bf16 %v20018_v6, %v20005_v49 }
 0x165   : > { %1998 = vmatmul.mubr.f32.gmra.mrb[28].mxu1 %v20061_v32  ;;  %16768 = vmatprep.subr.bf16.mxu0 %v16767_v29  ;;  %v24568_v29 = vand.u32 4294901760, %v24566_v44  ;;  %v24571_v44 = vand.u32 4294901760, %v19681_v24  ;;  %v2647_v24 = vld [vmem:[%s19184_s2 + $0x8] sm:$0xff]  ;;  %v2664_v32 = vld [vmem:[%s19184_s2 + $0x90] sm:$0xff] }
 0x166   : > { %16790 = vmatpush3.bf16.msra.mxu1 %v24567_v42  ;;  %2003 = vmatprep.mubr.f32.mxu1 %v20081_v39  ;;  %v2663_v39 = vld [vmem:[%s19184_s2 + $0x88] sm:$0xff]  ;;  %v2772_v38 = vand.u32 4294901760, %v2664_v32 }
 0x167   : > { %16792 = vmatprep.subr.bf16.mxu1 %v19819_v9 }
 0x168   : > { %16770 = vmatpush3.bf16.msra.mxu0 %v16769_v18  ;;  %v16777_v18 = vpack.c.bf16 %v20044_v14, %v20034_v13 }
 0x169   : > { %2005 = vmatmul.mubr.f32.gmra.mrb[30].mxu1 %v20097_v37  ;;  %16772 = vmatprep.subr.bf16.mxu0 %v16771_v55  ;;  %v24570_v55 = vand.u32 4294901760, %v19675_v43  ;;  %v2662_v37 = vld [vmem:[%s19184_s2 + $0x80] sm:$0xff]  ;;  %v24574_v43 = vand.u32 4294901760, %v19704_v60  ;;  %v2665_v60 = vld [vmem:[%s19184_s2 + $0x98] sm:$0xff] }
 0x16a   : > { %16794 = vmatpush3.bf16.msra.mxu1 %v19839_v50  ;;  %2274 = vmatprep.mubr.f32.mxu1 %v24568_v29  ;;  %v24572_v29 = vand.u32 4294901760, %v19698_v46  ;;  %v2766_v46 = vand.u32 4294901760, %v2662_v37 }
 0x16b   : > { %16796 = vmatprep.subr.bf16.mxu1 %v19868_v23  ;;  %v16811_v4 = vpack.c.bf16 %v24570_v55, %v24569_v27  ;;  %v16815_v27 = vpack.c.bf16 %v24574_v43, %v24573_v16  ;;  %v24576_v55 = vld [vmem:[#allocation43_spill] sm:$0xff]  ;;  %v24579_v16 = vld [vmem:[#allocation34_spill] sm:$0xff]  ;;  %v24580_v43 = vand.u32 4294901760, %v19768_v48 }
 0x16c   : > { %16774 = vmatpush3.bf16.msra.mxu0 %v16773_v41  ;;  %v16813_v41 = vpack.c.bf16 %v24572_v29, %v24571_v44  ;;  %v2769_v44 = vand.u32 4294901760, %v2663_v39  ;;  %v24577_v29 = vand.u32 4294901760, %v19761_v33  ;;  %v24583_v33 = vand.u32 4294901760, %v19795_v36 }
 0x16d   : > { %16776 = vmatprep.subr.bf16.mxu0 %v16775_v1  ;;  %v24575_v1 = vld [vmem:[#allocation27_spill] sm:$0xff]  ;;  %v16819_v20 = vpack.c.bf16 %v24581_v52, %v24580_v43  ;;  %v2775_v52 = vand.u32 4294901760, %v2665_v60  ;;  %v24586_v43 = vand.u32 4294901760, %v24552_v26  ;;  %v24587_v36 = vand.u32 4294901760, %v24553_v28 }
 0x16e   : > { %16798 = vmatpush3.bf16.msra.mxu1 %v19882_v58  ;;  %v20229_v48 = vsub.f32 %v2663_v39, %v2769_v44  ;;  %v24591_v39 = vand.u32 4294901760, %v24558_v17  ;;  %v24593_v26 = vand.u32 4294901760, %v24560_v11  ;;  %v24594_v28 = vand.u32 4294901760, %v24561_v25 }
 0x16f   : > { %16800 = vmatprep.subr.bf16.mxu1 %v19912_v47  ;;  %v24595_v17 = vand.u32 4294901760, %v24564_v21  ;;  %v24597_v11 = vand.u32 4294901760, %v19947_v35  ;;  %v24598_v25 = vand.u32 4294901760, %v19949_v51  ;;  %v24602_v21 = vand.u32 4294901760, %v20003_v19 }
 0x170   : > { %16778 = vmatpush3.bf16.msra.mxu0 %v16777_v18  ;;  %v20204_v18 = vld [vmem:[%s19184_s2] sm:$0xff]  ;;  %v20285_v35 = vsub.f32 %v2664_v32, %v2772_v38  ;;  %v20287_v51 = vsub.f32 %v2665_v60, %v2775_v52  ;;  %v24604_v19 = vand.u32 4294901760, %v20005_v49  ;;  %v24606_v32 = vand.u32 4294901760, %v20034_v13 }
 0x171   : > { %16812 = vmatprep.subr.bf16.mxu0 %v16811_v4  ;;  %v24578_v4 = vand.u32 4294901760, %v19763_v62  ;;  %v2718_v53 = vand.u32 4294901760, %v20204_v18  ;;  %v24584_v62 = vand.u32 4294901760, %v24550_v63  ;;  %v16823_v63 = vpack.c.bf16 %v24587_v36, %v24586_v43  ;;  %v2649_v43 = vld [vmem:[%s19184_s2 + $0x18] sm:$0xff] }
 0x172   : > { %16802 = vmatpush3.bf16.msra.mxu1 %v19930_v0  ;;  %v24607_v60 = vand.u32 4294901760, %v20044_v14  ;;  %v24609_v13 = vand.u32 4294901760, %v20038_v54 }
 0x173   : > { %16804 = vmatprep.subr.bf16.mxu1 %v24575_v1  ;;  %2143 = vmatmul.mubr.f32.vlgmr.msra.gmra.mrb[32].mxu0 %v24576_v55  ;;  %v16817_v40 = vpack.c.bf16 %v24578_v4, %v24577_v29  ;;  %v16821_v29 = vpack.c.bf16 %v24584_v62, %v24583_v33  ;;  %v24585_v4 = vld [vmem:[#allocation46_spill] sm:$0xff]  ;;  %v24588_v33 = vand.u32 4294901760, %v24554_v3  ;;  %v24589_v62 = vand.u32 4294901760, %v24555_v22 }
 0x174   : > { %16814 = vmatpush3.bf16.msra.mxu0 %v16813_v41  ;;  %2149 = vmatprep.mubr.f32.mxu0 %v20038_v54  ;;  %v2721_v41 = vand.u32 4294901760, %v2647_v24  ;;  %v24592_v1 = vld [vmem:[#allocation42_spill] sm:$0xff]  ;;  %v20252_v3 = vsub.f32 %v20204_v18, %v2718_v53  ;;  %v24599_v18 = vand.u32 4294901760, %v19957_v45 }
 0x175   : > { %16816 = vmatprep.subr.bf16.mxu0 %v16815_v27  ;;  %v20227_v27 = vsub.f32 %v2662_v37, %v2766_v46  ;;  %v24590_v37 = vand.u32 4294901760, %v24557_v34  ;;  %v2648_v34 = vld [vmem:[%s19184_s2 + $0x10] sm:$0xff] }
 0x176   : > { %16806 = vmatpush3.bf16.msra.mxu1 %v24579_v16  ;;  %v20254_v22 = vsub.f32 %v2647_v24, %v2721_v41  ;;  %v24600_v24 = vand.u32 4294901760, %v19971_v31  ;;  %v23987_v31 = vand.u32 4294901760, %v20229_v48  ;;  %v20316_v14 = vpack.c.bf16 %v2721_v41, %v2718_v53 }
 0x177   : > { %16808 = vmatprep.subr.bf16.mxu1 %v24582_v56  ;;  %2152 = vmatmul.mubr.f32.gmra.mrb[34].mxu0 %v24585_v4  ;;  %v16825_v56 = vpack.c.bf16 %v24589_v62, %v24588_v33  ;;  %v16827_v16 = vpack.c.bf16 %v24591_v39, %v24590_v37  ;;  %v20269_v33 = vpack.c.bf16 %v24598_v25, %v24597_v11  ;;  %v2667_v39 = vld [vmem:[%s19184_s2 + $0xa8] sm:$0xff]  ;;  %v23989_v45 = vand.u32 4294901760, %v20227_v27 }
 0x178   : > { %16818 = vmatpush3.bf16.msra.mxu0 %v16817_v40  ;;  %2158 = vmatprep.mubr.f32.mxu0 %v20072_v59  ;;  %v20249_v40 = vpack.c.bf16 %v24594_v28, %v24593_v26  ;;  %v20275_v62 = vpack.c.bf16 %v24600_v24, %v24599_v18  ;;  %v2650_v26 = vld [vmem:[%s19184_s2 + $0x20] sm:$0xff]  ;;  %v24605_v28 = vand.u32 4294901760, %v20018_v6  ;;  %v2724_v11 = vand.u32 4294901760, %v2648_v34  ;;  %24610 = vst [vmem:[#allocation26_spill] sm:$0xff] %v20316_v14 }
 0x179   : > { %16820 = vmatprep.subr.bf16.mxu0 %v16819_v20  ;;  %v24596_v20 = vand.u32 4294901760, %v24565_v7  ;;  %v2666_v7 = vld [vmem:[%s19184_s2 + $0xa0] sm:$0xff]  ;;  %v2727_v25 = vand.u32 4294901760, %v2649_v43  ;;  %v23983_v6 = vand.u32 4294901760, %v20252_v3  ;;  %v23982_v18 = vand.u32 4294901760, %v20254_v22 }
 0x17a   : > { %16810 = vmatpush3.bf16.msra.mxu1 %v24592_v1  ;;  %v2778_v49 = vand.u32 4294901760, %v2666_v7  ;;  %v20318_v24 = vpack.c.bf16 %v2775_v52, %v2772_v38  ;;  %v2997_v54 = vsub.f32 %v20229_v48, %v23987_v31  ;;  %v23978_v53 = vand.u32 4294901760, %v20285_v35  ;;  %v24638_v31 = vld [vmem:[#allocation34_spill] sm:$0xff] }
 0x17b   : > { %16844 = vmatprep.subr.bf16.mxu1 %v24551_v15  ;;  %v20263_v36 = vpack.c.bf16 %v24596_v20, %v24595_v17  ;;  %v24601_v15 = vand.u32 4294901760, %v19993_v30  ;;  %2161 = vmatmul.mubr.f32.gmra.mrb[36].mxu0 %v20095_v12  ;;  %v24603_v30 = vand.u32 4294901760, %v24576_v55  ;;  %v20299_v17 = vpack.c.bf16 %v24605_v28, %v24604_v19  ;;  %v24616_v28 = vld [vmem:[#allocation29_spill] sm:$0xff] }
 0x17c   : > { %16822 = vmatpush3.bf16.msra.mxu0 %v16821_v29  ;;  %v20305_v20 = vpack.c.bf16 %v24607_v60, %v24606_v32  ;;  %2167 = vmatprep.mubr.f32.mxu0 %v20112_v8  ;;  %v20309_v55 = vpack.c.bf16 %v2769_v44, %v2766_v46  ;;  %v2651_v29 = vld [vmem:[%s19184_s2 + $0x28] sm:$0xff]  ;;  %24611 = vst [vmem:[#allocation23_spill] sm:$0xff] %v20318_v24  ;;  %v23974_v44 = vand.u32 4294901760, %v20287_v51  ;;  %v24612_v41 = vand.u32 4294901760, %v24585_v4 }
 0x17d   : > { %v20281_v37 = vpack.c.bf16 %v24602_v21, %v24601_v15  ;;  %2278 = vmatmul.mubr.f32.vlgmr.msra.gmra.mrb[32].mxu1 %v24603_v30  ;;  %16824 = vmatprep.subr.bf16.mxu0 %v16823_v63  ;;  %v2781_v15 = vand.u32 4294901760, %v2667_v39  ;;  %v2668_v21 = vld [vmem:[%s19184_s2 + $0xb0] sm:$0xff]  ;;  %v2990_v46 = vsub.f32 %v20227_v27, %v23989_v45  ;;  %v20333_v38 = vpack.c.bf16 %v2727_v25, %v2724_v11 }
 0x17e   : > { %16846 = vmatpush3.bf16.msra.mxu1 %v24556_v5  ;;  %24608 = vst [vmem:[#allocation22_spill] sm:$0xff] %v20309_v55  ;;  %2285 = vmatprep.mubr.f32.mxu1 %v24609_v13  ;;  %v2730_v5 = vand.u32 4294901760, %v2650_v26  ;;  %v20337_v52 = vsub.f32 %v2649_v43, %v2727_v25  ;;  %v2733_v63 = vand.u32 4294901760, %v2651_v29  ;;  %v24614_v30 = vand.u32 4294901760, %v20072_v59  ;;  %v2653_v25 = vld [vmem:[%s19184_s2 + $0x38] sm:$0xff] }
 0x17f   : > { %2170 = vmatmul.mubr.f32.gmra.mrb[38].mxu0 %v20119_v61  ;;  %16848 = vmatprep.subr.bf16.mxu1 %v24559_v2  ;;  %24613 = vst [vmem:[#allocation31_spill] sm:$0xff] %v20333_v38  ;;  %v20335_v2 = vsub.f32 %v2648_v34, %v2724_v11  ;;  %v20342_v19 = vsub.f32 %v2666_v7, %v2778_v49  ;;  %v2669_v34 = vld [vmem:[%s19184_s2 + $0xb8] sm:$0xff]  ;;  %v2784_v43 = vand.u32 4294901760, %v2668_v21  ;;  %v2991_v32 = vand.u32 4294901760, %v2990_v46  ;;  %v2670_v46 = vld [vmem:[%s19184_s2 + $0xc0] sm:$0xff] }
 0x180   : > { %16826 = vmatpush3.bf16.msra.mxu0 %v16825_v56  ;;  %v2878_v56 = vsub.f32 %v20252_v3, %v23983_v6  ;;  %v2885_v4 = vsub.f32 %v20254_v22, %v23982_v18  ;;  %v20354_v59 = vsub.f32 %v2667_v39, %v2781_v15  ;;  %v20356_v7 = vsub.f32 %v2650_v26, %v2730_v5  ;;  %v24633_v6 = vld [vmem:[#allocation35_spill] sm:$0xff] }
 0x181   : > { %2289 = vmatmul.mubr.f32.gmra.mrb[34].mxu1 %v24612_v41  ;;  %16828 = vmatprep.subr.bf16.mxu0 %v16827_v16  ;;  %v2998_v60 = vand.u32 4294901760, %v2997_v54  ;;  %v3004_v11 = vsub.f32 %v20285_v35, %v23978_v53  ;;  %v3011_v16 = vsub.f32 %v20287_v51, %v23974_v44  ;;  %v20370_v39 = vpack.c.bf16 %v2733_v63, %v2730_v5  ;;  %v2631_v53 = vld [vmem:[#allocation5 + $0x8] sm:$0xff] }
 0x182   : > { %16850 = vmatpush3.bf16.msra.mxu1 %v24562_v10  ;;  %2296 = vmatprep.mubr.f32.mxu1 %v24614_v30  ;;  %v20352_v10 = vpack.c.bf16 %v2781_v15, %v2778_v49  ;;  %v24617_v49 = vand.u32 4294901760, %v20095_v12  ;;  %v2787_v26 = vand.u32 4294901760, %v2669_v34  ;;  %v23976_v13 = vand.u32 4294901760, %v20335_v2 }
 0x183   : > { %16852 = vmatprep.subr.bf16.mxu1 %v24563_v57  ;;  %2477 = vmatprep.mubr.f32.mxu0 %v24616_v28  ;;  %v2652_v57 = vld [vmem:[%s19184_s2 + $0x30] sm:$0xff]  ;;  %24618 = vst [vmem:[#allocation24_spill] sm:$0xff] %v20370_v39  ;;  %v23975_v15 = vand.u32 4294901760, %v20337_v52  ;;  %v24619_v54 = vand.u32 4294901760, %v20112_v8  ;;  %v20378_v41 = vsub.f32 %v2651_v29, %v2733_v63  ;;  %v2879_v12 = vand.u32 4294901760, %v2878_v56  ;;  %v2671_v56 = vld [vmem:[%s19184_s2 + $0xc8] sm:$0xff] }
 0x184   : > { %24615 = vst [vmem:[#allocation33_spill] sm:$0xff] %v20352_v10  ;;  %16830 = vmatpush3.bf16.msra.mxu0 %v20249_v40  ;;  %v2886_v30 = vand.u32 4294901760, %v2885_v4  ;;  %v2736_v40 = vand.u32 4294901760, %v2652_v57  ;;  %v2739_v5 = vand.u32 4294901760, %v2653_v25  ;;  %v23977_v44 = vand.u32 4294901760, %v20342_v19 }
 0x185   : > { %2300 = vmatmul.mubr.f32.gmra.mrb[36].mxu1 %v24617_v49  ;;  %v20380_v49 = vsub.f32 %v2668_v21, %v2784_v43  ;;  %16832 = vmatprep.subr.bf16.mxu0 %v20263_v36  ;;  %v20386_v8 = vpack.c.bf16 %v2998_v60, %v2991_v32  ;;  %v3005_v29 = vand.u32 4294901760, %v3004_v11  ;;  %v3012_v63 = vand.u32 4294901760, %v3011_v16  ;;  %v2654_v11 = vld [vmem:[%s19184_s2 + $0x40] sm:$0xff] }
 0x186   : > { %16854 = vmatpush3.bf16.msra.mxu1 %v24567_v42  ;;  %2307 = vmatprep.mubr.f32.mxu1 %v24619_v54  ;;  %v23981_v42 = vand.u32 4294901760, %v20354_v59  ;;  %v2790_v4 = vand.u32 4294901760, %v2670_v46  ;;  %v24620_v21 = vand.u32 4294901760, %v20119_v61  ;;  %v2892_v36 = vsub.f32 %v20335_v2, %v23976_v13 }
 0x187   : > { %16856 = vmatprep.subr.bf16.mxu1 %v19819_v9  ;;  %v20392_v9 = vpack.c.bf16 %v2787_v26, %v2784_v43  ;;  %v2899_v32 = vsub.f32 %v20337_v52, %v23975_v15  ;;  %v20402_v60 = vpack.c.bf16 %v2886_v30, %v2879_v12  ;;  %v20404_v61 = vsub.f32 %v2669_v34, %v2787_v26 }
 0x188   : > { %16834 = vmatpush3.bf16.msra.mxu0 %v20269_v33  ;;  %v2655_v33 = vld [vmem:[%s19184_s2 + $0x48] sm:$0xff]  ;;  %v23979_v43 = vand.u32 4294901760, %v20356_v7  ;;  %v23980_v16 = vand.u32 4294901760, %v20378_v41  ;;  %v20412_v54 = vpack.c.bf16 %v2739_v5, %v2736_v40  ;;  %v3025_v34 = vsub.f32 %v20354_v59, %v23981_v42 }
 0x189   : > { %2311 = vmatmul.mubr.f32.gmra.mrb[38].mxu1 %v24620_v21  ;;  %24621 = vst [vmem:[#allocation19_spill] sm:$0xff] %v20392_v9  ;;  %16836 = vmatprep.subr.bf16.mxu0 %v20275_v62  ;;  %24622 = vst [vmem:[#allocation25_spill] sm:$0xff] %v20404_v61  ;;  %v3018_v62 = vsub.f32 %v20342_v19, %v23977_v44  ;;  %v20420_v26 = vpack.c.bf16 %v3012_v63, %v3005_v29  ;;  %v2900_v21 = vand.u32 4294901760, %v2899_v32  ;;  %v2672_v44 = vld [vmem:[%s19184_s2 + $0xd0] sm:$0xff]  ;;  %v2657_v32 = vld [vmem:[%s19184_s2 + $0x58] sm:$0xff] }
 0x18a   : > { %16858 = vmatpush3.bf16.msra.mxu1 %v19839_v50  ;;  %2602 = vmatprep.mubr.f32.mxu1 %v24616_v28  ;;  %24623 = vst [vmem:[#allocation18_spill] sm:$0xff] %v20412_v54  ;;  %v2793_v50 = vand.u32 4294901760, %v2671_v56  ;;  %v20422_v12 = vsub.f32 %v2652_v57, %v2736_v40  ;;  %v20424_v30 = vsub.f32 %v2653_v25, %v2739_v5  ;;  %v2893_v28 = vand.u32 4294901760, %v2892_v36  ;;  %v2673_v25 = vld [vmem:[%s19184_s2 + $0xd8] sm:$0xff]  ;;  %v2656_v36 = vld [vmem:[%s19184_s2 + $0x50] sm:$0xff] }
 0x18b   : > { %16860 = vmatprep.subr.bf16.mxu1 %v19868_v23  ;;  %v20426_v23 = vsub.f32 %v2670_v46, %v2790_v4  ;;  %v2742_v15 = vand.u32 4294901760, %v2654_v11  ;;  %v2745_v13 = vand.u32 4294901760, %v2655_v33  ;;  %v2906_v57 = vsub.f32 %v20356_v7, %v23979_v43 }
 0x18c   : > { %24624 = vst [vmem:[#allocation28_spill] sm:$0xff] %v20422_v12  ;;  %24625 = vst [vmem:[#allocation37_spill] sm:$0xff] %v20424_v30  ;;  %16838 = vmatpush3.bf16.msra.mxu0 %v20281_v37  ;;  %v2913_v37 = vsub.f32 %v20378_v41, %v23980_v16  ;;  %v23986_v46 = vand.u32 4294901760, %v20380_v49  ;;  %v23984_v40 = vand.u32 4294901760, %v20404_v61  ;;  %v20442_v5 = vpack.c.bf16 %v2793_v50, %v2790_v4 }
 0x18d   : > { %24626 = vst [vmem:[#allocation38_spill] sm:$0xff] %v20426_v23  ;;  %16840 = vmatprep.subr.bf16.mxu0 %v20299_v17  ;;  %v3019_v17 = vand.u32 4294901760, %v3018_v62  ;;  %v3026_v29 = vand.u32 4294901760, %v3025_v34  ;;  %v2796_v63 = vand.u32 4294901760, %v2672_v44  ;;  %v23985_v43 = vand.u32 4294901760, %v20422_v12 }
 0x18e   : > { %16862 = vmatpush3.bf16.msra.mxu1 %v19882_v58  ;;  %24627 = vst [vmem:[#allocation32_spill] sm:$0xff] %v20442_v5  ;;  %v20444_v58 = vsub.f32 %v2671_v56, %v2793_v50  ;;  %v23988_v16 = vand.u32 4294901760, %v20424_v30  ;;  %v20450_v42 = vand.u32 4294901760, %v2631_v53  ;;  %v20453_v18 = vpack.c.bf16 %v2900_v21, %v2893_v28  ;;  %v24631_v28 = vld [vmem:[#allocation27_spill] sm:$0xff] }
 0x18f   : > { %16864 = vmatprep.subr.bf16.mxu1 %v19912_v47  ;;  %v20455_v47 = vpack.c.bf16 %v2745_v13, %v2742_v15  ;;  %v20457_v4 = vsub.f32 %v2654_v11, %v2742_v15  ;;  %v2799_v56 = vand.u32 4294901760, %v2673_v25  ;;  %v2907_v50 = vand.u32 4294901760, %v2906_v57 }
 0x190   : > { %24628 = vst [vmem:[#allocation20_spill] sm:$0xff] %v20444_v58  ;;  %24629 = vst [vmem:[#allocation39_spill] sm:$0xff] %v20450_v42  ;;  %16842 = vmatpush3.bf16.msra.mxu0 %v20305_v20  ;;  %v2914_v62 = vand.u32 4294901760, %v2913_v37  ;;  %v3032_v34 = vsub.f32 %v20380_v49, %v23986_v46  ;;  %v3039_v20 = vsub.f32 %v20404_v61, %v23984_v40  ;;  %v2751_v21 = vand.u32 4294901760, %v2657_v32 }
 0x191   : > { %24630 = vst [vmem:[#allocation40_spill] sm:$0xff] %v20457_v4  ;;  %16876 = vmatprep.subr.bf16.mxu0 %v20309_v55  ;;  %v20468_v15 = vpack.c.bf16 %v3026_v29, %v3019_v17  ;;  %v20470_v11 = vsub.f32 %v2655_v33, %v2745_v13  ;;  %v20473_v57 = vsub.f32 %v2672_v44, %v2796_v63  ;;  %v2674_v17 = vld [vmem:[%s19184_s2 + $0xe0] sm:$0xff]  ;;  %v24635_v33 = vld [vmem:[#allocation36_spill] sm:$0xff] }
 0x192   : > { %16866 = vmatpush3.bf16.msra.mxu1 %v19930_v0  ;;  %v2748_v0 = vand.u32 4294901760, %v2656_v36  ;;  %v2920_v37 = vsub.f32 %v20422_v12, %v23985_v43  ;;  %v2927_v40 = vsub.f32 %v20424_v30, %v23988_v16  ;;  %v20483_v13 = vsub.f32 %v2631_v53, %v20450_v42  ;;  %v2659_v30 = vld [vmem:[%s19184_s2 + $0x68] sm:$0xff]  ;;  %v24639_v12 = vld [vmem:[#allocation41_spill] sm:$0xff] }
 0x193   : > { %16868 = vmatprep.subr.bf16.mxu1 %v24631_v28  ;;  %24632 = vst [vmem:[#allocation30_spill] sm:$0xff] %v20470_v11  ;;  %2479 = vmatmul.mubr.f32.vlgmr.msra.gmra.mrb[40].mxu0 %v24633_v6  ;;  %v20487_v44 = vpack.c.bf16 %v2799_v56, %v2796_v63  ;;  %v20489_v29 = vsub.f32 %v2673_v25, %v2799_v56  ;;  %v2675_v28 = vld [vmem:[%s19184_s2 + $0xe8] sm:$0xff]  ;;  %v3033_v53 = vand.u32 4294901760, %v3032_v34  ;;  %v3040_v45 = vand.u32 4294901760, %v3039_v20  ;;  %v24642_v63 = vld [vmem:[#allocation45_spill] sm:$0xff] }
 0x194   : > { %24634 = vst [vmem:[#allocation21_spill] sm:$0xff] %v20483_v13  ;;  %16878 = vmatpush3.bf16.msra.mxu0 %v20316_v14  ;;  %2484 = vmatprep.mubr.f32.mxu0 %v24635_v33  ;;  %v20496_v16 = vpack.c.bf16 %v2914_v62, %v2907_v50  ;;  %v2658_v14 = vld [vmem:[%s19184_s2 + $0x60] sm:$0xff]  ;;  %v20502_v25 = vpack.c.bf16 %v2751_v21, %v2748_v0  ;;  %v2802_v43 = vand.u32 4294901760, %v2674_v17  ;;  %v2921_v50 = vand.u32 4294901760, %v2920_v37 }
 0x195   : > { %24636 = vst [vmem:[#allocation43_spill] sm:$0xff] %v20487_v44  ;;  %24637 = vst [vmem:[#allocation46_spill] sm:$0xff] %v20489_v29  ;;  %16880 = vmatprep.subr.bf16.mxu0 %v20318_v24  ;;  %v20504_v56 = vsub.f32 %v2656_v36, %v2748_v0  ;;  %v2928_v62 = vand.u32 4294901760, %v2927_v40  ;;  %v2805_v34 = vand.u32 4294901760, %v2675_v28  ;;  %v24644_v0 = vand.u32 4294901760, %v20444_v58 }
 0x196   : > { %16870 = vmatpush3.bf16.msra.mxu1 %v24638_v31  ;;  %24640 = vst [vmem:[#allocation42_spill] sm:$0xff] %v20502_v25  ;;  %v24641_v31 = vld [vmem:[#allocation44_spill] sm:$0xff]  ;;  %v2754_v24 = vand.u32 4294901760, %v2658_v14  ;;  %v2757_v55 = vand.u32 4294901760, %v2659_v30  ;;  %v20519_v40 = vpack.c.bf16 %v3040_v45, %v3033_v53  ;;  %v20521_v37 = vsub.f32 %v2657_v32, %v2751_v21  ;;  %v24647_v21 = vld [vmem:[#allocation47_spill] sm:$0xff] }
 0x197   : > { %16872 = vmatprep.subr.bf16.mxu1 %v24639_v12  ;;  %2486 = vmatmul.mubr.f32.gmra.mrb[42].mxu0 %v24641_v31  ;;  %v24643_v12 = vand.u32 4294901760, %v20426_v23  ;;  %v3053_v46 = vsub.f32 %v20444_v58, %v24644_v0  ;;  %v24645_v20 = vand.u32 4294901760, %v20457_v4  ;;  %v24646_v0 = vand.u32 4294901760, %v20470_v11  ;;  %v2677_v58 = vld [vmem:[%s19184_s2 + $0xf8] sm:$0xff] }
 0x198   : > { %16882 = vmatpush3.bf16.msra.mxu0 %v20333_v38  ;;  %2491 = vmatprep.mubr.f32.mxu0 %v24642_v63  ;;  %v20537_v53 = vpack.c.bf16 %v2928_v62, %v2921_v50  ;;  %v20549_v32 = vpack.c.bf16 %v2757_v55, %v2754_v24  ;;  %v2661_v50 = vld [vmem:[%s19184_s2 + $0x78] sm:$0xff]  ;;  %v2630_v62 = vld [vmem:[#allocation5] sm:$0xff] }
 0x199   : > { %v3046_v36 = vsub.f32 %v20426_v23, %v24643_v12  ;;  %16884 = vmatprep.subr.bf16.mxu0 %v20352_v10  ;;  %v2934_v38 = vsub.f32 %v20457_v4, %v24645_v20  ;;  %v2676_v12 = vld [vmem:[%s19184_s2 + $0xf0] sm:$0xff]  ;;  %v20528_v23 = vsub.f32 %v2674_v17, %v2802_v43  ;;  %v20539_v20 = vpack.c.bf16 %v2805_v34, %v2802_v43 }
 0x19a   : > { %16874 = vmatpush3.bf16.msra.mxu1 %v24592_v1  ;;  %v2941_v1 = vsub.f32 %v20470_v11, %v24646_v0  ;;  %v20541_v10 = vsub.f32 %v2675_v28, %v2805_v34  ;;  %v24649_v17 = vand.u32 4294901760, %v20483_v13  ;;  %v3054_v45 = vand.u32 4294901760, %v3053_v46  ;;  %24650 = vst [vmem:[#allocation27_spill] sm:$0xff] %v20549_v32  ;;  %v24651_v43 = vld [vmem:[#allocation48_spill] sm:$0xff] }
 0x19b   : > { %16908 = vmatprep.subr.bf16.mxu1 %v20386_v8  ;;  %2493 = vmatmul.mubr.f32.gmra.mrb[44].mxu0 %v24647_v21  ;;  %24648 = vst [vmem:[#allocation29_spill] sm:$0xff] %v20539_v20  ;;  %v2660_v8 = vld [vmem:[%s19184_s2 + $0x70] sm:$0xff]  ;;  %v3047_v0 = vand.u32 4294901760, %v3046_v36  ;;  %v2808_v11 = vand.u32 4294901760, %v2676_v12  ;;  %v20554_v28 = vsub.f32 %v2658_v14, %v2754_v24  ;;  %v20556_v34 = vsub.f32 %v2659_v30, %v2757_v55  ;;  %v24654_v24 = vld [vmem:[#allocation49_spill] sm:$0xff] }
 0x19c   : > { %v2816_v4 = vsub.f32 %v20483_v13, %v24649_v17  ;;  %16886 = vmatpush3.bf16.msra.mxu0 %v20370_v39  ;;  %2498 = vmatprep.mubr.f32.mxu0 %v24651_v43  ;;  %v2935_v17 = vand.u32 4294901760, %v2934_v38  ;;  %v2811_v13 = vand.u32 4294901760, %v2677_v58  ;;  %v2942_v46 = vand.u32 4294901760, %v2941_v1 }
 0x19d   : > { %2604 = vmatmul.mubr.f32.vlgmr.msra.gmra.mrb[40].mxu1 %v24633_v6  ;;  %v2635_v6 = vld [vmem:[#allocation5 + $0x28] sm:$0xff]  ;;  %16888 = vmatprep.subr.bf16.mxu0 %v20392_v9  ;;  %v24652_v36 = vand.u32 4294901760, %v20473_v57  ;;  %v2760_v14 = vand.u32 4294901760, %v2660_v8  ;;  %v2763_v55 = vand.u32 4294901760, %v2661_v50  ;;  %v16923_v1 = vpack.c.bf16 %v3054_v45, %v3047_v0 }
 0x19e   : > { %16910 = vmatpush3.bf16.msra.mxu1 %v20402_v60  ;;  %2609 = vmatprep.mubr.f32.mxu1 %v24635_v33  ;;  %v24653_v60 = vand.u32 4294901760, %v20489_v29  ;;  %v2817_v30 = vand.u32 4294901760, %v2816_v4  ;;  %v20569_v33 = vand.u32 4294901760, %v2630_v62  ;;  %v20575_v9 = vand.u32 4294901760, %v2635_v6 }
 0x19f   : > { %v3060_v39 = vsub.f32 %v20473_v57, %v24652_v36  ;;  %2500 = vmatmul.mubr.f32.gmra.mrb[46].mxu0 %v24654_v24  ;;  %16912 = vmatprep.subr.bf16.mxu1 %v20420_v26  ;;  %v20579_v26 = vpack.c.bf16 %v2811_v13, %v2808_v11  ;;  %v20581_v4 = vsub.f32 %v2676_v12, %v2808_v11  ;;  %v24024_v36 = vand.u32 4294901760, %v20541_v10 }
 0x1a0   : > { %v3067_v61 = vsub.f32 %v20489_v29, %v24653_v60  ;;  %24655 = vst [vmem:[#allocation35_spill] sm:$0xff] %v20569_v33  ;;  %16890 = vmatpush3.bf16.msra.mxu0 %v20412_v54  ;;  %24656 = vst [vmem:[#allocation36_spill] sm:$0xff] %v20575_v9  ;;  %v2634_v29 = vld [vmem:[#allocation5 + $0x20] sm:$0xff]  ;;  %v20583_v38 = vsub.f32 %v2677_v58, %v2811_v13  ;;  %v16925_v45 = vpack.c.bf16 %v2942_v46, %v2935_v17 }
 0x1a1   : > { %2611 = vmatmul.mubr.f32.gmra.mrb[42].mxu1 %v24641_v31  ;;  %v2639_v31 = vld [vmem:[#allocation5 + $0x48] sm:$0xff]  ;;  %16892 = vmatprep.subr.bf16.mxu0 %v20442_v5  ;;  %v3061_v0 = vand.u32 4294901760, %v3060_v39  ;;  %v20588_v54 = vpack.c.bf16 %v2763_v55, %v2760_v14  ;;  %v20594_v58 = vsub.f32 %v2630_v62, %v20569_v33  ;;  %v20596_v11 = vand.u32 4294901760, %v2634_v29  ;;  %v2638_v62 = vld [vmem:[#allocation5 + $0x40] sm:$0xff] }
 0x1a2   : > { %16914 = vmatpush3.bf16.msra.mxu1 %v20453_v18  ;;  %2616 = vmatprep.mubr.f32.mxu1 %v24642_v63  ;;  %v3068_v60 = vand.u32 4294901760, %v3067_v61  ;;  %v24658_v18 = vand.u32 4294901760, %v20504_v56  ;;  %v24661_v39 = vand.u32 4294901760, %v20521_v37  ;;  %v20607_v12 = vsub.f32 %v2635_v6, %v20575_v9 }
 0x1a3   : > { %16916 = vmatprep.subr.bf16.mxu1 %v20468_v15  ;;  %24657 = vst [vmem:[#allocation34_spill] sm:$0xff] %v20588_v54  ;;  %2818 = vmatprep.mubr.f32.mxu0 %v2817_v30  ;;  %24659 = vst [vmem:[#allocation41_spill] sm:$0xff] %v20594_v58  ;;  %v24662_v15 = vand.u32 4294901760, %v20528_v23  ;;  %v20609_v17 = vand.u32 4294901760, %v2639_v31  ;;  %v20615_v46 = vsub.f32 %v2661_v50, %v2763_v55  ;;  %v24025_v30 = vand.u32 4294901760, %v20554_v28 }
 0x1a4   : > { %v2948_v63 = vsub.f32 %v20504_v56, %v24658_v18  ;;  %24660 = vst [vmem:[#allocation44_spill] sm:$0xff] %v20596_v11  ;;  %16894 = vmatpush3.bf16.msra.mxu0 %v20455_v47  ;;  %v2955_v61 = vsub.f32 %v20521_v37, %v24661_v39  ;;  %v24026_v18 = vand.u32 4294901760, %v20556_v34  ;;  %v16927_v6 = vpack.c.bf16 %v3068_v60, %v3061_v0 }
 0x1a5   : > { %2618 = vmatmul.mubr.f32.gmra.mrb[44].mxu1 %v24647_v21  ;;  %v3074_v13 = vsub.f32 %v20528_v23, %v24662_v15  ;;  %24663 = vst [vmem:[#allocation45_spill] sm:$0xff] %v20609_v17  ;;  %v20613_v21 = vsub.f32 %v2660_v8, %v2760_v14  ;;  %16896 = vmatprep.subr.bf16.mxu0 %v20487_v44  ;;  %v24028_v8 = vand.u32 4294901760, %v20583_v38  ;;  %v24033_v50 = vand.u32 4294901760, %v20594_v58  ;;  %v2643_v15 = vld [vmem:[#allocation5 + $0x68] sm:$0xff] }
 0x1a6   : > { %16918 = vmatpush3.bf16.msra.mxu1 %v20496_v16  ;;  %2623 = vmatprep.mubr.f32.mxu1 %v24651_v43  ;;  %v3081_v39 = vsub.f32 %v20541_v10, %v24024_v36  ;;  %v24027_v16 = vand.u32 4294901760, %v20581_v4  ;;  %v2949_v43 = vand.u32 4294901760, %v2948_v63  ;;  %v20628_v14 = vsub.f32 %v2634_v29, %v20596_v11  ;;  %v2642_v63 = vld [vmem:[#allocation5 + $0x60] sm:$0xff] }
 0x1a7   : > { %16920 = vmatprep.subr.bf16.mxu1 %v20519_v40  ;;  %v20630_v55 = vand.u32 4294901760, %v2638_v62  ;;  %v2956_v40 = vand.u32 4294901760, %v2955_v61  ;;  %v3075_v60 = vand.u32 4294901760, %v3074_v13  ;;  %v20636_v36 = vsub.f32 %v2639_v31, %v20609_v17 }
 0x1a8   : > { %16898 = vmatpush3.bf16.msra.mxu0 %v20502_v25  ;;  %v2962_v29 = vsub.f32 %v20554_v28, %v24025_v30  ;;  %v3082_v31 = vand.u32 4294901760, %v3081_v39  ;;  %v3095_v0 = vsub.f32 %v20583_v38, %v24028_v8  ;;  %v20655_v30 = vand.u32 4294901760, %v2643_v15 }
 0x1a9   : > { %24664 = vst [vmem:[#allocation47_spill] sm:$0xff] %v20630_v55  ;;  %2625 = vmatmul.mubr.f32.gmra.mrb[46].mxu1 %v24654_v24  ;;  %16900 = vmatprep.subr.bf16.mxu0 %v20539_v20  ;;  %v2969_v24 = vsub.f32 %v20556_v34, %v24026_v18  ;;  %v2822_v18 = vsub.f32 %v20594_v58, %v24033_v50  ;;  %v20664_v39 = vand.u32 4294901760, %v2642_v63  ;;  %v24667_v61 = vand.u32 4294901760, %v20607_v12 }
 0x1aa   : > { %16922 = vmatpush3.bf16.msra.mxu1 %v20537_v53  ;;  %v3088_v53 = vsub.f32 %v20581_v4, %v24027_v16  ;;  %3099 = vmatprep.mubr.f32.mxu1 %v20450_v42  ;;  %24665 = vst [vmem:[#allocation48_spill] sm:$0xff] %v20655_v30  ;;  %v16929_v16 = vpack.c.bf16 %v2956_v40, %v2949_v43  ;;  %v2963_v50 = vand.u32 4294901760, %v2962_v29  ;;  %v24668_v13 = vand.u32 4294901760, %v20613_v21 }
 0x1ab   : > { %16924 = vmatprep.subr.bf16.mxu1 %v16923_v1  ;;  %v20662_v1 = vsub.f32 %v2638_v62, %v20630_v55  ;;  %24666 = vst [vmem:[#allocation49_spill] sm:$0xff] %v20664_v39  ;;  %v16939_v8 = vpack.c.bf16 %v20229_v48, %v20227_v27  ;;  %v2831_v42 = vsub.f32 %v20607_v12, %v24667_v61  ;;  %v2970_v62 = vand.u32 4294901760, %v2969_v24 }
 0x1ac   : > { %16902 = vmatpush3.bf16.msra.mxu0 %v20549_v32  ;;  %v2976_v58 = vsub.f32 %v20613_v21, %v24668_v13  ;;  %v24669_v43 = vand.u32 4294901760, %v20615_v46  ;;  %v16931_v32 = vpack.c.bf16 %v3082_v31, %v3075_v60  ;;  %v3089_v25 = vand.u32 4294901760, %v3088_v53 }
 0x1ad   : > { %16904 = vmatprep.subr.bf16.mxu0 %v20579_v26  ;;  %v3096_v44 = vand.u32 4294901760, %v3095_v0  ;;  %v20681_v61 = vsub.f32 %v2643_v15, %v20655_v30  ;;  %v24670_v20 = vand.u32 4294901760, %v20628_v14  ;;  %v20688_v13 = vsub.f32 %v2642_v63, %v20664_v39 }
 0x1ae   : > { %16926 = vmatpush3.bf16.msra.mxu1 %v16925_v45  ;;  %v2983_v40 = vsub.f32 %v20615_v46, %v24669_v43  ;;  %v2823_v45 = vand.u32 4294901760, %v2822_v18  ;;  %v2832_v60 = vand.u32 4294901760, %v2831_v42  ;;  %v24671_v0 = vand.u32 4294901760, %v20636_v36 }
 0x1af   : > { %16928 = vmatprep.subr.bf16.mxu1 %v16927_v6  ;;  %v2837_v29 = vsub.f32 %v20628_v14, %v24670_v20  ;;  %v16941_v6 = vpack.c.bf16 %v20254_v22, %v20252_v3  ;;  %v16933_v18 = vpack.c.bf16 %v2970_v62, %v2963_v50  ;;  %v16943_v20 = vpack.c.bf16 %v20287_v51, %v20285_v35 }
 0x1b0   : > { %16906 = vmatpush3.bf16.msra.mxu0 %v20588_v54  ;;  %v2846_v15 = vsub.f32 %v20636_v36, %v24671_v0  ;;  %v2977_v31 = vand.u32 4294901760, %v2976_v58  ;;  %v2984_v53 = vand.u32 4294901760, %v2983_v40  ;;  %v16935_v63 = vpack.c.bf16 %v3096_v44, %v3089_v25  ;;  %v24673_v40 = vld [vmem:[#allocation25_spill] sm:$0xff] }
 0x1b1   : > { %16940 = vmatprep.subr.bf16.mxu0 %v16939_v8  ;;  %v24045_v43 = vand.u32 4294901760, %v20681_v61  ;;  %v2838_v24 = vand.u32 4294901760, %v2837_v29  ;;  %v24672_v42 = vand.u32 4294901760, %v20662_v1  ;;  %v24044_v0 = vand.u32 4294901760, %v20688_v13  ;;  %v24674_v29 = vld [vmem:[#allocation22_spill] sm:$0xff] }
 0x1b2   : > { %16930 = vmatpush3.bf16.msra.mxu1 %v16929_v16  ;;  %v16945_v16 = vpack.c.bf16 %v20337_v52, %v20335_v2  ;;  %v2847_v8 = vand.u32 4294901760, %v2846_v15  ;;  %v16947_v44 = vpack.c.bf16 %v20354_v59, %v20342_v19  ;;  %v16949_v62 = vpack.c.bf16 %v20378_v41, %v20356_v7 }
 0x1b3   : > { %16932 = vmatprep.subr.bf16.mxu1 %v16931_v32  ;;  %2824 = vmatmul.mubr.f32.vlgmr.msra.gmra.mrb[48].mxu0 %v2823_v45  ;;  %v2852_v54 = vsub.f32 %v20662_v1, %v24672_v42  ;;  %v16937_v32 = vpack.c.bf16 %v2984_v53, %v2977_v31  ;;  %v2861_v25 = vsub.f32 %v20681_v61, %v24045_v43  ;;  %v24679_v31 = vld [vmem:[#allocation20_spill] sm:$0xff]  ;;  %v24689_v43 = vld [vmem:[#allocation18_spill] sm:$0xff] }
 0x1b4   : > { %16942 = vmatpush3.bf16.msra.mxu0 %v16941_v6  ;;  %2833 = vmatprep.mubr.f32.mxu0 %v2832_v60  ;;  %v2867_v50 = vsub.f32 %v20688_v13, %v24044_v0  ;;  %v16951_v45 = vpack.c.bf16 %v24673_v40, %v20380_v49  ;;  %v24676_v60 = vld [vmem:[#allocation37_spill] sm:$0xff]  ;;  %v24681_v42 = vld [vmem:[#allocation40_spill] sm:$0xff] }
 0x1b5   : > { %16944 = vmatprep.subr.bf16.mxu0 %v16943_v20  ;;  %v2853_v58 = vand.u32 4294901760, %v2852_v54  ;;  %v2862_v6 = vand.u32 4294901760, %v2861_v25  ;;  %v24675_v54 = vld [vmem:[#allocation28_spill] sm:$0xff]  ;;  %v24678_v20 = vld [vmem:[#allocation38_spill] sm:$0xff] }
 0x1b6   : > { %16934 = vmatpush3.bf16.msra.mxu1 %v16933_v18  ;;  %v16953_v15 = vpack.c.bf16 %v24676_v60, %v24675_v54  ;;  %v24677_v18 = vld [vmem:[#allocation26_spill] sm:$0xff]  ;;  %v16955_v53 = vpack.c.bf16 %v24679_v31, %v24678_v20 }
 0x1b7   : > { %16936 = vmatprep.subr.bf16.mxu1 %v16935_v63  ;;  %2839 = vmatmul.mubr.f32.gmra.mrb[50].mxu0 %v2838_v24  ;;  %v2868_v24 = vand.u32 4294901760, %v2867_v50  ;;  %v24680_v63 = vld [vmem:[#allocation23_spill] sm:$0xff]  ;;  %v24686_v50 = vld [vmem:[#allocation21_spill] sm:$0xff] }
 0x1b8   : > { %16946 = vmatpush3.bf16.msra.mxu0 %v16945_v16  ;;  %2848 = vmatprep.mubr.f32.mxu0 %v2847_v8  ;;  %v24682_v16 = vld [vmem:[#allocation30_spill] sm:$0xff] }
 0x1b9   : > { %16948 = vmatprep.subr.bf16.mxu0 %v16947_v44  ;;  %v16957_v8 = vpack.c.bf16 %v24682_v16, %v24681_v42  ;;  %v24684_v44 = vld [vmem:[#allocation46_spill] sm:$0xff] }
 0x1ba   : > { %16938 = vmatpush3.bf16.msra.mxu1 %v16937_v32  ;;  %v24683_v32 = vld [vmem:[#allocation31_spill] sm:$0xff]  ;;  %v16959_v25 = vpack.c.bf16 %v24684_v44, %v20473_v57 }
 0x1bb   : > { %16972 = vmatprep.subr.bf16.mxu1 %v24674_v29  ;;  %2854 = vmatmul.mubr.f32.gmra.mrb[52].mxu0 %v2853_v58  ;;  %v24685_v58 = vld [vmem:[#allocation33_spill] sm:$0xff] }
 0x1bc   : > { %16950 = vmatpush3.bf16.msra.mxu0 %v16949_v62  ;;  %2863 = vmatprep.mubr.f32.mxu0 %v2862_v6  ;;  %v16961_v62 = vpack.c.bf16 %v20521_v37, %v20504_v56  ;;  %v16963_v6 = vpack.c.bf16 %v20541_v10, %v20528_v23 }
 0x1bd   : > { %3101 = vmatmul.mubr.f32.vlgmr.msra.gmra.mrb[48].mxu1 %v20569_v33  ;;  %16952 = vmatprep.subr.bf16.mxu0 %v16951_v45  ;;  %v24687_v45 = vld [vmem:[#allocation24_spill] sm:$0xff] }
 0x1be   : > { %16974 = vmatpush3.bf16.msra.mxu1 %v24677_v18  ;;  %3106 = vmatprep.mubr.f32.mxu1 %v20575_v9  ;;  %v24694_v9 = vand.u32 4294901760, %v20254_v22  ;;  %v2679_v22 = vld [vmem:[%s19184_s2 + $0x108] sm:$0xff] }
 0x1bf   : > { %16976 = vmatprep.subr.bf16.mxu1 %v24680_v63  ;;  %2869 = vmatmul.mubr.f32.gmra.mrb[54].mxu0 %v2868_v24  ;;  %v24688_v24 = vld [vmem:[#allocation19_spill] sm:$0xff] }
 0x1c0   : > { %16954 = vmatpush3.bf16.msra.mxu0 %v16953_v15  ;;  %3257 = vmatprep.mubr.f32.mxu0 %v24686_v50 }
 0x1c1   : > { %3108 = vmatmul.mubr.f32.gmra.mrb[50].mxu1 %v20596_v11  ;;  %16956 = vmatprep.subr.bf16.mxu0 %v16955_v53 }
 0x1c2   : > { %16978 = vmatpush3.bf16.msra.mxu1 %v24683_v32  ;;  %3113 = vmatprep.mubr.f32.mxu1 %v20609_v17  ;;  %v16969_v17 = vpack.c.bf16 %v20615_v46, %v20613_v21 }
 0x1c3   : > { %16980 = vmatprep.subr.bf16.mxu1 %v24685_v58 }
 0x1c4   : > { %16958 = vmatpush3.bf16.msra.mxu0 %v16957_v8  ;;  %v16965_v8 = vpack.c.bf16 %v20556_v34, %v20554_v28 }
 0x1c5   : > { %3115 = vmatmul.mubr.f32.gmra.mrb[52].mxu1 %v20630_v55  ;;  %16960 = vmatprep.subr.bf16.mxu0 %v16959_v25  ;;  %v2694_v25 = vld [vmem:[%s19184_s2 + $0x180] sm:$0xff]  ;;  %v16967_v55 = vpack.c.bf16 %v20583_v38, %v20581_v4 }
 0x1c6   : > { %16982 = vmatpush3.bf16.msra.mxu1 %v24687_v45  ;;  %v14939_v15 = vpop.f32.mrb[0].mxu0  ;;  %3120 = vmatprep.mubr.f32.mxu1 %v20655_v30  ;;  %v24690_v30 = vand.u32 4294901760, %v24686_v50  ;;  %v3796_v11 = vand.u32 4294901760, %v2694_v25  ;;  %v20766_v50 = vld [vmem:[%s437_s13] ss:$0 sm:$0xff] }
 0x1c7   : > { %16984 = vmatprep.subr.bf16.mxu1 %v24688_v24  ;;  %v14940_v53 = vpop.f32.mrb[1].mxu0  ;;  %v24700_v24 = vand.u32 4294901760, %v20354_v59  ;;  %v24705_v59 = vand.u32 4294901760, %v24675_v54 }
 0x1c8   : > { %16962 = vmatpush3.bf16.msra.mxu0 %v16961_v62  ;;  %v14941_v0 = vadd.f32 %v14940_v53, %v14939_v15  ;;  %v2695_v62 = vld [vmem:[%s19184_s2 + $0x188] sm:$0xff]  ;;  %v24691_v15 = vand.u32 4294901760, %v20227_v27  ;;  %v24692_v53 = vand.u32 4294901760, %v20229_v48  ;;  %v24695_v27 = vand.u32 4294901760, %v20285_v35 }
 0x1c9   : > { %3122 = vmatmul.mubr.f32.gmra.mrb[54].mxu1 %v20664_v39  ;;  %16964 = vmatprep.subr.bf16.mxu0 %v16963_v6  ;;  %v2678_v6 = vld [vmem:[%s19184_s2 + $0x100] sm:$0xff]  ;;  %v24696_v48 = vand.u32 4294901760, %v20287_v51  ;;  %v24701_v35 = vand.u32 4294901760, %v20356_v7  ;;  %v24702_v51 = vand.u32 4294901760, %v20378_v41  ;;  %v24707_v7 = vld [vmem:[#allocation43_spill] sm:$0xff]  ;;  %v24708_v41 = vand.u32 4294901760, %v24678_v20 }
 0x1ca   : > { %16986 = vmatpush3.bf16.msra.mxu1 %v24689_v43  ;;  %3391 = vmatprep.mubr.f32.mxu1 %v24690_v30  ;;  %v17003_v39 = vpack.c.bf16 %v24692_v53, %v24691_v15  ;;  %v24693_v30 = vand.u32 4294901760, %v20252_v3  ;;  %v24697_v53 = vand.u32 4294901760, %v20335_v2  ;;  %v24699_v43 = vand.u32 4294901760, %v20342_v19  ;;  %v2680_v20 = vld [vmem:[%s19184_s2 + $0x110] sm:$0xff] }
 0x1cb   : > { %16988 = vmatprep.subr.bf16.mxu1 %v20442_v5  ;;  %v17007_v15 = vpack.c.bf16 %v24696_v48, %v24695_v27  ;;  %v20794_v2 = vpack.c.bf16 %v24702_v51, %v24701_v35  ;;  %v24704_v19 = vand.u32 4294901760, %v24673_v40  ;;  %v2697_v27 = vld [vmem:[%s19184_s2 + $0x198] sm:$0xff]  ;;  %v24709_v48 = vand.u32 4294901760, %v24679_v31 }
 0x1cc   : > { %16966 = vmatpush3.bf16.msra.mxu0 %v16965_v8  ;;  %v17005_v33 = vpack.c.bf16 %v24694_v9, %v24693_v30  ;;  %v24698_v8 = vand.u32 4294901760, %v20337_v52  ;;  %v20786_v3 = vpack.c.bf16 %v24700_v24, %v24699_v43  ;;  %v24703_v52 = vand.u32 4294901760, %v20380_v49 }
 0x1cd   : > { %16968 = vmatprep.subr.bf16.mxu0 %v16967_v55  ;;  %v24706_v43 = vand.u32 4294901760, %v24676_v60  ;;  %v3799_v30 = vand.u32 4294901760, %v2695_v62  ;;  %v2696_v55 = vld [vmem:[%s19184_s2 + $0x190] sm:$0xff]  ;;  %v20815_v49 = vpack.c.bf16 %v24709_v48, %v24708_v41  ;;  %v24710_v40 = vand.u32 4294901760, %v24681_v42 }
 0x1ce   : > { %v20780_v5 = vpack.c.bf16 %v24698_v8, %v24697_v53  ;;  %16990 = vmatpush3.bf16.msra.mxu1 %v20455_v47  ;;  %v20800_v9 = vpack.c.bf16 %v24704_v19, %v24703_v52  ;;  %v24711_v53 = vand.u32 4294901760, %v24682_v16  ;;  %v24712_v60 = vand.u32 4294901760, %v20473_v57  ;;  %v2681_v52 = vld [vmem:[%s19184_s2 + $0x118] sm:$0xff] }
 0x1cf   : > { %v20806_v24 = vpack.c.bf16 %v24706_v43, %v24705_v59  ;;  %16992 = vmatprep.subr.bf16.mxu1 %v24707_v7  ;;  %v24713_v8 = vand.u32 4294901760, %v24684_v44  ;;  %v3748_v51 = vand.u32 4294901760, %v2678_v6  ;;  %v679_v31 = vadd.f32 %v14941_v0, %v20766_v50  ;;  %v14983_v19 = vpop.f32.mrb[0].mxu1 }
 0x1d0   : > { %v20821_v54 = vpack.c.bf16 %v24711_v53, %v24710_v40  ;;  %v24714_v42 = vand.u32 4294901760, %v20504_v56  ;;  %v24715_v16 = vand.u32 4294901760, %v20521_v37  ;;  %v24716_v57 = vand.u32 4294901760, %v20528_v23  ;;  %v14984_v48 = vpop.f32.mrb[1].mxu1  ;;  %16970 = vmatpush3.bf16.msra.mxu0 %v16969_v17 }
 0x1d1   : > { %v20827_v35 = vpack.c.bf16 %v24713_v8, %v24712_v60  ;;  %v24717_v44 = vand.u32 4294901760, %v20541_v10  ;;  %v3751_v41 = vand.u32 4294901760, %v2679_v22  ;;  %v24718_v40 = vand.u32 4294901760, %v20554_v28  ;;  %v2698_v8 = vld [vmem:[%s19184_s2 + $0x1a0] sm:$0xff]  ;;  %17004 = vmatprep.subr.bf16.mxu0 %v17003_v39 }
 0x1d2   : > { %v20836_v59 = vpack.c.bf16 %v24715_v16, %v24714_v42  ;;  %v24719_v0 = vand.u32 4294901760, %v20556_v34  ;;  %v20850_v56 = vsub.f32 %v2694_v25, %v3796_v11  ;;  %v3802_v37 = vand.u32 4294901760, %v2696_v55  ;;  %v2699_v42 = vld [vmem:[%s19184_s2 + $0x1a8] sm:$0xff]  ;;  %v24721_v16 = vld [vmem:[#allocation42_spill] sm:$0xff]  ;;  %v14942_v28 = vpop.f32.mrb[2].mxu0 }
 0x1d3   : > { %v20842_v43 = vpack.c.bf16 %v24717_v44, %v24716_v57  ;;  %v3805_v60 = vand.u32 4294901760, %v2697_v27  ;;  %v14985_v23 = vadd.f32 %v14984_v48, %v14983_v19  ;;  %16994 = vmatpush3.bf16.msra.mxu1 %v24721_v16  ;;  %v20855_v10 = vsub.f32 %v2695_v62, %v3799_v30  ;;  %v24723_v44 = vld [vmem:[#allocation29_spill] sm:$0xff]  ;;  %v14943_v7 = vpop.f32.mrb[3].mxu0 }
 0x1d4   : > { %v20848_v53 = vpack.c.bf16 %v24719_v0, %v24718_v40  ;;  %24720 = vst [vmem:[#allocation25_spill] sm:$0xff] %v20850_v56  ;;  %v3754_v57 = vand.u32 4294901760, %v2680_v20  ;;  %v3757_v17 = vand.u32 4294901760, %v2681_v52  ;;  %16996 = vmatprep.subr.bf16.mxu1 %v24723_v44  ;;  %v24724_v34 = vand.u32 4294901760, %v20581_v4  ;;  %v24730_v44 = vld [vmem:[#allocation41_spill] sm:$0xff] }
 0x1d5   : > { %24722 = vst [vmem:[#allocation22_spill] sm:$0xff] %v20855_v10  ;;  %v24725_v25 = vand.u32 4294901760, %v20583_v38  ;;  %v24726_v0 = vand.u32 4294901760, %v20613_v21  ;;  %v24727_v19 = vand.u32 4294901760, %v20615_v46  ;;  %v20870_v39 = vpack.c.bf16 %v3799_v30, %v3796_v11  ;;  %3260 = vmatmul.mubr.f32.vlgmr.msra.gmra.mrb[56].mxu0 %v24730_v44  ;;  %v24733_v30 = vld [vmem:[#allocation27_spill] sm:$0xff] }
 0x1d6   : > { %v20872_v62 = vsub.f32 %v2678_v6, %v3748_v51  ;;  %v20874_v16 = vadd.f32 %v14985_v23, %v679_v31  ;;  %v20877_v4 = vsub.f32 %v2679_v22, %v3751_v41  ;;  %v3808_v38 = vand.u32 4294901760, %v2698_v8  ;;  %17006 = vmatpush3.bf16.msra.mxu0 %v17005_v33  ;;  %3266 = vmatprep.mubr.f32.mxu0 %v20607_v12  ;;  %v14986_v22 = vpop.f32.mrb[2].mxu1 }
 0x1d7   : > { %v20862_v40 = vpack.c.bf16 %v24725_v25, %v24724_v34  ;;  %v20868_v48 = vpack.c.bf16 %v24727_v19, %v24726_v0  ;;  %24728 = vst [vmem:[#allocation28_spill] sm:$0xff] %v20870_v39  ;;  %v3811_v34 = vand.u32 4294901760, %v2699_v42  ;;  %v14944_v21 = vadd.f32 %v14943_v7, %v14942_v28  ;;  %16998 = vmatpush3.bf16.msra.mxu1 %v24733_v30  ;;  %v2682_v7 = vld [vmem:[%s19184_s2 + $0x120] sm:$0xff]  ;;  %v14945_v28 = vpop.f32.mrb[4].mxu0  ;;  %v14987_v0 = vpop.f32.mrb[3].mxu1 }
 0x1d8   : > { %24729 = vst [vmem:[#allocation37_spill] sm:$0xff] %v20872_v62  ;;  %v20880_v46 = vpack.c.bf16 %v3751_v41, %v3748_v51  ;;  %v20882_v11 = vpack.c.bf16 %v3805_v60, %v3802_v37  ;;  %17008 = vmatprep.subr.bf16.mxu0 %v17007_v15  ;;  %v20886_v31 = vsub.f32 %v2696_v55, %v3802_v37  ;;  %v2683_v51 = vld [vmem:[%s19184_s2 + $0x128] sm:$0xff]  ;;  %v14946_v37 = vpop.f32.mrb[5].mxu0 }
 0x1d9   : > { %v20888_v23 = vsub.f32 %v2697_v27, %v3805_v60  ;;  %v20890_v25 = vpack.c.bf16 %v3757_v17, %v3754_v57  ;;  %17000 = vmatprep.subr.bf16.mxu1 %v20579_v26  ;;  %v694_v41 = vadd.f32 %v14944_v21, %v20766_v50  ;;  %v20897_v19 = vsub.f32 %v2680_v20, %v3754_v57  ;;  %v20903_v27 = vld [vmem:[%s19184_s2 + $0x1b0] sm:$0xff] }
 0x1da   : > { %24731 = vst [vmem:[#allocation26_spill] sm:$0xff] %v20880_v46  ;;  %24732 = vst [vmem:[#allocation38_spill] sm:$0xff] %v20882_v11  ;;  %v20899_v15 = vsub.f32 %v2681_v52, %v3757_v17  ;;  %3269 = vmatmul.mubr.f32.gmra.mrb[58].mxu0 %v20628_v14  ;;  %v14988_v60 = vadd.f32 %v14987_v0, %v14986_v22  ;;  %v20906_v33 = vpack.c.bf16 %v3811_v34, %v3808_v38  ;;  %v24737_v22 = vld [vmem:[#allocation34_spill] sm:$0xff] }
 0x1db   : > { %24734 = vst [vmem:[#allocation20_spill] sm:$0xff] %v20890_v25  ;;  %v20908_v6 = vsub.f32 %v2698_v8, %v3808_v38  ;;  %17010 = vmatpush3.bf16.msra.mxu0 %v20780_v5  ;;  %3275 = vmatprep.mubr.f32.mxu0 %v20636_v36  ;;  %v14947_v20 = vadd.f32 %v14946_v37, %v14945_v28  ;;  %v24736_v52 = vand.u32 4294901760, %v20850_v56  ;;  %v3760_v17 = vand.u32 4294901760, %v2682_v7  ;;  %v14989_v38 = vpop.f32.mrb[4].mxu1  ;;  %v2701_v37 = vld [vmem:[%s19184_s2 + $0x1b8] sm:$0xff] }
 0x1dc   : > { %24735 = vst [vmem:[#allocation23_spill] sm:$0xff] %v20906_v33  ;;  %v3763_v55 = vand.u32 4294901760, %v2683_v51  ;;  %17002 = vmatpush3.bf16.msra.mxu1 %v24737_v22  ;;  %17012 = vmatprep.subr.bf16.mxu0 %v20786_v3  ;;  %v20920_v8 = vadd.f32 %v14988_v60, %v694_v41  ;;  %v20922_v0 = vsub.f32 %v2699_v42, %v3811_v34  ;;  %v24738_v5 = vand.u32 4294901760, %v20855_v10  ;;  %v14990_v33 = vpop.f32.mrb[5].mxu1 }
 0x1dd   : > { %v20916_v57 = vsub.f32 %v20850_v56, %v24736_v52  ;;  %v3814_v52 = vand.u32 4294901760, %v20903_v27  ;;  %17036 = vmatprep.subr.bf16.mxu1 %v24674_v29  ;;  %v709_v21 = vadd.f32 %v14947_v20, %v20766_v50  ;;  %v14948_v56 = vpop.f32.mrb[6].mxu0  ;;  %v24739_v3 = vand.u32 4294901760, %v20872_v62 }
 0x1de   : > { %v20927_v28 = vsub.f32 %v20855_v10, %v24738_v5  ;;  %3278 = vmatmul.mubr.f32.gmra.mrb[60].mxu0 %v20662_v1  ;;  %v14949_v60 = vpop.f32.mrb[7].mxu0  ;;  %v14991_v5 = vadd.f32 %v14990_v33, %v14989_v38  ;;  %v24740_v10 = vand.u32 4294901760, %v20877_v4  ;;  %v3817_v33 = vand.u32 4294901760, %v2701_v37  ;;  %v14992_v38 = vpop.f32.mrb[6].mxu1 }
 0x1df   : > { %v3908_v41 = vsub.f32 %v20872_v62, %v24739_v3  ;;  %v24741_v3 = vand.u32 4294901760, %v24730_v44  ;;  %17014 = vmatpush3.bf16.msra.mxu0 %v20794_v2  ;;  %v14950_v34 = vadd.f32 %v14949_v60, %v14948_v56  ;;  %v4021_v42 = vand.u32 4294901760, %v20916_v57  ;;  %3284 = vmatprep.mubr.f32.mxu0 %v20681_v61  ;;  %v2684_v2 = vld [vmem:[%s19184_s2 + $0x130] sm:$0xff]  ;;  %v2685_v56 = vld [vmem:[%s19184_s2 + $0x138] sm:$0xff] }
 0x1e0   : > { %v3915_v29 = vsub.f32 %v20877_v4, %v24740_v10  ;;  %v20948_v62 = vpack.c.bf16 %v3763_v55, %v3760_v17  ;;  %v20952_v10 = vadd.f32 %v14991_v5, %v709_v21  ;;  %v4028_v22 = vand.u32 4294901760, %v20927_v28  ;;  %17016 = vmatprep.subr.bf16.mxu0 %v20800_v9  ;;  %v14993_v21 = vpop.f32.mrb[7].mxu1 }
 0x1e1   : > { %3395 = vmatmul.mubr.f32.vlgmr.msra.gmra.mrb[56].mxu1 %v24741_v3  ;;  %v20955_v20 = vsub.f32 %v2682_v7, %v3760_v17  ;;  %v20957_v44 = vsub.f32 %v2683_v51, %v3763_v55  ;;  %v24744_v57 = vand.u32 4294901760, %v20607_v12  ;;  %v3909_v60 = vand.u32 4294901760, %v3908_v41  ;;  %v2703_v3 = vld [vmem:[%s19184_s2 + $0x1c8] sm:$0xff] }
 0x1e2   : > { %24742 = vst [vmem:[#allocation40_spill] sm:$0xff] %v20948_v62  ;;  %17038 = vmatpush3.bf16.msra.mxu1 %v24677_v18  ;;  %v724_v18 = vadd.f32 %v14950_v34, %v20766_v50  ;;  %v24745_v5 = vand.u32 4294901760, %v20886_v31  ;;  %v24746_v51 = vand.u32 4294901760, %v20888_v23  ;;  %3287 = vmatmul.mubr.f32.gmra.mrb[62].mxu0 %v20688_v13  ;;  %v14994_v12 = vadd.f32 %v14993_v21, %v14992_v38  ;;  %v2702_v34 = vld [vmem:[%s19184_s2 + $0x1c0] sm:$0xff] }
 0x1e3   : > { %24743 = vst [vmem:[#allocation30_spill] sm:$0xff] %v20957_v44  ;;  %3402 = vmatprep.mubr.f32.mxu1 %v24744_v57  ;;  %17040 = vmatprep.subr.bf16.mxu1 %v24680_v63  ;;  %v3916_v17 = vand.u32 4294901760, %v3915_v29  ;;  %v24747_v9 = vand.u32 4294901760, %v20897_v19  ;;  %v24748_v28 = vand.u32 4294901760, %v20899_v15  ;;  %v24749_v57 = vand.u32 4294901760, %v20628_v14 }
 0x1e4   : > { %v4034_v7 = vsub.f32 %v20886_v31, %v24745_v5  ;;  %v4041_v55 = vsub.f32 %v20888_v23, %v24746_v51  ;;  %17018 = vmatpush3.bf16.msra.mxu0 %v20806_v24  ;;  %v20984_v5 = vpack.c.bf16 %v3817_v33, %v3814_v52  ;;  %v20987_v63 = vsub.f32 %v20903_v27, %v3814_v52 }
 0x1e5   : > { %v3922_v50 = vsub.f32 %v20897_v19, %v24747_v9  ;;  %v3929_v41 = vsub.f32 %v20899_v15, %v24748_v28  ;;  %3406 = vmatmul.mubr.f32.gmra.mrb[58].mxu1 %v24749_v57  ;;  %v3766_v29 = vand.u32 4294901760, %v2684_v2  ;;  %v3769_v38 = vand.u32 4294901760, %v2685_v56  ;;  %17020 = vmatprep.subr.bf16.mxu0 %v20815_v49  ;;  %v2686_v57 = vld [vmem:[%s19184_s2 + $0x140] sm:$0xff] }
 0x1e6   : > { %24750 = vst [vmem:[#allocation31_spill] sm:$0xff] %v20984_v5  ;;  %24751 = vst [vmem:[#allocation46_spill] sm:$0xff] %v20987_v63  ;;  %17042 = vmatpush3.bf16.msra.mxu1 %v24683_v32  ;;  %v24752_v21 = vand.u32 4294901760, %v20636_v36  ;;  %v20992_v51 = vadd.f32 %v14994_v12, %v724_v18  ;;  %v20994_v9 = vsub.f32 %v2701_v37, %v3817_v33  ;;  %v24069_v14 = vand.u32 4294901760, %v20908_v6  ;;  %v24754_v36 = vld [vmem:[#allocation39_spill] sm:$0xff] }
 0x1e7   : > { %v24068_v24 = vand.u32 4294901760, %v20922_v0  ;;  %17044 = vmatprep.subr.bf16.mxu1 %v24685_v58  ;;  %v4035_v27 = vand.u32 4294901760, %v4034_v7  ;;  %v4042_v52 = vand.u32 4294901760, %v4041_v55  ;;  %v3820_v28 = vand.u32 4294901760, %v2702_v34  ;;  %3594 = vmatprep.mubr.f32.mxu0 %v24754_v36  ;;  %v2687_v7 = vld [vmem:[%s19184_s2 + $0x148] sm:$0xff] }
 0x1e8   : > { %3413 = vmatprep.mubr.f32.mxu1 %v24752_v21  ;;  %24753 = vst [vmem:[#allocation33_spill] sm:$0xff] %v20994_v9  ;;  %v3823_v32 = vand.u32 4294901760, %v2703_v3  ;;  %v21002_v18 = vpack.c.bf16 %v4028_v22, %v4021_v42  ;;  %v21004_v37 = vpack.c.bf16 %v3916_v17, %v3909_v60  ;;  %v3923_v33 = vand.u32 4294901760, %v3922_v50  ;;  %17022 = vmatpush3.bf16.msra.mxu0 %v20821_v54  ;;  %v15027_v17 = vpop.f32.mrb[8].mxu0  ;;  %v24759_v50 = vld [vmem:[#allocation19_spill] sm:$0xff] }
 0x1e9   : > { %v3930_v12 = vand.u32 4294901760, %v3929_v41  ;;  %v24755_v21 = vand.u32 4294901760, %v20662_v1  ;;  %v21009_v49 = vpack.c.bf16 %v3769_v38, %v3766_v29  ;;  %v21011_v58 = vsub.f32 %v2684_v2, %v3766_v29  ;;  %17024 = vmatprep.subr.bf16.mxu0 %v20827_v35  ;;  %v2705_v41 = vld [vmem:[%s19184_s2 + $0x1d8] sm:$0xff] }
 0x1ea   : > { %v24072_v55 = vand.u32 4294901760, %v20955_v20  ;;  %17046 = vmatpush3.bf16.msra.mxu1 %v24687_v45  ;;  %v24757_v42 = vand.u32 4294901760, %v20681_v61  ;;  %v21019_v1 = vsub.f32 %v2685_v56, %v3769_v38  ;;  %v4048_v54 = vsub.f32 %v20908_v6, %v24069_v14  ;;  %v2704_v56 = vld [vmem:[%s19184_s2 + $0x1d0] sm:$0xff] }
 0x1eb   : > { %3417 = vmatmul.mubr.f32.gmra.mrb[60].mxu1 %v24755_v21  ;;  %24756 = vst [vmem:[#allocation21_spill] sm:$0xff] %v21011_v58  ;;  %v4055_v2 = vsub.f32 %v20922_v0, %v24068_v24  ;;  %v3772_v60 = vand.u32 4294901760, %v2686_v57  ;;  %17048 = vmatprep.subr.bf16.mxu1 %v24759_v50  ;;  %v21029_v45 = vpack.c.bf16 %v4042_v52, %v4035_v27  ;;  %v24070_v29 = vand.u32 4294901760, %v20987_v63  ;;  %v15028_v21 = vpop.f32.mrb[9].mxu0 }
 0x1ec   : > { %3424 = vmatprep.mubr.f32.mxu1 %v24757_v42  ;;  %24758 = vst [vmem:[#allocation24_spill] sm:$0xff] %v21019_v1  ;;  %v21031_v61 = vpack.c.bf16 %v3823_v32, %v3820_v28  ;;  %v24071_v38 = vand.u32 4294901760, %v20994_v9  ;;  %v21037_v42 = vpack.c.bf16 %v3930_v12, %v3923_v33  ;;  %v21039_v24 = vsub.f32 %v2702_v34, %v3820_v28  ;;  %v24765_v34 = vld [vmem:[#allocation18_spill] sm:$0xff] }
 0x1ed   : > { %v21041_v14 = vsub.f32 %v2703_v3, %v3823_v32  ;;  %v3775_v35 = vand.u32 4294901760, %v2687_v7  ;;  %v15029_v22 = vadd.f32 %v15028_v21, %v15027_v17  ;;  %v24763_v27 = vand.u32 4294901760, %v20688_v13  ;;  %17026 = vmatpush3.bf16.msra.mxu0 %v20836_v59  ;;  %v15030_v59 = vpop.f32.mrb[10].mxu0  ;;  %v24766_v17 = vld [vmem:[#allocation32_spill] sm:$0xff] }
 0x1ee   : > { %24760 = vst [vmem:[#allocation41_spill] sm:$0xff] %v21031_v61  ;;  %24761 = vst [vmem:[#allocation27_spill] sm:$0xff] %v21039_v24  ;;  %v3936_v52 = vsub.f32 %v20955_v20, %v24072_v55  ;;  %v24764_v50 = vand.u32 4294901760, %v20957_v44  ;;  %17050 = vmatpush3.bf16.msra.mxu1 %v24765_v34  ;;  %17028 = vmatprep.subr.bf16.mxu0 %v20842_v43  ;;  %v4049_v3 = vand.u32 4294901760, %v4048_v54  ;;  %v4056_v28 = vand.u32 4294901760, %v4055_v2  ;;  %v2688_v43 = vld [vmem:[%s19184_s2 + $0x150] sm:$0xff] }
 0x1ef   : > { %24762 = vst [vmem:[#allocation39_spill] sm:$0xff] %v21041_v14  ;;  %3428 = vmatmul.mubr.f32.gmra.mrb[62].mxu1 %v24763_v27  ;;  %v3826_v13 = vand.u32 4294901760, %v2704_v56  ;;  %v3829_v32 = vand.u32 4294901760, %v2705_v41  ;;  %v1115_v12 = vadd.f32 %v15029_v22, %v20874_v16  ;;  %17052 = vmatprep.subr.bf16.mxu1 %v24766_v17  ;;  %v4062_v21 = vsub.f32 %v20987_v63, %v24070_v29  ;;  %v15031_v54 = vpop.f32.mrb[11].mxu0  ;;  %v2689_v16 = vld [vmem:[%s19184_s2 + $0x158] sm:$0xff]  ;;  %v2706_v34 = vld [vmem:[%s19184_s2 + $0x1e0] sm:$0xff] }
 0x1f0   : > { %v3943_v33 = vsub.f32 %v20957_v44, %v24764_v50  ;;  %3719 = vmatprep.mubr.f32.mxu1 %v24754_v36  ;;  %v4069_v27 = vsub.f32 %v20994_v9, %v24071_v38  ;;  %v21064_v2 = vpack.c.bf16 %v3775_v35, %v3772_v60  ;;  %v21066_v50 = vsub.f32 %v2686_v57, %v3772_v60  ;;  %v2633_v55 = vld [vmem:[#allocation5 + $0x18] sm:$0xff]  ;;  %v2707_v9 = vld [vmem:[%s19184_s2 + $0x1e8] sm:$0xff]  ;;  %v24777_v44 = vld [vmem:[#allocation42_spill] sm:$0xff] }
 0x1f1   : > { %v15032_v36 = vadd.f32 %v15031_v54, %v15030_v59  ;;  %17030 = vmatpush3.bf16.msra.mxu0 %v20848_v53  ;;  %v21072_v17 = vsub.f32 %v2687_v7, %v3775_v35  ;;  %v3937_v29 = vand.u32 4294901760, %v3936_v52  ;;  %v21076_v57 = vpack.c.bf16 %v4056_v28, %v4049_v3  ;;  %v15033_v7 = vpop.f32.mrb[12].mxu0  ;;  %v24772_v35 = vld [vmem:[#allocation43_spill] sm:$0xff] }
 0x1f2   : > { %24767 = vst [vmem:[#allocation19_spill] sm:$0xff] %v21064_v2  ;;  %24768 = vst [vmem:[#allocation18_spill] sm:$0xff] %v21066_v50  ;;  %v3944_v38 = vand.u32 4294901760, %v3943_v33  ;;  %17054 = vmatpush3.bf16.msra.mxu1 %v20455_v47  ;;  %17032 = vmatprep.subr.bf16.mxu0 %v20862_v40  ;;  %v21078_v60 = vpack.c.bf16 %v3829_v32, %v3826_v13  ;;  %v21080_v22 = vsub.f32 %v2704_v56, %v3826_v13  ;;  %v15071_v47 = vpop.f32.mrb[8].mxu1  ;;  %v15034_v63 = vpop.f32.mrb[13].mxu0 }
 0x1f3   : > { %24769 = vst [vmem:[#allocation32_spill] sm:$0xff] %v21072_v17  ;;  %v3778_v59 = vand.u32 4294901760, %v2688_v43  ;;  %v1124_v53 = vadd.f32 %v15032_v36, %v20920_v8  ;;  %17056 = vmatprep.subr.bf16.mxu1 %v24772_v35  ;;  %v4063_v52 = vand.u32 4294901760, %v4062_v21  ;;  %v4070_v54 = vand.u32 4294901760, %v4069_v27  ;;  %v15072_v21 = vpop.f32.mrb[9].mxu1 }
 0x1f4   : > { %24770 = vst [vmem:[#allocation50_spill] sm:$0xff] %v21078_v60  ;;  %24771 = vst [vmem:[#allocation51_spill] sm:$0xff] %v21080_v22  ;;  %v3781_v33 = vand.u32 4294901760, %v2689_v16  ;;  %v21086_v40 = vsub.f32 %v2705_v41, %v3829_v32  ;;  %v24774_v3 = vand.u32 4294901760, %v21011_v58  ;;  %v24775_v28 = vand.u32 4294901760, %v21019_v1  ;;  %v24781_v41 = vld [vmem:[#allocation35_spill] sm:$0xff] }
 0x1f5   : > { %v21094_v13 = vand.u32 4294901760, %v2633_v55  ;;  %v15035_v36 = vadd.f32 %v15034_v63, %v15033_v7  ;;  %17034 = vmatpush3.bf16.msra.mxu0 %v20868_v48  ;;  %v21097_v27 = vpack.c.bf16 %v3944_v38, %v3937_v29  ;;  %v15073_v35 = vadd.f32 %v15072_v21, %v15071_v47  ;;  %v15036_v7 = vpop.f32.mrb[14].mxu0  ;;  %v24778_v48 = vld [vmem:[#allocation29_spill] sm:$0xff]  ;;  %v2690_v47 = vld [vmem:[%s19184_s2 + $0x160] sm:$0xff]  ;;  %v15074_v21 = vpop.f32.mrb[10].mxu1 }
 0x1f6   : > { %24773 = vst [vmem:[#allocation43_spill] sm:$0xff] %v21086_v40  ;;  %v3950_v56 = vsub.f32 %v21011_v58, %v24774_v3  ;;  %v3957_v8 = vsub.f32 %v21019_v1, %v24775_v28  ;;  %17058 = vmatpush3.bf16.msra.mxu1 %v24777_v44  ;;  %17068 = vmatprep.subr.bf16.mxu0 %v20870_v39  ;;  %v3832_v28 = vand.u32 4294901760, %v2706_v34  ;;  %v3835_v1 = vand.u32 4294901760, %v2707_v9 }
 0x1f7   : > { %24776 = vst [vmem:[#allocation52_spill] sm:$0xff] %v21094_v13  ;;  %v21103_v3 = vsub.f32 %v2688_v43, %v3778_v59  ;;  %v1133_v63 = vadd.f32 %v15035_v36, %v20952_v10  ;;  %17060 = vmatprep.subr.bf16.mxu1 %v24778_v48  ;;  %v21107_v29 = vpack.c.bf16 %v4070_v54, %v4063_v52  ;;  %v15037_v43 = vpop.f32.mrb[15].mxu0  ;;  %v15075_v52 = vpop.f32.mrb[11].mxu1  ;;  %v24785_v54 = vand.u32 4294901760, %v21041_v14 }
 0x1f8   : > { %v21109_v38 = vpack.c.bf16 %v3781_v33, %v3778_v59  ;;  %v21111_v32 = vsub.f32 %v2689_v16, %v3781_v33  ;;  %v21114_v44 = vadd.f32 %v15073_v35, %v1115_v12  ;;  %3596 = vmatmul.mubr.f32.vlgmr.msra.gmra.mrb[64].mxu0 %v24781_v41  ;;  %v3951_v58 = vand.u32 4294901760, %v3950_v56  ;;  %v24783_v59 = vld [vmem:[#allocation36_spill] sm:$0xff]  ;;  %v2691_v35 = vld [vmem:[%s19184_s2 + $0x168] sm:$0xff] }
 0x1f9   : > { %v3958_v39 = vand.u32 4294901760, %v3957_v8  ;;  %v21118_v10 = vsub.f32 %v2633_v55, %v21094_v13  ;;  %v15038_v36 = vadd.f32 %v15037_v43, %v15036_v7  ;;  %17070 = vmatpush3.bf16.msra.mxu0 %v20880_v46  ;;  %3601 = vmatprep.mubr.f32.mxu0 %v24783_v59  ;;  %v24784_v16 = vand.u32 4294901760, %v21039_v24 }
 0x1fa   : > { %24779 = vst [vmem:[#allocation42_spill] sm:$0xff] %v21109_v38  ;;  %24780 = vst [vmem:[#allocation29_spill] sm:$0xff] %v21111_v32  ;;  %v4083_v33 = vsub.f32 %v21041_v14, %v24785_v54  ;;  %v15076_v56 = vadd.f32 %v15075_v52, %v15074_v21  ;;  %17062 = vmatpush3.bf16.msra.mxu1 %v24733_v30  ;;  %17072 = vmatprep.subr.bf16.mxu0 %v20882_v11  ;;  %v3784_v7 = vand.u32 4294901760, %v2690_v47  ;;  %v15077_v30 = vpop.f32.mrb[12].mxu1  ;;  %v24787_v54 = vld [vmem:[#allocation44_spill] sm:$0xff]  ;;  %v21148_v14 = vld [vmem:[%s19184_s2 + $0x1f8] sm:$0xff] }
 0x1fb   : > { %24782 = vst [vmem:[#allocation35_spill] sm:$0xff] %v21118_v10  ;;  %v4076_v12 = vsub.f32 %v21039_v24, %v24784_v16  ;;  %v21131_v55 = vpack.c.bf16 %v3835_v1, %v3832_v28  ;;  %v21133_v8 = vsub.f32 %v2706_v34, %v3832_v28  ;;  %v1142_v48 = vadd.f32 %v15038_v36, %v20992_v51  ;;  %v2708_v28 = vld [vmem:[%s19184_s2 + $0x1f0] sm:$0xff] }
 0x1fc   : > { %17064 = vmatprep.subr.bf16.mxu1 %v20579_v26  ;;  %v21137_v43 = vsub.f32 %v2707_v9, %v3835_v1  ;;  %v21141_v52 = vadd.f32 %v15076_v56, %v1124_v53  ;;  %3603 = vmatmul.mubr.f32.gmra.mrb[66].mxu0 %v24787_v54  ;;  %v21144_v11 = vpack.c.bf16 %v3958_v39, %v3951_v58  ;;  %v3787_v34 = vand.u32 4294901760, %v2691_v35  ;;  %v15078_v26 = vpop.f32.mrb[13].mxu1  ;;  %v24788_v9 = vld [vmem:[#allocation45_spill] sm:$0xff]  ;;  %v24789_v39 = vld [vmem:[#allocation34_spill] sm:$0xff]  ;;  %v24790_v58 = vld [vmem:[#allocation23_spill] sm:$0xff] }
 0x1fd   : > { %24786 = vst [vmem:[#allocation36_spill] sm:$0xff] %v21131_v55  ;;  %17074 = vmatpush3.bf16.msra.mxu0 %v20890_v25  ;;  %3608 = vmatprep.mubr.f32.mxu0 %v24788_v9  ;;  %v4077_v1 = vand.u32 4294901760, %v4076_v12  ;;  %v4084_v36 = vand.u32 4294901760, %v4083_v33  ;;  %v15079_v21 = vadd.f32 %v15078_v26, %v15077_v30  ;;  %v21157_v16 = vsub.f32 %v2690_v47, %v3784_v7  ;;  %v2632_v47 = vld [vmem:[#allocation5 + $0x10] sm:$0xff]  ;;  %v15080_v51 = vpop.f32.mrb[14].mxu1 }
 0x1fe   : > { %17066 = vmatpush3.bf16.msra.mxu1 %v24789_v39  ;;  %17076 = vmatprep.subr.bf16.mxu0 %v24790_v58  ;;  %v24791_v12 = vand.u32 4294901760, %v21066_v50  ;;  %v24792_v56 = vand.u32 4294901760, %v21072_v17  ;;  %v3838_v26 = vand.u32 4294901760, %v2708_v28  ;;  %v3841_v39 = vand.u32 4294901760, %v21148_v14  ;;  %v24793_v58 = vld [vmem:[#allocation47_spill] sm:$0xff]  ;;  %v2692_v24 = vld [vmem:[%s19184_s2 + $0x170] sm:$0xff] }
 0x1ff   : > { %17100 = vmatprep.subr.bf16.mxu1 %v21002_v18  ;;  %v21169_v53 = vadd.f32 %v15079_v21, %v1133_v63  ;;  %v21172_v25 = vpack.c.bf16 %v3787_v34, %v3784_v7  ;;  %v21174_v18 = vsub.f32 %v2691_v35, %v3787_v34  ;;  %v24796_v63 = vand.u32 4294901760, %v21080_v22  ;;  %v2693_v34 = vld [vmem:[%s19184_s2 + $0x178] sm:$0xff] }
 0x200   : > { %v3964_v33 = vsub.f32 %v21066_v50, %v24791_v12  ;;  %v3971_v30 = vsub.f32 %v21072_v17, %v24792_v56  ;;  %3610 = vmatmul.mubr.f32.gmra.mrb[68].mxu0 %v24793_v58  ;;  %v24795_v12 = vand.u32 4294901760, %v21118_v10  ;;  %v15081_v56 = vpop.f32.mrb[15].mxu1  ;;  %v21182_v17 = vpack.c.bf16 %v4084_v36, %v4077_v1 }
 0x201   : > { %24794 = vst [vmem:[#allocation44_spill] sm:$0xff] %v21172_v25  ;;  %3721 = vmatmul.mubr.f32.vlgmr.msra.gmra.mrb[64].mxu1 %v24781_v41  ;;  %17078 = vmatpush3.bf16.msra.mxu0 %v20948_v62  ;;  %v4090_v21 = vsub.f32 %v21080_v22, %v24796_v63  ;;  %v24797_v7 = vand.u32 4294901760, %v21086_v40  ;;  %v15082_v46 = vadd.f32 %v15081_v56, %v15080_v51  ;;  %v24799_v41 = vand.u32 4294901760, %v21103_v3  ;;  %v2637_v63 = vld [vmem:[#allocation5 + $0x38] sm:$0xff] }
 0x202   : > { %v3846_v50 = vsub.f32 %v21118_v10, %v24795_v12  ;;  %17102 = vmatpush3.bf16.msra.mxu1 %v21004_v37  ;;  %v24798_v12 = vld [vmem:[#allocation48_spill] sm:$0xff]  ;;  %v24800_v1 = vand.u32 4294901760, %v21111_v32  ;;  %v21199_v10 = vand.u32 4294901760, %v2632_v47  ;;  %3726 = vmatprep.mubr.f32.mxu1 %v24783_v59  ;;  %v3965_v51 = vand.u32 4294901760, %v3964_v33  ;;  %v24803_v22 = vld [vmem:[#allocation49_spill] sm:$0xff] }
 0x203   : > { %v4097_v35 = vsub.f32 %v21086_v40, %v24797_v7  ;;  %3615 = vmatprep.mubr.f32.mxu0 %v24798_v12  ;;  %v3978_v62 = vsub.f32 %v21103_v3, %v24799_v41  ;;  %17080 = vmatprep.subr.bf16.mxu0 %v20984_v5  ;;  %v3972_v56 = vand.u32 4294901760, %v3971_v30  ;;  %v21203_v37 = vpack.c.bf16 %v3841_v39, %v3838_v26 }
 0x204   : > { %v3985_v36 = vsub.f32 %v21111_v32, %v24800_v1  ;;  %24801 = vst [vmem:[#allocation45_spill] sm:$0xff] %v21199_v10  ;;  %v3790_v7 = vand.u32 4294901760, %v2692_v24  ;;  %v21205_v40 = vadd.f32 %v15082_v46, %v1142_v48  ;;  %3617 = vmatmul.mubr.f32.gmra.mrb[70].mxu0 %v24803_v22  ;;  %17104 = vmatprep.subr.bf16.mxu1 %v21029_v45  ;;  %v3793_v41 = vand.u32 4294901760, %v2693_v34  ;;  %v2636_v46 = vld [vmem:[#allocation5 + $0x30] sm:$0xff] }
 0x205   : > { %24802 = vst [vmem:[#allocation34_spill] sm:$0xff] %v21203_v37  ;;  %v3847_v1 = vand.u32 4294901760, %v3846_v50  ;;  %3728 = vmatmul.mubr.f32.gmra.mrb[66].mxu1 %v24787_v54  ;;  %17082 = vmatpush3.bf16.msra.mxu0 %v21009_v49  ;;  %v21212_v59 = vsub.f32 %v2708_v28, %v3838_v26  ;;  %v4091_v33 = vand.u32 4294901760, %v4090_v21  ;;  %v24111_v30 = vand.u32 4294901760, %v21137_v43  ;;  %v2641_v54 = vld [vmem:[#allocation5 + $0x58] sm:$0xff] }
 0x206   : > { %v21215_v5 = vand.u32 4294901760, %v2637_v63  ;;  %17106 = vmatpush3.bf16.msra.mxu1 %v21037_v42  ;;  %3733 = vmatprep.mubr.f32.mxu1 %v24788_v9  ;;  %v4098_v45 = vand.u32 4294901760, %v4097_v35  ;;  %v3979_v50 = vand.u32 4294901760, %v3978_v62  ;;  %v3986_v48 = vand.u32 4294901760, %v3985_v36 }
 0x207   : > { %v21220_v32 = vsub.f32 %v2632_v47, %v21199_v10  ;;  %17084 = vmatprep.subr.bf16.mxu0 %v21031_v61  ;;  %17108 = vmatprep.subr.bf16.mxu1 %v21076_v57  ;;  %v21224_v28 = vpack.c.bf16 %v3972_v56, %v3965_v51  ;;  %v21227_v26 = vsub.f32 %v21148_v14, %v3841_v39  ;;  %v24112_v42 = vand.u32 4294901760, %v21157_v16  ;;  %v2640_v51 = vld [vmem:[#allocation5 + $0x50] sm:$0xff] }
 0x208   : > { %24804 = vst [vmem:[#allocation47_spill] sm:$0xff] %v21215_v5  ;;  %v21229_v21 = vsub.f32 %v2692_v24, %v3790_v7  ;;  %v21232_v9 = vpack.c.bf16 %v3793_v41, %v3790_v7  ;;  %3848 = vmatprep.mubr.f32.mxu0 %v3847_v1  ;;  %v24807_v62 = vand.u32 4294901760, %v21133_v8  ;;  %v24113_v35 = vand.u32 4294901760, %v21174_v18  ;;  %v24812_v7 = vld [vmem:[#allocation25_spill] sm:$0xff] }
 0x209   : > { %24805 = vst [vmem:[#allocation48_spill] sm:$0xff] %v21220_v32  ;;  %24806 = vst [vmem:[#allocation49_spill] sm:$0xff] %v21227_v26  ;;  %v21238_v36 = vand.u32 4294901760, %v2636_v46  ;;  %3735 = vmatmul.mubr.f32.gmra.mrb[68].mxu1 %v24793_v58  ;;  %17086 = vmatpush3.bf16.msra.mxu0 %v21064_v2  ;;  %v21242_v14 = vsub.f32 %v2693_v34, %v3793_v41  ;;  %v4111_v24 = vsub.f32 %v21137_v43, %v24111_v30  ;;  %v24813_v41 = vld [vmem:[#allocation22_spill] sm:$0xff] }
 0x20a   : > { %v4104_v47 = vsub.f32 %v21133_v8, %v24807_v62  ;;  %v21248_v57 = vsub.f32 %v2637_v63, %v21215_v5  ;;  %v21250_v39 = vand.u32 4294901760, %v2641_v54  ;;  %17110 = vmatpush3.bf16.msra.mxu1 %v21097_v27  ;;  %3740 = vmatprep.mubr.f32.mxu1 %v24798_v12  ;;  %v17119_v56 = vpack.c.bf16 %v4098_v45, %v4091_v33  ;;  %v15115_v62 = vpop.f32.mrb[16].mxu0  ;;  %v24814_v27 = vld [vmem:[#allocation37_spill] sm:$0xff] }
 0x20b   : > { %24808 = vst [vmem:[#allocation53_spill] sm:$0xff] %v21238_v36  ;;  %24809 = vst [vmem:[#allocation54_spill] sm:$0xff] %v21242_v14  ;;  %v21254_v58 = vpack.c.bf16 %v3986_v48, %v3979_v50  ;;  %17088 = vmatprep.subr.bf16.mxu0 %v21078_v60  ;;  %17112 = vmatprep.subr.bf16.mxu1 %v21107_v29  ;;  %v3992_v63 = vsub.f32 %v21157_v16, %v24112_v42  ;;  %v2645_v50 = vld [vmem:[#allocation5 + $0x78] sm:$0xff]  ;;  %v15116_v48 = vpop.f32.mrb[17].mxu0  ;;  %v21274_v34 = vand.u32 4294901760, %v2640_v51 }
 0x20c   : > { %24810 = vst [vmem:[#allocation55_spill] sm:$0xff] %v21248_v57  ;;  %24811 = vst [vmem:[#allocation56_spill] sm:$0xff] %v21250_v39  ;;  %v4105_v30 = vand.u32 4294901760, %v4104_v47  ;;  %v3999_v1 = vsub.f32 %v21174_v18, %v24113_v35  ;;  %v21272_v29 = vsub.f32 %v2636_v46, %v21238_v36  ;;  %v15117_v42 = vadd.f32 %v15116_v48, %v15115_v62  ;;  %v2644_v47 = vld [vmem:[#allocation5 + $0x70] sm:$0xff]  ;;  %v15118_v45 = vpop.f32.mrb[18].mxu0 }
 0x20d   : > { %24815 = vst [vmem:[#allocation25_spill] sm:$0xff] %v21274_v34  ;;  %3742 = vmatmul.mubr.f32.gmra.mrb[70].mxu1 %v24803_v22  ;;  %17090 = vmatpush3.bf16.msra.mxu0 %v21109_v38  ;;  %v4112_v12 = vand.u32 4294901760, %v4111_v24  ;;  %v21280_v33 = vsub.f32 %v2641_v54, %v21250_v39  ;;  %v24816_v46 = vand.u32 4294901760, %v21220_v32  ;;  %v21289_v48 = vand.u32 4294901760, %v2645_v50  ;;  %v15119_v62 = vpop.f32.mrb[19].mxu0 }
 0x20e   : > { %17114 = vmatpush3.bf16.msra.mxu1 %v21144_v11  ;;  %17092 = vmatprep.subr.bf16.mxu0 %v21131_v55  ;;  %v1451_v24 = vadd.f32 %v15117_v42, %v21114_v44  ;;  %v3993_v54 = vand.u32 4294901760, %v3992_v63  ;;  %v24818_v11 = vand.u32 4294901760, %v21212_v59  ;;  %v24819_v38 = vand.u32 4294901760, %v21227_v26 }
 0x20f   : > { %v3852_v35 = vsub.f32 %v21220_v32, %v24816_v46  ;;  %24817 = vst [vmem:[#allocation22_spill] sm:$0xff] %v21289_v48  ;;  %17116 = vmatprep.subr.bf16.mxu1 %v21182_v17  ;;  %4129 = vmatprep.mubr.f32.mxu1 %v21094_v13  ;;  %v4000_v22 = vand.u32 4294901760, %v3999_v1  ;;  %v21302_v44 = vsub.f32 %v2640_v51, %v21274_v34  ;;  %v21304_v42 = vand.u32 4294901760, %v2644_v47 }
 0x210   : > { %v4118_v55 = vsub.f32 %v21212_v59, %v24818_v11  ;;  %v4125_v46 = vsub.f32 %v21227_v26, %v24819_v38  ;;  %v15120_v17 = vadd.f32 %v15119_v62, %v15118_v45  ;;  %v17123_v63 = vpack.c.bf16 %v4112_v12, %v4105_v30  ;;  %v15121_v62 = vpop.f32.mrb[20].mxu0  ;;  %v15159_v13 = vpop.f32.mrb[16].mxu1 }
 0x211   : > { %24820 = vst [vmem:[#allocation37_spill] sm:$0xff] %v21304_v42  ;;  %17094 = vmatpush3.bf16.msra.mxu0 %v21172_v25  ;;  %v24821_v11 = vand.u32 4294901760, %v21248_v57  ;;  %v24822_v1 = vand.u32 4294901760, %v21229_v21  ;;  %v24823_v32 = vand.u32 4294901760, %v21242_v14  ;;  %v21320_v30 = vsub.f32 %v2645_v50, %v21289_v48 }
 0x212   : > { %17118 = vmatpush3.bf16.msra.mxu1 %v21224_v28  ;;  %17096 = vmatprep.subr.bf16.mxu0 %v21203_v37  ;;  %v1458_v12 = vadd.f32 %v15120_v17, %v21141_v52  ;;  %v4119_v38 = vand.u32 4294901760, %v4118_v55  ;;  %v4126_v28 = vand.u32 4294901760, %v4125_v46  ;;  %v15122_v37 = vpop.f32.mrb[21].mxu0  ;;  %v17125_v25 = vpack.c.bf16 %v4000_v22, %v3993_v54 }
 0x213   : > { %v3861_v60 = vsub.f32 %v21248_v57, %v24821_v11  ;;  %v4006_v51 = vsub.f32 %v21229_v21, %v24822_v1  ;;  %v4013_v45 = vsub.f32 %v21242_v14, %v24823_v32  ;;  %17120 = vmatprep.subr.bf16.mxu1 %v17119_v56  ;;  %v3853_v11 = vand.u32 4294901760, %v3852_v35  ;;  %v15160_v14 = vpop.f32.mrb[17].mxu1  ;;  %v15124_v46 = vpop.f32.mrb[22].mxu0 }
 0x214   : > { %v24824_v57 = vand.u32 4294901760, %v21272_v29  ;;  %v21328_v32 = vsub.f32 %v2644_v47, %v21304_v42  ;;  %v15123_v50 = vadd.f32 %v15122_v37, %v15121_v62  ;;  %v17135_v55 = vpack.c.bf16 %v20888_v23, %v20886_v31  ;;  %v15162_v2 = vpop.f32.mrb[18].mxu1 }
 0x215   : > { %17098 = vmatpush3.bf16.msra.mxu0 %v21232_v9  ;;  %v3862_v52 = vand.u32 4294901760, %v3861_v60  ;;  %v24825_v35 = vand.u32 4294901760, %v21280_v33  ;;  %v15161_v22 = vadd.f32 %v15160_v14, %v15159_v13  ;;  %v4007_v47 = vand.u32 4294901760, %v4006_v51 }
 0x216   : > { %v3867_v1 = vsub.f32 %v21272_v29, %v24824_v57  ;;  %17122 = vmatpush3.bf16.msra.mxu1 %v21254_v58  ;;  %v24826_v57 = vpack.c.bf16 %v24813_v41, %v24812_v7  ;;  %v4014_v37 = vand.u32 4294901760, %v4013_v45  ;;  %v24135_v54 = vand.u32 4294901760, %v21320_v30 }
 0x217   : > { %v3876_v56 = vsub.f32 %v21280_v33, %v24825_v35  ;;  %v1465_v60 = vadd.f32 %v15123_v50, %v21169_v53  ;;  %17124 = vmatprep.subr.bf16.mxu1 %v17123_v63  ;;  %v17127_v17 = vpack.c.bf16 %v4126_v28, %v4119_v38  ;;  %v21342_v62 = vadd.f32 %v15161_v22, %v1451_v24  ;;  %v15125_v35 = vpop.f32.mrb[23].mxu0 }
 0x218   : > { %17132 = vmatprep.subr.bf16.mxu0 %v24826_v57  ;;  %3854 = vmatmul.mubr.f32.vlgmr.msra.gmra.mrb[72].mxu0 %v3853_v11  ;;  %v3868_v13 = vand.u32 4294901760, %v3867_v1  ;;  %v24827_v14 = vand.u32 4294901760, %v21302_v44  ;;  %v24134_v51 = vand.u32 4294901760, %v21328_v32  ;;  %v15126_v45 = vadd.f32 %v15125_v35, %v15124_v46  ;;  %v15163_v57 = vpop.f32.mrb[19].mxu1 }
 0x219   : > { %v24828_v53 = vpack.c.bf16 %v20877_v4, %v24814_v27  ;;  %3863 = vmatprep.mubr.f32.mxu0 %v3862_v52  ;;  %v17137_v24 = vpack.c.bf16 %v20899_v15, %v20897_v19  ;;  %v3877_v63 = vand.u32 4294901760, %v3876_v56  ;;  %v17139_v38 = vpack.c.bf16 %v20922_v0, %v20908_v6  ;;  %v15165_v52 = vpop.f32.mrb[20].mxu1 }
 0x21a   : > { %v3882_v58 = vsub.f32 %v21302_v44, %v24827_v14  ;;  %v15164_v11 = vadd.f32 %v15163_v57, %v15162_v2  ;;  %17126 = vmatpush3.bf16.msra.mxu1 %v17125_v25  ;;  %v17129_v28 = vpack.c.bf16 %v4014_v37, %v4007_v47  ;;  %v3891_v1 = vsub.f32 %v21320_v30, %v24135_v54  ;;  %v15166_v2 = vpop.f32.mrb[21].mxu1  ;;  %v24829_v25 = vld [vmem:[#allocation30_spill] sm:$0xff]  ;;  %v24830_v37 = vld [vmem:[#allocation28_spill] sm:$0xff]  ;;  %v24833_v57 = vld [vmem:[#allocation21_spill] sm:$0xff] }
 0x21b   : > { %17134 = vmatpush3.bf16.msra.mxu0 %v24828_v53  ;;  %v1472_v50 = vadd.f32 %v15126_v45, %v21205_v40  ;;  %17128 = vmatprep.subr.bf16.mxu1 %v17127_v17  ;;  %v3897_v56 = vsub.f32 %v21328_v32, %v24134_v51  ;;  %v15167_v47 = vadd.f32 %v15166_v2, %v15165_v52  ;;  %v24832_v17 = vld [vmem:[#allocation33_spill] sm:$0xff]  ;;  %v24834_v53 = vld [vmem:[#allocation24_spill] sm:$0xff]  ;;  %v24838_v52 = vld [vmem:[#allocation38_spill] sm:$0xff] }
 0x21c   : > { %17136 = vmatprep.subr.bf16.mxu0 %v17135_v55  ;;  %v21359_v22 = vadd.f32 %v15164_v11, %v1458_v12  ;;  %3869 = vmatmul.mubr.f32.gmra.mrb[74].mxu0 %v3868_v13  ;;  %v3883_v46 = vand.u32 4294901760, %v3882_v58  ;;  %v17141_v55 = vpack.c.bf16 %v24829_v25, %v20955_v20  ;;  %v3892_v40 = vand.u32 4294901760, %v3891_v1  ;;  %v24831_v12 = vld [vmem:[#allocation46_spill] sm:$0xff]  ;;  %v15168_v14 = vpop.f32.mrb[22].mxu1  ;;  %v24836_v11 = vld [vmem:[#allocation27_spill] sm:$0xff] }
 0x21d   : > { %3878 = vmatprep.mubr.f32.mxu0 %v3877_v63  ;;  %v17143_v35 = vpack.c.bf16 %v24832_v17, %v24831_v12  ;;  %v21369_v13 = vadd.f32 %v15167_v47, %v1465_v60  ;;  %v3898_v58 = vand.u32 4294901760, %v3897_v56  ;;  %v15169_v45 = vpop.f32.mrb[23].mxu1  ;;  %v24837_v60 = vld [vmem:[#allocation39_spill] sm:$0xff]  ;;  %v24840_v56 = vld [vmem:[#allocation32_spill] sm:$0xff] }
 0x21e   : > { %17130 = vmatpush3.bf16.msra.mxu1 %v17129_v28  ;;  %v15170_v63 = vadd.f32 %v15169_v45, %v15168_v14  ;;  %v17147_v28 = vpack.c.bf16 %v24837_v60, %v24836_v11  ;;  %v24842_v47 = vld [vmem:[#allocation23_spill] sm:$0xff] }
 0x21f   : > { %17138 = vmatpush3.bf16.msra.mxu0 %v17137_v24  ;;  %17164 = vmatprep.subr.bf16.mxu1 %v24830_v37  ;;  %v17145_v24 = vpack.c.bf16 %v24834_v53, %v24833_v57  ;;  %v24845_v14 = vld [vmem:[#allocation35_spill] sm:$0xff] }
 0x220   : > { %17140 = vmatprep.subr.bf16.mxu0 %v17139_v38  ;;  %3884 = vmatmul.mubr.f32.gmra.mrb[76].mxu0 %v3883_v46  ;;  %v24835_v38 = vld [vmem:[#allocation26_spill] sm:$0xff]  ;;  %v21378_v1 = vadd.f32 %v15170_v63, %v1472_v50  ;;  %v17155_v63 = vpack.c.bf16 %v21137_v43, %v21133_v8  ;;  %v24848_v51 = vld [vmem:[#allocation31_spill] sm:$0xff] }
 0x221   : > { %4131 = vmatmul.mubr.f32.vlgmr.msra.gmra.mrb[72].mxu1 %v21199_v10  ;;  %3893 = vmatprep.mubr.f32.mxu0 %v3892_v40  ;;  %v24839_v46 = vld [vmem:[#allocation18_spill] sm:$0xff]  ;;  %v24843_v40 = vld [vmem:[#allocation51_spill] sm:$0xff]  ;;  %v24853_v10 = vand.u32 4294901760, %v24813_v41  ;;  %v24859_v41 = vand.u32 4294901760, %v20888_v23  ;;  %v24864_v23 = vand.u32 4294901760, %v20899_v15  ;;  %v24869_v15 = vand.u32 4294901760, %v20955_v20 }
 0x222   : > { %17166 = vmatpush3.bf16.msra.mxu1 %v24835_v38  ;;  %4136 = vmatprep.mubr.f32.mxu1 %v21215_v5  ;;  %v17149_v2 = vpack.c.bf16 %v24840_v56, %v24839_v46  ;;  %v24851_v5 = vld [vmem:[#allocation19_spill] sm:$0xff] }
 0x223   : > { %17142 = vmatpush3.bf16.msra.mxu0 %v17141_v55  ;;  %17168 = vmatprep.subr.bf16.mxu1 %v24838_v52  ;;  %v24841_v55 = vld [vmem:[#allocation20_spill] sm:$0xff] }
 0x224   : > { %17144 = vmatprep.subr.bf16.mxu0 %v17143_v35  ;;  %3899 = vmatmul.mubr.f32.gmra.mrb[78].mxu0 %v3898_v58  ;;  %v24844_v35 = vld [vmem:[#allocation43_spill] sm:$0xff]  ;;  %v24846_v58 = vld [vmem:[#allocation29_spill] sm:$0xff] }
 0x225   : > { %4138 = vmatmul.mubr.f32.gmra.mrb[74].mxu1 %v21238_v36  ;;  %v17151_v50 = vpack.c.bf16 %v24844_v35, %v24843_v40  ;;  %4287 = vmatprep.mubr.f32.mxu0 %v24845_v14  ;;  %v17153_v45 = vpack.c.bf16 %v24846_v58, %v21103_v3 }
 0x226   : > { %17170 = vmatpush3.bf16.msra.mxu1 %v24841_v55  ;;  %4143 = vmatprep.mubr.f32.mxu1 %v21250_v39 }
 0x227   : > { %17146 = vmatpush3.bf16.msra.mxu0 %v17145_v24  ;;  %17172 = vmatprep.subr.bf16.mxu1 %v24842_v47  ;;  %v24847_v24 = vld [vmem:[#allocation40_spill] sm:$0xff] }
 0x228   : > { %17148 = vmatprep.subr.bf16.mxu0 %v17147_v28  ;;  %v15203_v28 = vpop.f32.mrb[24].mxu0 }
 0x229   : > { %4145 = vmatmul.mubr.f32.gmra.mrb[76].mxu1 %v21274_v34  ;;  %v15204_v54 = vpop.f32.mrb[25].mxu0 }
 0x22a   : > { %17174 = vmatpush3.bf16.msra.mxu1 %v24847_v24  ;;  %4150 = vmatprep.mubr.f32.mxu1 %v21289_v48  ;;  %v15205_v39 = vadd.f32 %v15204_v54, %v15203_v28  ;;  %v17159_v48 = vpack.c.bf16 %v21227_v26, %v21212_v59  ;;  %v15206_v36 = vpop.f32.mrb[26].mxu0  ;;  %v24854_v26 = vld [vmem:[#allocation50_spill] sm:$0xff] }
 0x22b   : > { %17150 = vmatpush3.bf16.msra.mxu0 %v17149_v2  ;;  %17176 = vmatprep.subr.bf16.mxu1 %v24848_v51  ;;  %v17157_v2 = vpack.c.bf16 %v21174_v18, %v21157_v16  ;;  %v15207_v54 = vpop.f32.mrb[27].mxu0 }
 0x22c   : > { %17152 = vmatprep.subr.bf16.mxu0 %v17151_v50  ;;  %v1709_v34 = vadd.f32 %v15205_v39, %v21342_v62  ;;  %v24849_v50 = vand.u32 4294901760, %v24845_v14  ;;  %v15208_v28 = vadd.f32 %v15207_v54, %v15206_v36  ;;  %v24855_v54 = vand.u32 4294901760, %v24814_v27 }
 0x22d   : > { %4152 = vmatmul.mubr.f32.gmra.mrb[78].mxu1 %v21304_v42 }
 0x22e   : > { %17178 = vmatpush3.bf16.msra.mxu1 %v21009_v49  ;;  %4421 = vmatprep.mubr.f32.mxu1 %v24849_v50  ;;  %v1724_v62 = vadd.f32 %v15208_v28, %v21359_v22 }
 0x22f   : > { %17154 = vmatpush3.bf16.msra.mxu0 %v17153_v45  ;;  %17180 = vmatprep.subr.bf16.mxu1 %v21031_v61  ;;  %v24850_v45 = vld [vmem:[#allocation54_spill] sm:$0xff]  ;;  %v15209_v61 = vpop.f32.mrb[28].mxu0 }
 0x230   : > { %17156 = vmatprep.subr.bf16.mxu0 %v17155_v63  ;;  %v17161_v42 = vpack.c.bf16 %v24850_v45, %v21229_v21  ;;  %v24852_v63 = vand.u32 4294901760, %v24812_v7  ;;  %v15247_v14 = vpop.f32.mrb[24].mxu1  ;;  %v15210_v50 = vpop.f32.mrb[29].mxu0  ;;  %v24857_v7 = vld [vmem:[#allocation42_spill] sm:$0xff] }
 0x231   : > { %v15211_v36 = vadd.f32 %v15210_v50, %v15209_v61  ;;  %v24860_v61 = vld [vmem:[#allocation36_spill] sm:$0xff] }
 0x232   : > { %17182 = vmatpush3.bf16.msra.mxu1 %v24851_v5  ;;  %v17195_v39 = vpack.c.bf16 %v24853_v10, %v24852_v63  ;;  %v24856_v5 = vand.u32 4294901760, %v20877_v4  ;;  %v24858_v10 = vand.u32 4294901760, %v20886_v31  ;;  %v15212_v63 = vpop.f32.mrb[30].mxu0  ;;  %v24861_v4 = vld [vmem:[#allocation48_spill] sm:$0xff]  ;;  %v24863_v31 = vand.u32 4294901760, %v20897_v19 }
 0x233   : > { %17158 = vmatpush3.bf16.msra.mxu0 %v17157_v2  ;;  %17184 = vmatprep.subr.bf16.mxu1 %v24854_v26  ;;  %v15248_v2 = vpop.f32.mrb[25].mxu1  ;;  %v1739_v28 = vadd.f32 %v15211_v36, %v21369_v13  ;;  %v15213_v50 = vpop.f32.mrb[31].mxu0  ;;  %v24865_v36 = vld [vmem:[#allocation44_spill] sm:$0xff]  ;;  %v24873_v20 = vand.u32 4294901760, %v24861_v4 }
 0x234   : > { %17160 = vmatprep.subr.bf16.mxu0 %v17159_v48  ;;  %v17197_v48 = vpack.c.bf16 %v24856_v5, %v24855_v54  ;;  %v15249_v45 = vadd.f32 %v15248_v2, %v15247_v14  ;;  %v17199_v22 = vpack.c.bf16 %v24859_v41, %v24858_v10  ;;  %v15250_v27 = vpop.f32.mrb[26].mxu1  ;;  %v15214_v5 = vadd.f32 %v15213_v50, %v15212_v63  ;;  %v24868_v41 = vld [vmem:[#allocation34_spill] sm:$0xff] }
 0x235   : > { %v15251_v14 = vpop.f32.mrb[27].mxu1  ;;  %v17201_v2 = vpack.c.bf16 %v24864_v23, %v24863_v31  ;;  %v24875_v31 = vand.u32 4294901760, %v24834_v53  ;;  %v24880_v53 = vand.u32 4294901760, %v24839_v46  ;;  %v24886_v46 = vand.u32 4294901760, %v21302_v44 }
 0x236   : > { %17186 = vmatpush3.bf16.msra.mxu1 %v24857_v7  ;;  %v15252_v13 = vadd.f32 %v15251_v14, %v15250_v27  ;;  %v1754_v10 = vadd.f32 %v15214_v5, %v21378_v1  ;;  %v24871_v1 = vand.u32 4294901760, %v24831_v12 }
 0x237   : > { %17162 = vmatpush3.bf16.msra.mxu0 %v17161_v42  ;;  %17188 = vmatprep.subr.bf16.mxu1 %v24860_v61  ;;  %v21428_v42 = vadd.f32 %v15249_v45, %v1709_v34  ;;  %v24866_v34 = vand.u32 4294901760, %v20908_v6  ;;  %v24867_v45 = vand.u32 4294901760, %v20922_v0  ;;  %v24870_v6 = vand.u32 4294901760, %v24829_v25 }
 0x238   : > { %17196 = vmatprep.subr.bf16.mxu0 %v17195_v39  ;;  %v24862_v39 = vld [vmem:[#allocation55_spill] sm:$0xff]  ;;  %v15253_v63 = vpop.f32.mrb[28].mxu1  ;;  %v24874_v25 = vand.u32 4294901760, %v24833_v57  ;;  %v24879_v57 = vand.u32 4294901760, %v21272_v29 }
 0x239   : > { %v17203_v54 = vpack.c.bf16 %v24867_v45, %v24866_v34  ;;  %v15254_v19 = vpop.f32.mrb[29].mxu1  ;;  %v24876_v12 = vand.u32 4294901760, %v24862_v39 }
 0x23a   : > { %4290 = vmatmul.mubr.f32.vlgmr.msra.gmra.mrb[80].mxu0 %v24861_v4  ;;  %17190 = vmatpush3.bf16.msra.mxu1 %v24865_v36  ;;  %v15255_v0 = vadd.f32 %v15254_v19, %v15253_v63  ;;  %v17209_v23 = vpack.c.bf16 %v24875_v31, %v24874_v25 }
 0x23b   : > { %17198 = vmatpush3.bf16.msra.mxu0 %v17197_v48  ;;  %4296 = vmatprep.mubr.f32.mxu0 %v24862_v39  ;;  %v21443_v48 = vadd.f32 %v15252_v13, %v1724_v62  ;;  %v24872_v62 = vand.u32 4294901760, %v24832_v17  ;;  %v24877_v17 = vand.u32 4294901760, %v24836_v11  ;;  %v24882_v11 = vand.u32 4294901760, %v21280_v33  ;;  %v24885_v13 = vld [vmem:[#allocation52_spill] sm:$0xff] }
 0x23c   : > { %17200 = vmatprep.subr.bf16.mxu0 %v17199_v22  ;;  %17192 = vmatprep.subr.bf16.mxu1 %v24868_v41  ;;  %v17205_v22 = vpack.c.bf16 %v24870_v6, %v24869_v15  ;;  %v2000_v50 = vadd.f32 %v15255_v0, %v1739_v28  ;;  %v15256_v5 = vpop.f32.mrb[30].mxu1  ;;  %v24878_v28 = vand.u32 4294901760, %v24837_v60  ;;  %v24883_v60 = vand.u32 4294901760, %v24843_v40  ;;  %v24898_v15 = vld [vmem:[#allocation41_spill] sm:$0xff]  ;;  %v24900_v6 = vld [vmem:[#allocation54_spill] sm:$0xff]  ;;  %v24902_v0 = vld [vmem:[#allocation19_spill] sm:$0xff] }
 0x23d   : > { %v17207_v27 = vpack.c.bf16 %v24872_v62, %v24871_v1  ;;  %v15257_v14 = vpop.f32.mrb[31].mxu1  ;;  %v24890_v40 = vand.u32 4294901760, %v21133_v8  ;;  %v24895_v8 = vand.u32 4294901760, %v21212_v59 }
 0x23e   : > { %4299 = vmatmul.mubr.f32.gmra.mrb[82].mxu0 %v21272_v29  ;;  %17194 = vmatpush3.bf16.msra.mxu1 %v21232_v9  ;;  %v17211_v4 = vpack.c.bf16 %v24878_v28, %v24877_v17 }
 0x23f   : > { %17202 = vmatpush3.bf16.msra.mxu0 %v17201_v2  ;;  %4305 = vmatprep.mubr.f32.mxu0 %v21280_v33 }
 0x240   : > { %17204 = vmatprep.subr.bf16.mxu0 %v17203_v54  ;;  %17228 = vmatprep.subr.bf16.mxu1 %v24830_v37  ;;  %v15258_v37 = vadd.f32 %v15257_v14, %v15256_v5 }
 0x241   : > { %4425 = vmatmul.mubr.f32.vlgmr.msra.gmra.mrb[80].mxu1 %v24873_v20 }
 0x242   : > { %4308 = vmatmul.mubr.f32.gmra.mrb[84].mxu0 %v21302_v44  ;;  %17230 = vmatpush3.bf16.msra.mxu1 %v24835_v38  ;;  %v2007_v2 = vadd.f32 %v15258_v37, %v1754_v10  ;;  %v24881_v38 = vand.u32 4294901760, %v24840_v56  ;;  %v24887_v56 = vand.u32 4294901760, %v21103_v3  ;;  %v24892_v3 = vand.u32 4294901760, %v21328_v32  ;;  %v24903_v37 = vld [vmem:[#allocation45_spill] sm:$0xff] }
 0x243   : > { %17206 = vmatpush3.bf16.msra.mxu0 %v17205_v22  ;;  %4314 = vmatprep.mubr.f32.mxu0 %v21320_v30 }
 0x244   : > { %4432 = vmatprep.mubr.f32.mxu1 %v24876_v12  ;;  %17208 = vmatprep.subr.bf16.mxu0 %v17207_v27  ;;  %v17213_v39 = vpack.c.bf16 %v24881_v38, %v24880_v53 }
 0x245   : > { %17232 = vmatprep.subr.bf16.mxu1 %v24838_v52  ;;  %4436 = vmatmul.mubr.f32.gmra.mrb[82].mxu1 %v24879_v57  ;;  %v24884_v52 = vand.u32 4294901760, %v24844_v35  ;;  %v24891_v35 = vand.u32 4294901760, %v21137_v43  ;;  %v24896_v43 = vld [vmem:[#allocation49_spill] sm:$0xff]  ;;  %v24906_v57 = vld [vmem:[#allocation56_spill] sm:$0xff] }
 0x246   : > { %4317 = vmatmul.mubr.f32.gmra.mrb[86].mxu0 %v21328_v32  ;;  %17234 = vmatpush3.bf16.msra.mxu1 %v24841_v55  ;;  %v24888_v55 = vand.u32 4294901760, %v24846_v58  ;;  %v15291_v45 = vpop.f32.mrb[32].mxu0  ;;  %v24893_v58 = vand.u32 4294901760, %v21157_v16  ;;  %v24897_v10 = vand.u32 4294901760, %v24896_v43 }
 0x247   : > { %17210 = vmatpush3.bf16.msra.mxu0 %v17209_v23  ;;  %4443 = vmatprep.mubr.f32.mxu1 %v24882_v11  ;;  %v17215_v29 = vpack.c.bf16 %v24884_v52, %v24883_v60  ;;  %v17219_v34 = vpack.c.bf16 %v24891_v35, %v24890_v40  ;;  %v15292_v44 = vpop.f32.mrb[33].mxu0  ;;  %v24907_v11 = vld [vmem:[#allocation25_spill] sm:$0xff] }
 0x248   : > { %17212 = vmatprep.subr.bf16.mxu0 %v17211_v4  ;;  %17236 = vmatprep.subr.bf16.mxu1 %v24842_v47  ;;  %v17217_v33 = vpack.c.bf16 %v24888_v55, %v24887_v56  ;;  %v24889_v47 = vand.u32 4294901760, %v21320_v30  ;;  %v15293_v54 = vadd.f32 %v15292_v44, %v15291_v45  ;;  %v24894_v30 = vand.u32 4294901760, %v21174_v18  ;;  %v24905_v4 = vld [vmem:[#allocation53_spill] sm:$0xff] }
 0x249   : > { %4624 = vmatprep.mubr.f32.mxu0 %v24885_v13  ;;  %4447 = vmatmul.mubr.f32.gmra.mrb[84].mxu1 %v24886_v46  ;;  %v17223_v63 = vpack.c.bf16 %v24897_v10, %v24895_v8  ;;  %v24899_v18 = vand.u32 4294901760, %v21229_v21  ;;  %v24909_v52 = vld [vmem:[#allocation37_spill] sm:$0xff] }
 0x24a   : > { %17238 = vmatpush3.bf16.msra.mxu1 %v24847_v24  ;;  %4454 = vmatprep.mubr.f32.mxu1 %v24889_v47  ;;  %v17221_v24 = vpack.c.bf16 %v24894_v30, %v24893_v58  ;;  %v15294_v19 = vpop.f32.mrb[34].mxu0 }
 0x24b   : > { %17214 = vmatpush3.bf16.msra.mxu0 %v17213_v39  ;;  %17240 = vmatprep.subr.bf16.mxu1 %v24848_v51  ;;  %v2145_v51 = vadd.f32 %v15293_v54, %v21428_v42  ;;  %v15295_v32 = vpop.f32.mrb[35].mxu0 }
 0x24c   : > { %17216 = vmatprep.subr.bf16.mxu0 %v17215_v29  ;;  %v15296_v16 = vadd.f32 %v15295_v32, %v15294_v19 }
 0x24d   : > { %4458 = vmatmul.mubr.f32.gmra.mrb[86].mxu1 %v24892_v3 }
 0x24e   : > { %17242 = vmatpush3.bf16.msra.mxu1 %v21009_v49  ;;  %4749 = vmatprep.mubr.f32.mxu1 %v24885_v13  ;;  %v24901_v49 = vand.u32 4294901760, %v24900_v6  ;;  %v2154_v59 = vadd.f32 %v15296_v16, %v21443_v48  ;;  %v15297_v1 = vpop.f32.mrb[36].mxu0 }
 0x24f   : > { %17218 = vmatpush3.bf16.msra.mxu0 %v17217_v33  ;;  %17244 = vmatprep.subr.bf16.mxu1 %v24898_v15  ;;  %v15298_v62 = vpop.f32.mrb[37].mxu0 }
 0x250   : > { %17220 = vmatprep.subr.bf16.mxu0 %v17219_v34  ;;  %v17225_v22 = vpack.c.bf16 %v24901_v49, %v24899_v18  ;;  %v15335_v42 = vpop.f32.mrb[32].mxu1  ;;  %v15299_v27 = vadd.f32 %v15298_v62, %v15297_v1 }
 0x251   : > { %v15336_v5 = vpop.f32.mrb[33].mxu1 }
 0x252   : > { %17246 = vmatpush3.bf16.msra.mxu1 %v24902_v0  ;;  %v15337_v14 = vadd.f32 %v15336_v5, %v15335_v42  ;;  %v2163_v21 = vadd.f32 %v15299_v27, %v2000_v50  ;;  %v15300_v20 = vpop.f32.mrb[38].mxu0 }
 0x253   : > { %17222 = vmatpush3.bf16.msra.mxu0 %v17221_v24  ;;  %17248 = vmatprep.subr.bf16.mxu1 %v24854_v26  ;;  %v15301_v23 = vpop.f32.mrb[39].mxu0  ;;  %v24904_v26 = vld [vmem:[#allocation47_spill] sm:$0xff] }
 0x254   : > { %17224 = vmatprep.subr.bf16.mxu0 %v17223_v63  ;;  %v2280_v25 = vadd.f32 %v15337_v14, %v2145_v51  ;;  %v15338_v31 = vpop.f32.mrb[34].mxu1  ;;  %v15302_v48 = vadd.f32 %v15301_v23, %v15300_v20  ;;  %v14900_v23 = vld [vmem:[%s440_s19] ss:$0 sm:$0xff] }
 0x255   : > { %v15339_v12 = vpop.f32.mrb[35].mxu1 }
 0x256   : > { %17250 = vmatpush3.bf16.msra.mxu1 %v24857_v7  ;;  %v15340_v17 = vadd.f32 %v15339_v12, %v15338_v31  ;;  %v2172_v28 = vadd.f32 %v15302_v48, %v2007_v2 }
 0x257   : > { %17226 = vmatpush3.bf16.msra.mxu0 %v17225_v22  ;;  %17252 = vmatprep.subr.bf16.mxu1 %v24860_v61 }
 0x258   : > { %v2291_v7 = vadd.f32 %v15340_v17, %v2154_v59  ;;  %v15341_v50 = vpop.f32.mrb[36].mxu1 }
 0x259   : > { %v15342_v61 = vpop.f32.mrb[37].mxu1 }
 0x25a   : > { %4626 = vmatmul.mubr.f32.vlgmr.msra.gmra.mrb[88].mxu0 %v24903_v37  ;;  %17254 = vmatpush3.bf16.msra.mxu1 %v24865_v36  ;;  %v15343_v53 = vadd.f32 %v15342_v61, %v15341_v50  ;;  %v24908_v36 = vld [vmem:[#allocation22_spill] sm:$0xff] }
 0x25b   : > { %4631 = vmatprep.mubr.f32.mxu0 %v24904_v26  ;;  %17256 = vmatprep.subr.bf16.mxu1 %v24868_v41 }
 0x25c   : > { %v2302_v38 = vadd.f32 %v15343_v53, %v2163_v21  ;;  %v15344_v39 = vpop.f32.mrb[38].mxu1 }
 0x25d   : > { %v15345_v60 = vpop.f32.mrb[39].mxu1 }
 0x25e   : > { %4633 = vmatmul.mubr.f32.gmra.mrb[90].mxu0 %v24905_v4  ;;  %17258 = vmatpush3.bf16.msra.mxu1 %v21232_v9  ;;  %v15346_v41 = vadd.f32 %v15345_v60, %v15344_v39 }
 0x25f   : > { %4638 = vmatprep.mubr.f32.mxu0 %v24906_v57 }
 0x260   : > { %v2313_v2 = vadd.f32 %v15346_v41, %v2172_v28 }
 0x261   : > { %4751 = vmatmul.mubr.f32.vlgmr.msra.gmra.mrb[88].mxu1 %v24903_v37 }
 0x262   : > { %4640 = vmatmul.mubr.f32.gmra.mrb[92].mxu0 %v24907_v11  ;;  %4756 = vmatprep.mubr.f32.mxu1 %v24904_v26 }
 0x263   : > { %4645 = vmatprep.mubr.f32.mxu0 %v24908_v36 }
 0x265   : > { %4758 = vmatmul.mubr.f32.gmra.mrb[90].mxu1 %v24905_v4 }
 0x266   : > { %4647 = vmatmul.mubr.f32.gmra.mrb[94].mxu0 %v24909_v52  ;;  %4763 = vmatprep.mubr.f32.mxu1 %v24906_v57  ;;  %v15379_v9 = vpop.f32.mrb[40].mxu0 }
 0x267   : > { %v15380_v29 = vpop.f32.mrb[41].mxu0 }
 0x268   : > { %v15381_v13 = vadd.f32 %v15380_v29, %v15379_v9 }
 0x269   : > { %4765 = vmatmul.mubr.f32.gmra.mrb[92].mxu1 %v24907_v11 }
 0x26a   : > { %4770 = vmatprep.mubr.f32.mxu1 %v24908_v36  ;;  %v2481_v46 = vadd.f32 %v15381_v13, %v2280_v25  ;;  %v15382_v56 = vpop.f32.mrb[42].mxu0 }
 0x26b   : > { %v15383_v55 = vpop.f32.mrb[43].mxu0 }
 0x26c   : > { %v15384_v33 = vadd.f32 %v15383_v55, %v15382_v56 }
 0x26d   : > { %4772 = vmatmul.mubr.f32.gmra.mrb[94].mxu1 %v24909_v52 }
 0x26e   : > { %v2488_v47 = vadd.f32 %v15384_v33, %v2291_v7  ;;  %v15385_v40 = vpop.f32.mrb[44].mxu0 }
 0x26f   : > { %v15386_v34 = vpop.f32.mrb[45].mxu0 }
 0x270   : > { %v15423_v35 = vpop.f32.mrb[40].mxu1  ;;  %v15387_v45 = vadd.f32 %v15386_v34, %v15385_v40 }
 0x271   : > { %v15424_v44 = vpop.f32.mrb[41].mxu1 }
 0x272   : > { %v15425_v54 = vadd.f32 %v15424_v44, %v15423_v35  ;;  %v2495_v3 = vadd.f32 %v15387_v45, %v2302_v38  ;;  %v15388_v58 = vpop.f32.mrb[46].mxu0 }
 0x273   : > { %v15389_v8 = vpop.f32.mrb[47].mxu0 }
 0x274   : > { %v21543_v30 = vadd.f32 %v15425_v54, %v2481_v46  ;;  %v15426_v24 = vpop.f32.mrb[42].mxu1  ;;  %v15390_v43 = vadd.f32 %v15389_v8, %v15388_v58 }
 0x275   : > { %v15427_v10 = vpop.f32.mrb[43].mxu1 }
 0x276   : > { %24910 = vst [vmem:[#allocation30_spill] sm:$0xff] %v21543_v30  ;;  %v4811_v63 = vsel %vm4809_vm0, %v21543_v30, 0  ;;  %v15428_v51 = vadd.f32 %v15427_v10, %v15426_v24  ;;  %v2502_v15 = vadd.f32 %v15390_v43, %v2313_v2 }
 0x277   : > { %v21547_v19 = vand.u32 4294901760, %v4811_v63 }
 0x278   : > { %v21549_v32 = vadd.f32 %v15428_v51, %v2488_v47  ;;  %v15429_v16 = vpop.f32.mrb[44].mxu1 }
 0x279   : > { %v21552_v18 = vsub.f32 %v4811_v63, %v21547_v19  ;;  %v15430_v6 = vpop.f32.mrb[45].mxu1 }
 0x27a   : > { %24911 = vst [vmem:[#allocation28_spill] sm:$0xff] %v21549_v32  ;;  %v15431_v49 = vadd.f32 %v15430_v6, %v15429_v16 }
 0x27b   : > { %v4891_v22 = vand.u32 4294901760, %v21552_v18 }
 0x27c   : > { %v21555_v0 = vadd.f32 %v15431_v49, %v2495_v3  ;;  %v15432_v59 = vpop.f32.mrb[46].mxu1 }
 0x27d   : > { %v15433_v1 = vpop.f32.mrb[47].mxu1  ;;  %v4892_v42 = vsub.f32 %v21552_v18, %v4891_v22 }
 0x27e   : > { %24912 = vst [vmem:[#allocation46_spill] sm:$0xff] %v21555_v0  ;;  %v15434_v62 = vadd.f32 %v15433_v1, %v15432_v59 }
 0x27f   : > { %v4893_v27 = vand.u32 4294901760, %v4892_v42 }
 0x280   : > { %v21560_v5 = vadd.f32 %v15434_v62, %v2502_v15 }
 0x281   : > { %16159 = vmatprep.mubr.f32.mxu0 %v4893_v27 }
 0x282   : > { %24913 = vst [vmem:[#allocation33_spill] sm:$0xff] %v21560_v5 }
 0x286   : > { %v15467_v14 = vpop.f32.mrb[48].mxu0 }
 0x287   : > { %v15468_v21 = vpop.f32.mrb[49].mxu0 }
 0x288   : > { %v15469_v20 = vadd.f32 %v15468_v21, %v15467_v14 }
 0x28a   : > { %v15470_v25 = vpop.f32.mrb[50].mxu0  ;;  %v2826_v12 = vadd.f32 %v15469_v20, %v14900_v23 }
 0x28b   : > { %v15471_v31 = vpop.f32.mrb[51].mxu0 }
 0x28c   : > { %v15472_v37 = vadd.f32 %v15471_v31, %v15470_v25 }
 0x28e   : > { %v15473_v48 = vpop.f32.mrb[52].mxu0  ;;  %v2841_v53 = vadd.f32 %v15472_v37, %v14900_v23 }
 0x28f   : > { %v15474_v17 = vpop.f32.mrb[53].mxu0 }
 0x290   : > { %v15511_v26 = vpop.f32.mrb[48].mxu1  ;;  %v15475_v7 = vadd.f32 %v15474_v17, %v15473_v48 }
 0x291   : > { %v15512_v28 = vpop.f32.mrb[49].mxu1 }
 0x292   : > { %v15513_v50 = vadd.f32 %v15512_v28, %v15511_v26  ;;  %v2856_v4 = vadd.f32 %v15475_v7, %v14900_v23  ;;  %v15476_v61 = vpop.f32.mrb[54].mxu0 }
 0x293   : > { %v15477_v39 = vpop.f32.mrb[55].mxu0 }
 0x294   : > { %v3103_v57 = vadd.f32 %v15513_v50, %v2826_v12  ;;  %v15514_v38 = vpop.f32.mrb[50].mxu1  ;;  %v15478_v60 = vadd.f32 %v15477_v39, %v15476_v61 }
 0x295   : > { %v15515_v11 = vpop.f32.mrb[51].mxu1 }
 0x296   : > { %v15516_v36 = vadd.f32 %v15515_v11, %v15514_v38  ;;  %v2871_v41 = vadd.f32 %v15478_v60, %v14900_v23 }
 0x298   : > { %v3110_v2 = vadd.f32 %v15516_v36, %v2841_v53  ;;  %v15517_v52 = vpop.f32.mrb[52].mxu1 }
 0x299   : > { %v15518_v9 = vpop.f32.mrb[53].mxu1 }
 0x29a   : > { %v15519_v29 = vadd.f32 %v15518_v9, %v15517_v52 }
 0x29c   : > { %v3117_v13 = vadd.f32 %v15519_v29, %v2856_v4  ;;  %v15520_v46 = vpop.f32.mrb[54].mxu1 }
 0x29d   : > { %v15521_v56 = vpop.f32.mrb[55].mxu1 }
 0x29e   : > { %v15522_v55 = vadd.f32 %v15521_v56, %v15520_v46 }
 0x2a0   : > { %v3124_v33 = vadd.f32 %v15522_v55, %v2871_v41 }
 0x2a8   : > { %v15555_v47 = vpop.f32.mrb[56].mxu0 }
 0x2a9   : > { %v15556_v40 = vpop.f32.mrb[57].mxu0 }
 0x2aa   : > { %v15557_v35 = vadd.f32 %v15556_v40, %v15555_v47 }
 0x2ac   : > { %v3262_v34 = vadd.f32 %v15557_v35, %v3103_v57 }
 0x2ad   : > { %v15558_v45 = vpop.f32.mrb[58].mxu0 }
 0x2ae   : > { %v15559_v44 = vpop.f32.mrb[59].mxu0 }
 0x2af   : > { %v15560_v54 = vadd.f32 %v15559_v44, %v15558_v45 }
 0x2b1   : > { %v3271_v3 = vadd.f32 %v15560_v54, %v3110_v2  ;;  %v15561_v58 = vpop.f32.mrb[60].mxu0 }
 0x2b2   : > { %v15562_v8 = vpop.f32.mrb[61].mxu0 }
 0x2b3   : > { %v15563_v43 = vadd.f32 %v15562_v8, %v15561_v58 }
 0x2b4   : > { %v15599_v24 = vpop.f32.mrb[56].mxu1 }
 0x2b5   : > { %v15600_v10 = vpop.f32.mrb[57].mxu1  ;;  %v3280_v51 = vadd.f32 %v15563_v43, %v3117_v13  ;;  %v15564_v15 = vpop.f32.mrb[62].mxu0 }
 0x2b6   : > { %v15601_v63 = vadd.f32 %v15600_v10, %v15599_v24  ;;  %v15565_v49 = vpop.f32.mrb[63].mxu0 }
 0x2b7   : > { %v15566_v59 = vadd.f32 %v15565_v49, %v15564_v15 }
 0x2b8   : > { %v3397_v16 = vadd.f32 %v15601_v63, %v3262_v34  ;;  %v15602_v6 = vpop.f32.mrb[58].mxu1 }
 0x2b9   : > { %v15603_v1 = vpop.f32.mrb[59].mxu1  ;;  %v3289_v62 = vadd.f32 %v15566_v59, %v3124_v33 }
 0x2ba   : > { %v15604_v42 = vadd.f32 %v15603_v1, %v15602_v6 }
 0x2bc   : > { %v3408_v27 = vadd.f32 %v15604_v42, %v3271_v3 }
 0x2be   : > { %v15605_v14 = vpop.f32.mrb[60].mxu1 }
 0x2bf   : > { %v15606_v21 = vpop.f32.mrb[61].mxu1 }
 0x2c0   : > { %v15607_v20 = vadd.f32 %v15606_v21, %v15605_v14 }
 0x2c2   : > { %v3419_v25 = vadd.f32 %v15607_v20, %v3280_v51  ;;  %v15608_v31 = vpop.f32.mrb[62].mxu1 }
 0x2c3   : > { %v15609_v23 = vpop.f32.mrb[63].mxu1 }
 0x2c4   : > { %v15610_v37 = vadd.f32 %v15609_v23, %v15608_v31 }
 0x2c6   : > { %v3430_v48 = vadd.f32 %v15610_v37, %v3289_v62 }
 0x2cb   : > { %v15643_v12 = vpop.f32.mrb[64].mxu0 }
 0x2cc   : > { %v15644_v26 = vpop.f32.mrb[65].mxu0 }
 0x2cd   : > { %v15645_v17 = vadd.f32 %v15644_v26, %v15643_v12 }
 0x2cf   : > { %v3598_v28 = vadd.f32 %v15645_v17, %v3397_v16  ;;  %v15646_v7 = vpop.f32.mrb[66].mxu0 }
 0x2d0   : > { %v15647_v50 = vpop.f32.mrb[67].mxu0 }
 0x2d1   : > { %v15648_v4 = vadd.f32 %v15647_v50, %v15646_v7 }
 0x2d3   : > { %v3605_v61 = vadd.f32 %v15648_v4, %v3408_v27  ;;  %v15649_v57 = vpop.f32.mrb[68].mxu0 }
 0x2d4   : > { %v15687_v53 = vpop.f32.mrb[64].mxu1  ;;  %v15650_v38 = vpop.f32.mrb[69].mxu0 }
 0x2d5   : > { %v15651_v39 = vadd.f32 %v15650_v38, %v15649_v57  ;;  %v15688_v11 = vpop.f32.mrb[65].mxu1 }
 0x2d6   : > { %v15689_v60 = vadd.f32 %v15688_v11, %v15687_v53 }
 0x2d7   : > { %v3612_v36 = vadd.f32 %v15651_v39, %v3419_v25  ;;  %v15652_v41 = vpop.f32.mrb[70].mxu0 }
 0x2d8   : > { %v3723_v2 = vadd.f32 %v15689_v60, %v3598_v28  ;;  %v15690_v52 = vpop.f32.mrb[66].mxu1  ;;  %v15653_v9 = vpop.f32.mrb[71].mxu0 }
 0x2d9   : > { %v15654_v29 = vadd.f32 %v15653_v9, %v15652_v41  ;;  %v15691_v13 = vpop.f32.mrb[67].mxu1 }
 0x2da   : > { %v15692_v46 = vadd.f32 %v15691_v13, %v15690_v52 }
 0x2db   : > { %v3619_v56 = vadd.f32 %v15654_v29, %v3430_v48 }
 0x2dc   : > { %v3730_v55 = vadd.f32 %v15692_v46, %v3605_v61  ;;  %v15693_v33 = vpop.f32.mrb[68].mxu1 }
 0x2dd   : > { %v15694_v47 = vpop.f32.mrb[69].mxu1 }
 0x2de   : > { %v15695_v40 = vadd.f32 %v15694_v47, %v15693_v33 }
 0x2e0   : > { %v3737_v35 = vadd.f32 %v15695_v40, %v3612_v36  ;;  %v15696_v34 = vpop.f32.mrb[70].mxu1 }
 0x2e1   : > { %v15697_v45 = vpop.f32.mrb[71].mxu1 }
 0x2e2   : > { %v15698_v44 = vadd.f32 %v15697_v45, %v15696_v34 }
 0x2e4   : > { %v3744_v54 = vadd.f32 %v15698_v44, %v3619_v56 }
 0x2eb   : > { %v15731_v3 = vpop.f32.mrb[72].mxu0 }
 0x2ec   : > { %v15732_v58 = vpop.f32.mrb[73].mxu0 }
 0x2ed   : > { %v15733_v24 = vadd.f32 %v15732_v58, %v15731_v3 }
 0x2ef   : > { %v3856_v8 = vadd.f32 %v15733_v24, %v3723_v2  ;;  %v15734_v43 = vpop.f32.mrb[74].mxu0 }
 0x2f0   : > { %v15735_v10 = vpop.f32.mrb[75].mxu0 }
 0x2f1   : > { %v15736_v63 = vadd.f32 %v15735_v10, %v15734_v43 }
 0x2f3   : > { %v3871_v51 = vadd.f32 %v15736_v63, %v3730_v55  ;;  %v15737_v15 = vpop.f32.mrb[76].mxu0 }
 0x2f4   : > { %v15775_v16 = vpop.f32.mrb[72].mxu1  ;;  %v15738_v6 = vpop.f32.mrb[77].mxu0 }
 0x2f5   : > { %v15739_v49 = vadd.f32 %v15738_v6, %v15737_v15  ;;  %v15776_v59 = vpop.f32.mrb[73].mxu1 }
 0x2f6   : > { %v15777_v1 = vadd.f32 %v15776_v59, %v15775_v16 }
 0x2f7   : > { %v3886_v42 = vadd.f32 %v15739_v49, %v3737_v35  ;;  %v15740_v62 = vpop.f32.mrb[78].mxu0 }
 0x2f8   : > { %v4133_v27 = vadd.f32 %v15777_v1, %v3856_v8  ;;  %v15778_v14 = vpop.f32.mrb[74].mxu1  ;;  %v15741_v21 = vpop.f32.mrb[79].mxu0 }
 0x2f9   : > { %v15742_v20 = vadd.f32 %v15741_v21, %v15740_v62  ;;  %v15779_v25 = vpop.f32.mrb[75].mxu1 }
 0x2fa   : > { %v15780_v31 = vadd.f32 %v15779_v25, %v15778_v14  ;;  %v4814_v25 = vsel %vm4809_vm0, %v21549_v32, 0 }
 0x2fb   : > { %v3901_v23 = vadd.f32 %v15742_v20, %v3744_v54 }
 0x2fc   : > { %v4140_v37 = vadd.f32 %v15780_v31, %v3871_v51  ;;  %v15781_v48 = vpop.f32.mrb[76].mxu1 }
 0x2fd   : > { %v15782_v12 = vpop.f32.mrb[77].mxu1 }
 0x2fe   : > { %v15783_v26 = vadd.f32 %v15782_v12, %v15781_v48 }
 0x300   : > { %v4147_v17 = vadd.f32 %v15783_v26, %v3886_v42  ;;  %v15784_v28 = vpop.f32.mrb[78].mxu1 }
 0x301   : > { %v15785_v7 = vpop.f32.mrb[79].mxu1 }
 0x302   : > { %v15786_v50 = vadd.f32 %v15785_v7, %v15784_v28 }
 0x304   : > { %v4154_v4 = vadd.f32 %v15786_v50, %v3901_v23 }
 0x30d   : > { %v15819_v61 = vpop.f32.mrb[80].mxu0 }
 0x30e   : > { %v15820_v57 = vpop.f32.mrb[81].mxu0 }
 0x30f   : > { %v15821_v53 = vadd.f32 %v15820_v57, %v15819_v61 }
 0x311   : > { %v4292_v38 = vadd.f32 %v15821_v53, %v4133_v27  ;;  %v15822_v39 = vpop.f32.mrb[82].mxu0 }
 0x312   : > { %v15823_v11 = vpop.f32.mrb[83].mxu0 }
 0x313   : > { %v15824_v60 = vadd.f32 %v15823_v11, %v15822_v39 }
 0x314   : > { %v15863_v2 = vpop.f32.mrb[80].mxu1 }
 0x315   : > { %v4301_v36 = vadd.f32 %v15824_v60, %v4140_v37  ;;  %v15825_v41 = vpop.f32.mrb[84].mxu0  ;;  %v15864_v29 = vpop.f32.mrb[81].mxu1 }
 0x316   : > { %v15826_v52 = vpop.f32.mrb[85].mxu0  ;;  %v15865_v13 = vadd.f32 %v15864_v29, %v15863_v2 }
 0x317   : > { %v15827_v9 = vadd.f32 %v15826_v52, %v15825_v41 }
 0x318   : > { %v4427_v55 = vadd.f32 %v15865_v13, %v4292_v38  ;;  %v15866_v33 = vpop.f32.mrb[82].mxu1 }
 0x319   : > { %v4310_v46 = vadd.f32 %v15827_v9, %v4147_v17  ;;  %v15828_v56 = vpop.f32.mrb[86].mxu0  ;;  %v15867_v35 = vpop.f32.mrb[83].mxu1  ;;  %v21571_v17 = vand.u32 4294901760, %v4814_v25 }
 0x31a   : > { %v15829_v47 = vpop.f32.mrb[87].mxu0  ;;  %v15868_v34 = vadd.f32 %v15867_v35, %v15866_v33 }
 0x31b   : > { %v15830_v40 = vadd.f32 %v15829_v47, %v15828_v56  ;;  %v21580_v60 = vsub.f32 %v4814_v25, %v21571_v17 }
 0x31c   : > { %v4438_v44 = vadd.f32 %v15868_v34, %v4301_v36  ;;  %v15869_v54 = vpop.f32.mrb[84].mxu1 }
 0x31d   : > { %v4319_v45 = vadd.f32 %v15830_v40, %v4154_v4  ;;  %v15870_v3 = vpop.f32.mrb[85].mxu1  ;;  %v4901_v40 = vand.u32 4294901760, %v21580_v60 }
 0x31e   : > { %v15871_v58 = vadd.f32 %v15870_v3, %v15869_v54 }
 0x320   : > { %v4449_v24 = vadd.f32 %v15871_v58, %v4310_v46  ;;  %v15872_v8 = vpop.f32.mrb[86].mxu1 }
 0x321   : > { %v15873_v43 = vpop.f32.mrb[87].mxu1 }
 0x322   : > { %v15874_v10 = vadd.f32 %v15873_v43, %v15872_v8 }
 0x324   : > { %v4460_v63 = vadd.f32 %v15874_v10, %v4319_v45 }
 0x32d   : > { %v15907_v51 = vpop.f32.mrb[88].mxu0 }
 0x32e   : > { %v15908_v15 = vpop.f32.mrb[89].mxu0 }
 0x32f   : > { %v15909_v16 = vadd.f32 %v15908_v15, %v15907_v51 }
 0x331   : > { %v4628_v6 = vadd.f32 %v15909_v16, %v4427_v55  ;;  %v15910_v49 = vpop.f32.mrb[90].mxu0 }
 0x332   : > { %v15911_v59 = vpop.f32.mrb[91].mxu0 }
 0x333   : > { %v15912_v1 = vadd.f32 %v15911_v59, %v15910_v49 }
 0x334   : > { %v15951_v27 = vpop.f32.mrb[88].mxu1 }
 0x335   : > { %v4635_v42 = vadd.f32 %v15912_v1, %v4438_v44  ;;  %v15913_v62 = vpop.f32.mrb[92].mxu0  ;;  %v15952_v20 = vpop.f32.mrb[89].mxu1 }
 0x336   : > { %v15914_v14 = vpop.f32.mrb[93].mxu0  ;;  %v15953_v31 = vadd.f32 %v15952_v20, %v15951_v27 }
 0x337   : > { %v15915_v21 = vadd.f32 %v15914_v14, %v15913_v62 }
 0x338   : > { %v21569_v48 = vadd.f32 %v15953_v31, %v4628_v6  ;;  %v15954_v12 = vpop.f32.mrb[90].mxu1 }
 0x339   : > { %v4642_v23 = vadd.f32 %v15915_v21, %v4449_v24  ;;  %v15916_v37 = vpop.f32.mrb[94].mxu0  ;;  %v15955_v7 = vpop.f32.mrb[91].mxu1 }
 0x33a   : > { %24914 = vst [vmem:[#allocation21_spill] sm:$0xff] %v21569_v48  ;;  %v15917_v26 = vpop.f32.mrb[95].mxu0  ;;  %v4817_v50 = vsel %vm4809_vm0, %v21569_v48, 0  ;;  %v5360_v4 = vand.u32 4294901760, %v21569_v48  ;;  %v15956_v61 = vadd.f32 %v15955_v7, %v15954_v12 }
 0x33b   : > { %v15918_v28 = vadd.f32 %v15917_v26, %v15916_v37  ;;  %v4823_v57 = vand.u32 4294901760, %v4817_v50 }
 0x33c   : > { %v5448_v38 = vsub.f32 %v21569_v48, %v5360_v4  ;;  %v21577_v39 = vadd.f32 %v15956_v61, %v4635_v42  ;;  %v15957_v11 = vpop.f32.mrb[92].mxu1  ;;  %v24185_v48 = vmov 0.0  }
 0x33d   : > { %v4649_v53 = vadd.f32 %v15918_v28, %v4460_v63  ;;  %v15958_v36 = vpop.f32.mrb[93].mxu1  ;;  %v4911_v41 = vsub.f32 %v4817_v50, %v4823_v57  ;;  %v4902_v63 = vsub.f32 %v21580_v60, %v4901_v40 }
 0x33e   : > { %24915 = vst [vmem:[#allocation24_spill] sm:$0xff] %v21577_v39  ;;  %v4820_v2 = vsel %vm4809_vm0, %v21577_v39, 0  ;;  %v5363_v52 = vand.u32 4294901760, %v21577_v39  ;;  %v15959_v9 = vadd.f32 %v15958_v36, %v15957_v11  ;;  %v5449_v13 = vand.u32 4294901760, %v5448_v38  ;;  %v21642_v36 = vld [vmem:[%s19186_s30 + $0x18] sm:$0xff] }
 0x33f   : > { %v4826_v29 = vand.u32 4294901760, %v4820_v2  ;;  %v4912_v46 = vand.u32 4294901760, %v4911_v41  ;;  %v4903_v14 = vand.u32 4294901760, %v4902_v63 }
 0x340   : > { %v21585_v56 = vpack.c.bf16 %v5363_v52, %v5360_v4  ;;  %v5455_v55 = vsub.f32 %v21577_v39, %v5363_v52  ;;  %v21588_v33 = vadd.f32 %v15959_v9, %v4642_v23  ;;  %v15960_v47 = vpop.f32.mrb[94].mxu1  ;;  %v5450_v3 = vsub.f32 %v5448_v38, %v5449_v13  ;;  %v21650_v9 = vld [vmem:[%s19186_s30 + $0x10] sm:$0xff] }
 0x341   : > { %v17259_v35 = vpack.c.bf16 %v4826_v29, %v4823_v57  ;;  %v15961_v34 = vpop.f32.mrb[95].mxu1  ;;  %v4918_v45 = vsub.f32 %v4820_v2, %v4826_v29  ;;  %v4913_v24 = vsub.f32 %v4911_v41, %v4912_v46  ;;  %v6571_v2 = vand.u32 4294901760, %v21642_v36  ;;  %v21653_v29 = vld [vmem:[%s19186_s30 + $0x30] sm:$0xff] }
 0x342   : > { %24916 = vst [vmem:[#allocation26_spill] sm:$0xff] %v21588_v33  ;;  %v24153_v44 = vand.u32 4294901760, %v21588_v33  ;;  %v15962_v54 = vadd.f32 %v15961_v34, %v15960_v47  ;;  %17284 = vmatprep.subr.bf16.mxu1 %v21585_v56  ;;  %v5456_v58 = vand.u32 4294901760, %v5455_v55  ;;  %v21596_v10 = vpack.c.bf16 %v5455_v55, %v5448_v38 }
 0x343   : > { %17260 = vmatprep.subr.bf16.mxu0 %v17259_v35  ;;  %17286 = vmatpush3.bf16.msra.mxu1 %v21585_v56  ;;  %v4919_v8 = vand.u32 4294901760, %v4918_v45  ;;  %v5451_v59 = vand.u32 4294901760, %v5450_v3  ;;  %v4914_v42 = vand.u32 4294901760, %v4913_v24  ;;  %v17267_v37 = vpack.c.bf16 %v4918_v45, %v4911_v41  ;;  %v21645_v41 = vld [vmem:[%s19186_s30 + $0x38] sm:$0xff] }
 0x344   : > { %v21594_v43 = vadd.f32 %v15962_v54, %v4649_v53  ;;  %17262 = vmatpush3.bf16.xpose.msra.mxu0 %v17259_v35  ;;  %v5457_v51 = vsub.f32 %v5455_v55, %v5456_v58  ;;  %v21599_v16 = vpack.c.bf16 %v5456_v58, %v5449_v13  ;;  %v21604_v6 = vsub.f32 %v21588_v33, %v24153_v44 }
 0x345   : > { %v4920_v15 = vsub.f32 %v4918_v45, %v4919_v8  ;;  %v17275_v26 = vpack.c.bf16 %v4919_v8, %v4912_v46  ;;  %v24176_v52 = vand.u32 4294901760, %v21645_v41  ;;  %v24157_v13 = vand.u32 4294901760, %v21650_v9 }
 0x346   : > { %24917 = vst [vmem:[#allocation27_spill] sm:$0xff] %v21594_v43  ;;  %24918 = vst [vmem:[#allocation39_spill] sm:$0xff] %v21604_v6  ;;  %v24152_v49 = vand.u32 4294901760, %v21594_v43  ;;  %v5458_v1 = vand.u32 4294901760, %v5457_v51  ;;  %v24154_v25 = vand.u32 4294901760, %v21604_v6  ;;  %v24156_v46 = vand.u32 4294901760, %v21653_v29 }
 0x347   : > { %v4921_v62 = vand.u32 4294901760, %v4920_v15  ;;  %v21661_v55 = vpack.c.bf16 %v24176_v52, %v6571_v2 }
 0x348   : > { %v21610_v27 = vsub.f32 %v21594_v43, %v24152_v49  ;;  %v21612_v21 = vpack.c.bf16 %v5458_v1, %v5451_v59  ;;  %v21667_v47 = vpack.c.bf16 %v24156_v46, %v24157_v13  ;;  %v21781_v49 = vld [vmem:[%s19186_s30 + $0xa0] sm:$0xff]  ;;  %v21789_v46 = vld [vmem:[%s19186_s30 + $0x90] sm:$0xff] }
 0x349   : > { %v17263_v20 = vpack.c.bf16 %v4921_v62, %v4914_v42  ;;  %24922 = vst [vmem:[#allocation20_spill] sm:$0xff] %v21661_v55  ;;  %v21792_v13 = vld [vmem:[%s19186_s30 + $0xb0] sm:$0xff] }
 0x34a   : > { %24919 = vst [vmem:[#allocation38_spill] sm:$0xff] %v21610_v27  ;;  %v24155_v31 = vand.u32 4294901760, %v21610_v27  ;;  %v21618_v23 = vpack.c.bf16 %v21610_v27, %v21604_v6  ;;  %17288 = vmatprep.subr.bf16.mxu1 %v21612_v21  ;;  %24923 = vst [vmem:[#allocation23_spill] sm:$0xff] %v21667_v47 }
 0x34b   : > { %16160 = vmatmul.mubr.f32.vlgmr.msra.gmra.mrb[96].mxu0 %v4903_v14  ;;  %17264 = vmatprep.subr.bf16.mxu0 %v17263_v20 }
 0x34c   : > { %24920 = vst [vmem:[#allocation18_spill] sm:$0xff] %v21618_v23  ;;  %16166 = vmatprep.mubr.f32.mxu0 %v21547_v19  ;;  %v21626_v12 = vpack.c.bf16 %v24155_v31, %v24154_v25  ;;  %17266 = vmatpush3.bf16.xpose.msra.mxu0 %v17263_v20  ;;  %v24167_v31 = vand.u32 4294901760, %v21781_v49 }
 0x34d   : > { %17268 = vmatprep.subr.bf16.mxu0 %v17267_v37 }
 0x34e   : > { %24921 = vst [vmem:[#allocation32_spill] sm:$0xff] %v21626_v12 }
 0x353   : > { %16167 = vmatmul.mubr.f32.vlgmr.msra.gmra.mrb[96].mxu0 %v21571_v17 }
 0x354   : > { %17270 = vmatpush3.bf16.xpose.msra.mxu0 %v17267_v37  ;;  %16173 = vmatprep.mubr.f32.mxu0 %v21552_v18 }
 0x355   : > { %17272 = vmatprep.subr.bf16.mxu0 %v17259_v35 }
 0x35b   : > { %16174 = vmatmul.mubr.f32.vlgmr.msra.gmra.mrb[96].mxu0 %v21580_v60 }
 0x35c   : > { %17274 = vmatpush3.bf16.xpose.msra.mxu0 %v17259_v35  ;;  %16180 = vmatprep.mubr.f32.mxu0 %v4891_v22 }
 0x35d   : > { %17276 = vmatprep.subr.bf16.mxu0 %v17275_v26 }
 0x363   : > { %16181 = vmatmul.mubr.f32.vlgmr.msra.gmra.mrb[96].mxu0 %v4901_v40 }
 0x364   : > { %17278 = vmatpush3.bf16.xpose.msra.mxu0 %v17275_v26  ;;  %16187 = vmatprep.mubr.f32.mxu0 %v21547_v19 }
 0x365   : > { %17280 = vmatprep.subr.bf16.mxu0 %v17259_v35 }
 0x36b   : > { %16188 = vmatmul.mubr.f32.vlgmr.msra.gmra.mrb[96].mxu0 %v21571_v17 }
 0x36c   : > { %17282 = vmatpush3.bf16.xpose.msra.mxu0 %v17259_v35  ;;  %16194 = vmatprep.mubr.f32.mxu0 %v21547_v19 }
 0x36d   : > { %17404 = vmatprep.subr.bf16.mxu0 %v21661_v55 }
 0x373   : > { %16195 = vmatmul.mubr.f32.vlgmr.msra.gmra.mrb[96].mxu0 %v21571_v17 }
 0x374   : > { %17406 = vmatpush1.bf16.msra.mxu0 %v21667_v47  ;;  %6651 = vmatprep.mubr.f32.mxu0 %v24185_v48 }
 0x446   : > { %v16196_v28 = vpop.f32.mrb[96].mxu0 }
 0x447   : > { %v5314_v7 = vpop.f32.mrb[97].mxu0  ;;  %v5328_v18 = vsel %vm5324_vm1, %v16196_v28, -inf }
 0x448   : > { %v5325_v50 = vsel %vm5324_vm1, %v5314_v7, -inf }
 0x449   : > { %5326 = vmax.xlane.f32.xlu0 %v5325_v50 }
 0x44d   : > { %5329 = vmax.xlane.f32.xlu0 %v5328_v18 }
 0x4d6   : > { %v5327_v22 = vpop.xlane.xlu0 %5326 }
 0x4d7   : > { %v5331_v4 = vsub.f32 %v5314_v7, %v5327_v22  ;;  %v4778_v22 = vld [vmem:[%s19186_s30 + $0x8] sm:$0xff] }
 0x4d9   : > { %v5333_v61 = vmul.f32 1.442695, %v5331_v4  ;;  %v21681_v4 = vld [vmem:[%s19186_s30 + $0x28] sm:$0xff] }
 0x4da   : > { %v5330_v57 = vpop.xlane.xlu0 %5329 }
 0x4db   : > { %18608 = vpow2.f32 %v5333_v61  ;;  %v5332_v19 = vsub.f32 %v16196_v28, %v5330_v57  ;;  %v21689_v57 = vld [vmem:[%s19186_s30] sm:$0xff] }
 0x4dd   : > { %v5335_v17 = vmul.f32 1.442695, %v5332_v19  ;;  %v21692_v19 = vld [vmem:[%s19186_s30 + $0x20] sm:$0xff] }
 0x4df   : > { %18610 = vpow2.f32 %v5335_v17  ;;  %v24158_v17 = vand.u32 4294901760, %v21692_v19 }
 0x4e5   : > { %v18609_v53 = vpop.eup %18608 }
 0x4e6   : > { %v5337_v38 = vsel %vm5324_vm1, %v18609_v53, 0.0 }
 0x4e7   : > { %5338 = vadd.xlane.f32.xlu1 %v5337_v38  ;;  %v21709_v38 = vld [vmem:[%s19186_s30 + $0x68] sm:$0xff] }
 0x4e9   : > { %v18611_v11 = vpop.eup %18610 }
 0x4ea   : > { %v5340_v60 = vsel %vm5324_vm1, %v18611_v11, 0.0 }
 0x4eb   : > { %5341 = vadd.xlane.f32.xlu1 %v5340_v60 }
 0x574   : > { %v5339_v40 = vpop.xlane.xlu1 %5338 }
 0x575   : > { %18612 = vrcp.f32 %v5339_v40 }
 0x578   : > { %v5342_v35 = vpop.xlane.xlu1 %5341 }
 0x579   : > { %18614 = vrcp.f32 %v5342_v35 }
 0x57f   : > { %v18613_v34 = vpop.eup %18612 }
 0x580   : > { %v5345_v45 = vmul.f32 %v18613_v34, %v5339_v40  ;;  %v24174_v40 = vand.u32 4294901760, %v21709_v38 }
 0x582   : > { %v5347_v54 = vsub.f32 2.0, %v5345_v45  ;;  %v21721_v45 = vld [vmem:[%s19186_s30 + $0x40] sm:$0xff] }
 0x583   : > { %v18615_v3 = vpop.eup %18614 }
 0x584   : > { %v5349_v58 = vmul.f32 %v18613_v34, %v5347_v54  ;;  %v5346_v24 = vmul.f32 %v18615_v3, %v5342_v35  ;;  %v21717_v35 = vld [vmem:[%s19186_s30 + $0x78] sm:$0xff]  ;;  %v21724_v54 = vld [vmem:[%s19186_s30 + $0x60] sm:$0xff] }
 0x586   : > { %v5351_v8 = vmul.f32 %v18609_v53, %v5349_v58  ;;  %v5348_v63 = vsub.f32 2.0, %v5346_v24  ;;  %v24165_v58 = vand.u32 4294901760, %v21721_v45  ;;  %v24162_v24 = vand.u32 4294901760, %v21724_v54 }
 0x588   : > { %v5354_v51 = vsel %vm5324_vm1, %v5351_v8, 0  ;;  %v5350_v15 = vmul.f32 %v18615_v3, %v5348_v63  ;;  %v24166_v3 = vand.u32 4294901760, %v21717_v35  ;;  %v21730_v8 = vld [vmem:[%s19186_s30 + $0x50] sm:$0xff] }
 0x589   : > { %v5426_v59 = vand.u32 4294901760, %v5354_v51  ;;  %v21733_v63 = vld [vmem:[%s19186_s30 + $0x70] sm:$0xff] }
 0x58a   : > { %v5352_v1 = vmul.f32 %v18611_v11, %v5350_v15  ;;  %v21712_v11 = vld [vmem:[%s19186_s30 + $0x58] sm:$0xff]  ;;  %v24161_v15 = vand.u32 4294901760, %v21730_v8 }
 0x58b   : > { %v5427_v42 = vsub.f32 %v5354_v51, %v5426_v59  ;;  %v24173_v34 = vand.u32 4294901760, %v21712_v11 }
 0x58c   : > { %v5357_v62 = vsel %vm5324_vm1, %v5352_v1, 0 }
 0x58d   : > { %v5436_v14 = vand.u32 4294901760, %v5357_v62  ;;  %v5428_v20 = vand.u32 4294901760, %v5427_v42  ;;  %v21747_v1 = vpack.c.bf16 %v24166_v3, %v24173_v34  ;;  %v21824_v3 = vld [vmem:[%s19186_s30 + $0xd8] sm:$0xff]  ;;  %v21859_v34 = vld [vmem:[%s19186_s30 + $0xd0] sm:$0xff] }
 0x58f   : > { %v5437_v37 = vsub.f32 %v5357_v62, %v5436_v14  ;;  %v5429_v26 = vsub.f32 %v5427_v42, %v5428_v20  ;;  %24927 = vst [vmem:[#allocation29_spill] sm:$0xff] %v21747_v1  ;;  %v21756_v62 = vld [vmem:[%s19186_s30 + $0x88] sm:$0xff]  ;;  %17408 = vmatprep.subr.bf16.mxu0 %v21747_v1 }
 0x591   : > { %v5438_v28 = vand.u32 4294901760, %v5437_v37  ;;  %v5430_v7 = vand.u32 4294901760, %v5429_v26  ;;  %v24164_v26 = vand.u32 4294901760, %v21756_v62 }
 0x593   : > { %16201 = vmatprep.mubr.f32.mxu1 %v5430_v7  ;;  %v5439_v50 = vsub.f32 %v5437_v37, %v5438_v28  ;;  %v21774_v7 = vld [vmem:[%s19186_s30 + $0xb8] sm:$0xff] }
 0x594   : > { %v24169_v44 = vand.u32 4294901760, %v21774_v7 }
 0x595   : > { %v5440_v18 = vand.u32 4294901760, %v5439_v50 }
 0x597   : > { %16202 = vmatmul.mubr.f32.vlgmr.msra.gmra.mrb[96].mxu1 %v5440_v18  ;;  %v21778_v18 = vld [vmem:[%s19186_s30 + $0x80] sm:$0xff] }
 0x598   : > { %17290 = vmatpush3.bf16.msra.mxu1 %v21612_v21  ;;  %16208 = vmatprep.mubr.f32.mxu1 %v5426_v59  ;;  %v5879_v21 = vand.u32 4294901760, %v21681_v4  ;;  %v24168_v25 = vand.u32 4294901760, %v21778_v18 }
 0x599   : > { %17292 = vmatprep.subr.bf16.mxu1 %v21596_v10 }
 0x59f   : > { %16209 = vmatmul.mubr.f32.vlgmr.msra.gmra.mrb[96].mxu1 %v5436_v14 }
 0x5a0   : > { %17294 = vmatpush3.bf16.msra.mxu1 %v21596_v10  ;;  %16215 = vmatprep.mubr.f32.mxu1 %v5427_v42  ;;  %v5875_v10 = vand.u32 4294901760, %v4778_v22  ;;  %v21753_v42 = vpack.c.bf16 %v24162_v24, %v24165_v58  ;;  %v21821_v58 = vld [vmem:[%s19186_s30 + $0xe8] sm:$0xff] }
 0x5a1   : > { %17296 = vmatprep.subr.bf16.mxu1 %v21585_v56 }
 0x5a2   : > { %v21686_v61 = vpack.c.bf16 %v5879_v21, %v5875_v10  ;;  %24928 = vst [vmem:[#allocation40_spill] sm:$0xff] %v21753_v42 }
 0x5a4   : > { %24924 = vst [vmem:[#allocation51_spill] sm:$0xff] %v21686_v61 }
 0x5a7   : > { %16216 = vmatmul.mubr.f32.vlgmr.msra.gmra.mrb[96].mxu1 %v5437_v37 }
 0x5a8   : > { %17298 = vmatpush3.bf16.msra.mxu1 %v21585_v56  ;;  %16222 = vmatprep.mubr.f32.mxu1 %v5428_v20  ;;  %v21762_v20 = vld [vmem:[%s19186_s30 + $0x98] sm:$0xff] }
 0x5a9   : > { %17300 = vmatprep.subr.bf16.mxu1 %v21599_v16  ;;  %v24170_v50 = vand.u32 4294901760, %v21762_v20 }
 0x5ab   : > { %v21809_v24 = vpack.c.bf16 %v24169_v44, %v24170_v50  ;;  %v24181_v44 = vand.u32 4294901760, %v21821_v58  ;;  %v21848_v50 = vld [vmem:[%s19186_s30 + $0xc0] sm:$0xff] }
 0x5ad   : > { %24931 = vst [vmem:[#allocation42_spill] sm:$0xff] %v21809_v24 }
 0x5af   : > { %16223 = vmatmul.mubr.f32.vlgmr.msra.gmra.mrb[96].mxu1 %v5438_v28 }
 0x5b0   : > { %17302 = vmatpush3.bf16.msra.mxu1 %v21599_v16  ;;  %16229 = vmatprep.mubr.f32.mxu1 %v5426_v59  ;;  %v24159_v16 = vand.u32 4294901760, %v21689_v57 }
 0x5b1   : > { %17304 = vmatprep.subr.bf16.mxu1 %v21585_v56 }
 0x5b2   : > { %v21702_v53 = vpack.c.bf16 %v24158_v17, %v24159_v16  ;;  %v24172_v16 = vand.u32 4294901760, %v21789_v46 }
 0x5b4   : > { %24925 = vst [vmem:[#allocation43_spill] sm:$0xff] %v21702_v53 }
 0x5b7   : > { %16230 = vmatmul.mubr.f32.vlgmr.msra.gmra.mrb[96].mxu1 %v5436_v14 }
 0x5b8   : > { %17306 = vmatpush3.bf16.msra.mxu1 %v21585_v56  ;;  %16236 = vmatprep.mubr.f32.mxu1 %v5426_v59  ;;  %v21706_v56 = vld [vmem:[%s19186_s30 + $0x48] sm:$0xff]  ;;  %v24160_v59 = vand.u32 4294901760, %v21733_v63 }
 0x5b9   : > { %17308 = vmatprep.subr.bf16.mxu1 %v21686_v61  ;;  %v24175_v60 = vand.u32 4294901760, %v21706_v56 }
 0x5ba   : > { %v21769_v37 = vpack.c.bf16 %v24160_v59, %v24161_v15  ;;  %v24171_v59 = vand.u32 4294901760, %v21792_v13  ;;  %v21803_v15 = vsub.f32 %v4778_v22, %v5875_v10  ;;  %v21827_v22 = vsub.f32 %v21681_v4, %v5879_v21  ;;  %v21844_v4 = vld [vmem:[%s19186_s30 + $0xf8] sm:$0xff] }
 0x5bb   : > { %v21739_v51 = vpack.c.bf16 %v24174_v40, %v24175_v60  ;;  %v21832_v10 = vsub.f32 %v21642_v36, %v6571_v2  ;;  %v24183_v21 = vand.u32 4294901760, %v21824_v3  ;;  %v21851_v36 = vld [vmem:[%s19186_s30 + $0xe0] sm:$0xff]  ;;  %v21862_v40 = vld [vmem:[%s19186_s30 + $0xf0] sm:$0xff]  ;;  %v24187_v2 = vand.u32 4294901760, %v21859_v34 }
 0x5bc   : > { %24929 = vst [vmem:[#allocation31_spill] sm:$0xff] %v21769_v37  ;;  %17410 = vmatpush1.bf16.msra.mxu0 %v21769_v37  ;;  %v24937_v60 = vand.u32 4294901760, %v21848_v50  ;;  %v24938_v23 = vand.u32 4294901760, %v21851_v36 }
 0x5bd   : > { %24926 = vst [vmem:[#allocation35_spill] sm:$0xff] %v21739_v51  ;;  %17412 = vmatprep.subr.bf16.mxu0 %v21809_v24  ;;  %v24967_v24 = vand.u32 4294901760, %v21844_v4 }
 0x5be   : > { %v21884_v32 = vpack.c.bf16 %v24938_v23, %v24937_v60  ;;  %v24195_v23 = vand.u32 4294901760, %v21832_v10  ;;  %v24943_v60 = vand.u32 4294901760, %v21645_v41 }
 0x5bf   : > { %16237 = vmatmul.mubr.f32.vlgmr.msra.gmra.mrb[96].mxu1 %v5436_v14  ;;  %v21759_v14 = vld [vmem:[%s19186_s30 + $0xa8] sm:$0xff] }
 0x5c0   : > { %17310 = vmatpush1.bf16.msra.mxu1 %v21702_v53  ;;  %v24163_v28 = vand.u32 4294901760, %v21759_v14  ;;  %24939 = vst [vmem:[#allocation34_spill] sm:$0xff] %v21884_v32  ;;  %5955 = vmatprep.mubr.f32.mxu1 %v24185_v48  ;;  %v21903_v30 = vsub.f32 %v21645_v41, %v24943_v60  ;;  %v24944_v41 = vand.u32 4294901760, %v21706_v56 }
 0x5c1   : > { %17312 = vmatprep.subr.bf16.mxu1 %v21739_v51 }
 0x5c2   : > { %v21799_v17 = vpack.c.bf16 %v24163_v28, %v24164_v26  ;;  %v21815_v28 = vpack.c.bf16 %v24167_v31, %v24168_v25  ;;  %v21818_v26 = vld [vmem:[%s19186_s30 + $0xc8] sm:$0xff]  ;;  %v21839_v31 = vpack.c.bf16 %v24171_v59, %v24172_v16  ;;  %v24935_v16 = vand.u32 4294901760, %v21844_v4 }
 0x5c3   : > { %v24182_v25 = vand.u32 4294901760, %v21818_v26  ;;  %v24191_v59 = vand.u32 4294901760, %v21827_v22  ;;  %v21918_v60 = vsub.f32 %v21706_v56, %v24944_v41  ;;  %v24947_v56 = vand.u32 4294901760, %v21712_v11 }
 0x5c4   : > { %17314 = vmatpush1.bf16.msra.mxu1 %v21753_v42  ;;  %24930 = vst [vmem:[#allocation50_spill] sm:$0xff] %v21799_v17  ;;  %24932 = vst [vmem:[#allocation36_spill] sm:$0xff] %v21815_v28  ;;  %17414 = vmatpush1.bf16.msra.mxu0 %v21839_v31  ;;  %v21878_v12 = vpack.c.bf16 %v24935_v16, %v24183_v21  ;;  %v24941_v16 = vand.u32 4294901760, %v21862_v40  ;;  %v24949_v41 = vand.u32 4294901760, %v21717_v35 }
 0x5c5   : > { %17316 = vmatprep.subr.bf16.mxu1 %v21799_v17  ;;  %24933 = vst [vmem:[#allocation48_spill] sm:$0xff] %v21839_v31  ;;  %v21870_v52 = vpack.c.bf16 %v24181_v44, %v24182_v25  ;;  %v24940_v44 = vand.u32 4294901760, %v21803_v15  ;;  %v5993_v48 = vsub.f32 %v21827_v22, %v24191_v59  ;;  %v24198_v27 = vand.u32 4294901760, %v21918_v60 }
 0x5c6   : > { %24936 = vst [vmem:[#allocation44_spill] sm:$0xff] %v21878_v12  ;;  %v21897_v21 = vpack.c.bf16 %v24941_v16, %v24187_v2  ;;  %17416 = vmatprep.subr.bf16.mxu0 %v21878_v12  ;;  %v6677_v16 = vsub.f32 %v21832_v10, %v24195_v23  ;;  %v24200_v2 = vand.u32 4294901760, %v21903_v30  ;;  %v24946_v23 = vand.u32 4294901760, %v21709_v38 }
 0x5c7   : > { %24934 = vst [vmem:[#allocation55_spill] sm:$0xff] %v21870_v52  ;;  %v5981_v25 = vsub.f32 %v21803_v15, %v24940_v44  ;;  %v5994_v39 = vand.u32 4294901760, %v5993_v48  ;;  %v6005_v48 = vsub.f32 %v21918_v60, %v24198_v27  ;;  %v24959_v12 = vand.u32 4294901760, %v21774_v7 }
 0x5c8   : > { %17318 = vmatpush1.bf16.msra.mxu1 %v21815_v28  ;;  %24942 = vst [vmem:[#allocation52_spill] sm:$0xff] %v21897_v21  ;;  %17418 = vmatpush1.bf16.msra.mxu0 %v21897_v21  ;;  %v6678_v6 = vand.u32 4294901760, %v6677_v16  ;;  %v21929_v33 = vsub.f32 %v21709_v38, %v24946_v23  ;;  %v21938_v16 = vsub.f32 %v21712_v11, %v24947_v56  ;;  %v24951_v56 = vand.u32 4294901760, %v21724_v54 }
 0x5c9   : > { %17320 = vmatprep.subr.bf16.mxu1 %v21870_v52  ;;  %v5982_v44 = vand.u32 4294901760, %v5981_v25  ;;  %v6689_v25 = vsub.f32 %v21903_v30, %v24200_v2  ;;  %v21946_v38 = vsub.f32 %v21717_v35, %v24949_v41  ;;  %v6006_v11 = vand.u32 4294901760, %v6005_v48 }
 0x5ca   : > { %v24202_v23 = vand.u32 4294901760, %v21938_v16  ;;  %v21962_v35 = vsub.f32 %v21724_v54, %v24951_v56 }
 0x5cb   : > { %v21923_v59 = vpack.c.bf16 %v5994_v39, %v5982_v44  ;;  %v6690_v5 = vand.u32 4294901760, %v6689_v25  ;;  %v24199_v44 = vand.u32 4294901760, %v21929_v33  ;;  %v24950_v25 = vand.u32 4294901760, %v21721_v45 }
 0x5cc   : > { %17322 = vmatpush1.bf16.msra.mxu1 %v21884_v32  ;;  %v6701_v41 = vsub.f32 %v21938_v16, %v24202_v23  ;;  %v24954_v54 = vand.u32 4294901760, %v21946_v38  ;;  %v24955_v23 = vand.u32 4294901760, %v21756_v62 }
 0x5cd   : > { %24945 = vst [vmem:[#allocation49_spill] sm:$0xff] %v21923_v59  ;;  %17324 = vmatprep.subr.bf16.mxu1 %v21923_v59  ;;  %v21940_v39 = vpack.c.bf16 %v6690_v5, %v6678_v6  ;;  %v21952_v27 = vsub.f32 %v21721_v45, %v24950_v25  ;;  %v6017_v5 = vsub.f32 %v21929_v33, %v24199_v44  ;;  %v24952_v25 = vand.u32 4294901760, %v21730_v8 }
 0x5ce   : > { %v24953_v44 = vand.u32 4294901760, %v21733_v63  ;;  %v6713_v56 = vsub.f32 %v21946_v38, %v24954_v54  ;;  %v24207_v59 = vand.u32 4294901760, %v21962_v35  ;;  %v21985_v45 = vsub.f32 %v21756_v62, %v24955_v23 }
 0x5cf   : > { %24948 = vst [vmem:[#allocation41_spill] sm:$0xff] %v21940_v39  ;;  %17420 = vmatprep.subr.bf16.mxu0 %v21940_v39  ;;  %v21971_v48 = vsub.f32 %v21730_v8, %v24952_v25  ;;  %v6018_v6 = vand.u32 4294901760, %v6017_v5  ;;  %v6702_v39 = vand.u32 4294901760, %v6701_v41  ;;  %v24956_v8 = vand.u32 4294901760, %v21952_v27 }
 0x5d0   : > { %v21976_v2 = vsub.f32 %v21733_v63, %v24953_v44  ;;  %v6714_v0 = vand.u32 4294901760, %v6713_v56  ;;  %v6023_v54 = vsub.f32 %v21962_v35, %v24207_v59  ;;  %v24216_v43 = vand.u32 4294901760, %v21985_v45 }
 0x5d1   : > { %v6011_v25 = vsub.f32 %v21952_v27, %v24956_v8  ;;  %v24208_v63 = vand.u32 4294901760, %v21971_v48  ;;  %v21992_v5 = vpack.c.bf16 %v6018_v6, %v6006_v11  ;;  %v24957_v8 = vand.u32 4294901760, %v21759_v14 }
 0x5d2   : > { %v24213_v44 = vand.u32 4294901760, %v21976_v2  ;;  %v22009_v6 = vpack.c.bf16 %v6714_v0, %v6702_v39  ;;  %v6024_v56 = vand.u32 4294901760, %v6023_v54  ;;  %v24958_v59 = vand.u32 4294901760, %v21762_v20 }
 0x5d3   : > { %v6012_v62 = vand.u32 4294901760, %v6011_v25  ;;  %v6707_v23 = vsub.f32 %v21971_v48, %v24208_v63  ;;  %v22007_v11 = vsub.f32 %v21759_v14, %v24957_v8  ;;  %v6029_v25 = vsub.f32 %v21985_v45, %v24216_v43 }
 0x5d4   : > { %v6719_v41 = vsub.f32 %v21976_v2, %v24213_v44  ;;  %v22017_v63 = vsub.f32 %v21762_v20, %v24958_v59  ;;  %v22023_v14 = vsub.f32 %v21774_v7, %v24959_v12  ;;  %v24960_v8 = vand.u32 4294901760, %v21778_v18 }
 0x5d5   : > { %v6708_v21 = vand.u32 4294901760, %v6707_v23  ;;  %v24218_v44 = vand.u32 4294901760, %v22007_v11  ;;  %v22025_v0 = vpack.c.bf16 %v6024_v56, %v6012_v62  ;;  %v6030_v39 = vand.u32 4294901760, %v6029_v25 }
 0x5d6   : > { %v6720_v32 = vand.u32 4294901760, %v6719_v41  ;;  %v24217_v54 = vand.u32 4294901760, %v22017_v63  ;;  %v22031_v43 = vsub.f32 %v21778_v18, %v24960_v8  ;;  %v24219_v23 = vand.u32 4294901760, %v22023_v14 }
 0x5d7   : > { %v6041_v20 = vsub.f32 %v22007_v11, %v24218_v44  ;;  %v24961_v12 = vand.u32 4294901760, %v21781_v49  ;;  %v24963_v41 = vand.u32 4294901760, %v21792_v13 }
 0x5d8   : > { %v22033_v59 = vpack.c.bf16 %v6720_v32, %v6708_v21  ;;  %v6725_v62 = vsub.f32 %v22017_v63, %v24217_v54  ;;  %v24222_v18 = vand.u32 4294901760, %v22031_v43  ;;  %v24962_v32 = vand.u32 4294901760, %v21789_v46 }
 0x5d9   : > { %v22042_v7 = vsub.f32 %v21781_v49, %v24961_v12  ;;  %v22056_v56 = vsub.f32 %v21792_v13, %v24963_v41  ;;  %v6042_v25 = vand.u32 4294901760, %v6041_v20  ;;  %v6737_v49 = vsub.f32 %v22023_v14, %v24219_v23 }
 0x5da   : > { %v22051_v21 = vsub.f32 %v21789_v46, %v24962_v32  ;;  %v24964_v12 = vand.u32 4294901760, %v21818_v26  ;;  %v6726_v44 = vand.u32 4294901760, %v6725_v62  ;;  %v6035_v46 = vsub.f32 %v22031_v43, %v24222_v18 }
 0x5db   : > { %v24223_v8 = vand.u32 4294901760, %v22042_v7  ;;  %v24229_v20 = vand.u32 4294901760, %v22056_v56  ;;  %v22072_v32 = vpack.c.bf16 %v6042_v25, %v6030_v39  ;;  %v6738_v41 = vand.u32 4294901760, %v6737_v49 }
 0x5dc   : > { %v22065_v54 = vsub.f32 %v21818_v26, %v24964_v12  ;;  %v24224_v13 = vand.u32 4294901760, %v22051_v21  ;;  %v6036_v26 = vand.u32 4294901760, %v6035_v46  ;;  %v24965_v18 = vand.u32 4294901760, %v21821_v58 }
 0x5dd   : > { %v6047_v23 = vsub.f32 %v22042_v7, %v24223_v8  ;;  %v6743_v12 = vsub.f32 %v22056_v56, %v24229_v20  ;;  %v22089_v25 = vpack.c.bf16 %v6738_v41, %v6726_v44  ;;  %v24966_v8 = vand.u32 4294901760, %v21824_v3 }
 0x5de   : > { %v24232_v52 = vand.u32 4294901760, %v22065_v54  ;;  %v6731_v62 = vsub.f32 %v22051_v21, %v24224_v13  ;;  %v22087_v39 = vsub.f32 %v21821_v58, %v24965_v18  ;;  %v6759_v58 = vsub.f32 %v21844_v4, %v24967_v24 }
 0x5df   : > { %v6048_v49 = vand.u32 4294901760, %v6047_v23  ;;  %v6747_v13 = vsub.f32 %v21824_v3, %v24966_v8  ;;  %v6744_v28 = vand.u32 4294901760, %v6743_v12  ;;  %v24968_v41 = vand.u32 4294901760, %v21848_v50 }
 0x5e0   : > { %v6053_v46 = vsub.f32 %v22065_v54, %v24232_v52  ;;  %v6732_v31 = vand.u32 4294901760, %v6731_v62  ;;  %v6064_v20 = vand.u32 4294901760, %v22087_v39  ;;  %v6760_v8 = vand.u32 4294901760, %v6759_v58 }
 0x5e1   : > { %v22101_v18 = vpack.c.bf16 %v6048_v49, %v6036_v26  ;;  %v6748_v23 = vand.u32 4294901760, %v6747_v13  ;;  %v6057_v52 = vsub.f32 %v21848_v50, %v24968_v41  ;;  %v24969_v62 = vand.u32 4294901760, %v21851_v36 }
 0x5e2   : > { %v6054_v44 = vand.u32 4294901760, %v6053_v46  ;;  %v22106_v17 = vpack.c.bf16 %v6744_v28, %v6732_v31  ;;  %v6065_v3 = vsub.f32 %v22087_v39, %v6064_v20  ;;  %v24970_v24 = vand.u32 4294901760, %v21859_v34 }
 0x5e3   : > { %v6069_v12 = vsub.f32 %v21851_v36, %v24969_v62  ;;  %v6749_v37 = vsub.f32 %v6747_v13, %v6748_v23  ;;  %v6058_v42 = vand.u32 4294901760, %v6057_v52  ;;  %v24971_v26 = vand.u32 4294901760, %v21862_v40 }
 0x5e4   : > { %v6753_v4 = vsub.f32 %v21859_v34, %v24970_v24  ;;  %v6066_v50 = vand.u32 4294901760, %v6065_v3  ;;  %v6761_v31 = vsub.f32 %v6759_v58, %v6760_v8  ;;  %v22120_v46 = vpack.c.bf16 %v21827_v22, %v21803_v15 }
 0x5e5   : > { %v6765_v49 = vsub.f32 %v21862_v40, %v24971_v26  ;;  %v6070_v28 = vand.u32 4294901760, %v6069_v12  ;;  %v6750_v41 = vand.u32 4294901760, %v6749_v37  ;;  %v6059_v1 = vsub.f32 %v6057_v52, %v6058_v42 }
 0x5e6   : > { %24972 = vst [vmem:[#allocation54_spill] sm:$0xff] %v22120_v46  ;;  %v6754_v36 = vand.u32 4294901760, %v6753_v4  ;;  %v22122_v51 = vpack.c.bf16 %v6066_v50, %v6054_v44  ;;  %v6762_v47 = vand.u32 4294901760, %v6761_v31  ;;  %v22126_v34 = vpack.c.bf16 %v21903_v30, %v21832_v10 }
 0x5e7   : > { %v6766_v62 = vand.u32 4294901760, %v6765_v49  ;;  %v6071_v53 = vsub.f32 %v6069_v12, %v6070_v28  ;;  %v6060_v40 = vand.u32 4294901760, %v6059_v1  ;;  %v22132_v37 = vpack.c.bf16 %v21929_v33, %v21918_v60 }
 0x5e8   : > { %v6755_v3 = vsub.f32 %v6753_v4, %v6754_v36  ;;  %v22128_v26 = vpack.c.bf16 %v6762_v47, %v6750_v41  ;;  %v22136_v44 = vpack.c.bf16 %v21946_v38, %v21938_v16  ;;  %v22140_v50 = vpack.c.bf16 %v21962_v35, %v21952_v27 }
 0x5e9   : > { %v6767_v24 = vsub.f32 %v6765_v49, %v6766_v62  ;;  %v6072_v55 = vand.u32 4294901760, %v6071_v53  ;;  %v22146_v47 = vpack.c.bf16 %v21976_v2, %v21971_v48  ;;  %v22150_v53 = vpack.c.bf16 %v22007_v11, %v21985_v45 }
 0x5ea   : > { %v6756_v61 = vand.u32 4294901760, %v6755_v3  ;;  %24973 = vst [vmem:[#allocation19_spill] sm:$0xff] %v22136_v44  ;;  %24974 = vst [vmem:[#allocation45_spill] sm:$0xff] %v22140_v50  ;;  %v22154_v31 = vpack.c.bf16 %v22023_v14, %v22017_v63  ;;  %v22160_v3 = vpack.c.bf16 %v22042_v7, %v22031_v43 }
 0x5eb   : > { %v6768_v46 = vand.u32 4294901760, %v6767_v24  ;;  %v22142_v1 = vpack.c.bf16 %v6072_v55, %v6060_v40  ;;  %24975 = vst [vmem:[#allocation47_spill] sm:$0xff] %v22146_v47  ;;  %24976 = vst [vmem:[#allocation53_spill] sm:$0xff] %v22150_v53  ;;  %v22164_v55 = vpack.c.bf16 %v22056_v56, %v22051_v21  ;;  %v22168_v40 = vpack.c.bf16 %v22087_v39, %v22065_v54 }
 0x5ec   : > { %24977 = vst [vmem:[#allocation56_spill] sm:$0xff] %v22154_v31  ;;  %24978 = vst [vmem:[#allocation25_spill] sm:$0xff] %v22160_v3  ;;  %v22170_v24 = vpack.c.bf16 %v6759_v58, %v6747_v13  ;;  %v22172_v53 = vpack.c.bf16 %v6069_v12, %v6057_v52  ;;  %v22174_v47 = vpack.c.bf16 %v6765_v49, %v6753_v4  ;;  %v24986_v3 = vand.u32 4294901760, %v21832_v10 }
 0x5ed   : > { %v22156_v41 = vpack.c.bf16 %v6768_v46, %v6756_v61  ;;  %24979 = vst [vmem:[#allocation22_spill] sm:$0xff] %v22164_v55  ;;  %24980 = vst [vmem:[#allocation37_spill] sm:$0xff] %v22168_v40  ;;  %v24984_v61 = vand.u32 4294901760, %v21803_v15  ;;  %v24985_v46 = vand.u32 4294901760, %v21827_v22  ;;  %v24987_v55 = vand.u32 4294901760, %v21903_v30 }
 0x5ee   : > { %24981 = vst [vmem:[#allocation57_spill] sm:$0xff] %v22170_v24  ;;  %24982 = vst [vmem:[#allocation58_spill] sm:$0xff] %v22172_v53  ;;  %v24989_v39 = vand.u32 4294901760, %v21918_v60  ;;  %v24990_v13 = vand.u32 4294901760, %v21929_v33  ;;  %v24992_v58 = vand.u32 4294901760, %v21938_v16  ;;  %v24993_v15 = vand.u32 4294901760, %v21946_v38 }
 0x5ef   : > { %24983 = vst [vmem:[#allocation59_spill] sm:$0xff] %v22174_v47  ;;  %v22180_v31 = vpack.c.bf16 %v24985_v46, %v24984_v61  ;;  %v22186_v50 = vpack.c.bf16 %v24987_v55, %v24986_v3  ;;  %v24995_v22 = vand.u32 4294901760, %v21952_v27  ;;  %v24996_v10 = vand.u32 4294901760, %v21962_v35 }
 0x5f0   : > { %v22192_v52 = vpack.c.bf16 %v24990_v13, %v24989_v39  ;;  %v22198_v12 = vpack.c.bf16 %v24993_v15, %v24992_v58  ;;  %v24998_v30 = vand.u32 4294901760, %v21971_v48  ;;  %v24999_v60 = vand.u32 4294901760, %v21976_v2 }
 0x5f1   : > { %24988 = vst [vmem:[#allocation60_spill] sm:$0xff] %v22186_v50  ;;  %v22204_v4 = vpack.c.bf16 %v24996_v10, %v24995_v22  ;;  %v25001_v33 = vand.u32 4294901760, %v21985_v45  ;;  %v25002_v16 = vand.u32 4294901760, %v22007_v11  ;;  %v25004_v38 = vand.u32 4294901760, %v22017_v63 }
 0x5f2   : > { %24991 = vst [vmem:[#allocation61_spill] sm:$0xff] %v22192_v52  ;;  %24994 = vst [vmem:[#allocation62_spill] sm:$0xff] %v22198_v12  ;;  %v22210_v49 = vpack.c.bf16 %v24999_v60, %v24998_v30  ;;  %v25005_v27 = vand.u32 4294901760, %v22023_v14  ;;  %v25007_v35 = vand.u32 4294901760, %v22031_v43  ;;  %v25008_v48 = vand.u32 4294901760, %v22042_v7 }
 0x5f3   : > { %24997 = vst [vmem:[#allocation63_spill] sm:$0xff] %v22204_v4  ;;  %v22216_v3 = vpack.c.bf16 %v25002_v16, %v25001_v33  ;;  %v25010_v2 = vand.u32 4294901760, %v22051_v21  ;;  %v25011_v45 = vand.u32 4294901760, %v22056_v56  ;;  %v25013_v11 = vand.u32 4294901760, %v22065_v54 }
 0x5f4   : > { %25000 = vst [vmem:[#allocation64_spill] sm:$0xff] %v22210_v49  ;;  %v22222_v55 = vpack.c.bf16 %v25005_v27, %v25004_v38  ;;  %v22228_v61 = vpack.c.bf16 %v25008_v48, %v25007_v35  ;;  %v22240_v63 = vpack.c.bf16 %v6760_v8, %v6748_v23  ;;  %v22242_v14 = vpack.c.bf16 %v6070_v28, %v6058_v42 }
 0x5f5   : > { %25003 = vst [vmem:[#allocation65_spill] sm:$0xff] %v22216_v3  ;;  %v22234_v46 = vpack.c.bf16 %v25011_v45, %v25010_v2  ;;  %v22238_v39 = vpack.c.bf16 %v6064_v20, %v25013_v11  ;;  %v22244_v13 = vpack.c.bf16 %v6766_v62, %v6754_v36  ;;  %v25018_v43 = vand.u32 4294901760, %v21689_v57 }
 0x5f6   : > { %25006 = vst [vmem:[#allocation66_spill] sm:$0xff] %v22222_v55  ;;  %25009 = vst [vmem:[#allocation67_spill] sm:$0xff] %v22228_v61  ;;  %v25019_v21 = vand.u32 4294901760, %v21692_v19  ;;  %v25020_v54 = vand.u32 4294901760, %v21650_v9  ;;  %v25021_v42 = vand.u32 4294901760, %v21653_v29 }
 0x5f7   : > { %25012 = vst [vmem:[#allocation68_spill] sm:$0xff] %v22234_v46  ;;  %25014 = vst [vmem:[#allocation69_spill] sm:$0xff] %v22238_v39  ;;  %v22249_v7 = vsub.f32 %v21689_v57, %v25018_v43 }
 0x5f8   : > { %25015 = vst [vmem:[#allocation70_spill] sm:$0xff] %v22240_v63  ;;  %25016 = vst [vmem:[#allocation71_spill] sm:$0xff] %v22242_v14  ;;  %v22254_v56 = vsub.f32 %v21692_v19, %v25019_v21  ;;  %v22259_v20 = vsub.f32 %v21650_v9, %v25020_v54  ;;  %v22264_v23 = vsub.f32 %v21653_v29, %v25021_v42 }
 0x5f9   : > { %25017 = vst [vmem:[#allocation72_spill] sm:$0xff] %v22244_v13  ;;  %v24261_v8 = vand.u32 4294901760, %v22249_v7 }
 0x5fa   : > { %v24260_v57 = vand.u32 4294901760, %v22254_v56  ;;  %v24259_v28 = vand.u32 4294901760, %v22259_v20  ;;  %v24258_v36 = vand.u32 4294901760, %v22264_v23 }
 0x5fb   : > { %v5987_v9 = vsub.f32 %v22249_v7, %v24261_v8  ;;  %v25039_v8 = vld [vmem:[#allocation42_spill] sm:$0xff] }
 0x5fc   : > { %v5999_v29 = vsub.f32 %v22254_v56, %v24260_v57  ;;  %v6683_v10 = vsub.f32 %v22259_v20, %v24259_v28  ;;  %v6695_v30 = vsub.f32 %v22264_v23, %v24258_v36  ;;  %v25035_v36 = vld [vmem:[#allocation29_spill] sm:$0xff]  ;;  %v25036_v28 = vld [vmem:[#allocation40_spill] sm:$0xff]  ;;  %v25037_v57 = vld [vmem:[#allocation31_spill] sm:$0xff] }
 0x5fd   : > { %v5988_v38 = vand.u32 4294901760, %v5987_v9  ;;  %v22332_v9 = vpack.c.bf16 %v22264_v23, %v22259_v20 }
 0x5fe   : > { %v6000_v27 = vand.u32 4294901760, %v5999_v29  ;;  %v6684_v35 = vand.u32 4294901760, %v6683_v10  ;;  %v6696_v48 = vand.u32 4294901760, %v6695_v30  ;;  %v25023_v29 = vld [vmem:[#allocation54_spill] sm:$0xff]  ;;  %v25025_v10 = vld [vmem:[#allocation47_spill] sm:$0xff]  ;;  %v25026_v30 = vld [vmem:[#allocation53_spill] sm:$0xff] }
 0x600   : > { %v22302_v43 = vpack.c.bf16 %v6000_v27, %v5988_v38  ;;  %v22304_v21 = vpack.c.bf16 %v6696_v48, %v6684_v35  ;;  %v25027_v38 = vld [vmem:[#allocation56_spill] sm:$0xff]  ;;  %v25028_v27 = vld [vmem:[#allocation25_spill] sm:$0xff]  ;;  %v25029_v35 = vld [vmem:[#allocation22_spill] sm:$0xff] }
 0x601   : > { %v25030_v48 = vld [vmem:[#allocation51_spill] sm:$0xff] }
 0x692   : > { %v16238_v19 = vpop.f32.mrb[96].mxu1 }
 0x693   : > { %v5873_v62 = vsel %vm4809_vm0, %v16238_v19, 0  ;;  %v5851_v58 = vpop.f32.mrb[97].mxu1  ;;  %v25022_v19 = vmov 0.0  }
 0x694   : > { %v22277_v15 = vand.u32 4294901760, %v5873_v62  ;;  %v5870_v22 = vsel %vm4809_vm0, %v5851_v58, 0  ;;  %v22328_v58 = vpack.c.bf16 %v22254_v56, %v22249_v7 }
 0x695   : > { %v22286_v60 = vand.u32 4294901760, %v5870_v22 }
 0x696   : > { %v22289_v33 = vsub.f32 %v5873_v62, %v22277_v15 }
 0x697   : > { %v22292_v16 = vsub.f32 %v5870_v22, %v22286_v60  ;;  %v25024_v22 = vld [vmem:[#allocation45_spill] sm:$0xff] }
 0x698   : > { %v22298_v45 = vand.u32 4294901760, %v22289_v33 }
 0x699   : > { %v22295_v2 = vand.u32 4294901760, %v22292_v16 }
 0x69a   : > { %v5970_v42 = vsub.f32 %v22289_v33, %v22298_v45 }
 0x69b   : > { %v5959_v11 = vsub.f32 %v22292_v16, %v22295_v2 }
 0x69c   : > { %v5971_v62 = vand.u32 4294901760, %v5970_v42  ;;  %v25033_v42 = vld [vmem:[#allocation23_spill] sm:$0xff] }
 0x69d   : > { %v5960_v54 = vand.u32 4294901760, %v5959_v11  ;;  %v25031_v11 = vld [vmem:[#allocation20_spill] sm:$0xff] }
 0x69f   : > { %5961 = vmatmul.mubr.f32.vlgmr.msra.gmra.mrb[98].mxu1 %v5960_v54  ;;  %6657 = vmatmul.mubr.f32.vlgmr.msra.gmra.mrb[98].mxu0 %v5960_v54  ;;  %v25032_v54 = vld [vmem:[#allocation43_spill] sm:$0xff] }
 0x6a0   : > { %17326 = vmatpush1.bf16.msra.mxu1 %v22302_v43  ;;  %17422 = vmatpush1.bf16.msra.mxu0 %v22304_v21 }
 0x6a1   : > { %5966 = vmatprep.mubr.f32.mxu1 %v25022_v19  ;;  %17328 = vmatprep.subr.bf16.mxu1 %v21992_v5 }
 0x6a2   : > { %6662 = vmatprep.mubr.f32.mxu0 %v25022_v19  ;;  %17424 = vmatprep.subr.bf16.mxu0 %v22009_v6 }
 0x6a3   : > { %5972 = vmatmul.mubr.f32.gmra.mrb[100].mxu1 %v5971_v62  ;;  %6668 = vmatmul.mubr.f32.gmra.mrb[100].mxu0 %v5971_v62  ;;  %v25034_v62 = vld [vmem:[#allocation35_spill] sm:$0xff] }
 0x6a4   : > { %17330 = vmatpush1.bf16.msra.mxu1 %v22025_v0  ;;  %17426 = vmatpush1.bf16.msra.mxu0 %v22033_v59 }
 0x6a5   : > { %17332 = vmatprep.subr.bf16.mxu1 %v22072_v32  ;;  %17428 = vmatprep.subr.bf16.mxu0 %v22089_v25 }
 0x6a6   : > { %6122 = vmatprep.mubr.f32.mxu1 %v25022_v19  ;;  %6818 = vmatprep.mubr.f32.mxu0 %v25022_v19 }
 0x6a8   : > { %17334 = vmatpush1.bf16.msra.mxu1 %v22101_v18  ;;  %17430 = vmatpush1.bf16.msra.mxu0 %v22106_v17 }
 0x6a9   : > { %17336 = vmatprep.subr.bf16.mxu1 %v22122_v51  ;;  %17432 = vmatprep.subr.bf16.mxu0 %v22128_v26 }
 0x6ac   : > { %17338 = vmatpush1.bf16.msra.mxu1 %v22142_v1  ;;  %17434 = vmatpush1.bf16.msra.mxu0 %v22156_v41 }
 0x6ad   : > { %17340 = vmatprep.subr.bf16.mxu1 %v25023_v29  ;;  %17436 = vmatprep.subr.bf16.mxu0 %v22126_v34 }
 0x6af   : > { %6124 = vmatmul.mubr.f32.vlgmr.msra.gmra.mrb[98].mxu1 %v22286_v60  ;;  %6820 = vmatmul.mubr.f32.vlgmr.msra.gmra.mrb[98].mxu0 %v22286_v60 }
 0x6b0   : > { %17342 = vmatpush1.bf16.msra.mxu1 %v22328_v58  ;;  %17438 = vmatpush1.bf16.msra.mxu0 %v22332_v9 }
 0x6b1   : > { %6129 = vmatprep.mubr.f32.mxu1 %v25022_v19  ;;  %6825 = vmatprep.mubr.f32.mxu0 %v25022_v19 }
 0x6b2   : > { %17344 = vmatprep.subr.bf16.mxu1 %v22132_v37  ;;  %17440 = vmatprep.subr.bf16.mxu0 %v22136_v44 }
 0x6b3   : > { %6131 = vmatmul.mubr.f32.gmra.mrb[100].mxu1 %v22277_v15  ;;  %6827 = vmatmul.mubr.f32.gmra.mrb[100].mxu0 %v22277_v15 }
 0x6b4   : > { %17346 = vmatpush1.bf16.msra.mxu1 %v25024_v22  ;;  %17442 = vmatpush1.bf16.msra.mxu0 %v25025_v10  ;;  %v25049_v10 = vand.u32 4294901760, %v22259_v20  ;;  %v25050_v22 = vand.u32 4294901760, %v22264_v23  ;;  %v25053_v20 = vld [vmem:[#allocation46_spill] sm:$0xff] }
 0x6b5   : > { %17348 = vmatprep.subr.bf16.mxu1 %v25026_v30  ;;  %17444 = vmatprep.subr.bf16.mxu0 %v25027_v38  ;;  %v25047_v38 = vand.u32 4294901760, %v22254_v56  ;;  %v7284_v23 = vsel %vm4809_vm0, %v25053_v20, 0 }
 0x6b6   : > { %6233 = vmatprep.mubr.f32.mxu1 %v25022_v19  ;;  %6929 = vmatprep.mubr.f32.mxu0 %v25022_v19  ;;  %v22392_v44 = vpack.c.bf16 %v25050_v22, %v25049_v10  ;;  %v22432_v10 = vand.u32 4294901760, %v7284_v23 }
 0x6b8   : > { %17350 = vmatpush1.bf16.msra.mxu1 %v25028_v27  ;;  %17446 = vmatpush1.bf16.msra.mxu0 %v25029_v35  ;;  %v25045_v35 = vld [vmem:[#allocation52_spill] sm:$0xff]  ;;  %v25046_v27 = vand.u32 4294901760, %v22249_v7  ;;  %25051 = vst [vmem:[#allocation51_spill] sm:$0xff] %v22392_v44  ;;  %v25052_v7 = vld [vmem:[#allocation27_spill] sm:$0xff]  ;;  %v7363_v20 = vsub.f32 %v7284_v23, %v22432_v10 }
 0x6b9   : > { %17352 = vmatprep.subr.bf16.mxu1 %v22168_v40  ;;  %17448 = vmatprep.subr.bf16.mxu0 %v22170_v24  ;;  %v25042_v24 = vld [vmem:[#allocation55_spill] sm:$0xff]  ;;  %v25043_v40 = vld [vmem:[#allocation44_spill] sm:$0xff]  ;;  %v7293_v56 = vsel %vm4809_vm0, %v25052_v7, 0 }
 0x6ba   : > { %v22386_v30 = vpack.c.bf16 %v25047_v38, %v25046_v27  ;;  %v7299_v22 = vand.u32 4294901760, %v7293_v56  ;;  %v25058_v23 = vld [vmem:[#allocation39_spill] sm:$0xff] }
 0x6bc   : > { %17354 = vmatpush1.bf16.msra.mxu1 %v22172_v53  ;;  %17450 = vmatpush1.bf16.msra.mxu0 %v22174_v47  ;;  %v25040_v47 = vld [vmem:[#allocation36_spill] sm:$0xff]  ;;  %25048 = vst [vmem:[#allocation54_spill] sm:$0xff] %v22386_v30  ;;  %v7391_v27 = vsub.f32 %v7293_v56, %v7299_v22 }
 0x6bd   : > { %17356 = vmatprep.subr.bf16.mxu1 %v25030_v48  ;;  %17452 = vmatprep.subr.bf16.mxu0 %v25031_v11  ;;  %v25041_v53 = vld [vmem:[#allocation48_spill] sm:$0xff] }
 0x6be   : > { %v7392_v56 = vand.u32 4294901760, %v7391_v27 }
 0x6bf   : > { %6236 = vmatmul.mubr.f32.vlgmr.msra.gmra.mrb[98].mxu1 %v22292_v16  ;;  %6932 = vmatmul.mubr.f32.vlgmr.msra.gmra.mrb[98].mxu0 %v22292_v16  ;;  %v25038_v16 = vld [vmem:[#allocation50_spill] sm:$0xff] }
 0x6c0   : > { %17358 = vmatpush1.bf16.msra.mxu1 %v25032_v54  ;;  %17454 = vmatpush1.bf16.msra.mxu0 %v25033_v42 }
 0x6c1   : > { %6241 = vmatprep.mubr.f32.mxu1 %v25022_v19  ;;  %6937 = vmatprep.mubr.f32.mxu0 %v25022_v19 }
 0x6c2   : > { %17360 = vmatprep.subr.bf16.mxu1 %v25034_v62  ;;  %17456 = vmatprep.subr.bf16.mxu0 %v25035_v36 }
 0x6c3   : > { %6244 = vmatmul.mubr.f32.gmra.mrb[100].mxu1 %v22289_v33  ;;  %6940 = vmatmul.mubr.f32.gmra.mrb[100].mxu0 %v22289_v33  ;;  %v25044_v33 = vld [vmem:[#allocation34_spill] sm:$0xff] }
 0x6c4   : > { %17362 = vmatpush1.bf16.msra.mxu1 %v25036_v28  ;;  %17458 = vmatpush1.bf16.msra.mxu0 %v25037_v57 }
 0x6c5   : > { %17364 = vmatprep.subr.bf16.mxu1 %v25038_v16  ;;  %17460 = vmatprep.subr.bf16.mxu0 %v25039_v8 }
 0x6c6   : > { %6330 = vmatprep.mubr.f32.mxu1 %v25022_v19  ;;  %7026 = vmatprep.mubr.f32.mxu0 %v25022_v19 }
 0x6c8   : > { %17366 = vmatpush1.bf16.msra.mxu1 %v25040_v47  ;;  %17462 = vmatpush1.bf16.msra.mxu0 %v25041_v53 }
 0x6c9   : > { %17368 = vmatprep.subr.bf16.mxu1 %v25042_v24  ;;  %17464 = vmatprep.subr.bf16.mxu0 %v25043_v40 }
 0x6cc   : > { %17370 = vmatpush1.bf16.msra.mxu1 %v25044_v33  ;;  %17466 = vmatpush1.bf16.msra.mxu0 %v25045_v35 }
 0x6cd   : > { %17372 = vmatprep.subr.bf16.mxu1 %v22180_v31  ;;  %17468 = vmatprep.subr.bf16.mxu0 %v22186_v50 }
 0x6cf   : > { %6334 = vmatmul.mubr.f32.vlgmr.msra.gmra.mrb[98].mxu1 %v22295_v2  ;;  %7030 = vmatmul.mubr.f32.vlgmr.msra.gmra.mrb[98].mxu0 %v22295_v2  ;;  %v25054_v2 = vld [vmem:[#allocation26_spill] sm:$0xff] }
 0x6d0   : > { %17374 = vmatpush1.bf16.msra.mxu1 %v22386_v30  ;;  %17470 = vmatpush1.bf16.msra.mxu0 %v22392_v44  ;;  %v7393_v44 = vsub.f32 %v7391_v27, %v7392_v56 }
 0x6d1   : > { %6339 = vmatprep.mubr.f32.mxu1 %v25022_v19  ;;  %7035 = vmatprep.mubr.f32.mxu0 %v25022_v19 }
 0x6d2   : > { %17376 = vmatprep.subr.bf16.mxu1 %v22192_v52  ;;  %17472 = vmatprep.subr.bf16.mxu0 %v22198_v12  ;;  %v25060_v12 = vand.u32 4294901760, %v25054_v2 }
 0x6d3   : > { %6343 = vmatmul.mubr.f32.gmra.mrb[100].mxu1 %v22298_v45  ;;  %7039 = vmatmul.mubr.f32.gmra.mrb[100].mxu0 %v22298_v45  ;;  %v7290_v45 = vsel %vm4809_vm0, %v25054_v2, 0 }
 0x6d4   : > { %17378 = vmatpush1.bf16.msra.mxu1 %v22204_v4  ;;  %17474 = vmatpush1.bf16.msra.mxu0 %v22210_v49  ;;  %v7296_v38 = vand.u32 4294901760, %v7290_v45  ;;  %v7364_v49 = vand.u32 4294901760, %v7363_v20 }
 0x6d5   : > { %17380 = vmatprep.subr.bf16.mxu1 %v22216_v3  ;;  %17476 = vmatprep.subr.bf16.mxu0 %v22222_v55  ;;  %v25059_v55 = vand.u32 4294901760, %v25058_v23 }
 0x6d6   : > { %6461 = vmatprep.mubr.f32.mxu1 %v25022_v19  ;;  %7157 = vmatprep.mubr.f32.mxu0 %v25022_v19  ;;  %v17499_v4 = vpack.c.bf16 %v7299_v22, %v7296_v38  ;;  %v7365_v30 = vsub.f32 %v7363_v20, %v7364_v49 }
 0x6d8   : > { %17382 = vmatpush1.bf16.msra.mxu1 %v22228_v61  ;;  %17478 = vmatpush1.bf16.msra.mxu0 %v22234_v46 }
 0x6d9   : > { %17384 = vmatprep.subr.bf16.mxu1 %v22238_v39  ;;  %17480 = vmatprep.subr.bf16.mxu0 %v22240_v63  ;;  %v25056_v39 = vld [vmem:[#allocation38_spill] sm:$0xff] }
 0x6da   : > { %v25057_v46 = vand.u32 4294901760, %v25056_v39 }
 0x6dc   : > { %17386 = vmatpush1.bf16.msra.mxu1 %v22242_v14  ;;  %17482 = vmatpush1.bf16.msra.mxu0 %v22244_v13  ;;  %v7384_v13 = vsub.f32 %v7290_v45, %v7296_v38  ;;  %v25055_v14 = vld [vmem:[#allocation33_spill] sm:$0xff]  ;;  %v7929_v61 = vsub.f32 %v25056_v39, %v25057_v46  ;;  %v7922_v45 = vsub.f32 %v25058_v23, %v25059_v55  ;;  %v25061_v46 = vand.u32 4294901760, %v25052_v7 }
 0x6dd   : > { %17388 = vmatprep.subr.bf16.mxu1 %v25030_v48  ;;  %17484 = vmatprep.subr.bf16.mxu0 %v25031_v11  ;;  %v7287_v63 = vsel %vm4809_vm0, %v25055_v14, 0  ;;  %v7366_v38 = vand.u32 4294901760, %v7365_v30 }
 0x6de   : > { %v7372_v3 = vand.u32 4294901760, %v7287_v63  ;;  %v7385_v14 = vand.u32 4294901760, %v7384_v13  ;;  %v22461_v39 = vpack.c.bf16 %v25061_v46, %v25060_v12  ;;  %v7930_v52 = vand.u32 4294901760, %v7929_v61 }
 0x6df   : > { %6463 = vmatmul.mubr.f32.vlgmr.msra.gmra.mrb[98].mxu1 %v22286_v60  ;;  %7159 = vmatmul.mubr.f32.vlgmr.msra.gmra.mrb[98].mxu0 %v22286_v60  ;;  %v7923_v55 = vand.u32 4294901760, %v7922_v45  ;;  %v7394_v12 = vand.u32 4294901760, %v7393_v44  ;;  %v17507_v46 = vpack.c.bf16 %v7391_v27, %v7384_v13 }
 0x6e0   : > { %17390 = vmatpush1.bf16.msra.mxu1 %v25032_v54  ;;  %17486 = vmatpush1.bf16.msra.mxu0 %v25033_v42  ;;  %v7373_v23 = vsub.f32 %v7287_v63, %v7372_v3  ;;  %v7386_v50 = vsub.f32 %v7384_v13, %v7385_v14  ;;  %v17515_v44 = vpack.c.bf16 %v7392_v56, %v7385_v14 }
 0x6e1   : > { %6468 = vmatprep.mubr.f32.mxu1 %v25022_v19  ;;  %7164 = vmatprep.mubr.f32.mxu0 %v25022_v19  ;;  %v22468_v22 = vpack.c.bf16 %v7930_v52, %v7923_v55 }
 0x6e2   : > { %17392 = vmatprep.subr.bf16.mxu1 %v25034_v62  ;;  %17488 = vmatprep.subr.bf16.mxu0 %v25035_v36  ;;  %v7374_v61 = vand.u32 4294901760, %v7373_v23  ;;  %v7387_v63 = vand.u32 4294901760, %v7386_v50  ;;  %v25062_v50 = vld [vmem:[#allocation41_spill] sm:$0xff] }
 0x6e3   : > { %6470 = vmatmul.mubr.f32.gmra.mrb[100].mxu1 %v22277_v15  ;;  %7166 = vmatmul.mubr.f32.gmra.mrb[100].mxu0 %v22277_v15 }
 0x6e4   : > { %17394 = vmatpush1.bf16.msra.mxu1 %v25036_v28  ;;  %17490 = vmatpush1.bf16.msra.mxu0 %v25037_v57  ;;  %v7375_v52 = vsub.f32 %v7373_v23, %v7374_v61 }
 0x6e5   : > { %17396 = vmatprep.subr.bf16.mxu1 %v25038_v16  ;;  %17492 = vmatprep.subr.bf16.mxu0 %v25039_v8 }
 0x6e6   : > { %6556 = vmatprep.mubr.f32.mxu1 %v25022_v19  ;;  %7252 = vmatprep.mubr.f32.mxu0 %v25022_v19  ;;  %v7376_v45 = vand.u32 4294901760, %v7375_v52 }
 0x6e8   : > { %17398 = vmatpush1.bf16.msra.mxu1 %v25040_v47  ;;  %17494 = vmatpush1.bf16.msra.mxu0 %v25041_v53 }
 0x6e9   : > { %17400 = vmatprep.subr.bf16.mxu1 %v25042_v24  ;;  %17496 = vmatprep.subr.bf16.mxu0 %v25043_v40 }
 0x6ec   : > { %17402 = vmatpush1.bf16.msra.mxu1 %v25044_v33  ;;  %17498 = vmatpush1.bf16.msra.mxu0 %v25045_v35 }
 0x6ed   : > { %17500 = vmatprep.subr.bf16.mxu1 %v17499_v4  ;;  %17524 = vmatprep.subr.bf16.mxu0 %v22461_v39 }
 0x6ef   : > { %6558 = vmatmul.mubr.f32.vlgmr.msra.gmra.mrb[98].mxu1 %v22286_v60  ;;  %7254 = vmatmul.mubr.f32.vlgmr.msra.gmra.mrb[98].mxu0 %v22286_v60  ;;  %v17503_v60 = vpack.c.bf16 %v7394_v12, %v7387_v63  ;;  %v25065_v63 = vld [vmem:[#allocation21_spill] sm:$0xff] }
 0x6f0   : > { %17526 = vmatpush3.bf16.msra.mxu0 %v22461_v39  ;;  %6563 = vmatprep.mubr.f32.mxu1 %v25022_v19 }
 0x6f1   : > { %17528 = vmatprep.subr.bf16.mxu0 %v22468_v22  ;;  %7259 = vmatprep.mubr.f32.mxu0 %v25022_v19 }
 0x6f3   : > { %6565 = vmatmul.mubr.f32.gmra.mrb[100].mxu1 %v22277_v15  ;;  %7261 = vmatmul.mubr.f32.gmra.mrb[100].mxu0 %v22277_v15 }
 0x6f4   : > { %16243 = vmatprep.mubr.f32.mxu1 %v7366_v38  ;;  %v25064_v38 = vld [vmem:[#allocation30_spill] sm:$0xff] }
 0x6f5   : > { %17502 = vmatpush3.bf16.xpose.msra.mxu1 %v17499_v4 }
 0x6f6   : > { %17504 = vmatprep.subr.bf16.mxu1 %v17503_v60 }
 0x6fc   : > { %16244 = vmatmul.mubr.f32.vlgmr.msra.gmra.mrb[102].mxu1 %v7376_v45 }
 0x6fd   : > { %17506 = vmatpush3.bf16.xpose.msra.mxu1 %v17503_v60  ;;  %16250 = vmatprep.mubr.f32.mxu1 %v22432_v10  ;;  %v25066_v60 = vld [vmem:[#allocation28_spill] sm:$0xff] }
 0x6fe   : > { %17508 = vmatprep.subr.bf16.mxu1 %v17507_v46 }
 0x704   : > { %16251 = vmatmul.mubr.f32.vlgmr.msra.gmra.mrb[102].mxu1 %v7372_v3 }
 0x705   : > { %17510 = vmatpush3.bf16.xpose.msra.mxu1 %v17507_v46  ;;  %16257 = vmatprep.mubr.f32.mxu1 %v7363_v20 }
 0x706   : > { %17512 = vmatprep.subr.bf16.mxu1 %v17499_v4 }
 0x70c   : > { %16258 = vmatmul.mubr.f32.vlgmr.msra.gmra.mrb[102].mxu1 %v7373_v23 }
 0x70d   : > { %17514 = vmatpush3.bf16.xpose.msra.mxu1 %v17499_v4  ;;  %16264 = vmatprep.mubr.f32.mxu1 %v7364_v49 }
 0x70e   : > { %17516 = vmatprep.subr.bf16.mxu1 %v17515_v44 }
 0x714   : > { %16265 = vmatmul.mubr.f32.vlgmr.msra.gmra.mrb[102].mxu1 %v7374_v61  ;;  %v25063_v61 = vld [vmem:[#allocation24_spill] sm:$0xff] }
 0x715   : > { %17518 = vmatpush3.bf16.xpose.msra.mxu1 %v17515_v44  ;;  %16271 = vmatprep.mubr.f32.mxu1 %v22432_v10 }
 0x716   : > { %17520 = vmatprep.subr.bf16.mxu1 %v17499_v4 }
 0x71c   : > { %16272 = vmatmul.mubr.f32.vlgmr.msra.gmra.mrb[102].mxu1 %v7372_v3 }
 0x71d   : > { %17522 = vmatpush3.bf16.xpose.msra.mxu1 %v17499_v4  ;;  %16278 = vmatprep.mubr.f32.mxu1 %v22432_v10 }
 0x71e   : > { %17644 = vmatprep.subr.bf16.mxu1 %v25031_v11 }
 0x724   : > { %16279 = vmatmul.mubr.f32.vlgmr.msra.gmra.mrb[102].mxu1 %v7372_v3 }
 0x725   : > { %17646 = vmatpush1.bf16.msra.mxu1 %v25033_v42  ;;  %9123 = vmatprep.mubr.f32.mxu1 %v25022_v19 }
 0x726   : > { %17648 = vmatprep.subr.bf16.mxu1 %v25035_v36 }
 0x729   : > { %17650 = vmatpush1.bf16.msra.mxu1 %v25037_v57 }
 0x72a   : > { %17652 = vmatprep.subr.bf16.mxu1 %v25039_v8 }
 0x72d   : > { %17654 = vmatpush1.bf16.msra.mxu1 %v25041_v53 }
 0x72e   : > { %17656 = vmatprep.subr.bf16.mxu1 %v25043_v40 }
 0x731   : > { %17658 = vmatpush1.bf16.msra.mxu1 %v25045_v35 }
 0x732   : > { %17660 = vmatprep.subr.bf16.mxu1 %v25062_v50 }
 0x7f7   : > { %v16280_v4 = vpop.f32.mrb[102].mxu1 }
 0x7f8   : > { %v7787_v49 = vpop.f32.mrb[103].mxu1  ;;  %v7800_v3 = vsel %vm5324_vm1, %v16280_v4, -inf }
 0x7f9   : > { %7801 = vmax.xlane.f32.xlu1 %v7800_v3  ;;  %v7797_v14 = vsel %vm5324_vm1, %v7787_v49, -inf }
 0x7fa   : > { %7798 = vmax.xlane.f32.xlu0 %v7797_v14 }
 0x886   : > { %v7802_v13 = vpop.xlane.xlu1 %7801 }
 0x887   : > { %v7804_v15 = vsub.f32 %v16280_v4, %v7802_v13  ;;  %v7799_v30 = vpop.xlane.xlu0 %7798 }
 0x888   : > { %v7803_v20 = vsub.f32 %v7787_v49, %v7799_v30 }
 0x889   : > { %v7807_v10 = vmul.f32 1.442695, %v7804_v15 }
 0x88a   : > { %v7805_v27 = vmul.f32 1.442695, %v7803_v20 }
 0x88b   : > { %18616 = vpow2.f32 %v7807_v10 }
 0x88c   : > { %18618 = vpow2.f32 %v7805_v27 }
 0x895   : > { %v18617_v56 = vpop.eup %18616 }
 0x896   : > { %v18619_v55 = vpop.eup %18618  ;;  %v7812_v23 = vsel %vm5324_vm1, %v18617_v56, 0.0 }
 0x897   : > { %7813 = vadd.xlane.f32.xlu1 %v7812_v23  ;;  %v7809_v12 = vsel %vm5324_vm1, %v18619_v55, 0.0 }
 0x898   : > { %7810 = vadd.xlane.f32.xlu0 %v7809_v12 }
 0x8a8   : > { %9793 = vrot.lane.b32.xlu1 %v25063_v61, %s18870_s23 }
 0x8ac   : > { %9787 = vrot.lane.b32.xlu1 %v25064_v38, %s18870_s23 }
 0x8ae   : > { %9791 = vrot.lane.b32.xlu0 %v25065_v63, %s18870_s23 }
 0x8b0   : > { %9789 = vrot.lane.b32.xlu1 %v25066_v60, %s18870_s23 }
 0x924   : > { %v7814_v52 = vpop.xlane.xlu1 %7813 }
 0x925   : > { %18620 = vrcp.f32 %v7814_v52  ;;  %v7811_v45 = vpop.xlane.xlu0 %7810 }
 0x926   : > { %18622 = vrcp.f32 %v7811_v45 }
 0x928   : > { %v22501_v46 = vpop.permute.xlu1 %9793 }
 0x929   : > { %v24282_v44 = vand.u32 4294901760, %v22501_v46  ;;  %v22504_v50 = vpop.permute.xlu0 %9791 }
 0x92a   : > { %v24283_v4 = vand.u32 4294901760, %v22504_v50 }
 0x92b   : > { %v22510_v49 = vsub.f32 %v22501_v46, %v24282_v44 }
 0x92c   : > { %v22515_v3 = vsub.f32 %v22504_v50, %v24283_v4 }
 0x92d   : > { %v10438_v10 = vand.u32 4294901760, %v22510_v49 }
 0x92e   : > { %v22519_v14 = vpack.c.bf16 %v22510_v49, %v22515_v3  ;;  %v10431_v27 = vand.u32 4294901760, %v22515_v3 }
 0x92f   : > { %v18621_v13 = vpop.eup %18620 }
 0x930   : > { %25067 = vst [vmem:[#allocation20_spill] sm:$0xff] %v22519_v14  ;;  %v18623_v15 = vpop.eup %18622  ;;  %v7818_v30 = vmul.f32 %v18621_v13, %v7814_v52  ;;  %v22527_v63 = vpack.c.bf16 %v10438_v10, %v10431_v27 }
 0x931   : > { %v7817_v20 = vmul.f32 %v18623_v15, %v7811_v45 }
 0x932   : > { %v7820_v23 = vsub.f32 2.0, %v7818_v30 }
 0x933   : > { %v7819_v12 = vsub.f32 2.0, %v7817_v20 }
 0x934   : > { %v7822_v61 = vmul.f32 %v18621_v13, %v7820_v23 }
 0x935   : > { %v7821_v38 = vmul.f32 %v18623_v15, %v7819_v12 }
 0x936   : > { %v7824_v60 = vmul.f32 %v18617_v56, %v7822_v61  ;;  %v25068_v56 = vld [vmem:[#allocation18_spill] sm:$0xff] }
 0x937   : > { %v7823_v44 = vmul.f32 %v18619_v55, %v7821_v38  ;;  %v25069_v55 = vld [vmem:[#allocation32_spill] sm:$0xff] }
 0x938   : > { %v7829_v4 = vsel %vm5324_vm1, %v7824_v60, 0 }
 0x939   : > { %v7908_v52 = vand.u32 4294901760, %v7829_v4  ;;  %v7826_v45 = vsel %vm5324_vm1, %v7823_v44, 0 }
 0x93a   : > { %v7898_v14 = vand.u32 4294901760, %v7826_v45 }
 0x93b   : > { %v7909_v2 = vsub.f32 %v7829_v4, %v7908_v52 }
 0x93c   : > { %v7899_v7 = vsub.f32 %v7826_v45, %v7898_v14 }
 0x93d   : > { %v7910_v30 = vand.u32 4294901760, %v7909_v2 }
 0x93e   : > { %v7900_v20 = vand.u32 4294901760, %v7899_v7 }
 0x93f   : > { %v7911_v13 = vsub.f32 %v7909_v2, %v7910_v30 }
 0x940   : > { %v7901_v15 = vsub.f32 %v7899_v7, %v7900_v20 }
 0x941   : > { %v7912_v12 = vand.u32 4294901760, %v7911_v13 }
 0x942   : > { %v7902_v23 = vand.u32 4294901760, %v7901_v15  ;;  %v25091_v15 = vld [vmem:[#allocation67_spill] sm:$0xff] }
 0x944   : > { %16285 = vmatprep.mubr.f32.mxu0 %v7902_v23  ;;  %v25092_v23 = vld [vmem:[#allocation68_spill] sm:$0xff] }
 0x945   : > { %16286 = vmatmul.mubr.f32.vlgmr.msra.gmra.mrb[102].mxu0 %v7912_v12  ;;  %v25093_v12 = vld [vmem:[#allocation69_spill] sm:$0xff] }
 0x946   : > { %17530 = vmatpush3.bf16.msra.mxu0 %v22468_v22  ;;  %16292 = vmatprep.mubr.f32.mxu0 %v7898_v14 }
 0x947   : > { %17532 = vmatprep.subr.bf16.mxu0 %v25068_v56 }
 0x94d   : > { %16293 = vmatmul.mubr.f32.vlgmr.msra.gmra.mrb[102].mxu0 %v7908_v52 }
 0x94e   : > { %17534 = vmatpush3.bf16.msra.mxu0 %v25068_v56  ;;  %16299 = vmatprep.mubr.f32.mxu0 %v7899_v7  ;;  %v25070_v7 = vld [vmem:[#allocation49_spill] sm:$0xff]  ;;  %v25094_v56 = vld [vmem:[#allocation70_spill] sm:$0xff] }
 0x94f   : > { %17536 = vmatprep.subr.bf16.mxu0 %v22461_v39 }
 0x955   : > { %16300 = vmatmul.mubr.f32.vlgmr.msra.gmra.mrb[102].mxu0 %v7909_v2 }
 0x956   : > { %17538 = vmatpush3.bf16.msra.mxu0 %v22461_v39  ;;  %16306 = vmatprep.mubr.f32.mxu0 %v7900_v20 }
 0x957   : > { %17540 = vmatprep.subr.bf16.mxu0 %v25069_v55 }
 0x95d   : > { %16307 = vmatmul.mubr.f32.vlgmr.msra.gmra.mrb[102].mxu0 %v7910_v30 }
 0x95e   : > { %17542 = vmatpush3.bf16.msra.mxu0 %v25069_v55  ;;  %16313 = vmatprep.mubr.f32.mxu0 %v7898_v14  ;;  %v9788_v55 = vpop.permute.xlu1 %9787 }
 0x95f   : > { %17544 = vmatprep.subr.bf16.mxu0 %v22461_v39 }
 0x965   : > { %16314 = vmatmul.mubr.f32.vlgmr.msra.gmra.mrb[102].mxu0 %v7908_v52 }
 0x966   : > { %17546 = vmatpush3.bf16.msra.mxu0 %v22461_v39  ;;  %16320 = vmatprep.mubr.f32.mxu0 %v7898_v14 }
 0x967   : > { %17548 = vmatprep.subr.bf16.mxu0 %v25030_v48 }
 0x96d   : > { %16321 = vmatmul.mubr.f32.vlgmr.msra.gmra.mrb[102].mxu0 %v7908_v52 }
 0x96e   : > { %17550 = vmatpush1.bf16.msra.mxu0 %v25032_v54  ;;  %8427 = vmatprep.mubr.f32.mxu0 %v25022_v19 }
 0x96f   : > { %17552 = vmatprep.subr.bf16.mxu0 %v25034_v62 }
 0x972   : > { %17554 = vmatpush1.bf16.msra.mxu0 %v25036_v28 }
 0x973   : > { %17556 = vmatprep.subr.bf16.mxu0 %v25038_v16 }
 0x976   : > { %17558 = vmatpush1.bf16.msra.mxu0 %v25040_v47 }
 0x977   : > { %17560 = vmatprep.subr.bf16.mxu0 %v25042_v24 }
 0x97a   : > { %17562 = vmatpush1.bf16.msra.mxu0 %v25044_v33 }
 0x97b   : > { %17564 = vmatprep.subr.bf16.mxu0 %v25070_v7  ;;  %v25095_v7 = vld [vmem:[#allocation71_spill] sm:$0xff] }
 0xa40   : > { %v16322_v2 = vpop.f32.mrb[102].mxu0 }
 0xa41   : > { %v8345_v39 = vsel %vm4809_vm0, %v16322_v2, 0  ;;  %v8323_v22 = vpop.f32.mrb[103].mxu0  ;;  %v25096_v2 = vld [vmem:[#allocation72_spill] sm:$0xff] }
 0xa42   : > { %v22551_v44 = vand.u32 4294901760, %v8345_v39  ;;  %v8342_v4 = vsel %vm4809_vm0, %v8323_v22, 0  ;;  %v9799_v22 = vsel %vm4809_vm0, %v22504_v50, 0 }
 0xa43   : > { %v22554_v14 = vand.u32 4294901760, %v8342_v4 }
 0xa44   : > { %v22557_v61 = vsub.f32 %v8345_v39, %v22551_v44  ;;  %v9801_v39 = vsel %vm4809_vm0, %v22501_v46, 0 }
 0xa45   : > { %v8429_v38 = vsub.f32 %v8342_v4, %v22554_v14  ;;  %v9795_v4 = vsel %vm4809_vm0, %v9788_v55, 0  ;;  %v22742_v55 = vld [vmem:[%s19186_s30 + $0x110] sm:$0xff] }
 0xa46   : > { %v22563_v52 = vand.u32 4294901760, %v22557_v61 }
 0xa47   : > { %v22560_v60 = vand.u32 4294901760, %v8429_v38 }
 0xa48   : > { %v8442_v20 = vsub.f32 %v22557_v61, %v22563_v52 }
 0xa49   : > { %v8431_v45 = vsub.f32 %v8429_v38, %v22560_v60 }
 0xa4a   : > { %v8443_v13 = vand.u32 4294901760, %v8442_v20 }
 0xa4b   : > { %v8432_v30 = vand.u32 4294901760, %v8431_v45 }
 0xa4d   : > { %8433 = vmatmul.mubr.f32.vlgmr.msra.gmra.mrb[104].mxu0 %v8432_v30  ;;  %9129 = vmatmul.mubr.f32.vlgmr.msra.gmra.mrb[104].mxu1 %v8432_v30 }
 0xa4e   : > { %17566 = vmatpush1.bf16.msra.mxu0 %v22302_v43  ;;  %17662 = vmatpush1.bf16.msra.mxu1 %v22304_v21  ;;  %v25085_v43 = vld [vmem:[#allocation61_spill] sm:$0xff]  ;;  %v25086_v21 = vld [vmem:[#allocation62_spill] sm:$0xff] }
 0xa4f   : > { %8438 = vmatprep.mubr.f32.mxu0 %v25022_v19  ;;  %17568 = vmatprep.subr.bf16.mxu0 %v21992_v5  ;;  %v25073_v5 = vld [vmem:[#allocation47_spill] sm:$0xff] }
 0xa50   : > { %9134 = vmatprep.mubr.f32.mxu1 %v25022_v19  ;;  %17664 = vmatprep.subr.bf16.mxu1 %v22009_v6  ;;  %v25074_v6 = vld [vmem:[#allocation53_spill] sm:$0xff] }
 0xa51   : > { %8444 = vmatmul.mubr.f32.gmra.mrb[106].mxu0 %v8443_v13  ;;  %9140 = vmatmul.mubr.f32.gmra.mrb[106].mxu1 %v8443_v13 }
 0xa52   : > { %17570 = vmatpush1.bf16.msra.mxu0 %v22025_v0  ;;  %17666 = vmatpush1.bf16.msra.mxu1 %v22033_v59  ;;  %v25075_v0 = vld [vmem:[#allocation56_spill] sm:$0xff]  ;;  %v25076_v59 = vld [vmem:[#allocation25_spill] sm:$0xff] }
 0xa53   : > { %17572 = vmatprep.subr.bf16.mxu0 %v22072_v32  ;;  %17668 = vmatprep.subr.bf16.mxu1 %v22089_v25  ;;  %v25077_v32 = vld [vmem:[#allocation22_spill] sm:$0xff]  ;;  %v25078_v25 = vld [vmem:[#allocation37_spill] sm:$0xff] }
 0xa54   : > { %8594 = vmatprep.mubr.f32.mxu0 %v25022_v19  ;;  %9290 = vmatprep.mubr.f32.mxu1 %v25022_v19 }
 0xa56   : > { %17574 = vmatpush1.bf16.msra.mxu0 %v22101_v18  ;;  %17670 = vmatpush1.bf16.msra.mxu1 %v22106_v17  ;;  %v25071_v17 = vld [vmem:[#allocation19_spill] sm:$0xff]  ;;  %v25079_v18 = vld [vmem:[#allocation57_spill] sm:$0xff] }
 0xa57   : > { %17576 = vmatprep.subr.bf16.mxu0 %v22122_v51  ;;  %17672 = vmatprep.subr.bf16.mxu1 %v22128_v26  ;;  %v25072_v51 = vld [vmem:[#allocation45_spill] sm:$0xff]  ;;  %v25081_v26 = vld [vmem:[#allocation59_spill] sm:$0xff] }
 0xa5a   : > { %17578 = vmatpush1.bf16.msra.mxu0 %v22142_v1  ;;  %17674 = vmatpush1.bf16.msra.mxu1 %v22156_v41  ;;  %v25083_v1 = vld [vmem:[#allocation54_spill] sm:$0xff]  ;;  %v25084_v41 = vld [vmem:[#allocation51_spill] sm:$0xff] }
 0xa5b   : > { %17580 = vmatprep.subr.bf16.mxu0 %v25023_v29  ;;  %17676 = vmatprep.subr.bf16.mxu1 %v22126_v34  ;;  %v25080_v34 = vld [vmem:[#allocation58_spill] sm:$0xff] }
 0xa5c   : > { %v25090_v29 = vld [vmem:[#allocation66_spill] sm:$0xff] }
 0xa5d   : > { %8596 = vmatmul.mubr.f32.vlgmr.msra.gmra.mrb[104].mxu0 %v22554_v14  ;;  %9292 = vmatmul.mubr.f32.vlgmr.msra.gmra.mrb[104].mxu1 %v22554_v14 }
 0xa5e   : > { %17582 = vmatpush1.bf16.msra.mxu0 %v22328_v58  ;;  %17678 = vmatpush1.bf16.msra.mxu1 %v22332_v9  ;;  %v25088_v58 = vld [vmem:[#allocation64_spill] sm:$0xff]  ;;  %v25089_v9 = vld [vmem:[#allocation65_spill] sm:$0xff] }
 0xa5f   : > { %8601 = vmatprep.mubr.f32.mxu0 %v25022_v19  ;;  %9297 = vmatprep.mubr.f32.mxu1 %v25022_v19 }
 0xa60   : > { %17584 = vmatprep.subr.bf16.mxu0 %v22132_v37  ;;  %17680 = vmatprep.subr.bf16.mxu1 %v25071_v17  ;;  %v25082_v37 = vld [vmem:[#allocation60_spill] sm:$0xff] }
 0xa61   : > { %8603 = vmatmul.mubr.f32.gmra.mrb[106].mxu0 %v22551_v44  ;;  %9299 = vmatmul.mubr.f32.gmra.mrb[106].mxu1 %v22551_v44 }
 0xa62   : > { %17586 = vmatpush1.bf16.msra.mxu0 %v25072_v51  ;;  %17682 = vmatpush1.bf16.msra.mxu1 %v25073_v5 }
 0xa63   : > { %17588 = vmatprep.subr.bf16.mxu0 %v25074_v6  ;;  %17684 = vmatprep.subr.bf16.mxu1 %v25075_v0 }
 0xa64   : > { %8705 = vmatprep.mubr.f32.mxu0 %v25022_v19  ;;  %9401 = vmatprep.mubr.f32.mxu1 %v25022_v19 }
 0xa66   : > { %17590 = vmatpush1.bf16.msra.mxu0 %v25076_v59  ;;  %17686 = vmatpush1.bf16.msra.mxu1 %v25077_v32  ;;  %v25099_v32 = vld [vmem:[#allocation27_spill] sm:$0xff] }
 0xa67   : > { %17592 = vmatprep.subr.bf16.mxu0 %v25078_v25  ;;  %17688 = vmatprep.subr.bf16.mxu1 %v25079_v18  ;;  %v25100_v25 = vld [vmem:[#allocation46_spill] sm:$0xff]  ;;  %v25101_v18 = vld [vmem:[#allocation33_spill] sm:$0xff] }
 0xa6a   : > { %17594 = vmatpush1.bf16.msra.mxu0 %v25080_v34  ;;  %17690 = vmatpush1.bf16.msra.mxu1 %v25081_v26 }
 0xa6b   : > { %17596 = vmatprep.subr.bf16.mxu0 %v25030_v48  ;;  %17692 = vmatprep.subr.bf16.mxu1 %v25031_v11 }
 0xa6d   : > { %8708 = vmatmul.mubr.f32.vlgmr.msra.gmra.mrb[104].mxu0 %v8429_v38  ;;  %9404 = vmatmul.mubr.f32.vlgmr.msra.gmra.mrb[104].mxu1 %v8429_v38  ;;  %v9804_v38 = vand.u32 4294901760, %v9799_v22 }
 0xa6e   : > { %17598 = vmatpush1.bf16.msra.mxu0 %v25032_v54  ;;  %17694 = vmatpush1.bf16.msra.mxu1 %v25033_v42 }
 0xa6f   : > { %8713 = vmatprep.mubr.f32.mxu0 %v25022_v19  ;;  %9409 = vmatprep.mubr.f32.mxu1 %v25022_v19 }
 0xa70   : > { %17600 = vmatprep.subr.bf16.mxu0 %v25034_v62  ;;  %17696 = vmatprep.subr.bf16.mxu1 %v25035_v36 }
 0xa71   : > { %8716 = vmatmul.mubr.f32.gmra.mrb[106].mxu0 %v22557_v61  ;;  %9412 = vmatmul.mubr.f32.gmra.mrb[106].mxu1 %v22557_v61  ;;  %v9807_v61 = vand.u32 4294901760, %v9801_v39 }
 0xa72   : > { %17602 = vmatpush1.bf16.msra.mxu0 %v25036_v28  ;;  %17698 = vmatpush1.bf16.msra.mxu1 %v25037_v57 }
 0xa73   : > { %17604 = vmatprep.subr.bf16.mxu0 %v25038_v16  ;;  %17700 = vmatprep.subr.bf16.mxu1 %v25039_v8  ;;  %v17739_v45 = vpack.c.bf16 %v9807_v61, %v9804_v38 }
 0xa74   : > { %8802 = vmatprep.mubr.f32.mxu0 %v25022_v19  ;;  %9498 = vmatprep.mubr.f32.mxu1 %v25022_v19 }
 0xa76   : > { %17606 = vmatpush1.bf16.msra.mxu0 %v25040_v47  ;;  %17702 = vmatpush1.bf16.msra.mxu1 %v25041_v53 }
 0xa77   : > { %17608 = vmatprep.subr.bf16.mxu0 %v25042_v24  ;;  %17704 = vmatprep.subr.bf16.mxu1 %v25043_v40 }
 0xa7a   : > { %17610 = vmatpush1.bf16.msra.mxu0 %v25044_v33  ;;  %17706 = vmatpush1.bf16.msra.mxu1 %v25045_v35 }
 0xa7b   : > { %17612 = vmatprep.subr.bf16.mxu0 %v22180_v31  ;;  %17708 = vmatprep.subr.bf16.mxu1 %v25082_v37  ;;  %v25087_v31 = vld [vmem:[#allocation63_spill] sm:$0xff] }
 0xa7d   : > { %8806 = vmatmul.mubr.f32.vlgmr.msra.gmra.mrb[104].mxu0 %v22560_v60  ;;  %9502 = vmatmul.mubr.f32.vlgmr.msra.gmra.mrb[104].mxu1 %v22560_v60  ;;  %v22669_v60 = vand.u32 4294901760, %v9795_v4 }
 0xa7e   : > { %17614 = vmatpush1.bf16.msra.mxu0 %v25083_v1  ;;  %17710 = vmatpush1.bf16.msra.mxu1 %v25084_v41 }
 0xa7f   : > { %8811 = vmatprep.mubr.f32.mxu0 %v25022_v19  ;;  %9507 = vmatprep.mubr.f32.mxu1 %v25022_v19 }
 0xa80   : > { %17616 = vmatprep.subr.bf16.mxu0 %v25085_v43  ;;  %17712 = vmatprep.subr.bf16.mxu1 %v25086_v21 }
 0xa81   : > { %8815 = vmatmul.mubr.f32.gmra.mrb[106].mxu0 %v22563_v52  ;;  %9511 = vmatmul.mubr.f32.gmra.mrb[106].mxu1 %v22563_v52 }
 0xa82   : > { %17618 = vmatpush1.bf16.msra.mxu0 %v25087_v31  ;;  %17714 = vmatpush1.bf16.msra.mxu1 %v25088_v58 }
 0xa83   : > { %17620 = vmatprep.subr.bf16.mxu0 %v25089_v9  ;;  %17716 = vmatprep.subr.bf16.mxu1 %v25090_v29  ;;  %v25102_v29 = vld [vmem:[#allocation26_spill] sm:$0xff] }
 0xa84   : > { %8933 = vmatprep.mubr.f32.mxu0 %v25022_v19  ;;  %9629 = vmatprep.mubr.f32.mxu1 %v25022_v19 }
 0xa86   : > { %17622 = vmatpush1.bf16.msra.mxu0 %v25091_v15  ;;  %17718 = vmatpush1.bf16.msra.mxu1 %v25092_v23  ;;  %v22734_v15 = vld [vmem:[%s19186_s30 + $0x118] sm:$0xff] }
 0xa87   : > { %17624 = vmatprep.subr.bf16.mxu0 %v25093_v12  ;;  %17720 = vmatprep.subr.bf16.mxu1 %v25094_v56  ;;  %v22737_v23 = vld [vmem:[%s19186_s30 + $0x138] sm:$0xff]  ;;  %v11553_v12 = vand.u32 4294901760, %v22734_v15 }
 0xa88   : > { %v11557_v56 = vand.u32 4294901760, %v22737_v23 }
 0xa8a   : > { %17626 = vmatpush1.bf16.msra.mxu0 %v25095_v7  ;;  %17722 = vmatpush1.bf16.msra.mxu1 %v25096_v2  ;;  %v22745_v7 = vld [vmem:[%s19186_s30 + $0x130] sm:$0xff]  ;;  %v24288_v2 = vand.u32 4294901760, %v22742_v55 }
 0xa8b   : > { %17628 = vmatprep.subr.bf16.mxu0 %v25030_v48  ;;  %17724 = vmatprep.subr.bf16.mxu1 %v25031_v11  ;;  %v22675_v48 = vsub.f32 %v9801_v39, %v9807_v61  ;;  %v9892_v11 = vsub.f32 %v9799_v22, %v9804_v38  ;;  %v24287_v39 = vand.u32 4294901760, %v22745_v7  ;;  %v22753_v22 = vpack.c.bf16 %v11557_v56, %v11553_v12 }
 0xa8d   : > { %8935 = vmatmul.mubr.f32.vlgmr.msra.gmra.mrb[104].mxu0 %v22554_v14  ;;  %9631 = vmatmul.mubr.f32.vlgmr.msra.gmra.mrb[104].mxu1 %v22554_v14  ;;  %v17747_v51 = vpack.c.bf16 %v22675_v48, %v9892_v11  ;;  %25103 = vst [vmem:[#allocation43_spill] sm:$0xff] %v22753_v22 }
 0xa8e   : > { %17630 = vmatpush1.bf16.msra.mxu0 %v25032_v54  ;;  %17726 = vmatpush1.bf16.msra.mxu1 %v25033_v42  ;;  %v9790_v54 = vpop.permute.xlu1 %9789  ;;  %v9871_v42 = vsub.f32 %v9795_v4, %v22669_v60  ;;  %v22759_v4 = vpack.c.bf16 %v24287_v39, %v24288_v2 }
 0xa8f   : > { %8940 = vmatprep.mubr.f32.mxu0 %v25022_v19  ;;  %9636 = vmatprep.mubr.f32.mxu1 %v25022_v19 }
 0xa90   : > { %17632 = vmatprep.subr.bf16.mxu0 %v25034_v62  ;;  %17728 = vmatprep.subr.bf16.mxu1 %v25035_v36  ;;  %v9797_v36 = vsel %vm4809_vm0, %v9790_v54, 0  ;;  %v10432_v62 = vsub.f32 %v22515_v3, %v10431_v27  ;;  %v25097_v3 = vand.u32 4294901760, %v22504_v50  ;;  %v25098_v27 = vand.u32 4294901760, %v22501_v46  ;;  %25104 = vst [vmem:[#allocation23_spill] sm:$0xff] %v22759_v4 }
 0xa91   : > { %8942 = vmatmul.mubr.f32.gmra.mrb[106].mxu0 %v22551_v44  ;;  %9638 = vmatmul.mubr.f32.gmra.mrb[106].mxu1 %v22551_v44  ;;  %v9880_v52 = vand.u32 4294901760, %v9797_v36 }
 0xa92   : > { %17634 = vmatpush1.bf16.msra.mxu0 %v25036_v28  ;;  %17730 = vmatpush1.bf16.msra.mxu1 %v25037_v57  ;;  %v10439_v57 = vsub.f32 %v22510_v49, %v10438_v10  ;;  %v9900_v28 = vand.u32 4294901760, %v22675_v48  ;;  %v22700_v30 = vpack.c.bf16 %v25098_v27, %v25097_v3  ;;  %v10433_v49 = vand.u32 4294901760, %v10432_v62 }
 0xa93   : > { %17636 = vmatprep.subr.bf16.mxu0 %v25038_v16  ;;  %17732 = vmatprep.subr.bf16.mxu1 %v25039_v8  ;;  %v9893_v8 = vand.u32 4294901760, %v9892_v11  ;;  %v9872_v16 = vand.u32 4294901760, %v9871_v42 }
 0xa94   : > { %9028 = vmatprep.mubr.f32.mxu0 %v25022_v19  ;;  %9724 = vmatprep.mubr.f32.mxu1 %v25022_v19 }
 0xa95   : > { %v9873_v10 = vsub.f32 %v9871_v42, %v9872_v16  ;;  %v17755_v5 = vpack.c.bf16 %v9900_v28, %v9893_v8 }
 0xa96   : > { %17638 = vmatpush1.bf16.msra.mxu0 %v25040_v47  ;;  %17734 = vmatpush1.bf16.msra.mxu1 %v25041_v53  ;;  %v10440_v47 = vand.u32 4294901760, %v10439_v57  ;;  %v9894_v53 = vsub.f32 %v9892_v11, %v9893_v8 }
 0xa97   : > { %17640 = vmatprep.subr.bf16.mxu0 %v25042_v24  ;;  %17736 = vmatprep.subr.bf16.mxu1 %v25043_v40  ;;  %v9901_v24 = vsub.f32 %v22675_v48, %v9900_v28  ;;  %v9881_v40 = vsub.f32 %v9797_v36, %v9880_v52  ;;  %v9874_v20 = vand.u32 4294901760, %v9873_v10 }
 0xa98   : > { %v22708_v46 = vpack.c.bf16 %v10440_v47, %v10433_v49 }
 0xa99   : > { %v9882_v50 = vand.u32 4294901760, %v9881_v40 }
 0xa9a   : > { %17642 = vmatpush1.bf16.msra.mxu0 %v25044_v33  ;;  %17738 = vmatpush1.bf16.msra.mxu1 %v25045_v35  ;;  %v9895_v33 = vand.u32 4294901760, %v9894_v53  ;;  %v9902_v35 = vand.u32 4294901760, %v9901_v24 }
 0xa9b   : > { %17740 = vmatprep.subr.bf16.mxu0 %v17739_v45  ;;  %17764 = vmatprep.subr.bf16.mxu1 %v22700_v30  ;;  %v9883_v13 = vsub.f32 %v9881_v40, %v9882_v50 }
 0xa9d   : > { %9030 = vmatmul.mubr.f32.vlgmr.msra.gmra.mrb[104].mxu0 %v22554_v14  ;;  %9726 = vmatmul.mubr.f32.vlgmr.msra.gmra.mrb[104].mxu1 %v22554_v14  ;;  %v17743_v14 = vpack.c.bf16 %v9902_v35, %v9895_v33  ;;  %v9884_v17 = vand.u32 4294901760, %v9883_v13  ;;  %v25105_v35 = vld [vmem:[#allocation20_spill] sm:$0xff] }
 0xa9e   : > { %17766 = vmatpush3.bf16.msra.mxu1 %v22700_v30  ;;  %9035 = vmatprep.mubr.f32.mxu0 %v25022_v19 }
 0xa9f   : > { %17768 = vmatprep.subr.bf16.mxu1 %v22708_v46  ;;  %9731 = vmatprep.mubr.f32.mxu1 %v25022_v19 }
 0xaa1   : > { %9037 = vmatmul.mubr.f32.gmra.mrb[106].mxu0 %v22551_v44  ;;  %9733 = vmatmul.mubr.f32.gmra.mrb[106].mxu1 %v22551_v44 }
 0xaa2   : > { %16327 = vmatprep.mubr.f32.mxu0 %v9874_v20  ;;  %v22773_v20 = vld [vmem:[%s19186_s30 + $0x128] sm:$0xff] }
 0xaa3   : > { %17742 = vmatpush3.bf16.xpose.msra.mxu0 %v17739_v45 }
 0xaa4   : > { %17744 = vmatprep.subr.bf16.mxu0 %v17743_v14 }
 0xaaa   : > { %16328 = vmatmul.mubr.f32.vlgmr.msra.gmra.mrb[108].mxu0 %v9884_v17  ;;  %v22781_v17 = vld [vmem:[%s19186_s30 + $0x100] sm:$0xff] }
 0xaab   : > { %17746 = vmatpush3.bf16.xpose.msra.mxu0 %v17743_v14  ;;  %16334 = vmatprep.mubr.f32.mxu0 %v22669_v60  ;;  %v10861_v14 = vand.u32 4294901760, %v22773_v20 }
 0xaac   : > { %17748 = vmatprep.subr.bf16.mxu0 %v17747_v51 }
 0xab2   : > { %16335 = vmatmul.mubr.f32.vlgmr.msra.gmra.mrb[108].mxu0 %v9880_v52 }
 0xab3   : > { %17750 = vmatpush3.bf16.xpose.msra.mxu0 %v17747_v51  ;;  %16341 = vmatprep.mubr.f32.mxu0 %v9871_v42  ;;  %v22784_v51 = vld [vmem:[%s19186_s30 + $0x120] sm:$0xff] }
 0xab4   : > { %17752 = vmatprep.subr.bf16.mxu0 %v17739_v45 }
 0xaba   : > { %16342 = vmatmul.mubr.f32.vlgmr.msra.gmra.mrb[108].mxu0 %v9881_v40 }
 0xabb   : > { %17754 = vmatpush3.bf16.xpose.msra.mxu0 %v17739_v45  ;;  %16348 = vmatprep.mubr.f32.mxu0 %v9872_v16 }
 0xabc   : > { %17756 = vmatprep.subr.bf16.mxu0 %v17755_v5 }
 0xac2   : > { %16349 = vmatmul.mubr.f32.vlgmr.msra.gmra.mrb[108].mxu0 %v9882_v50  ;;  %v9756_v50 = vld [vmem:[%s19186_s30 + $0x108] sm:$0xff] }
 0xac3   : > { %17758 = vmatpush3.bf16.xpose.msra.mxu0 %v17755_v5  ;;  %16355 = vmatprep.mubr.f32.mxu0 %v22669_v60  ;;  %v24289_v5 = vand.u32 4294901760, %v22784_v51 }
 0xac4   : > { %17760 = vmatprep.subr.bf16.mxu0 %v17739_v45 }
 0xaca   : > { %16356 = vmatmul.mubr.f32.vlgmr.msra.gmra.mrb[108].mxu0 %v9880_v52 }
 0xacb   : > { %17762 = vmatpush3.bf16.xpose.msra.mxu0 %v17739_v45  ;;  %16362 = vmatprep.mubr.f32.mxu0 %v22669_v60 }
 0xacc   : > { %17884 = vmatprep.subr.bf16.mxu0 %v22753_v22 }
 0xad2   : > { %16363 = vmatmul.mubr.f32.vlgmr.msra.gmra.mrb[108].mxu0 %v9880_v52 }
 0xad3   : > { %11633 = vmatprep.mubr.f32.mxu0 %v25022_v19  ;;  %17886 = vmatpush1.bf16.msra.mxu0 %v22759_v4 }
 0xba5   : > { %v16364_v44 = vpop.f32.mrb[108].mxu0 }
 0xba6   : > { %v10295_v6 = vpop.f32.mrb[109].mxu0  ;;  %v10308_v0 = vsel %vm5324_vm1, %v16364_v44, -inf }
 0xba7   : > { %10309 = vmax.xlane.f32.xlu1 %v10308_v0  ;;  %v10305_v59 = vsel %vm5324_vm1, %v10295_v6, -inf  ;;  %v22805_v0 = vld [vmem:[%s19186_s30 + $0x158] sm:$0xff] }
 0xba8   : > { %10306 = vmax.xlane.f32.xlu0 %v10305_v59 }
 0xbb8   : > { %12271 = vrot.lane.b32.xlu1 %v25099_v32, %s18870_s23 }
 0xbbc   : > { %12265 = vrot.lane.b32.xlu1 %v25100_v25, %s18870_s23  ;;  %v22810_v25 = vld [vmem:[%s19186_s30 + $0x178] sm:$0xff] }
 0xbc0   : > { %12267 = vrot.lane.b32.xlu1 %v25101_v18, %s18870_s23  ;;  %v11561_v18 = vand.u32 4294901760, %v22805_v0 }
 0xc34   : > { %v10310_v34 = vpop.xlane.xlu1 %10309 }
 0xc35   : > { %v10312_v26 = vsub.f32 %v16364_v44, %v10310_v34  ;;  %v10307_v37 = vpop.xlane.xlu0 %10306  ;;  %v22814_v34 = vld [vmem:[%s19186_s30 + $0x140] sm:$0xff] }
 0xc36   : > { %v10311_v1 = vsub.f32 %v10295_v6, %v10307_v37  ;;  %v22802_v6 = vld [vmem:[%s19186_s30 + $0x168] sm:$0xff]  ;;  %v11565_v37 = vand.u32 4294901760, %v22810_v25 }
 0xc37   : > { %v10315_v41 = vmul.f32 1.442695, %v10312_v26  ;;  %v10869_v32 = vand.u32 4294901760, %v22802_v6  ;;  %v22817_v26 = vld [vmem:[%s19186_s30 + $0x160] sm:$0xff] }
 0xc38   : > { %v10313_v43 = vmul.f32 1.442695, %v10311_v1  ;;  %v24312_v1 = vand.u32 4294901760, %v22814_v34 }
 0xc3a   : > { %18624 = vpow2.f32 %v10313_v43  ;;  %v22823_v43 = vld [vmem:[%s19186_s30 + $0x150] sm:$0xff] }
 0xc3b   : > { %18626 = vpow2.f32 %v10315_v41  ;;  %v24301_v41 = vand.u32 4294901760, %v22817_v26 }
 0xc44   : > { %v18625_v21 = vpop.eup %18624 }
 0xc45   : > { %v10317_v31 = vsel %vm5324_vm1, %v18625_v21, 0.0  ;;  %v18627_v58 = vpop.eup %18626 }
 0xc46   : > { %10318 = vadd.xlane.f32.xlu0 %v10317_v31  ;;  %v10320_v9 = vsel %vm5324_vm1, %v18627_v58, 0.0 }
 0xc4a   : > { %10321 = vadd.xlane.f32.xlu0 %v10320_v9 }
 0xc60   : > { %12269 = vrot.lane.b32.xlu0 %v25102_v29, %s18870_s23  ;;  %v22840_v29 = vpack.c.bf16 %v11565_v37, %v11561_v18 }
 0xc62   : > { %25109 = vst [vmem:[#allocation31_spill] sm:$0xff] %v22840_v29  ;;  %17888 = vmatprep.subr.bf16.mxu0 %v22840_v29 }
 0xcd3   : > { %v10319_v61 = vpop.xlane.xlu0 %10318 }
 0xcd4   : > { %18628 = vrcp.f32 %v10319_v61 }
 0xcd7   : > { %v10322_v38 = vpop.xlane.xlu0 %10321 }
 0xcd8   : > { %18630 = vrcp.f32 %v10322_v38 }
 0xcde   : > { %v18629_v60 = vpop.eup %18628 }
 0xcdf   : > { %v10325_v48 = vmul.f32 %v18629_v60, %v10319_v61  ;;  %v22846_v61 = vpack.c.bf16 %v24301_v41, %v24312_v1 }
 0xce1   : > { %v10327_v11 = vsub.f32 2.0, %v10325_v48  ;;  %25110 = vst [vmem:[#allocation50_spill] sm:$0xff] %v22846_v61  ;;  %v22855_v48 = vld [vmem:[%s19186_s30 + $0x198] sm:$0xff] }
 0xce2   : > { %v18631_v54 = vpop.eup %18630 }
 0xce3   : > { %v10329_v42 = vmul.f32 %v18629_v60, %v10327_v11  ;;  %v10326_v36 = vmul.f32 %v18631_v54, %v10322_v38  ;;  %v22849_v38 = vld [vmem:[%s19186_s30 + $0x188] sm:$0xff] }
 0xce4   : > { %v22852_v60 = vld [vmem:[%s19186_s30 + $0x1a8] sm:$0xff] }
 0xce5   : > { %v10331_v62 = vmul.f32 %v18625_v21, %v10329_v42  ;;  %v10328_v57 = vsub.f32 2.0, %v10326_v36  ;;  %v22826_v21 = vld [vmem:[%s19186_s30 + $0x170] sm:$0xff]  ;;  %v24297_v42 = vand.u32 4294901760, %v22852_v60  ;;  %v22867_v36 = vld [vmem:[%s19186_s30 + $0x1b8] sm:$0xff] }
 0xce6   : > { %v24299_v9 = vand.u32 4294901760, %v22826_v21 }
 0xce7   : > { %v10336_v8 = vsel %vm5324_vm1, %v10331_v62, 0  ;;  %v10330_v28 = vmul.f32 %v18631_v54, %v10328_v57  ;;  %v24298_v54 = vand.u32 4294901760, %v22849_v38  ;;  %v24296_v62 = vand.u32 4294901760, %v22855_v48  ;;  %v22871_v57 = vld [vmem:[%s19186_s30 + $0x180] sm:$0xff] }
 0xce8   : > { %v10408_v16 = vand.u32 4294901760, %v10336_v8 }
 0xce9   : > { %v10332_v52 = vmul.f32 %v18627_v58, %v10330_v28  ;;  %v24300_v58 = vand.u32 4294901760, %v22823_v43  ;;  %v24295_v28 = vand.u32 4294901760, %v22867_v36 }
 0xcea   : > { %v10409_v45 = vsub.f32 %v10336_v8, %v10408_v16  ;;  %v22874_v8 = vld [vmem:[%s19186_s30 + $0x1a0] sm:$0xff] }
 0xceb   : > { %v10339_v3 = vsel %vm5324_vm1, %v10332_v52, 0  ;;  %v22862_v11 = vpack.c.bf16 %v24299_v9, %v24300_v58  ;;  %v24293_v52 = vand.u32 4294901760, %v22874_v8 }
 0xcec   : > { %v10418_v27 = vand.u32 4294901760, %v10339_v3  ;;  %v10410_v49 = vand.u32 4294901760, %v10409_v45 }
 0xced   : > { %25111 = vst [vmem:[#allocation42_spill] sm:$0xff] %v22862_v11  ;;  %17890 = vmatpush1.bf16.msra.mxu0 %v22862_v11 }
 0xcee   : > { %v10419_v47 = vsub.f32 %v10339_v3, %v10418_v27  ;;  %v10411_v53 = vsub.f32 %v10409_v45, %v10410_v49  ;;  %v22885_v3 = vld [vmem:[%s19186_s30 + $0x1b0] sm:$0xff] }
 0xcf0   : > { %v10420_v24 = vand.u32 4294901760, %v10419_v47  ;;  %v10412_v40 = vand.u32 4294901760, %v10411_v53 }
 0xcf2   : > { %16369 = vmatprep.mubr.f32.mxu1 %v10412_v40  ;;  %v10421_v10 = vsub.f32 %v10419_v47, %v10420_v24 }
 0xcf4   : > { %v10422_v33 = vand.u32 4294901760, %v10421_v10  ;;  %v22911_v10 = vld [vmem:[%s19186_s30 + $0x1c8] sm:$0xff] }
 0xcf5   : > { %v24303_v2 = vand.u32 4294901760, %v22911_v10 }
 0xcf6   : > { %16370 = vmatmul.mubr.f32.vlgmr.msra.gmra.mrb[108].mxu1 %v10422_v33  ;;  %v22914_v33 = vld [vmem:[%s19186_s30 + $0x1e8] sm:$0xff] }
 0xcf7   : > { %17770 = vmatpush3.bf16.msra.mxu1 %v22708_v46  ;;  %16376 = vmatprep.mubr.f32.mxu1 %v10408_v16  ;;  %v10857_v46 = vand.u32 4294901760, %v9756_v50 }
 0xcf8   : > { %17772 = vmatprep.subr.bf16.mxu1 %v25105_v35 }
 0xcf9   : > { %v22778_v13 = vpack.c.bf16 %v10861_v14, %v10857_v46  ;;  %v22896_v53 = vsub.f32 %v9756_v50, %v10857_v46  ;;  %v22920_v50 = vsub.f32 %v22773_v20, %v10861_v14  ;;  %v22925_v46 = vsub.f32 %v22734_v15, %v11553_v12  ;;  %v22937_v20 = vld [vmem:[%s19186_s30 + $0x1f8] sm:$0xff]  ;;  %v22944_v15 = vld [vmem:[%s19186_s30 + $0x1e0] sm:$0xff] }
 0xcfa   : > { %v24304_v12 = vand.u32 4294901760, %v22937_v20 }
 0xcfb   : > { %25106 = vst [vmem:[#allocation35_spill] sm:$0xff] %v22778_v13  ;;  %v24311_v9 = vand.u32 4294901760, %v22920_v50 }
 0xcfe   : > { %16377 = vmatmul.mubr.f32.vlgmr.msra.gmra.mrb[108].mxu1 %v10418_v27 }
 0xcff   : > { %17774 = vmatpush3.bf16.msra.mxu1 %v25105_v35  ;;  %16383 = vmatprep.mubr.f32.mxu1 %v10409_v45  ;;  %v22882_v45 = vld [vmem:[%s19186_s30 + $0x190] sm:$0xff]  ;;  %v22917_v35 = vld [vmem:[%s19186_s30 + $0x1d8] sm:$0xff] }
 0xd00   : > { %17776 = vmatprep.subr.bf16.mxu1 %v22700_v30  ;;  %v24305_v14 = vand.u32 4294901760, %v22917_v35 }
 0xd02   : > { %v22972_v58 = vpack.c.bf16 %v24304_v12, %v24305_v14  ;;  %v10975_v14 = vsub.f32 %v22920_v50, %v24311_v9 }
 0xd04   : > { %25117 = vst [vmem:[#allocation52_spill] sm:$0xff] %v22972_v58 }
 0xd06   : > { %16384 = vmatmul.mubr.f32.vlgmr.msra.gmra.mrb[108].mxu1 %v10419_v47  ;;  %v24291_v47 = vand.u32 4294901760, %v22885_v3 }
 0xd07   : > { %17778 = vmatpush3.bf16.msra.mxu1 %v22700_v30  ;;  %16390 = vmatprep.mubr.f32.mxu1 %v10410_v49  ;;  %v24292_v49 = vand.u32 4294901760, %v22882_v45 }
 0xd08   : > { %17780 = vmatprep.subr.bf16.mxu1 %v22527_v63 }
 0xd09   : > { %v22932_v39 = vpack.c.bf16 %v24291_v47, %v24292_v49  ;;  %v24306_v49 = vand.u32 4294901760, %v22944_v15 }
 0xd0b   : > { %25115 = vst [vmem:[#allocation44_spill] sm:$0xff] %v22932_v39 }
 0xd0e   : > { %16391 = vmatmul.mubr.f32.vlgmr.msra.gmra.mrb[108].mxu1 %v10420_v24  ;;  %v22902_v24 = vpack.c.bf16 %v24295_v28, %v24296_v62  ;;  %v24307_v28 = vand.u32 4294901760, %v22896_v53 }
 0xd0f   : > { %17782 = vmatpush3.bf16.msra.mxu1 %v22527_v63  ;;  %16397 = vmatprep.mubr.f32.mxu1 %v10408_v16  ;;  %v24290_v63 = vand.u32 4294901760, %v22781_v17 }
 0xd10   : > { %17784 = vmatprep.subr.bf16.mxu1 %v22700_v30  ;;  %25113 = vst [vmem:[#allocation48_spill] sm:$0xff] %v22902_v24  ;;  %17892 = vmatprep.subr.bf16.mxu0 %v22902_v24 }
 0xd11   : > { %v22794_v44 = vpack.c.bf16 %v24289_v5, %v24290_v63  ;;  %v24302_v5 = vand.u32 4294901760, %v22914_v33  ;;  %v22941_v63 = vld [vmem:[%s19186_s30 + $0x1c0] sm:$0xff]  ;;  %17894 = vmatpush1.bf16.msra.mxu0 %v22932_v39 }
 0xd12   : > { %v24308_v47 = vand.u32 4294901760, %v22941_v63  ;;  %17896 = vmatprep.subr.bf16.mxu0 %v22972_v58 }
 0xd13   : > { %25107 = vst [vmem:[#allocation29_spill] sm:$0xff] %v22794_v44  ;;  %v22963_v62 = vpack.c.bf16 %v24302_v5, %v24303_v2  ;;  %v10963_v5 = vsub.f32 %v22896_v53, %v24307_v28  ;;  %v24313_v2 = vand.u32 4294901760, %v22925_v46 }
 0xd14   : > { %v22978_v41 = vpack.c.bf16 %v24306_v49, %v24308_v47  ;;  %v22997_v49 = vsub.f32 %v22737_v23, %v11557_v56 }
 0xd15   : > { %25116 = vst [vmem:[#allocation34_spill] sm:$0xff] %v22963_v62  ;;  %v10964_v28 = vand.u32 4294901760, %v10963_v5  ;;  %v11659_v47 = vsub.f32 %v22925_v46, %v24313_v2 }
 0xd16   : > { %16398 = vmatmul.mubr.f32.vlgmr.msra.gmra.mrb[108].mxu1 %v10418_v27  ;;  %25118 = vst [vmem:[#allocation38_spill] sm:$0xff] %v22978_v41 }
 0xd17   : > { %17786 = vmatpush3.bf16.msra.mxu1 %v22700_v30  ;;  %16404 = vmatprep.mubr.f32.mxu1 %v10408_v16  ;;  %v22799_v30 = vld [vmem:[%s19186_s30 + $0x148] sm:$0xff]  ;;  %v24294_v16 = vand.u32 4294901760, %v22871_v57  ;;  %v11660_v56 = vand.u32 4294901760, %v11659_v47 }
 0xd18   : > { %17788 = vmatprep.subr.bf16.mxu1 %v22778_v13  ;;  %v10865_v59 = vand.u32 4294901760, %v22799_v30 }
 0xd19   : > { %v22908_v40 = vpack.c.bf16 %v24293_v52, %v24294_v16  ;;  %v22952_v52 = vld [vmem:[%s19186_s30 + $0x1d0] sm:$0xff] }
 0xd1a   : > { %v22832_v31 = vpack.c.bf16 %v10869_v32, %v10865_v59  ;;  %v22955_v16 = vld [vmem:[%s19186_s30 + $0x1f0] sm:$0xff]  ;;  %v23009_v9 = vsub.f32 %v22799_v30, %v10865_v59  ;;  %v23026_v30 = vsub.f32 %v22805_v0, %v11561_v18  ;;  %v25122_v18 = vand.u32 4294901760, %v22814_v34 }
 0xd1b   : > { %25114 = vst [vmem:[#allocation55_spill] sm:$0xff] %v22908_v40 }
 0xd1c   : > { %25108 = vst [vmem:[#allocation40_spill] sm:$0xff] %v22832_v31  ;;  %v24315_v1 = vand.u32 4294901760, %v23009_v9  ;;  %v24317_v47 = vand.u32 4294901760, %v23026_v30 }
 0xd1e   : > { %16405 = vmatmul.mubr.f32.vlgmr.msra.gmra.mrb[108].mxu1 %v10418_v27  ;;  %v22892_v27 = vpack.c.bf16 %v24297_v42, %v24298_v54  ;;  %v24310_v42 = vand.u32 4294901760, %v22952_v52  ;;  %v24309_v54 = vand.u32 4294901760, %v22955_v16  ;;  %v10987_v59 = vsub.f32 %v23009_v9, %v24315_v1 }
 0xd1f   : > { %17790 = vmatpush1.bf16.msra.mxu1 %v22794_v44  ;;  %10937 = vmatprep.mubr.f32.mxu1 %v25022_v19  ;;  %v25124_v1 = vand.u32 4294901760, %v22823_v43 }
 0xd20   : > { %17792 = vmatprep.subr.bf16.mxu1 %v22832_v31  ;;  %25112 = vst [vmem:[#allocation36_spill] sm:$0xff] %v22892_v27  ;;  %v22989_v12 = vpack.c.bf16 %v24309_v54, %v24310_v42  ;;  %v10976_v54 = vand.u32 4294901760, %v10975_v14  ;;  %v24316_v42 = vand.u32 4294901760, %v22997_v49  ;;  %v23020_v14 = vsub.f32 %v22802_v6, %v10869_v32 }
 0xd21   : > { %v23038_v6 = vsub.f32 %v22810_v25, %v11565_v37  ;;  %v10988_v32 = vand.u32 4294901760, %v10987_v59  ;;  %v25123_v25 = vand.u32 4294901760, %v22817_v26 }
 0xd22   : > { %25119 = vst [vmem:[#allocation39_spill] sm:$0xff] %v22989_v12  ;;  %17898 = vmatpush1.bf16.msra.mxu0 %v22989_v12  ;;  %v23011_v23 = vpack.c.bf16 %v10976_v54, %v10964_v28  ;;  %v11671_v5 = vsub.f32 %v22997_v49, %v24316_v42  ;;  %v24314_v54 = vand.u32 4294901760, %v23020_v14  ;;  %v23227_v13 = vpack.c.bf16 %v23020_v14, %v23009_v9 }
 0xd23   : > { %17794 = vmatpush1.bf16.msra.mxu1 %v22846_v61  ;;  %v23056_v37 = vsub.f32 %v22817_v26, %v25123_v25 }
 0xd24   : > { %17796 = vmatprep.subr.bf16.mxu1 %v22892_v27  ;;  %25120 = vst [vmem:[#allocation41_spill] sm:$0xff] %v23011_v23  ;;  %v11672_v2 = vand.u32 4294901760, %v11671_v5  ;;  %v10999_v0 = vsub.f32 %v23020_v14, %v24314_v54  ;;  %v23046_v5 = vsub.f32 %v22814_v34, %v25122_v18  ;;  %v23062_v34 = vsub.f32 %v22823_v43, %v25124_v1 }
 0xd25   : > { %v25125_v18 = vand.u32 4294901760, %v22826_v21  ;;  %v24321_v26 = vand.u32 4294901760, %v23056_v37 }
 0xd26   : > { %v23032_v28 = vpack.c.bf16 %v11672_v2, %v11660_v56  ;;  %v11683_v2 = vsub.f32 %v23026_v30, %v24317_v47  ;;  %v24319_v56 = vand.u32 4294901760, %v23038_v6  ;;  %v11000_v59 = vand.u32 4294901760, %v10999_v0 }
 0xd27   : > { %17798 = vmatpush1.bf16.msra.mxu1 %v22908_v40  ;;  %v23067_v42 = vsub.f32 %v22826_v21, %v25125_v18  ;;  %v25126_v0 = vand.u32 4294901760, %v22849_v38  ;;  %v25127_v1 = vand.u32 4294901760, %v23046_v5  ;;  %v24326_v21 = vand.u32 4294901760, %v23062_v34 }
 0xd28   : > { %17800 = vmatprep.subr.bf16.mxu1 %v22963_v62  ;;  %25121 = vst [vmem:[#allocation24_spill] sm:$0xff] %v23032_v28  ;;  %17900 = vmatprep.subr.bf16.mxu0 %v23032_v28  ;;  %v11684_v47 = vand.u32 4294901760, %v11683_v2  ;;  %v23078_v54 = vpack.c.bf16 %v11000_v59, %v10988_v32 }
 0xd29   : > { %v23076_v25 = vsub.f32 %v22849_v38, %v25126_v0  ;;  %v10993_v43 = vsub.f32 %v23046_v5, %v25127_v1  ;;  %v24329_v2 = vand.u32 4294901760, %v23067_v42  ;;  %v25128_v38 = vand.u32 4294901760, %v22852_v60 }
 0xd2a   : > { %v11689_v0 = vsub.f32 %v23062_v34, %v24326_v21  ;;  %v25129_v1 = vand.u32 4294901760, %v22855_v48 }
 0xd2b   : > { %17802 = vmatpush1.bf16.msra.mxu1 %v22978_v41  ;;  %v23092_v32 = vsub.f32 %v22852_v60, %v25128_v38  ;;  %v10994_v59 = vand.u32 4294901760, %v10993_v43  ;;  %v25130_v60 = vand.u32 4294901760, %v23076_v25 }
 0xd2c   : > { %17804 = vmatprep.subr.bf16.mxu1 %v23011_v23  ;;  %v11695_v23 = vsub.f32 %v23038_v6, %v24319_v56  ;;  %v11005_v56 = vsub.f32 %v23056_v37, %v24321_v26  ;;  %v23103_v26 = vsub.f32 %v22855_v48, %v25129_v1  ;;  %v11690_v41 = vand.u32 4294901760, %v11689_v0 }
 0xd2d   : > { %v11011_v43 = vsub.f32 %v23076_v25, %v25130_v60  ;;  %v24333_v38 = vand.u32 4294901760, %v23092_v32 }
 0xd2e   : > { %v11696_v18 = vand.u32 4294901760, %v11695_v23  ;;  %v11701_v23 = vsub.f32 %v23067_v42, %v24329_v2  ;;  %v11006_v12 = vand.u32 4294901760, %v11005_v56  ;;  %v24332_v58 = vand.u32 4294901760, %v23103_v26 }
 0xd2f   : > { %v25131_v2 = vand.u32 4294901760, %v22867_v36  ;;  %v11023_v56 = vsub.f32 %v23092_v32, %v24333_v38 }
 0xd30   : > { %v23105_v28 = vpack.c.bf16 %v11696_v18, %v11684_v47  ;;  %v11702_v21 = vand.u32 4294901760, %v11701_v23  ;;  %v23117_v48 = vpack.c.bf16 %v11006_v12, %v10994_v59  ;;  %v11012_v47 = vand.u32 4294901760, %v11011_v43 }
 0xd31   : > { %v23115_v62 = vsub.f32 %v22867_v36, %v25131_v2  ;;  %v25132_v18 = vand.u32 4294901760, %v22871_v57  ;;  %v11707_v23 = vsub.f32 %v23103_v26, %v24332_v58  ;;  %v25133_v12 = vand.u32 4294901760, %v22874_v8 }
 0xd32   : > { %v23127_v0 = vpack.c.bf16 %v11702_v21, %v11690_v41  ;;  %v11024_v59 = vand.u32 4294901760, %v11023_v56  ;;  %v25134_v43 = vand.u32 4294901760, %v22882_v45  ;;  %v25135_v41 = vand.u32 4294901760, %v22885_v3 }
 0xd33   : > { %v23125_v1 = vsub.f32 %v22871_v57, %v25132_v18  ;;  %v24334_v36 = vand.u32 4294901760, %v23115_v62  ;;  %v23136_v2 = vsub.f32 %v22874_v8, %v25133_v12  ;;  %v11708_v18 = vand.u32 4294901760, %v11707_v23 }
 0xd34   : > { %v23142_v57 = vsub.f32 %v22882_v45, %v25134_v43  ;;  %v23147_v21 = vsub.f32 %v22885_v3, %v25135_v41  ;;  %v25136_v56 = vand.u32 4294901760, %v22911_v10  ;;  %v23158_v38 = vpack.c.bf16 %v11024_v59, %v11012_v47 }
 0xd35   : > { %v24335_v60 = vand.u32 4294901760, %v23125_v1  ;;  %v11719_v58 = vsub.f32 %v23115_v62, %v24334_v36  ;;  %v24336_v8 = vand.u32 4294901760, %v23136_v2 }
 0xd36   : > { %v23156_v12 = vsub.f32 %v22911_v10, %v25136_v56  ;;  %v24341_v3 = vand.u32 4294901760, %v23142_v57  ;;  %v24344_v23 = vand.u32 4294901760, %v23147_v21  ;;  %v25137_v10 = vand.u32 4294901760, %v22914_v33 }
 0xd37   : > { %v11017_v45 = vsub.f32 %v23125_v1, %v24335_v60  ;;  %v11720_v43 = vand.u32 4294901760, %v11719_v58  ;;  %v11029_v41 = vsub.f32 %v23136_v2, %v24336_v8  ;;  %v25138_v60 = vand.u32 4294901760, %v22917_v35 }
 0xd38   : > { %v23172_v47 = vsub.f32 %v22914_v33, %v25137_v10  ;;  %v11713_v56 = vsub.f32 %v23142_v57, %v24341_v3  ;;  %v11725_v58 = vsub.f32 %v23147_v21, %v24344_v23  ;;  %v25139_v33 = vand.u32 4294901760, %v23156_v12 }
 0xd39   : > { %v11018_v59 = vand.u32 4294901760, %v11017_v45  ;;  %v23183_v8 = vsub.f32 %v22917_v35, %v25138_v60  ;;  %v23185_v36 = vpack.c.bf16 %v11720_v43, %v11708_v18  ;;  %v11030_v39 = vand.u32 4294901760, %v11029_v41 }
 0xd3a   : > { %v11035_v45 = vsub.f32 %v23156_v12, %v25139_v33  ;;  %v11046_v10 = vand.u32 4294901760, %v23172_v47  ;;  %v11714_v40 = vand.u32 4294901760, %v11713_v56  ;;  %v11726_v3 = vand.u32 4294901760, %v11725_v58 }
 0xd3b   : > { %v11730_v24 = vand.u32 4294901760, %v23183_v8  ;;  %v25140_v23 = vand.u32 4294901760, %v22937_v20  ;;  %v23195_v11 = vpack.c.bf16 %v11030_v39, %v11018_v59  ;;  %v25141_v18 = vand.u32 4294901760, %v22941_v63 }
 0xd3c   : > { %v11036_v35 = vand.u32 4294901760, %v11035_v45  ;;  %v11047_v60 = vsub.f32 %v23172_v47, %v11046_v10  ;;  %v23201_v41 = vpack.c.bf16 %v11726_v3, %v11714_v40  ;;  %v25142_v33 = vand.u32 4294901760, %v22944_v15 }
 0xd3d   : > { %v11741_v27 = vsub.f32 %v22937_v20, %v25140_v23  ;;  %v11039_v43 = vsub.f32 %v22941_v63, %v25141_v18  ;;  %v11731_v56 = vsub.f32 %v23183_v8, %v11730_v24  ;;  %v25143_v39 = vand.u32 4294901760, %v22952_v52 }
 0xd3e   : > { %v11051_v61 = vsub.f32 %v22944_v15, %v25142_v33  ;;  %v11048_v29 = vand.u32 4294901760, %v11047_v60  ;;  %v25144_v59 = vand.u32 4294901760, %v22955_v16  ;;  %v23215_v18 = vpack.c.bf16 %v22920_v50, %v22896_v53 }
 0xd3f   : > { %v11742_v58 = vand.u32 4294901760, %v11741_v27  ;;  %v11040_v20 = vand.u32 4294901760, %v11039_v43  ;;  %v11735_v23 = vsub.f32 %v22952_v52, %v25143_v39  ;;  %v11732_v63 = vand.u32 4294901760, %v11731_v56 }
 0xd40   : > { %v11747_v45 = vsub.f32 %v22955_v16, %v25144_v59  ;;  %v11052_v3 = vand.u32 4294901760, %v11051_v61  ;;  %25145 = vst [vmem:[#allocation30_spill] sm:$0xff] %v23215_v18  ;;  %v23217_v31 = vpack.c.bf16 %v11048_v29, %v11036_v35  ;;  %v23221_v52 = vpack.c.bf16 %v22997_v49, %v22925_v46 }
 0xd41   : > { %v11743_v40 = vsub.f32 %v11741_v27, %v11742_v58  ;;  %v11041_v15 = vsub.f32 %v11039_v43, %v11040_v20  ;;  %v11736_v60 = vand.u32 4294901760, %v11735_v23  ;;  %v23231_v29 = vpack.c.bf16 %v23038_v6, %v23026_v30 }
 0xd42   : > { %v11748_v33 = vand.u32 4294901760, %v11747_v45  ;;  %v11053_v44 = vsub.f32 %v11051_v61, %v11052_v3  ;;  %v23235_v18 = vpack.c.bf16 %v23056_v37, %v23046_v5 }
 0xd43   : > { %v11744_v4 = vand.u32 4294901760, %v11743_v40  ;;  %v11042_v39 = vand.u32 4294901760, %v11041_v15  ;;  %v11737_v16 = vsub.f32 %v11735_v23, %v11736_v60  ;;  %25146 = vst [vmem:[#allocation21_spill] sm:$0xff] %v23231_v29  ;;  %v23239_v15 = vpack.c.bf16 %v23067_v42, %v23062_v34 }
 0xd44   : > { %v11749_v56 = vsub.f32 %v11747_v45, %v11748_v33  ;;  %v11054_v22 = vand.u32 4294901760, %v11053_v44  ;;  %25147 = vst [vmem:[#allocation28_spill] sm:$0xff] %v23235_v18  ;;  %v23245_v44 = vpack.c.bf16 %v23092_v32, %v23076_v25  ;;  %v23259_v18 = vpack.c.bf16 %v23147_v21, %v23142_v57 }
 0xd45   : > { %v23223_v59 = vpack.c.bf16 %v11744_v4, %v11732_v63  ;;  %v11738_v35 = vand.u32 4294901760, %v11737_v16  ;;  %25148 = vst [vmem:[#allocation18_spill] sm:$0xff] %v23239_v15  ;;  %v23249_v63 = vpack.c.bf16 %v23115_v62, %v23103_v26  ;;  %v23253_v16 = vpack.c.bf16 %v23136_v2, %v23125_v1 }
 0xd46   : > { %v11750_v40 = vand.u32 4294901760, %v11749_v56  ;;  %v23241_v4 = vpack.c.bf16 %v11054_v22, %v11042_v39  ;;  %25149 = vst [vmem:[#allocation32_spill] sm:$0xff] %v23245_v44  ;;  %25152 = vst [vmem:[#allocation45_spill] sm:$0xff] %v23259_v18  ;;  %v23263_v22 = vpack.c.bf16 %v23172_v47, %v23156_v12  ;;  %v23266_v39 = vpack.c.bf16 %v11741_v27, %v23183_v8 }
 0xd47   : > { %25150 = vst [vmem:[#allocation49_spill] sm:$0xff] %v23249_v63  ;;  %25151 = vst [vmem:[#allocation19_spill] sm:$0xff] %v23253_v16  ;;  %v23268_v44 = vpack.c.bf16 %v11051_v61, %v11039_v43  ;;  %v23270_v63 = vpack.c.bf16 %v11747_v45, %v11735_v23  ;;  %v25157_v15 = vand.u32 4294901760, %v22896_v53  ;;  %v25159_v16 = vand.u32 4294901760, %v22925_v46 }
 0xd48   : > { %v23255_v56 = vpack.c.bf16 %v11750_v40, %v11738_v35  ;;  %25153 = vst [vmem:[#allocation47_spill] sm:$0xff] %v23263_v22  ;;  %25154 = vst [vmem:[#allocation53_spill] sm:$0xff] %v23266_v39  ;;  %v25158_v35 = vand.u32 4294901760, %v22920_v50  ;;  %v25160_v18 = vand.u32 4294901760, %v22997_v49  ;;  %v25162_v47 = vand.u32 4294901760, %v23009_v9 }
 0xd49   : > { %25155 = vst [vmem:[#allocation56_spill] sm:$0xff] %v23268_v44  ;;  %25156 = vst [vmem:[#allocation25_spill] sm:$0xff] %v23270_v63  ;;  %v25163_v27 = vand.u32 4294901760, %v23020_v14  ;;  %v25165_v8 = vand.u32 4294901760, %v23026_v30  ;;  %v25166_v53 = vand.u32 4294901760, %v23038_v6  ;;  %v25168_v50 = vand.u32 4294901760, %v23046_v5 }
 0xd4a   : > { %v23276_v40 = vpack.c.bf16 %v25158_v35, %v25157_v15  ;;  %v23282_v29 = vpack.c.bf16 %v25160_v18, %v25159_v16  ;;  %v25169_v46 = vand.u32 4294901760, %v23056_v37  ;;  %v25171_v49 = vand.u32 4294901760, %v23062_v34 }
 0xd4b   : > { %v23288_v61 = vpack.c.bf16 %v25163_v27, %v25162_v47  ;;  %v23294_v43 = vpack.c.bf16 %v25166_v53, %v25165_v8  ;;  %v25172_v9 = vand.u32 4294901760, %v23067_v42  ;;  %v25174_v14 = vand.u32 4294901760, %v23076_v25 }
 0xd4c   : > { %25161 = vst [vmem:[#allocation22_spill] sm:$0xff] %v23282_v29  ;;  %v23300_v23 = vpack.c.bf16 %v25169_v46, %v25168_v50  ;;  %v25175_v30 = vand.u32 4294901760, %v23092_v32  ;;  %v25177_v6 = vand.u32 4294901760, %v23103_v26  ;;  %v25178_v5 = vand.u32 4294901760, %v23115_v62 }
 0xd4d   : > { %25164 = vst [vmem:[#allocation37_spill] sm:$0xff] %v23288_v61  ;;  %25167 = vst [vmem:[#allocation57_spill] sm:$0xff] %v23294_v43  ;;  %v23306_v45 = vpack.c.bf16 %v25172_v9, %v25171_v49  ;;  %v25180_v37 = vand.u32 4294901760, %v23125_v1  ;;  %v25181_v34 = vand.u32 4294901760, %v23136_v2  ;;  %v25183_v42 = vand.u32 4294901760, %v23142_v57 }
 0xd4e   : > { %25170 = vst [vmem:[#allocation58_spill] sm:$0xff] %v23300_v23  ;;  %v23312_v18 = vpack.c.bf16 %v25175_v30, %v25174_v14  ;;  %v23318_v15 = vpack.c.bf16 %v25178_v5, %v25177_v6  ;;  %v25184_v25 = vand.u32 4294901760, %v23147_v21  ;;  %v25186_v32 = vand.u32 4294901760, %v23156_v12 }
 0xd4f   : > { %25173 = vst [vmem:[#allocation59_spill] sm:$0xff] %v23306_v45  ;;  %v23324_v16 = vpack.c.bf16 %v25181_v34, %v25180_v37  ;;  %v23336_v26 = vpack.c.bf16 %v11742_v58, %v11730_v24  ;;  %v23338_v62 = vpack.c.bf16 %v11052_v3, %v11040_v20  ;;  %v23340_v27 = vpack.c.bf16 %v11748_v33, %v11736_v60 }
 0xd50   : > { %25176 = vst [vmem:[#allocation60_spill] sm:$0xff] %v23312_v18  ;;  %25179 = vst [vmem:[#allocation54_spill] sm:$0xff] %v23318_v15  ;;  %v23330_v35 = vpack.c.bf16 %v25184_v25, %v25183_v42  ;;  %v23334_v47 = vpack.c.bf16 %v11046_v10, %v25186_v32  ;;  %v25191_v1 = vand.u32 4294901760, %v22781_v17  ;;  %v25192_v57 = vand.u32 4294901760, %v22784_v51 }
 0xd51   : > { %25182 = vst [vmem:[#allocation51_spill] sm:$0xff] %v23324_v16  ;;  %25188 = vst [vmem:[#allocation63_spill] sm:$0xff] %v23336_v26  ;;  %v25193_v12 = vand.u32 4294901760, %v22742_v55  ;;  %v25194_v24 = vand.u32 4294901760, %v22745_v7 }
 0xd52   : > { %25185 = vst [vmem:[#allocation61_spill] sm:$0xff] %v23330_v35  ;;  %25187 = vst [vmem:[#allocation62_spill] sm:$0xff] %v23334_v47  ;;  %v23345_v2 = vsub.f32 %v22781_v17, %v25191_v1  ;;  %v23350_v21 = vsub.f32 %v22784_v51, %v25192_v57 }
 0xd53   : > { %25189 = vst [vmem:[#allocation64_spill] sm:$0xff] %v23338_v62  ;;  %25190 = vst [vmem:[#allocation65_spill] sm:$0xff] %v23340_v27  ;;  %v23355_v10 = vsub.f32 %v22742_v55, %v25193_v12  ;;  %v23360_v58 = vsub.f32 %v22745_v7, %v25194_v24 }
 0xd54   : > { %v24374_v20 = vand.u32 4294901760, %v23345_v2  ;;  %v24373_v17 = vand.u32 4294901760, %v23350_v21 }
 0xd55   : > { %v24372_v3 = vand.u32 4294901760, %v23355_v10  ;;  %v24371_v60 = vand.u32 4294901760, %v23360_v58 }
 0xd56   : > { %v10969_v55 = vsub.f32 %v23345_v2, %v24374_v20  ;;  %v10981_v7 = vsub.f32 %v23350_v21, %v24373_v17  ;;  %v25210_v17 = vld [vmem:[#allocation42_spill] sm:$0xff]  ;;  %v25212_v20 = vld [vmem:[#allocation48_spill] sm:$0xff] }
 0xd57   : > { %v11665_v46 = vsub.f32 %v23355_v10, %v24372_v3  ;;  %v11677_v49 = vsub.f32 %v23360_v58, %v24371_v60  ;;  %v25208_v60 = vld [vmem:[#allocation31_spill] sm:$0xff]  ;;  %v25209_v3 = vld [vmem:[#allocation50_spill] sm:$0xff] }
 0xd58   : > { %v10970_v6 = vand.u32 4294901760, %v10969_v55  ;;  %v10982_v5 = vand.u32 4294901760, %v10981_v7  ;;  %v25195_v55 = vld [vmem:[#allocation30_spill] sm:$0xff]  ;;  %v25196_v7 = vld [vmem:[#allocation21_spill] sm:$0xff] }
 0xd59   : > { %v11666_v37 = vand.u32 4294901760, %v11665_v46  ;;  %v11678_v34 = vand.u32 4294901760, %v11677_v49  ;;  %v25198_v46 = vld [vmem:[#allocation18_spill] sm:$0xff]  ;;  %v25199_v49 = vld [vmem:[#allocation32_spill] sm:$0xff] }
 0xd5a   : > { %v23398_v1 = vpack.c.bf16 %v10982_v5, %v10970_v6  ;;  %v25200_v6 = vld [vmem:[#allocation49_spill] sm:$0xff]  ;;  %v25201_v5 = vld [vmem:[#allocation19_spill] sm:$0xff] }
 0xd5b   : > { %v23400_v57 = vpack.c.bf16 %v11678_v34, %v11666_v37  ;;  %v25202_v37 = vld [vmem:[#allocation45_spill] sm:$0xff]  ;;  %v25203_v34 = vld [vmem:[#allocation35_spill] sm:$0xff] }
 0xdf1   : > { %v16406_v51 = vpop.f32.mrb[108].mxu1 }
 0xdf2   : > { %v10855_v33 = vsel %vm4809_vm0, %v16406_v51, 0  ;;  %v10833_v8 = vpop.f32.mrb[109].mxu1 }
 0xdf3   : > { %v23373_v53 = vand.u32 4294901760, %v10855_v33  ;;  %v10852_v50 = vsel %vm4809_vm0, %v10833_v8, 0  ;;  %v23428_v8 = vpack.c.bf16 %v23360_v58, %v23355_v10 }
 0xdf4   : > { %v23382_v9 = vand.u32 4294901760, %v10852_v50 }
 0xdf5   : > { %v23385_v14 = vsub.f32 %v10855_v33, %v23373_v53  ;;  %v23424_v33 = vpack.c.bf16 %v23350_v21, %v23345_v2 }
 0xdf6   : > { %v23388_v30 = vsub.f32 %v10852_v50, %v23382_v9  ;;  %v25197_v50 = vld [vmem:[#allocation28_spill] sm:$0xff] }
 0xdf7   : > { %v23394_v25 = vand.u32 4294901760, %v23385_v14 }
 0xdf8   : > { %v23391_v42 = vand.u32 4294901760, %v23388_v30 }
 0xdf9   : > { %v10952_v24 = vsub.f32 %v23385_v14, %v23394_v25 }
 0xdfa   : > { %v10941_v32 = vsub.f32 %v23388_v30, %v23391_v42 }
 0xdfb   : > { %v10953_v51 = vand.u32 4294901760, %v10952_v24  ;;  %v25206_v24 = vld [vmem:[#allocation23_spill] sm:$0xff] }
 0xdfc   : > { %v10942_v12 = vand.u32 4294901760, %v10941_v32  ;;  %v25204_v32 = vld [vmem:[#allocation43_spill] sm:$0xff] }
 0xdfe   : > { %10943 = vmatmul.mubr.f32.vlgmr.msra.gmra.mrb[98].mxu1 %v10942_v12  ;;  %11639 = vmatmul.mubr.f32.vlgmr.msra.gmra.mrb[98].mxu0 %v10942_v12  ;;  %v25205_v12 = vld [vmem:[#allocation29_spill] sm:$0xff] }
 0xdff   : > { %17806 = vmatpush1.bf16.msra.mxu1 %v23398_v1  ;;  %17902 = vmatpush1.bf16.msra.mxu0 %v23400_v57 }
 0xe00   : > { %10948 = vmatprep.mubr.f32.mxu1 %v25022_v19  ;;  %17808 = vmatprep.subr.bf16.mxu1 %v23078_v54 }
 0xe01   : > { %11644 = vmatprep.mubr.f32.mxu0 %v25022_v19  ;;  %17904 = vmatprep.subr.bf16.mxu0 %v23105_v28 }
 0xe02   : > { %10954 = vmatmul.mubr.f32.gmra.mrb[100].mxu1 %v10953_v51  ;;  %11650 = vmatmul.mubr.f32.gmra.mrb[100].mxu0 %v10953_v51  ;;  %v25207_v51 = vld [vmem:[#allocation40_spill] sm:$0xff] }
 0xe03   : > { %17810 = vmatpush1.bf16.msra.mxu1 %v23117_v48  ;;  %17906 = vmatpush1.bf16.msra.mxu0 %v23127_v0 }
 0xe04   : > { %17812 = vmatprep.subr.bf16.mxu1 %v23158_v38  ;;  %17908 = vmatprep.subr.bf16.mxu0 %v23185_v36 }
 0xe05   : > { %11104 = vmatprep.mubr.f32.mxu1 %v25022_v19  ;;  %11800 = vmatprep.mubr.f32.mxu0 %v25022_v19 }
 0xe07   : > { %17814 = vmatpush1.bf16.msra.mxu1 %v23195_v11  ;;  %17910 = vmatpush1.bf16.msra.mxu0 %v23201_v41 }
 0xe08   : > { %17816 = vmatprep.subr.bf16.mxu1 %v23217_v31  ;;  %17912 = vmatprep.subr.bf16.mxu0 %v23223_v59 }
 0xe0b   : > { %17818 = vmatpush1.bf16.msra.mxu1 %v23241_v4  ;;  %17914 = vmatpush1.bf16.msra.mxu0 %v23255_v56 }
 0xe0c   : > { %17820 = vmatprep.subr.bf16.mxu1 %v25195_v55  ;;  %17916 = vmatprep.subr.bf16.mxu0 %v23221_v52 }
 0xe0e   : > { %11106 = vmatmul.mubr.f32.vlgmr.msra.gmra.mrb[98].mxu1 %v23382_v9  ;;  %11802 = vmatmul.mubr.f32.vlgmr.msra.gmra.mrb[98].mxu0 %v23382_v9 }
 0xe0f   : > { %17822 = vmatpush1.bf16.msra.mxu1 %v23424_v33  ;;  %17918 = vmatpush1.bf16.msra.mxu0 %v23428_v8 }
 0xe10   : > { %11111 = vmatprep.mubr.f32.mxu1 %v25022_v19  ;;  %11807 = vmatprep.mubr.f32.mxu0 %v25022_v19 }
 0xe11   : > { %17824 = vmatprep.subr.bf16.mxu1 %v23227_v13  ;;  %17920 = vmatprep.subr.bf16.mxu0 %v25196_v7 }
 0xe12   : > { %11113 = vmatmul.mubr.f32.gmra.mrb[100].mxu1 %v23373_v53  ;;  %11809 = vmatmul.mubr.f32.gmra.mrb[100].mxu0 %v23373_v53 }
 0xe13   : > { %17826 = vmatpush1.bf16.msra.mxu1 %v25197_v50  ;;  %17922 = vmatpush1.bf16.msra.mxu0 %v25198_v46  ;;  %v25222_v46 = vand.u32 4294901760, %v23355_v10  ;;  %v25223_v50 = vand.u32 4294901760, %v23360_v58 }
 0xe14   : > { %17828 = vmatprep.subr.bf16.mxu1 %v25199_v49  ;;  %17924 = vmatprep.subr.bf16.mxu0 %v25200_v6  ;;  %v25220_v6 = vand.u32 4294901760, %v23350_v21  ;;  %v12270_v21 = vpop.permute.xlu0 %12269 }
 0xe15   : > { %11215 = vmatprep.mubr.f32.mxu1 %v25022_v19  ;;  %11911 = vmatprep.mubr.f32.mxu0 %v25022_v19  ;;  %v23488_v7 = vpack.c.bf16 %v25223_v50, %v25222_v46  ;;  %v12820_v10 = vand.u32 4294901760, %v12270_v21 }
 0xe17   : > { %17830 = vmatpush1.bf16.msra.mxu1 %v25201_v5  ;;  %17926 = vmatpush1.bf16.msra.mxu0 %v25202_v37  ;;  %v25218_v37 = vld [vmem:[#allocation39_spill] sm:$0xff]  ;;  %v25219_v5 = vand.u32 4294901760, %v23345_v2  ;;  %25224 = vst [vmem:[#allocation67_spill] sm:$0xff] %v23488_v7  ;;  %v12272_v2 = vpop.permute.xlu1 %12271 }
 0xe18   : > { %17832 = vmatprep.subr.bf16.mxu1 %v23263_v22  ;;  %17928 = vmatprep.subr.bf16.mxu0 %v23266_v39  ;;  %v25215_v39 = vld [vmem:[#allocation34_spill] sm:$0xff]  ;;  %v25216_v22 = vld [vmem:[#allocation52_spill] sm:$0xff]  ;;  %v12279_v50 = vsel %vm4809_vm0, %v12272_v2, 0 }
 0xe19   : > { %v23482_v49 = vpack.c.bf16 %v25220_v6, %v25219_v5  ;;  %v23519_v6 = vsub.f32 %v12270_v21, %v12820_v10 }
 0xe1b   : > { %17834 = vmatpush1.bf16.msra.mxu1 %v23268_v44  ;;  %17930 = vmatpush1.bf16.msra.mxu0 %v23270_v63  ;;  %v25213_v63 = vld [vmem:[#allocation55_spill] sm:$0xff]  ;;  %v25214_v44 = vld [vmem:[#allocation44_spill] sm:$0xff]  ;;  %25221 = vst [vmem:[#allocation66_spill] sm:$0xff] %v23482_v49  ;;  %v12266_v58 = vpop.permute.xlu1 %12265 }
 0xe1c   : > { %17836 = vmatprep.subr.bf16.mxu1 %v25203_v34  ;;  %17932 = vmatprep.subr.bf16.mxu0 %v25204_v32  ;;  %v12273_v46 = vsel %vm4809_vm0, %v12266_v58, 0 }
 0xe1e   : > { %11218 = vmatmul.mubr.f32.vlgmr.msra.gmra.mrb[98].mxu1 %v23388_v30  ;;  %11914 = vmatmul.mubr.f32.vlgmr.msra.gmra.mrb[98].mxu0 %v23388_v30  ;;  %v25211_v30 = vld [vmem:[#allocation36_spill] sm:$0xff] }
 0xe1f   : > { %17838 = vmatpush1.bf16.msra.mxu1 %v25205_v12  ;;  %17934 = vmatpush1.bf16.msra.mxu0 %v25206_v24  ;;  %v12268_v58 = vpop.permute.xlu1 %12267 }
 0xe20   : > { %11223 = vmatprep.mubr.f32.mxu1 %v25022_v19  ;;  %11919 = vmatprep.mubr.f32.mxu0 %v25022_v19 }
 0xe21   : > { %17840 = vmatprep.subr.bf16.mxu1 %v25207_v51  ;;  %17936 = vmatprep.subr.bf16.mxu0 %v25208_v60 }
 0xe22   : > { %11226 = vmatmul.mubr.f32.gmra.mrb[100].mxu1 %v23385_v14  ;;  %11922 = vmatmul.mubr.f32.gmra.mrb[100].mxu0 %v23385_v14  ;;  %v25217_v14 = vld [vmem:[#allocation38_spill] sm:$0xff] }
 0xe23   : > { %17842 = vmatpush1.bf16.msra.mxu1 %v25209_v3  ;;  %17938 = vmatpush1.bf16.msra.mxu0 %v25210_v17 }
 0xe24   : > { %17844 = vmatprep.subr.bf16.mxu1 %v25211_v30  ;;  %17940 = vmatprep.subr.bf16.mxu0 %v25212_v20 }
 0xe25   : > { %11312 = vmatprep.mubr.f32.mxu1 %v25022_v19  ;;  %12008 = vmatprep.mubr.f32.mxu0 %v25022_v19 }
 0xe27   : > { %17846 = vmatpush1.bf16.msra.mxu1 %v25213_v63  ;;  %17942 = vmatpush1.bf16.msra.mxu0 %v25214_v44 }
 0xe28   : > { %17848 = vmatprep.subr.bf16.mxu1 %v25215_v39  ;;  %17944 = vmatprep.subr.bf16.mxu0 %v25216_v22 }
 0xe2b   : > { %17850 = vmatpush1.bf16.msra.mxu1 %v25217_v14  ;;  %17946 = vmatpush1.bf16.msra.mxu0 %v25218_v37 }
 0xe2c   : > { %17852 = vmatprep.subr.bf16.mxu1 %v23276_v40  ;;  %17948 = vmatprep.subr.bf16.mxu0 %v23282_v29 }
 0xe2e   : > { %11316 = vmatmul.mubr.f32.vlgmr.msra.gmra.mrb[98].mxu1 %v23391_v42  ;;  %12012 = vmatmul.mubr.f32.vlgmr.msra.gmra.mrb[98].mxu0 %v23391_v42  ;;  %v12823_v42 = vand.u32 4294901760, %v12272_v2 }
 0xe2f   : > { %17854 = vmatpush1.bf16.msra.mxu1 %v23482_v49  ;;  %17950 = vmatpush1.bf16.msra.mxu0 %v23488_v7 }
 0xe30   : > { %11321 = vmatprep.mubr.f32.mxu1 %v25022_v19  ;;  %12017 = vmatprep.mubr.f32.mxu0 %v25022_v19 }
 0xe31   : > { %17856 = vmatprep.subr.bf16.mxu1 %v23288_v61  ;;  %17952 = vmatprep.subr.bf16.mxu0 %v23294_v43  ;;  %v23558_v43 = vpack.c.bf16 %v12823_v42, %v12820_v10 }
 0xe32   : > { %11325 = vmatmul.mubr.f32.gmra.mrb[100].mxu1 %v23394_v25  ;;  %12021 = vmatmul.mubr.f32.gmra.mrb[100].mxu0 %v23394_v25  ;;  %v12277_v25 = vsel %vm4809_vm0, %v12270_v21, 0 }
 0xe33   : > { %17858 = vmatpush1.bf16.msra.mxu1 %v23300_v23  ;;  %17954 = vmatpush1.bf16.msra.mxu0 %v23306_v45  ;;  %v12282_v5 = vand.u32 4294901760, %v12277_v25 }
 0xe34   : > { %17860 = vmatprep.subr.bf16.mxu1 %v23312_v18  ;;  %17956 = vmatprep.subr.bf16.mxu0 %v23318_v15 }
 0xe35   : > { %11443 = vmatprep.mubr.f32.mxu1 %v25022_v19  ;;  %12139 = vmatprep.mubr.f32.mxu0 %v25022_v19 }
 0xe37   : > { %17862 = vmatpush1.bf16.msra.mxu1 %v23324_v16  ;;  %17958 = vmatpush1.bf16.msra.mxu0 %v23330_v35  ;;  %v25225_v16 = vand.u32 4294901760, %v23519_v6 }
 0xe38   : > { %17864 = vmatprep.subr.bf16.mxu1 %v23334_v47  ;;  %17960 = vmatprep.subr.bf16.mxu0 %v23336_v26  ;;  %v23529_v26 = vand.u32 4294901760, %v12273_v46 }
 0xe39   : > { %v12910_v15 = vsub.f32 %v23519_v6, %v25225_v16 }
 0xe3a   : > { %v12349_v21 = vsub.f32 %v12273_v46, %v23529_v26 }
 0xe3b   : > { %17866 = vmatpush1.bf16.msra.mxu1 %v23338_v62  ;;  %17962 = vmatpush1.bf16.msra.mxu0 %v23340_v27  ;;  %v23525_v27 = vsub.f32 %v12272_v2, %v12823_v42  ;;  %v12285_v62 = vand.u32 4294901760, %v12279_v50  ;;  %v23536_v2 = vsub.f32 %v12277_v25, %v12282_v5  ;;  %v12275_v25 = vsel %vm4809_vm0, %v12268_v58, 0 }
 0xe3c   : > { %17868 = vmatprep.subr.bf16.mxu1 %v25203_v34  ;;  %17964 = vmatprep.subr.bf16.mxu0 %v25204_v32  ;;  %v12350_v18 = vand.u32 4294901760, %v12349_v21  ;;  %v12358_v58 = vand.u32 4294901760, %v12275_v25  ;;  %v12911_v16 = vand.u32 4294901760, %v12910_v15 }
 0xe3d   : > { %v12377_v35 = vsub.f32 %v12279_v50, %v12285_v62  ;;  %v12371_v47 = vand.u32 4294901760, %v23536_v2  ;;  %v25226_v50 = vand.u32 4294901760, %v23525_v27  ;;  %v17979_v23 = vpack.c.bf16 %v12285_v62, %v12282_v5 }
 0xe3e   : > { %11445 = vmatmul.mubr.f32.vlgmr.msra.gmra.mrb[98].mxu1 %v23382_v9  ;;  %12141 = vmatmul.mubr.f32.vlgmr.msra.gmra.mrb[98].mxu0 %v23382_v9  ;;  %v12359_v49 = vsub.f32 %v12275_v25, %v12358_v58  ;;  %v12351_v29 = vsub.f32 %v12349_v21, %v12350_v18 }
 0xe3f   : > { %17870 = vmatpush1.bf16.msra.mxu1 %v25205_v12  ;;  %17966 = vmatpush1.bf16.msra.mxu0 %v25206_v24  ;;  %v12917_v46 = vsub.f32 %v23525_v27, %v25226_v50  ;;  %v12378_v45 = vand.u32 4294901760, %v12377_v35  ;;  %v12372_v61 = vsub.f32 %v23536_v2, %v12371_v47 }
 0xe40   : > { %11450 = vmatprep.mubr.f32.mxu1 %v25022_v19  ;;  %12146 = vmatprep.mubr.f32.mxu0 %v25022_v19  ;;  %v12360_v10 = vand.u32 4294901760, %v12359_v49  ;;  %v12352_v42 = vand.u32 4294901760, %v12351_v29 }
 0xe41   : > { %17872 = vmatprep.subr.bf16.mxu1 %v25207_v51  ;;  %17968 = vmatprep.subr.bf16.mxu0 %v25208_v60  ;;  %v12918_v7 = vand.u32 4294901760, %v12917_v46  ;;  %v12379_v50 = vsub.f32 %v12377_v35, %v12378_v45  ;;  %v12373_v15 = vand.u32 4294901760, %v12372_v61  ;;  %v17987_v61 = vpack.c.bf16 %v12377_v35, %v23536_v2  ;;  %v5862_v35 = vld [vmem:[#allocation10 + $0x8] sm:$0xff] }
 0xe42   : > { %11452 = vmatmul.mubr.f32.gmra.mrb[100].mxu1 %v23373_v53  ;;  %12148 = vmatmul.mubr.f32.gmra.mrb[100].mxu0 %v23373_v53  ;;  %v17995_v29 = vpack.c.bf16 %v12378_v45, %v12371_v47  ;;  %v5861_v45 = vld [vmem:[#allocation10] sm:$0xff]  ;;  %v5864_v47 = vld [vmem:[#allocation10 + $0x18] sm:$0xff] }
 0xe43   : > { %17874 = vmatpush1.bf16.msra.mxu1 %v25209_v3  ;;  %17970 = vmatpush1.bf16.msra.mxu0 %v25210_v17  ;;  %v23566_v62 = vpack.c.bf16 %v12918_v7, %v12911_v16  ;;  %v12380_v5 = vand.u32 4294901760, %v12379_v50  ;;  %v12361_v7 = vsub.f32 %v12359_v49, %v12360_v10  ;;  %v5865_v50 = vld [vmem:[#allocation10 + $0x20] sm:$0xff] }
 0xe44   : > { %17876 = vmatprep.subr.bf16.mxu1 %v25211_v30  ;;  %17972 = vmatprep.subr.bf16.mxu0 %v25212_v20 }
 0xe45   : > { %11538 = vmatprep.mubr.f32.mxu1 %v25022_v19  ;;  %12234 = vmatprep.mubr.f32.mxu0 %v25022_v19  ;;  %v12362_v25 = vand.u32 4294901760, %v12361_v7 }
 0xe47   : > { %17878 = vmatpush1.bf16.msra.mxu1 %v25213_v63  ;;  %17974 = vmatpush1.bf16.msra.mxu0 %v25214_v44 }
 0xe48   : > { %17880 = vmatprep.subr.bf16.mxu1 %v25215_v39  ;;  %17976 = vmatprep.subr.bf16.mxu0 %v25216_v22 }
 0xe4b   : > { %17882 = vmatpush1.bf16.msra.mxu1 %v25217_v14  ;;  %17978 = vmatpush1.bf16.msra.mxu0 %v25218_v37 }
 0xe4c   : > { %17980 = vmatprep.subr.bf16.mxu1 %v17979_v23  ;;  %18004 = vmatprep.subr.bf16.mxu0 %v23558_v43 }
 0xe4e   : > { %11540 = vmatmul.mubr.f32.vlgmr.msra.gmra.mrb[98].mxu1 %v23382_v9  ;;  %12236 = vmatmul.mubr.f32.vlgmr.msra.gmra.mrb[98].mxu0 %v23382_v9  ;;  %v17983_v9 = vpack.c.bf16 %v12380_v5, %v12373_v15  ;;  %v5867_v15 = vld [vmem:[#allocation10 + $0x30] sm:$0xff] }
 0xe4f   : > { %18006 = vmatpush3.bf16.msra.mxu0 %v23558_v43  ;;  %11545 = vmatprep.mubr.f32.mxu1 %v25022_v19 }
 0xe50   : > { %18008 = vmatprep.subr.bf16.mxu0 %v23566_v62  ;;  %12241 = vmatprep.mubr.f32.mxu0 %v25022_v19 }
 0xe52   : > { %11547 = vmatmul.mubr.f32.gmra.mrb[100].mxu1 %v23373_v53  ;;  %12243 = vmatmul.mubr.f32.gmra.mrb[100].mxu0 %v23373_v53 }
 0xe53   : > { %16411 = vmatprep.mubr.f32.mxu1 %v12352_v42  ;;  %v5868_v42 = vld [vmem:[#allocation10 + $0x38] sm:$0xff] }
 0xe54   : > { %17982 = vmatpush3.bf16.xpose.msra.mxu1 %v17979_v23 }
 0xe55   : > { %17984 = vmatprep.subr.bf16.mxu1 %v17983_v9 }
 0xe5b   : > { %16412 = vmatmul.mubr.f32.vlgmr.msra.gmra.mrb[110].mxu1 %v12362_v25 }
 0xe5c   : > { %17986 = vmatpush3.bf16.xpose.msra.mxu1 %v17983_v9  ;;  %16418 = vmatprep.mubr.f32.mxu1 %v23529_v26 }
 0xe5d   : > { %17988 = vmatprep.subr.bf16.mxu1 %v17987_v61 }
 0xe63   : > { %16419 = vmatmul.mubr.f32.vlgmr.msra.gmra.mrb[110].mxu1 %v12358_v58 }
 0xe64   : > { %17990 = vmatpush3.bf16.xpose.msra.mxu1 %v17987_v61  ;;  %16425 = vmatprep.mubr.f32.mxu1 %v12349_v21 }
 0xe65   : > { %17992 = vmatprep.subr.bf16.mxu1 %v17979_v23 }
 0xe6b   : > { %16426 = vmatmul.mubr.f32.vlgmr.msra.gmra.mrb[110].mxu1 %v12359_v49 }
 0xe6c   : > { %17994 = vmatpush3.bf16.xpose.msra.mxu1 %v17979_v23  ;;  %16432 = vmatprep.mubr.f32.mxu1 %v12350_v18  ;;  %v5863_v18 = vld [vmem:[#allocation10 + $0x10] sm:$0xff] }
 0xe6d   : > { %17996 = vmatprep.subr.bf16.mxu1 %v17995_v29 }
 0xe73   : > { %16433 = vmatmul.mubr.f32.vlgmr.msra.gmra.mrb[110].mxu1 %v12360_v10  ;;  %v5866_v10 = vld [vmem:[#allocation10 + $0x28] sm:$0xff] }
 0xe74   : > { %17998 = vmatpush3.bf16.xpose.msra.mxu1 %v17995_v29  ;;  %16439 = vmatprep.mubr.f32.mxu1 %v23529_v26 }
 0xe75   : > { %18000 = vmatprep.subr.bf16.mxu1 %v17979_v23 }
 0xe7b   : > { %16440 = vmatmul.mubr.f32.vlgmr.msra.gmra.mrb[110].mxu1 %v12358_v58 }
 0xe7c   : > { %18002 = vmatpush3.bf16.xpose.msra.mxu1 %v17979_v23  ;;  %16446 = vmatprep.mubr.f32.mxu1 %v23529_v26  ;;  %v25227_v23 = vld [vmem:[#allocation24_spill] sm:$0xff] }
 0xe7d   : > { %18124 = vmatprep.subr.bf16.mxu1 %v25204_v32 }
 0xe83   : > { %16447 = vmatmul.mubr.f32.vlgmr.msra.gmra.mrb[110].mxu1 %v12358_v58 }
 0xe84   : > { %18126 = vmatpush1.bf16.msra.mxu1 %v25206_v24  ;;  %14111 = vmatprep.mubr.f32.mxu1 %v25022_v19 }
 0xe85   : > { %18128 = vmatprep.subr.bf16.mxu1 %v25208_v60 }
 0xe88   : > { %18130 = vmatpush1.bf16.msra.mxu1 %v25210_v17 }
 0xe89   : > { %18132 = vmatprep.subr.bf16.mxu1 %v25212_v20 }
 0xe8c   : > { %18134 = vmatpush1.bf16.msra.mxu1 %v25214_v44 }
 0xe8d   : > { %18136 = vmatprep.subr.bf16.mxu1 %v25216_v22 }
 0xe90   : > { %18138 = vmatpush1.bf16.msra.mxu1 %v25218_v37 }
 0xe91   : > { %18140 = vmatprep.subr.bf16.mxu1 %v25227_v23 }
 0xf21   : > { %v11541_v26 = vpop.f32.mrb[98].mxu1  ;;  %v12237_v53 = vpop.f32.mrb[98].mxu0 }
 0xf22   : > { %v18221_v49 = vadd.f32 %v11541_v26, %v5861_v45  ;;  %v18233_v21 = vadd.f32 %v12237_v53, %v5863_v18  ;;  %v11543_v2 = vpop.f32.mrb[99].mxu1  ;;  %v12239_v46 = vpop.f32.mrb[99].mxu0 }
 0xf23   : > { %v18224_v58 = vadd.f32 %v11543_v2, %v5862_v35  ;;  %v18236_v16 = vadd.f32 %v12239_v46, %v5864_v47 }
 0xf24   : > { %12257 = vst [vmem:[#allocation10] sm:$0xff] %v18221_v49  ;;  %12259 = vst [vmem:[#allocation10 + $0x10] sm:$0xff] %v18233_v21 }
 0xf25   : > { %12258 = vst [vmem:[#allocation10 + $0x8] sm:$0xff] %v18224_v58  ;;  %12260 = vst [vmem:[#allocation10 + $0x18] sm:$0xff] %v18236_v16  ;;  %v11548_v5 = vpop.f32.mrb[100].mxu1  ;;  %v12244_v9 = vpop.f32.mrb[100].mxu0 }
 0xf26   : > { %v18227_v7 = vadd.f32 %v11548_v5, %v5865_v50  ;;  %v18239_v25 = vadd.f32 %v12244_v9, %v5867_v15  ;;  %v11550_v61 = vpop.f32.mrb[101].mxu1  ;;  %v12246_v29 = vpop.f32.mrb[101].mxu0 }
 0xf27   : > { %v18230_v23 = vadd.f32 %v11550_v61, %v5866_v10  ;;  %v18242_v45 = vadd.f32 %v12246_v29, %v5868_v42 }
 0xf28   : > { %12261 = vst [vmem:[#allocation10 + $0x20] sm:$0xff] %v18227_v7  ;;  %12263 = vst [vmem:[#allocation10 + $0x30] sm:$0xff] %v18239_v25 }
 0xf29   : > { %12262 = vst [vmem:[#allocation10 + $0x28] sm:$0xff] %v18230_v23  ;;  %12264 = vst [vmem:[#allocation10 + $0x38] sm:$0xff] %v18242_v45 }
 0xf56   : > { %v16448_v18 = vpop.f32.mrb[110].mxu1 }
 0xf57   : > { %v12773_v35 = vpop.f32.mrb[111].mxu1  ;;  %v12786_v47 = vsel %vm5324_vm1, %v16448_v18, -inf }
 0xf58   : > { %12787 = vmax.xlane.f32.xlu1 %v12786_v47  ;;  %v12783_v26 = vsel %vm5324_vm1, %v12773_v35, -inf }
 0xf59   : > { %12784 = vmax.xlane.f32.xlu0 %v12783_v26 }
 0xfe5   : > { %v12788_v53 = vpop.xlane.xlu1 %12787 }
 0xfe6   : > { %v12790_v49 = vsub.f32 %v16448_v18, %v12788_v53  ;;  %v12785_v21 = vpop.xlane.xlu0 %12784 }
 0xfe7   : > { %v12789_v2 = vsub.f32 %v12773_v35, %v12785_v21 }
 0xfe8   : > { %v12793_v46 = vmul.f32 1.442695, %v12790_v49 }
 0xfe9   : > { %v12791_v58 = vmul.f32 1.442695, %v12789_v2 }
 0xfeb   : > { %18632 = vpow2.f32 %v12791_v58 }
 0xfec   : > { %18634 = vpow2.f32 %v12793_v46 }
 0xff5   : > { %v18633_v16 = vpop.eup %18632 }
 0xff6   : > { %v12795_v50 = vsel %vm5324_vm1, %v18633_v16, 0.0  ;;  %v18635_v15 = vpop.eup %18634 }
 0xff7   : > { %12796 = vadd.xlane.f32.xlu0 %v12795_v50  ;;  %v12798_v10 = vsel %vm5324_vm1, %v18635_v15, 0.0 }
 0xffb   : > { %12799 = vadd.xlane.f32.xlu0 %v12798_v10 }
0x1084   : > { %v12797_v42 = vpop.xlane.xlu0 %12796 }
0x1085   : > { %18636 = vrcp.f32 %v12797_v42 }
0x1088   : > { %v12800_v5 = vpop.xlane.xlu0 %12799 }
0x1089   : > { %18638 = vrcp.f32 %v12800_v5 }
0x108f   : > { %v18637_v9 = vpop.eup %18636 }
0x1090   : > { %v12803_v7 = vmul.f32 %v18637_v9, %v12797_v42 }
0x1092   : > { %v12805_v25 = vsub.f32 2.0, %v12803_v7 }
0x1093   : > { %v18639_v61 = vpop.eup %18638 }
0x1094   : > { %v12807_v29 = vmul.f32 %v18637_v9, %v12805_v25  ;;  %v12804_v23 = vmul.f32 %v18639_v61, %v12800_v5  ;;  %v25229_v5 = vand.u32 4294901760, %v23525_v27 }
0x1096   : > { %v12809_v45 = vmul.f32 %v18633_v16, %v12807_v29  ;;  %v12806_v18 = vsub.f32 2.0, %v12804_v23  ;;  %v18011_v16 = vpack.c.bf16 %v23525_v27, %v23519_v6 }
0x1098   : > { %v12814_v35 = vsel %vm5324_vm1, %v12809_v45, 0  ;;  %v12808_v47 = vmul.f32 %v18639_v61, %v12806_v18 }
0x1099   : > { %v12886_v26 = vand.u32 4294901760, %v12814_v35 }
0x109a   : > { %v12810_v53 = vmul.f32 %v18635_v15, %v12808_v47  ;;  %v25228_v15 = vand.u32 4294901760, %v23519_v6 }
0x109b   : > { %v12887_v49 = vsub.f32 %v12814_v35, %v12886_v26 }
0x109c   : > { %v12817_v21 = vsel %vm5324_vm1, %v12810_v53, 0  ;;  %v18019_v25 = vpack.c.bf16 %v25229_v5, %v25228_v15 }
0x109d   : > { %v12896_v2 = vand.u32 4294901760, %v12817_v21  ;;  %v12888_v46 = vand.u32 4294901760, %v12887_v49 }
0x109f   : > { %v12897_v58 = vsub.f32 %v12817_v21, %v12896_v2  ;;  %v12889_v50 = vsub.f32 %v12887_v49, %v12888_v46 }
0x10a1   : > { %v12898_v10 = vand.u32 4294901760, %v12897_v58  ;;  %v12890_v42 = vand.u32 4294901760, %v12889_v50  ;;  %v25254_v50 = vld [vmem:[#allocation63_spill] sm:$0xff] }
0x10a3   : > { %16453 = vmatprep.mubr.f32.mxu0 %v12890_v42  ;;  %v12899_v7 = vsub.f32 %v12897_v58, %v12898_v10  ;;  %v25256_v42 = vld [vmem:[#allocation65_spill] sm:$0xff] }
0x10a5   : > { %v12900_v9 = vand.u32 4294901760, %v12899_v7 }
0x10a7   : > { %16454 = vmatmul.mubr.f32.vlgmr.msra.gmra.mrb[110].mxu0 %v12900_v9 }
0x10a8   : > { %18010 = vmatpush3.bf16.msra.mxu0 %v23566_v62  ;;  %16460 = vmatprep.mubr.f32.mxu0 %v12886_v26 }
0x10a9   : > { %18012 = vmatprep.subr.bf16.mxu0 %v18011_v16 }
0x10af   : > { %16461 = vmatmul.mubr.f32.vlgmr.msra.gmra.mrb[110].mxu0 %v12896_v2 }
0x10b0   : > { %18014 = vmatpush3.bf16.msra.mxu0 %v18011_v16  ;;  %16467 = vmatprep.mubr.f32.mxu0 %v12887_v49 }
0x10b1   : > { %18016 = vmatprep.subr.bf16.mxu0 %v23558_v43 }
0x10b7   : > { %16468 = vmatmul.mubr.f32.vlgmr.msra.gmra.mrb[110].mxu0 %v12897_v58  ;;  %v25253_v58 = vld [vmem:[#allocation62_spill] sm:$0xff] }
0x10b8   : > { %18018 = vmatpush3.bf16.msra.mxu0 %v23558_v43  ;;  %16474 = vmatprep.mubr.f32.mxu0 %v12888_v46  ;;  %v25252_v46 = vld [vmem:[#allocation61_spill] sm:$0xff] }
0x10b9   : > { %18020 = vmatprep.subr.bf16.mxu0 %v18019_v25 }
0x10bf   : > { %16475 = vmatmul.mubr.f32.vlgmr.msra.gmra.mrb[110].mxu0 %v12898_v10  ;;  %v25255_v10 = vld [vmem:[#allocation64_spill] sm:$0xff] }
0x10c0   : > { %18022 = vmatpush3.bf16.msra.mxu0 %v18019_v25  ;;  %16481 = vmatprep.mubr.f32.mxu0 %v12886_v26 }
0x10c1   : > { %18024 = vmatprep.subr.bf16.mxu0 %v23558_v43 }
0x10c7   : > { %16482 = vmatmul.mubr.f32.vlgmr.msra.gmra.mrb[110].mxu0 %v12896_v2 }
0x10c8   : > { %18026 = vmatpush3.bf16.msra.mxu0 %v23558_v43  ;;  %16488 = vmatprep.mubr.f32.mxu0 %v12886_v26  ;;  %v25230_v43 = vld [vmem:[#allocation41_spill] sm:$0xff] }
0x10c9   : > { %18028 = vmatprep.subr.bf16.mxu0 %v25203_v34 }
0x10cf   : > { %16489 = vmatmul.mubr.f32.vlgmr.msra.gmra.mrb[110].mxu0 %v12896_v2  ;;  %v25251_v2 = vld [vmem:[#allocation51_spill] sm:$0xff] }
0x10d0   : > { %18030 = vmatpush1.bf16.msra.mxu0 %v25205_v12  ;;  %13415 = vmatprep.mubr.f32.mxu0 %v25022_v19 }
0x10d1   : > { %18032 = vmatprep.subr.bf16.mxu0 %v25207_v51 }
0x10d4   : > { %18034 = vmatpush1.bf16.msra.mxu0 %v25209_v3 }
0x10d5   : > { %18036 = vmatprep.subr.bf16.mxu0 %v25211_v30 }
0x10d8   : > { %18038 = vmatpush1.bf16.msra.mxu0 %v25213_v63 }
0x10d9   : > { %18040 = vmatprep.subr.bf16.mxu0 %v25215_v39 }
0x10dc   : > { %18042 = vmatpush1.bf16.msra.mxu0 %v25217_v14 }
0x10dd   : > { %18044 = vmatprep.subr.bf16.mxu0 %v25230_v43 }
0x11a2   : > { %v16490_v27 = vpop.f32.mrb[110].mxu0 }
0x11a3   : > { %v13333_v6 = vsel %vm4809_vm0, %v16490_v27, 0  ;;  %v13311_v62 = vpop.f32.mrb[111].mxu0 }
0x11a4   : > { %v23616_v61 = vand.u32 4294901760, %v13333_v6  ;;  %v13330_v29 = vsel %vm4809_vm0, %v13311_v62, 0 }
0x11a5   : > { %v23619_v23 = vand.u32 4294901760, %v13330_v29 }
0x11a6   : > { %v23622_v45 = vsub.f32 %v13333_v6, %v23616_v61 }
0x11a7   : > { %v13417_v18 = vsub.f32 %v13330_v29, %v23619_v23 }
0x11a8   : > { %v23628_v47 = vand.u32 4294901760, %v23622_v45 }
0x11a9   : > { %v23625_v35 = vand.u32 4294901760, %v13417_v18 }
0x11aa   : > { %v13430_v49 = vsub.f32 %v23622_v45, %v23628_v47 }
0x11ab   : > { %v13419_v26 = vsub.f32 %v13417_v18, %v23625_v35 }
0x11ac   : > { %v13431_v21 = vand.u32 4294901760, %v13430_v49 }
0x11ad   : > { %v13420_v53 = vand.u32 4294901760, %v13419_v26 }
0x11af   : > { %13421 = vmatmul.mubr.f32.vlgmr.msra.gmra.mrb[104].mxu0 %v13420_v53  ;;  %14117 = vmatmul.mubr.f32.vlgmr.msra.gmra.mrb[104].mxu1 %v13420_v53 }
0x11b0   : > { %18046 = vmatpush1.bf16.msra.mxu0 %v23398_v1  ;;  %18142 = vmatpush1.bf16.msra.mxu1 %v23400_v57  ;;  %v25245_v1 = vld [vmem:[#allocation37_spill] sm:$0xff] }
0x11b1   : > { %13426 = vmatprep.mubr.f32.mxu0 %v25022_v19  ;;  %18048 = vmatprep.subr.bf16.mxu0 %v23078_v54  ;;  %v25233_v54 = vld [vmem:[#allocation18_spill] sm:$0xff]  ;;  %v25246_v57 = vld [vmem:[#allocation57_spill] sm:$0xff] }
0x11b2   : > { %14122 = vmatprep.mubr.f32.mxu1 %v25022_v19  ;;  %18144 = vmatprep.subr.bf16.mxu1 %v23105_v28  ;;  %v25234_v28 = vld [vmem:[#allocation32_spill] sm:$0xff] }
0x11b3   : > { %13432 = vmatmul.mubr.f32.gmra.mrb[106].mxu0 %v13431_v21  ;;  %14128 = vmatmul.mubr.f32.gmra.mrb[106].mxu1 %v13431_v21 }
0x11b4   : > { %18050 = vmatpush1.bf16.msra.mxu0 %v23117_v48  ;;  %18146 = vmatpush1.bf16.msra.mxu1 %v23127_v0  ;;  %v25236_v48 = vld [vmem:[#allocation19_spill] sm:$0xff] }
0x11b5   : > { %18052 = vmatprep.subr.bf16.mxu0 %v23158_v38  ;;  %18148 = vmatprep.subr.bf16.mxu1 %v23185_v36  ;;  %v25235_v38 = vld [vmem:[#allocation49_spill] sm:$0xff]  ;;  %v25238_v0 = vld [vmem:[#allocation47_spill] sm:$0xff] }
0x11b6   : > { %13582 = vmatprep.mubr.f32.mxu0 %v25022_v19  ;;  %14278 = vmatprep.mubr.f32.mxu1 %v25022_v19  ;;  %v25239_v36 = vld [vmem:[#allocation53_spill] sm:$0xff] }
0x11b8   : > { %18054 = vmatpush1.bf16.msra.mxu0 %v23195_v11  ;;  %18150 = vmatpush1.bf16.msra.mxu1 %v23201_v41  ;;  %v25232_v11 = vld [vmem:[#allocation28_spill] sm:$0xff] }
0x11b9   : > { %18056 = vmatprep.subr.bf16.mxu0 %v23217_v31  ;;  %18152 = vmatprep.subr.bf16.mxu1 %v23223_v59  ;;  %v25231_v31 = vld [vmem:[#allocation21_spill] sm:$0xff]  ;;  %v25240_v41 = vld [vmem:[#allocation56_spill] sm:$0xff]  ;;  %v25242_v59 = vld [vmem:[#allocation22_spill] sm:$0xff] }
0x11bc   : > { %18058 = vmatpush1.bf16.msra.mxu0 %v23241_v4  ;;  %18154 = vmatpush1.bf16.msra.mxu1 %v23255_v56  ;;  %v25243_v4 = vld [vmem:[#allocation66_spill] sm:$0xff]  ;;  %v25244_v56 = vld [vmem:[#allocation67_spill] sm:$0xff] }
0x11bd   : > { %18060 = vmatprep.subr.bf16.mxu0 %v25195_v55  ;;  %18156 = vmatprep.subr.bf16.mxu1 %v23221_v52  ;;  %v25241_v52 = vld [vmem:[#allocation25_spill] sm:$0xff]  ;;  %v25250_v55 = vld [vmem:[#allocation54_spill] sm:$0xff] }
0x11bf   : > { %13584 = vmatmul.mubr.f32.vlgmr.msra.gmra.mrb[104].mxu0 %v23619_v23  ;;  %14280 = vmatmul.mubr.f32.vlgmr.msra.gmra.mrb[104].mxu1 %v23619_v23 }
0x11c0   : > { %18062 = vmatpush1.bf16.msra.mxu0 %v23424_v33  ;;  %18158 = vmatpush1.bf16.msra.mxu1 %v23428_v8  ;;  %v25248_v33 = vld [vmem:[#allocation59_spill] sm:$0xff]  ;;  %v25249_v8 = vld [vmem:[#allocation60_spill] sm:$0xff] }
0x11c1   : > { %13589 = vmatprep.mubr.f32.mxu0 %v25022_v19  ;;  %14285 = vmatprep.mubr.f32.mxu1 %v25022_v19 }
0x11c2   : > { %18064 = vmatprep.subr.bf16.mxu0 %v23227_v13  ;;  %18160 = vmatprep.subr.bf16.mxu1 %v25231_v31  ;;  %v25237_v13 = vld [vmem:[#allocation45_spill] sm:$0xff] }
0x11c3   : > { %13591 = vmatmul.mubr.f32.gmra.mrb[106].mxu0 %v23616_v61  ;;  %14287 = vmatmul.mubr.f32.gmra.mrb[106].mxu1 %v23616_v61 }
0x11c4   : > { %18066 = vmatpush1.bf16.msra.mxu0 %v25232_v11  ;;  %18162 = vmatpush1.bf16.msra.mxu1 %v25233_v54 }
0x11c5   : > { %18068 = vmatprep.subr.bf16.mxu0 %v25234_v28  ;;  %18164 = vmatprep.subr.bf16.mxu1 %v25235_v38 }
0x11c6   : > { %13693 = vmatprep.mubr.f32.mxu0 %v25022_v19  ;;  %14389 = vmatprep.mubr.f32.mxu1 %v25022_v19 }
0x11c8   : > { %18070 = vmatpush1.bf16.msra.mxu0 %v25236_v48  ;;  %18166 = vmatpush1.bf16.msra.mxu1 %v25237_v13 }
0x11c9   : > { %18072 = vmatprep.subr.bf16.mxu0 %v25238_v0  ;;  %18168 = vmatprep.subr.bf16.mxu1 %v25239_v36 }
0x11cc   : > { %18074 = vmatpush1.bf16.msra.mxu0 %v25240_v41  ;;  %18170 = vmatpush1.bf16.msra.mxu1 %v25241_v52 }
0x11cd   : > { %18076 = vmatprep.subr.bf16.mxu0 %v25203_v34  ;;  %18172 = vmatprep.subr.bf16.mxu1 %v25204_v32 }
0x11cf   : > { %13696 = vmatmul.mubr.f32.vlgmr.msra.gmra.mrb[104].mxu0 %v13417_v18  ;;  %14392 = vmatmul.mubr.f32.vlgmr.msra.gmra.mrb[104].mxu1 %v13417_v18 }
0x11d0   : > { %18078 = vmatpush1.bf16.msra.mxu0 %v25205_v12  ;;  %18174 = vmatpush1.bf16.msra.mxu1 %v25206_v24 }
0x11d1   : > { %13701 = vmatprep.mubr.f32.mxu0 %v25022_v19  ;;  %14397 = vmatprep.mubr.f32.mxu1 %v25022_v19 }
0x11d2   : > { %18080 = vmatprep.subr.bf16.mxu0 %v25207_v51  ;;  %18176 = vmatprep.subr.bf16.mxu1 %v25208_v60 }
0x11d3   : > { %13704 = vmatmul.mubr.f32.gmra.mrb[106].mxu0 %v23622_v45  ;;  %14400 = vmatmul.mubr.f32.gmra.mrb[106].mxu1 %v23622_v45 }
0x11d4   : > { %18082 = vmatpush1.bf16.msra.mxu0 %v25209_v3  ;;  %18178 = vmatpush1.bf16.msra.mxu1 %v25210_v17 }
0x11d5   : > { %18084 = vmatprep.subr.bf16.mxu0 %v25211_v30  ;;  %18180 = vmatprep.subr.bf16.mxu1 %v25212_v20 }
0x11d6   : > { %13790 = vmatprep.mubr.f32.mxu0 %v25022_v19  ;;  %14486 = vmatprep.mubr.f32.mxu1 %v25022_v19 }
0x11d8   : > { %18086 = vmatpush1.bf16.msra.mxu0 %v25213_v63  ;;  %18182 = vmatpush1.bf16.msra.mxu1 %v25214_v44 }
0x11d9   : > { %18088 = vmatprep.subr.bf16.mxu0 %v25215_v39  ;;  %18184 = vmatprep.subr.bf16.mxu1 %v25216_v22 }
0x11dc   : > { %18090 = vmatpush1.bf16.msra.mxu0 %v25217_v14  ;;  %18186 = vmatpush1.bf16.msra.mxu1 %v25218_v37 }
0x11dd   : > { %18092 = vmatprep.subr.bf16.mxu0 %v23276_v40  ;;  %18188 = vmatprep.subr.bf16.mxu1 %v25242_v59  ;;  %v25247_v40 = vld [vmem:[#allocation58_spill] sm:$0xff] }
0x11df   : > { %13794 = vmatmul.mubr.f32.vlgmr.msra.gmra.mrb[104].mxu0 %v23625_v35  ;;  %14490 = vmatmul.mubr.f32.vlgmr.msra.gmra.mrb[104].mxu1 %v23625_v35 }
0x11e0   : > { %18094 = vmatpush1.bf16.msra.mxu0 %v25243_v4  ;;  %18190 = vmatpush1.bf16.msra.mxu1 %v25244_v56 }
0x11e1   : > { %13799 = vmatprep.mubr.f32.mxu0 %v25022_v19  ;;  %14495 = vmatprep.mubr.f32.mxu1 %v25022_v19 }
0x11e2   : > { %18096 = vmatprep.subr.bf16.mxu0 %v25245_v1  ;;  %18192 = vmatprep.subr.bf16.mxu1 %v25246_v57 }
0x11e3   : > { %13803 = vmatmul.mubr.f32.gmra.mrb[106].mxu0 %v23628_v47  ;;  %14499 = vmatmul.mubr.f32.gmra.mrb[106].mxu1 %v23628_v47 }
0x11e4   : > { %18098 = vmatpush1.bf16.msra.mxu0 %v25247_v40  ;;  %18194 = vmatpush1.bf16.msra.mxu1 %v25248_v33 }
0x11e5   : > { %18100 = vmatprep.subr.bf16.mxu0 %v25249_v8  ;;  %18196 = vmatprep.subr.bf16.mxu1 %v25250_v55 }
0x11e6   : > { %13921 = vmatprep.mubr.f32.mxu0 %v25022_v19  ;;  %14617 = vmatprep.mubr.f32.mxu1 %v25022_v19 }
0x11e8   : > { %18102 = vmatpush1.bf16.msra.mxu0 %v25251_v2  ;;  %18198 = vmatpush1.bf16.msra.mxu1 %v25252_v46 }
0x11e9   : > { %18104 = vmatprep.subr.bf16.mxu0 %v25253_v58  ;;  %18200 = vmatprep.subr.bf16.mxu1 %v25254_v50 }
0x11ec   : > { %18106 = vmatpush1.bf16.msra.mxu0 %v25255_v10  ;;  %18202 = vmatpush1.bf16.msra.mxu1 %v25256_v42 }
0x11ed   : > { %18108 = vmatprep.subr.bf16.mxu0 %v25203_v34  ;;  %18204 = vmatprep.subr.bf16.mxu1 %v25204_v32 }
0x11ef   : > { %13923 = vmatmul.mubr.f32.vlgmr.msra.gmra.mrb[104].mxu0 %v23619_v23  ;;  %14619 = vmatmul.mubr.f32.vlgmr.msra.gmra.mrb[104].mxu1 %v23619_v23 }
0x11f0   : > { %18110 = vmatpush1.bf16.msra.mxu0 %v25205_v12  ;;  %18206 = vmatpush1.bf16.msra.mxu1 %v25206_v24  ;;  %v8337_v24 = vld [vmem:[#allocation10 + $0x60] sm:$0xff] }
0x11f1   : > { %13928 = vmatprep.mubr.f32.mxu0 %v25022_v19  ;;  %14624 = vmatprep.mubr.f32.mxu1 %v25022_v19 }
0x11f2   : > { %18112 = vmatprep.subr.bf16.mxu0 %v25207_v51  ;;  %18208 = vmatprep.subr.bf16.mxu1 %v25208_v60  ;;  %v8339_v51 = vld [vmem:[#allocation10 + $0x70] sm:$0xff] }
0x11f3   : > { %13930 = vmatmul.mubr.f32.gmra.mrb[106].mxu0 %v23616_v61  ;;  %14626 = vmatmul.mubr.f32.gmra.mrb[106].mxu1 %v23616_v61 }
0x11f4   : > { %18114 = vmatpush1.bf16.msra.mxu0 %v25209_v3  ;;  %18210 = vmatpush1.bf16.msra.mxu1 %v25210_v17 }
0x11f5   : > { %18116 = vmatprep.subr.bf16.mxu0 %v25211_v30  ;;  %18212 = vmatprep.subr.bf16.mxu1 %v25212_v20  ;;  %v8340_v30 = vld [vmem:[#allocation10 + $0x78] sm:$0xff] }
0x11f6   : > { %14016 = vmatprep.mubr.f32.mxu0 %v25022_v19  ;;  %14712 = vmatprep.mubr.f32.mxu1 %v25022_v19 }
0x11f8   : > { %18118 = vmatpush1.bf16.msra.mxu0 %v25213_v63  ;;  %18214 = vmatpush1.bf16.msra.mxu1 %v25214_v44  ;;  %v8333_v44 = vld [vmem:[#allocation10 + $0x40] sm:$0xff]  ;;  %v8335_v63 = vld [vmem:[#allocation10 + $0x50] sm:$0xff] }
0x11f9   : > { %18120 = vmatprep.subr.bf16.mxu0 %v25215_v39  ;;  %18216 = vmatprep.subr.bf16.mxu1 %v25216_v22  ;;  %v8334_v39 = vld [vmem:[#allocation10 + $0x48] sm:$0xff]  ;;  %v8336_v22 = vld [vmem:[#allocation10 + $0x58] sm:$0xff] }
0x11fc   : > { %18122 = vmatpush1.bf16.msra.mxu0 %v25217_v14  ;;  %18218 = vmatpush1.bf16.msra.mxu1 %v25218_v37 }
0x11ff   : > { %14018 = vmatmul.mubr.f32.vlgmr.msra.gmra.mrb[104].mxu0 %v23619_v23  ;;  %14714 = vmatmul.mubr.f32.vlgmr.msra.gmra.mrb[104].mxu1 %v23619_v23 }
0x1200   : > { %14023 = vmatprep.mubr.f32.mxu0 %v25022_v19  ;;  %14719 = vmatprep.mubr.f32.mxu1 %v25022_v19  ;;  %v8338_v19 = vld [vmem:[#allocation10 + $0x68] sm:$0xff] }
0x1203   : > { %14025 = vmatmul.mubr.f32.gmra.mrb[106].mxu0 %v23616_v61  ;;  %14721 = vmatmul.mubr.f32.gmra.mrb[106].mxu1 %v23616_v61 }
0x12d2   : > { %v14019_v20 = vpop.f32.mrb[104].mxu0  ;;  %v14715_v17 = vpop.f32.mrb[104].mxu1 }
0x12d3   : > { %v18245_v3 = vadd.f32 %v14019_v20, %v8333_v44  ;;  %v18257_v60 = vadd.f32 %v14715_v17, %v8335_v63  ;;  %v14021_v37 = vpop.f32.mrb[105].mxu0  ;;  %v14717_v34 = vpop.f32.mrb[105].mxu1 }
0x12d4   : > { %v18248_v32 = vadd.f32 %v14021_v37, %v8334_v39  ;;  %v18260_v12 = vadd.f32 %v14717_v34, %v8336_v22 }
0x12d5   : > { %14735 = vst [vmem:[#allocation10 + $0x40] sm:$0xff] %v18245_v3  ;;  %14737 = vst [vmem:[#allocation10 + $0x50] sm:$0xff] %v18257_v60 }
0x12d6   : > { %14736 = vst [vmem:[#allocation10 + $0x48] sm:$0xff] %v18248_v32  ;;  %14738 = vst [vmem:[#allocation10 + $0x58] sm:$0xff] %v18260_v12  ;;  %v14026_v14 = vpop.f32.mrb[106].mxu0  ;;  %v14722_v7 = vpop.f32.mrb[106].mxu1 }
0x12d7   : > { %v18251_v9 = vadd.f32 %v14026_v14, %v8337_v24  ;;  %v18263_v16 = vadd.f32 %v14722_v7, %v8339_v51  ;;  %v14028_v15 = vpop.f32.mrb[107].mxu0  ;;  %v14724_v5 = vpop.f32.mrb[107].mxu1 }
0x12d8   : > { %v18254_v25 = vadd.f32 %v14028_v15, %v8338_v19  ;;  %v18266_v43 = vadd.f32 %v14724_v5, %v8340_v30 }
0x12d9   : > { %14739 = vst [vmem:[#allocation10 + $0x60] sm:$0xff] %v18251_v9  ;;  %14741 = vst [vmem:[#allocation10 + $0x70] sm:$0xff] %v18263_v16 }
0x12da   : > { %14740 = vst [vmem:[#allocation10 + $0x68] sm:$0xff] %v18254_v25  ;;  %14742 = vst [vmem:[#allocation10 + $0x78] sm:$0xff] %v18266_v43 }
0x12db   : > { %18799 = shalt.err (!%p18796_p5)
}
0x12dc   : > { %s18800_s21 = scalar_lea.hbm %s23795_s8, 2048 }
0x12dd   : > { %p18801_p10 = scmp.ne.s32.totalorder %s23795_s8, %s18800_s21  ;;  %p18806_p12 = scmp.lt.u32.totalorder %s18800_s21, %s23795_s8 }
0x12df   : > { %p18802_p1 = pnand %p18801_p10, %p18563_p4 }
0x12e1   : > { %p18803_p3 = pneg %p18802_p1 }
0x12e3   : > { %p18808_p2 = pnand %p18806_p12, %p18803_p3 }
0x12e5   : > { %18811 = shalt.err (!%p18808_p2)
}
0x12e6   : > { %s18872_s20 = smov 512   ;;  %s18873_s0 = smov 32  }
0x12e7   : > { %18538 = dma.vmem_to_hbm [thread:$0]  (%p18563_p4), %s14750_s22, 2048, %s23795_s8, [#allocation4], %s18872_s20, %s18872_s20, %s18873_s0  }
0x12e8   : > { %18841 = dma.done.wait (%p18563_p4), [#allocation4], 2048  }
0x12e9   : > { %18843 = vsyncadd (%p18563_p4), [#allocation4], 4294965248 }
0x12ea PF: > { %s25257_s30 = sld [smem:[#allocation16_spill]]  ;;  %s25258_s15 = sld [smem:[#allocation15_spill]] }
0x12eb   : > { %s25259_s29 = sld [smem:[#allocation17_spill]]  ;;  %s25260_s27 = smov %s18850_s28 }
0x12f0   : > { %p18_p6 = scmp.ge.s32.totalorder %s25257_s30, 6   ;;  %s25261_s28 = smov %s25258_s15 }
0x12f2   :  { %20 = sbr.rel (!%p18_p6) target bundleno = 7 (0x7), region = 128 }
0x12f9   :  { %14765 = vsyncpa [#allocation3], 1 }
0x12fa   :  { %14767 = vsyncpa [#allocation3 + $0x1], 1 }
0x12fb   :  { %14768 = vsyncpa [#allocation6], 1 }
0x12fc   :  { %14769 = vsyncpa [#allocation4], 1 }
0x12fd   :  { %14771 = vsyncpa [#allocation4 + $0x1], 1 }

</bundles_post_ra>
